<compile_context>
chip_gen: v5e
topology: v5e:2x2
jax: 0.10.0
libtpu: 0.0.40
codegen_flags: <defaults>
</compile_context>

<pallas_src>
import functools
import math

import numpy as np
import jax
import jax.numpy as jnp
from jax.experimental import pallas as pl
from jax.experimental.pallas import tpu as pltpu

# Full-precision f32 matmuls in both kernel trace and reference so they match.
jax.config.update("jax_default_matmul_precision", "highest")


# ---------------------------------------------------------------------------
# Host-side regrouping (shapes depend on the data -> cannot live in the kernel)
# ---------------------------------------------------------------------------
def _build_slots(embedding, study_indexes):
    """Group samples by study id into a slot-major (max_n, B, D) numpy tensor."""
    emb = np.asarray(embedding, np.float32)
    seg = np.asarray(study_indexes)
    uniq, seg = np.unique(seg, return_inverse=True)   # module assumes contiguous ids
    b = int(uniq.size)
    counts = np.bincount(seg, minlength=b)
    m = int(counts.max())
    d = emb.shape[1]
    xm = np.zeros((m, b, d), np.float32)
    fill = np.zeros((b,), np.int64)
    for i in range(emb.shape[0]):                     # original order, like the module
        s = int(seg[i])
        xm[fill[s], s] = emb[i]
        fill[s] += 1
    return xm, counts, b, m, d


def _key_bias(counts, n_slots):
    """(n_slots, len(counts)) additive key-padding bias: 0 valid, -1e30 masked."""
    counts = np.asarray(counts)
    return np.where(np.arange(n_slots)[:, None] >= counts[None, :],
                    -1e30, 0.0).astype(np.float32)


# ---------------------------------------------------------------------------
# Pallas kernel: one TransformerEncoderLayer + pooling, accumulated over slot tiles
# ---------------------------------------------------------------------------
def _encoder_pool_kernel(x_ref, kb_ref, pw_ref,
                         wqkv_ref, bqkv_ref, wo_ref, bo_ref,
                         g1_ref, be1_ref, w1_ref, fb1_ref, w2_ref, fb2_ref,
                         g2_ref, be2_ref, out_ref, *, n_head):
    tm, b_pad, d = x_ref.shape
    rows = tm * b_pad
    dh = d // n_head
    scale = 1.0 / math.sqrt(dh)

    # program_id only at top level (interpret-safe, no nested control flow).
    @pl.when(pl.program_id(0) == 0)
    def _init():
        out_ref[...] = jnp.zeros_like(out_ref)

    def _layer_norm(xv, g, beta):
        mu = jnp.mean(xv, axis=-1, keepdims=True)
        xc = xv - mu
        var = jnp.mean(xc * xc, axis=-1, keepdims=True)
        return xc * jax.lax.rsqrt(var + 1e-5) * g + beta

    # Flatten the slot tile to rows so every projection/FFN matmul is one wide
    # MXU call per grid step (not per slot).  b_pad is a multiple of 8, so this
    # reshape is sublane-aligned.
    x = x_ref[...].reshape(rows, d)
    kb = kb_ref[...]                                     # (TM, 1, Bp) key bias

    # Fused QKV projection: one (rows, 3D) matmul.
    qkv = jnp.dot(x, wqkv_ref[...], preferred_element_type=jnp.float32) + bqkv_ref[...]

    # Attention: static unroll over heads; each head is a slot-batched
    # dot_general with a single leading batch dim (the slot axis).
    head_outs = []
    for h in range(n_head):
        lo = h * dh
        qh = qkv[:, lo:lo + dh].reshape(tm, b_pad, dh)
        kh = qkv[:, d + lo:d + lo + dh].reshape(tm, b_pad, dh)
        vh = qkv[:, 2 * d + lo:2 * d + lo + dh].reshape(tm, b_pad, dh)
        s = jax.lax.dot_general(qh, kh, (((2,), (2,)), ((0,), (0,))),
                                preferred_element_type=jnp.float32)    # (TM, Bp, Bp)
        s = s * scale + kb                                # mask padded keys
        s = s - jnp.max(s, axis=-1, keepdims=True)
        p = jnp.exp(s)
        p = p / jnp.sum(p, axis=-1, keepdims=True)
        ctx = jax.lax.dot_general(p, vh, (((2,), (1,)), ((0,), (0,))),
                                  preferred_element_type=jnp.float32)  # (TM, Bp, dh)
        head_outs.append(ctx.reshape(rows, dh))
    attn = jnp.concatenate(head_outs, axis=-1)                          # (rows, D)
    attn = jnp.dot(attn, wo_ref[...], preferred_element_type=jnp.float32) + bo_ref[...]

    x1 = _layer_norm(x + attn, g1_ref[...], be1_ref[...])               # post-norm
    ff = jnp.maximum(
        jnp.dot(x1, w1_ref[...], preferred_element_type=jnp.float32) + fb1_ref[...],
        0.0)
    ff = jnp.dot(ff, w2_ref[...], preferred_element_type=jnp.float32) + fb2_ref[...]
    x2 = _layer_norm(x1 + ff, g2_ref[...], be2_ref[...])                # (rows, D)

    # Pooling folded into a host-precomputed per-slot weight (1/max_n for valid
    # slots, 0 for the padded grid tail; slot-0 indicator for the non-mean pool).
    out_ref[...] += jnp.sum(x2.reshape(tm, b_pad, d) * pw_ref[...], axis=0)


# ---------------------------------------------------------------------------
# Wrapper
# ---------------------------------------------------------------------------
def _resident_spec(shape):
    nd = len(shape)
    return pl.BlockSpec(shape, lambda *_: (0,) * nd)


def _round_up(x, n):
    return ((x + n - 1) // n) * n


def _auto_tile_m(m, b_pad, d):
    # Target >= ~512 matmul rows per grid step; cap the activation tile at ~6 MiB
    # so double-buffered inputs + weights stay under the 32 MiB scoped VMEM that
    # is safe on every generation (v7x has only 64 MiB physical VMEM).
    rows_target = 512
    tm = max(1, -(-rows_target // b_pad))
    tm_vmem = max(1, (6 * 1024 * 1024) // (b_pad * d * 4))
    return max(1, min(tm, tm_vmem, m))


def _vmem_limit_bytes():
    try:
        kind = jax.devices()[0].device_kind.lower()
    except Exception:
        kind = ""
    if "v5" in kind or "v6" in kind:
        return 64 * 1024 * 1024      # 128 MiB physical: give the pipeline headroom
    return 32 * 1024 * 1024          # conservative default (safe on v7x's 64 MiB)


def transformer_combinator(embedding, study_indexes, params, *, n_head,
                           pool="mean", tile_m=None):
    xm, counts, b, m, d = _build_slots(embedding, study_indexes)
    assert d % n_head == 0, "dim_features must be divisible by n_head"

    # pool != 'mean' only needs slot 0 (attention is independent per slot):
    # grid of one step instead of computing every slot and discarding it.
    m_used = m if pool == "mean" else 1
    xm = xm[:m_used]

    b_pad = _round_up(b, 8)                       # sublane-align the study axis
    if tile_m is None:
        tm = _auto_tile_m(m_used, b_pad, d)
    else:
        tm = max(1, min(int(tile_m), m_used))
    m_pad = _round_up(m_used, tm)

    # slot-major input, studies padded to b_pad (masked via -1e30 key bias),
    # slots padded to m_pad (discarded via zero pooling weight).
    xm_p = np.zeros((m_pad, b_pad, d), np.float32)
    xm_p[:m_used, :b] = xm
    counts_pad = np.zeros((b_pad,), np.int64)
    counts_pad[:b] = counts
    kb = _key_bias(counts_pad, m_pad).reshape(m_pad, 1, b_pad)

    pw = np.zeros((m_pad, 1, 1), np.float32)      # per-slot pooling weight
    if pool == "mean":
        pw[:m_used] = 1.0 / float(m)              # divide by max_n, like the module
    else:
        pw[0] = 1.0

    f32 = lambda a: jnp.asarray(a, jnp.float32)
    wqkv = f32(params["in_proj_weight"]).T                 # (D, 3D)
    bqkv = f32(params["in_proj_bias"]).reshape(1, 3 * d)
    wo = f32(params["out_proj_weight"]).T                  # (D, D)
    bo = f32(params["out_proj_bias"]).reshape(1, d)
    g1 = f32(params["norm1_weight"]).reshape(1, d)
    be1 = f32(params["norm1_bias"]).reshape(1, d)
    w1 = f32(params["linear1_weight"]).T                   # (D, 2D)
    fb1 = f32(params["linear1_bias"]).reshape(1, 2 * d)
    w2 = f32(params["linear2_weight"]).T                   # (2D, D)
    fb2 = f32(params["linear2_bias"]).reshape(1, d)
    g2 = f32(params["norm2_weight"]).reshape(1, d)
    be2 = f32(params["norm2_bias"]).reshape(1, d)
    resident = [wqkv, bqkv, wo, bo, g1, be1, w1, fb1, w2, fb2, g2, be2]

    kernel = functools.partial(_encoder_pool_kernel, n_head=n_head)
    grid = (m_pad // tm,)
    out = pl.pallas_call(
        kernel,
        out_shape=jax.ShapeDtypeStruct((b_pad, d), jnp.float32),
        grid=grid,
        in_specs=[pl.BlockSpec((tm, b_pad, d), lambda i: (i, 0, 0)),   # slot tile
                  pl.BlockSpec((tm, 1, b_pad), lambda i: (i, 0, 0)),   # key bias
                  pl.BlockSpec((tm, 1, 1), lambda i: (i, 0, 0))]       # pool weight
                 + [_resident_spec(a.shape) for a in resident],
        out_specs=pl.BlockSpec((b_pad, d), lambda i: (0, 0)),          # resident acc
        compiler_params=pltpu.CompilerParams(
            dimension_semantics=("arbitrary",),          # slot axis is a reduction
            vmem_limit_bytes=_vmem_limit_bytes()),
    )(jnp.asarray(xm_p), jnp.asarray(kb), jnp.asarray(pw), *resident)
    return out[:b]


# ---------------------------------------------------------------------------
# Pure-JAX reference (mirrors the PyTorch forward, eval mode)
# ---------------------------------------------------------------------------
def _reference(embedding, study_indexes, params, *, n_head, pool="mean"):
    xm, counts, b, m, d = _build_slots(embedding, study_indexes)
    xm = jnp.asarray(xm)
    kbias = jnp.asarray(_key_bias(counts, m))             # (M, B)
    dh = d // n_head
    wqkv = jnp.asarray(params["in_proj_weight"], jnp.float32).T
    bqkv = jnp.asarray(params["in_proj_bias"], jnp.float32)
    wo = jnp.asarray(params["out_proj_weight"], jnp.float32).T
    bo = jnp.asarray(params["out_proj_bias"], jnp.float32)
    g1 = jnp.asarray(params["norm1_weight"], jnp.float32)
    be1 = jnp.asarray(params["norm1_bias"], jnp.float32)
    w1 = jnp.asarray(params["linear1_weight"], jnp.float32).T
    fb1 = jnp.asarray(params["linear1_bias"], jnp.float32)
    w2 = jnp.asarray(params["linear2_weight"], jnp.float32).T
    fb2 = jnp.asarray(params["linear2_bias"], jnp.float32)
    g2 = jnp.asarray(params["norm2_weight"], jnp.float32)
    be2 = jnp.asarray(params["norm2_bias"], jnp.float32)

    def ln(x, g, beta):
        mu = x.mean(-1, keepdims=True)
        xc = x - mu
        var = (xc * xc).mean(-1, keepdims=True)
        return xc * jax.lax.rsqrt(var + 1e-5) * g + beta

    def slot(x, bias):                      # x: (B, D), bias: (B,)
        qkv = x @ wqkv + bqkv
        q, k, v = qkv[:, :d], qkv[:, d:2 * d], qkv[:, 2 * d:]
        outs = []
        for h in range(n_head):
            lo, hi = h * dh, (h + 1) * dh
            s = q[:, lo:hi] @ k[:, lo:hi].T / math.sqrt(dh) + bias[None, :]
            p = jax.nn.softmax(s, axis=-1)
            outs.append(p @ v[:, lo:hi])
        a = jnp.concatenate(outs, -1) @ wo + bo
        x1 = ln(x + a, g1, be1)
        f = jnp.maximum(x1 @ w1 + fb1, 0.0) @ w2 + fb2
        return ln(x1 + f, g2, be2)

    enc = jax.vmap(slot)(xm, kbias)          # (M, B, D)
    return enc.mean(axis=0) if pool == "mean" else enc[0]


# ---------------------------------------------------------------------------
if __name__ == "__main__":
    key = jax.random.PRNGKey(0)
    dim_features, n_head = 32, 4
    # 20 samples over 4 studies (counts 5, 3, 8, 4) -> B=4, max_n=8
    study_indexes = np.array(
        [0, 1, 0, 2, 2, 0, 3, 1, 2, 0, 2, 3, 0, 2, 1, 2, 3, 2, 2, 3], np.int32)
    n_samples = study_indexes.size

    ks = jax.random.split(key, 12)
    embedding = jax.random.normal(ks[0], (n_samples, dim_features), jnp.float32)
    params = {
        "in_proj_weight": 0.2 * jax.random.normal(ks[1], (3 * dim_features, dim_features), jnp.float32),
        "in_proj_bias": 0.1 * jax.random.normal(ks[2], (3 * dim_features,), jnp.float32),
        "out_proj_weight": 0.2 * jax.random.normal(ks[3], (dim_features, dim_features), jnp.float32),
        "out_proj_bias": 0.1 * jax.random.normal(ks[4], (dim_features,), jnp.float32),
        "linear1_weight": 0.2 * jax.random.normal(ks[5], (2 * dim_features, dim_features), jnp.float32),
        "linear1_bias": 0.1 * jax.random.normal(ks[6], (2 * dim_features,), jnp.float32),
        "linear2_weight": 0.2 * jax.random.normal(ks[7], (dim_features, 2 * dim_features), jnp.float32),
        "linear2_bias": 0.1 * jax.random.normal(ks[8], (dim_features,), jnp.float32),
        "norm1_weight": jnp.ones((dim_features,), jnp.float32)
                        + 0.05 * jax.random.normal(ks[9], (dim_features,), jnp.float32),
        "norm1_bias": 0.05 * jax.random.normal(ks[10], (dim_features,), jnp.float32),
        "norm2_weight": jnp.ones((dim_features,), jnp.float32),
        "norm2_bias": jnp.zeros((dim_features,), jnp.float32),
    }

    ref_mean = _reference(embedding, study_indexes, params, n_head=n_head, pool="mean")
    ref_first = _reference(embedding, study_indexes, params, n_head=n_head, pool="first")

    # auto tile: single grid step covering all 8 slots
    out_auto = transformer_combinator(embedding, study_indexes, params,
                                      n_head=n_head, pool="mean")
    # forced tile_m=3: max_n=8 padded to 9 -> 3-step grid, exercises the resident
    # accumulator, padded-slot tail and padded-study masking
    out_tiled = transformer_combinator(embedding, study_indexes, params,
                                       n_head=n_head, pool="mean", tile_m=3)
    # non-mean pooling: only slot 0 is computed (grid of one step)
    out_first = transformer_combinator(embedding, study_indexes, params,
                                       n_head=n_head, pool="first")
    jax.block_until_ready((out_auto, out_tiled, out_first))

    np.testing.assert_allclose(np.asarray(out_auto), np.asarray(ref_mean),
                               rtol=1e-4, atol=1e-4)
    np.testing.assert_allclose(np.asarray(out_tiled), np.asarray(ref_mean),
                               rtol=1e-4, atol=1e-4)
    np.testing.assert_allclose(np.asarray(out_first), np.asarray(ref_first),
                               rtol=1e-4, atol=1e-4)
    print("KERNEL_OK")
</pallas_src>

<mosaic_0001>
module attributes {stable_mosaic.version = 11 : i64} {
  func.func @_encoder_pool_kernel(%arg0: i32, %arg1: memref<8x8x32xf32, #tpu.memory_space<vmem>>, %arg2: memref<8x1x8xf32, #tpu.memory_space<vmem>>, %arg3: memref<8x1x1xf32, #tpu.memory_space<vmem>>, %arg4: memref<32x96xf32, #tpu.memory_space<vmem>>, %arg5: memref<1x96xf32, #tpu.memory_space<vmem>>, %arg6: memref<32x32xf32, #tpu.memory_space<vmem>>, %arg7: memref<1x32xf32, #tpu.memory_space<vmem>>, %arg8: memref<1x32xf32, #tpu.memory_space<vmem>>, %arg9: memref<1x32xf32, #tpu.memory_space<vmem>>, %arg10: memref<32x64xf32, #tpu.memory_space<vmem>>, %arg11: memref<1x64xf32, #tpu.memory_space<vmem>>, %arg12: memref<64x32xf32, #tpu.memory_space<vmem>>, %arg13: memref<1x32xf32, #tpu.memory_space<vmem>>, %arg14: memref<1x32xf32, #tpu.memory_space<vmem>>, %arg15: memref<1x32xf32, #tpu.memory_space<vmem>>, %arg16: memref<8x32xf32, #tpu.memory_space<vmem>>) attributes {dimension_semantics = [#tpu.dimension_semantics<arbitrary>], iteration_bounds = array<i64: 1>, scalar_prefetch = 0 : i64, scratch_operands = 0 : i64, tpu.core_type = #tpu.core_type<tc>, window_params = [{transform_indices = @transform_0, window_bounds = array<i64: 8, 8, 32>}, {transform_indices = @transform_1, window_bounds = array<i64: 8, 1, 8>}, {transform_indices = @transform_2, window_bounds = array<i64: 8, 1, 1>}, {pipeline_mode = #tpu.pipeline_mode<synchronous>, transform_indices = @transform_3, window_bounds = array<i64: 32, 96>}, {pipeline_mode = #tpu.pipeline_mode<synchronous>, transform_indices = @transform_4, window_bounds = array<i64: 1, 96>}, {pipeline_mode = #tpu.pipeline_mode<synchronous>, transform_indices = @transform_5, window_bounds = array<i64: 32, 32>}, {pipeline_mode = #tpu.pipeline_mode<synchronous>, transform_indices = @transform_6, window_bounds = array<i64: 1, 32>}, {pipeline_mode = #tpu.pipeline_mode<synchronous>, transform_indices = @transform_7, window_bounds = array<i64: 1, 32>}, {pipeline_mode = #tpu.pipeline_mode<synchronous>, transform_indices = @transform_8, window_bounds = array<i64: 1, 32>}, {pipeline_mode = #tpu.pipeline_mode<synchronous>, transform_indices = @transform_9, window_bounds = array<i64: 32, 64>}, {pipeline_mode = #tpu.pipeline_mode<synchronous>, transform_indices = @transform_10, window_bounds = array<i64: 1, 64>}, {pipeline_mode = #tpu.pipeline_mode<synchronous>, transform_indices = @transform_11, window_bounds = array<i64: 64, 32>}, {pipeline_mode = #tpu.pipeline_mode<synchronous>, transform_indices = @transform_12, window_bounds = array<i64: 1, 32>}, {pipeline_mode = #tpu.pipeline_mode<synchronous>, transform_indices = @transform_13, window_bounds = array<i64: 1, 32>}, {pipeline_mode = #tpu.pipeline_mode<synchronous>, transform_indices = @transform_14, window_bounds = array<i64: 1, 32>}, {pipeline_mode = #tpu.pipeline_mode<synchronous>, transform_indices = @transform_15, window_bounds = array<i64: 8, 32>}]} {
    %c0_i32 = arith.constant 0 : i32
    %0 = arith.cmpi eq, %arg0, %c0_i32 : i32
    %1 = arith.extui %0 : i1 to i32
    %c0_i32_0 = arith.constant 0 : i32
    %2 = arith.cmpi ne, %1, %c0_i32_0 : i32
    scf.if %2 {
      %cst_72 = arith.constant 0.000000e+00 : f32
      %171 = vector.broadcast %cst_72 : f32 to vector<8x32xf32>
      %c0_73 = arith.constant 0 : index
      %c0_74 = arith.constant 0 : index
      %172 = vector.load %arg16[%c0_73, %c0_74] : memref<8x32xf32, #tpu.memory_space<vmem>>, vector<8x32xf32>
      tpu.vector_store %arg16[%c0_73, %c0_74], %171 {strides = array<i32>} : memref<8x32xf32, #tpu.memory_space<vmem>>, vector<8x32xf32>,
    } else {
    }
    %c0 = arith.constant 0 : index
    %c0_1 = arith.constant 0 : index
    %c0_2 = arith.constant 0 : index
    %3 = vector.load %arg1[%c0, %c0_1, %c0_2] : memref<8x8x32xf32, #tpu.memory_space<vmem>>, vector<8x8x32xf32>
    %4 = vector.shape_cast %3 : vector<8x8x32xf32> to vector<64x32xf32>
    %c0_3 = arith.constant 0 : index
    %c0_4 = arith.constant 0 : index
    %c0_5 = arith.constant 0 : index
    %5 = vector.load %arg2[%c0_3, %c0_4, %c0_5] : memref<8x1x8xf32, #tpu.memory_space<vmem>>, vector<8x1x8xf32>
    %c0_6 = arith.constant 0 : index
    %c0_7 = arith.constant 0 : index
    %6 = vector.load %arg4[%c0_6, %c0_7] : memref<32x96xf32, #tpu.memory_space<vmem>>, vector<32x96xf32>
    %cst = arith.constant dense<0.000000e+00> : vector<64x96xf32>
    %7 = tpu.matmul %4, %6, %cst {dimension_numbers = #tpu.dot_dimension_numbers<[1], [0], [0], [1], [0, 0, 1, 1], [], []>, precision = #tpu.contract_precision<fp32>} : vector<64x32xf32>, vector<32x96xf32>, vector<64x96xf32> -> vector<64x96xf32>
    %c0_8 = arith.constant 0 : index
    %c0_9 = arith.constant 0 : index
    %8 = vector.load %arg5[%c0_8, %c0_9] : memref<1x96xf32, #tpu.memory_space<vmem>>, vector<1x96xf32>
    %9 = vector.broadcast %8 : vector<1x96xf32> to vector<64x96xf32>
    %10 = arith.addf %7, %9 : vector<64x96xf32>
    %11 = vector.extract_strided_slice %10 {offsets = [0, 0], sizes = [64, 8], strides = [1, 1]} : vector<64x96xf32> to vector<64x8xf32>
    %12 = vector.shape_cast %11 : vector<64x8xf32> to vector<8x8x8xf32>
    %13 = vector.extract_strided_slice %10 {offsets = [0, 32], sizes = [64, 8], strides = [1, 1]} : vector<64x96xf32> to vector<64x8xf32>
    %14 = vector.shape_cast %13 : vector<64x8xf32> to vector<8x8x8xf32>
    %15 = vector.extract_strided_slice %10 {offsets = [0, 64], sizes = [64, 8], strides = [1, 1]} : vector<64x96xf32> to vector<64x8xf32>
    %16 = vector.shape_cast %15 : vector<64x8xf32> to vector<8x8x8xf32>
    %cst_10 = arith.constant dense<0.000000e+00> : vector<8x8x8xf32>
    %17 = tpu.matmul %12, %14, %cst_10 {dimension_numbers = #tpu.dot_dimension_numbers<[2], [2], [1], [1], [0, 0, 0, 1, 1, 1], [0], [0]>, precision = #tpu.contract_precision<fp32>} : vector<8x8x8xf32>, vector<8x8x8xf32>, vector<8x8x8xf32> -> vector<8x8x8xf32>
    %cst_11 = arith.constant 0.353553385 : f32
    %18 = vector.broadcast %cst_11 : f32 to vector<8x8x8xf32>
    %19 = arith.mulf %17, %18 : vector<8x8x8xf32>
    %20 = vector.broadcast %5 : vector<8x1x8xf32> to vector<8x8x8xf32>
    %21 = arith.addf %19, %20 : vector<8x8x8xf32>
    %cst_12 = arith.constant dense<0xFF800000> : vector<8x8xf32>
    %22 = vector.multi_reduction <maximumf>, %21, %cst_12 [2] : vector<8x8x8xf32> to vector<8x8xf32>
    %23 = vector.shape_cast %22 : vector<8x8xf32> to vector<8x8x1xf32>
    %24 = vector.broadcast %23 : vector<8x8x1xf32> to vector<8x8x8xf32>
    %25 = arith.subf %21, %24 : vector<8x8x8xf32>
    %26 = math.exp %25 : vector<8x8x8xf32>
    %cst_13 = arith.constant dense<0.000000e+00> : vector<8x8xf32>
    %27 = vector.multi_reduction <add>, %26, %cst_13 [2] : vector<8x8x8xf32> to vector<8x8xf32>
    %28 = vector.shape_cast %27 : vector<8x8xf32> to vector<8x8x1xf32>
    %29 = vector.broadcast %28 : vector<8x8x1xf32> to vector<8x8x8xf32>
    %30 = arith.divf %26, %29 : vector<8x8x8xf32>
    %cst_14 = arith.constant dense<0.000000e+00> : vector<8x8x8xf32>
    %31 = tpu.matmul %30, %16, %cst_14 {dimension_numbers = #tpu.dot_dimension_numbers<[2], [1], [1], [2], [0, 0, 0, 1, 1, 2], [0], [0]>, precision = #tpu.contract_precision<fp32>} : vector<8x8x8xf32>, vector<8x8x8xf32>, vector<8x8x8xf32> -> vector<8x8x8xf32>
    %32 = vector.shape_cast %31 : vector<8x8x8xf32> to vector<64x8xf32>
    %33 = vector.extract_strided_slice %10 {offsets = [0, 8], sizes = [64, 8], strides = [1, 1]} : vector<64x96xf32> to vector<64x8xf32>
    %34 = vector.shape_cast %33 : vector<64x8xf32> to vector<8x8x8xf32>
    %35 = vector.extract_strided_slice %10 {offsets = [0, 40], sizes = [64, 8], strides = [1, 1]} : vector<64x96xf32> to vector<64x8xf32>
    %36 = vector.shape_cast %35 : vector<64x8xf32> to vector<8x8x8xf32>
    %37 = vector.extract_strided_slice %10 {offsets = [0, 72], sizes = [64, 8], strides = [1, 1]} : vector<64x96xf32> to vector<64x8xf32>
    %38 = vector.shape_cast %37 : vector<64x8xf32> to vector<8x8x8xf32>
    %cst_15 = arith.constant dense<0.000000e+00> : vector<8x8x8xf32>
    %39 = tpu.matmul %34, %36, %cst_15 {dimension_numbers = #tpu.dot_dimension_numbers<[2], [2], [1], [1], [0, 0, 0, 1, 1, 1], [0], [0]>, precision = #tpu.contract_precision<fp32>} : vector<8x8x8xf32>, vector<8x8x8xf32>, vector<8x8x8xf32> -> vector<8x8x8xf32>
    %cst_16 = arith.constant 0.353553385 : f32
    %40 = vector.broadcast %cst_16 : f32 to vector<8x8x8xf32>
    %41 = arith.mulf %39, %40 : vector<8x8x8xf32>
    %42 = vector.broadcast %5 : vector<8x1x8xf32> to vector<8x8x8xf32>
    %43 = arith.addf %41, %42 : vector<8x8x8xf32>
    %cst_17 = arith.constant dense<0xFF800000> : vector<8x8xf32>
    %44 = vector.multi_reduction <maximumf>, %43, %cst_17 [2] : vector<8x8x8xf32> to vector<8x8xf32>
    %45 = vector.shape_cast %44 : vector<8x8xf32> to vector<8x8x1xf32>
    %46 = vector.broadcast %45 : vector<8x8x1xf32> to vector<8x8x8xf32>
    %47 = arith.subf %43, %46 : vector<8x8x8xf32>
    %48 = math.exp %47 : vector<8x8x8xf32>
    %cst_18 = arith.constant dense<0.000000e+00> : vector<8x8xf32>
    %49 = vector.multi_reduction <add>, %48, %cst_18 [2] : vector<8x8x8xf32> to vector<8x8xf32>
    %50 = vector.shape_cast %49 : vector<8x8xf32> to vector<8x8x1xf32>
    %51 = vector.broadcast %50 : vector<8x8x1xf32> to vector<8x8x8xf32>
    %52 = arith.divf %48, %51 : vector<8x8x8xf32>
    %cst_19 = arith.constant dense<0.000000e+00> : vector<8x8x8xf32>
    %53 = tpu.matmul %52, %38, %cst_19 {dimension_numbers = #tpu.dot_dimension_numbers<[2], [1], [1], [2], [0, 0, 0, 1, 1, 2], [0], [0]>, precision = #tpu.contract_precision<fp32>} : vector<8x8x8xf32>, vector<8x8x8xf32>, vector<8x8x8xf32> -> vector<8x8x8xf32>
    %54 = vector.shape_cast %53 : vector<8x8x8xf32> to vector<64x8xf32>
    %55 = vector.extract_strided_slice %10 {offsets = [0, 16], sizes = [64, 8], strides = [1, 1]} : vector<64x96xf32> to vector<64x8xf32>
    %56 = vector.shape_cast %55 : vector<64x8xf32> to vector<8x8x8xf32>
    %57 = vector.extract_strided_slice %10 {offsets = [0, 48], sizes = [64, 8], strides = [1, 1]} : vector<64x96xf32> to vector<64x8xf32>
    %58 = vector.shape_cast %57 : vector<64x8xf32> to vector<8x8x8xf32>
    %59 = vector.extract_strided_slice %10 {offsets = [0, 80], sizes = [64, 8], strides = [1, 1]} : vector<64x96xf32> to vector<64x8xf32>
    %60 = vector.shape_cast %59 : vector<64x8xf32> to vector<8x8x8xf32>
    %cst_20 = arith.constant dense<0.000000e+00> : vector<8x8x8xf32>
    %61 = tpu.matmul %56, %58, %cst_20 {dimension_numbers = #tpu.dot_dimension_numbers<[2], [2], [1], [1], [0, 0, 0, 1, 1, 1], [0], [0]>, precision = #tpu.contract_precision<fp32>} : vector<8x8x8xf32>, vector<8x8x8xf32>, vector<8x8x8xf32> -> vector<8x8x8xf32>
    %cst_21 = arith.constant 0.353553385 : f32
    %62 = vector.broadcast %cst_21 : f32 to vector<8x8x8xf32>
    %63 = arith.mulf %61, %62 : vector<8x8x8xf32>
    %64 = vector.broadcast %5 : vector<8x1x8xf32> to vector<8x8x8xf32>
    %65 = arith.addf %63, %64 : vector<8x8x8xf32>
    %cst_22 = arith.constant dense<0xFF800000> : vector<8x8xf32>
    %66 = vector.multi_reduction <maximumf>, %65, %cst_22 [2] : vector<8x8x8xf32> to vector<8x8xf32>
    %67 = vector.shape_cast %66 : vector<8x8xf32> to vector<8x8x1xf32>
    %68 = vector.broadcast %67 : vector<8x8x1xf32> to vector<8x8x8xf32>
    %69 = arith.subf %65, %68 : vector<8x8x8xf32>
    %70 = math.exp %69 : vector<8x8x8xf32>
    %cst_23 = arith.constant dense<0.000000e+00> : vector<8x8xf32>
    %71 = vector.multi_reduction <add>, %70, %cst_23 [2] : vector<8x8x8xf32> to vector<8x8xf32>
    %72 = vector.shape_cast %71 : vector<8x8xf32> to vector<8x8x1xf32>
    %73 = vector.broadcast %72 : vector<8x8x1xf32> to vector<8x8x8xf32>
    %74 = arith.divf %70, %73 : vector<8x8x8xf32>
    %cst_24 = arith.constant dense<0.000000e+00> : vector<8x8x8xf32>
    %75 = tpu.matmul %74, %60, %cst_24 {dimension_numbers = #tpu.dot_dimension_numbers<[2], [1], [1], [2], [0, 0, 0, 1, 1, 2], [0], [0]>, precision = #tpu.contract_precision<fp32>} : vector<8x8x8xf32>, vector<8x8x8xf32>, vector<8x8x8xf32> -> vector<8x8x8xf32>
    %76 = vector.shape_cast %75 : vector<8x8x8xf32> to vector<64x8xf32>
    %77 = vector.extract_strided_slice %10 {offsets = [0, 24], sizes = [64, 8], strides = [1, 1]} : vector<64x96xf32> to vector<64x8xf32>
    %78 = vector.shape_cast %77 : vector<64x8xf32> to vector<8x8x8xf32>
    %79 = vector.extract_strided_slice %10 {offsets = [0, 56], sizes = [64, 8], strides = [1, 1]} : vector<64x96xf32> to vector<64x8xf32>
    %80 = vector.shape_cast %79 : vector<64x8xf32> to vector<8x8x8xf32>
    %81 = vector.extract_strided_slice %10 {offsets = [0, 88], sizes = [64, 8], strides = [1, 1]} : vector<64x96xf32> to vector<64x8xf32>
    %82 = vector.shape_cast %81 : vector<64x8xf32> to vector<8x8x8xf32>
    %cst_25 = arith.constant dense<0.000000e+00> : vector<8x8x8xf32>
    %83 = tpu.matmul %78, %80, %cst_25 {dimension_numbers = #tpu.dot_dimension_numbers<[2], [2], [1], [1], [0, 0, 0, 1, 1, 1], [0], [0]>, precision = #tpu.contract_precision<fp32>} : vector<8x8x8xf32>, vector<8x8x8xf32>, vector<8x8x8xf32> -> vector<8x8x8xf32>
    %cst_26 = arith.constant 0.353553385 : f32
    %84 = vector.broadcast %cst_26 : f32 to vector<8x8x8xf32>
    %85 = arith.mulf %83, %84 : vector<8x8x8xf32>
    %86 = vector.broadcast %5 : vector<8x1x8xf32> to vector<8x8x8xf32>
    %87 = arith.addf %85, %86 : vector<8x8x8xf32>
    %cst_27 = arith.constant dense<0xFF800000> : vector<8x8xf32>
    %88 = vector.multi_reduction <maximumf>, %87, %cst_27 [2] : vector<8x8x8xf32> to vector<8x8xf32>
    %89 = vector.shape_cast %88 : vector<8x8xf32> to vector<8x8x1xf32>
    %90 = vector.broadcast %89 : vector<8x8x1xf32> to vector<8x8x8xf32>
    %91 = arith.subf %87, %90 : vector<8x8x8xf32>
    %92 = math.exp %91 : vector<8x8x8xf32>
    %cst_28 = arith.constant dense<0.000000e+00> : vector<8x8xf32>
    %93 = vector.multi_reduction <add>, %92, %cst_28 [2] : vector<8x8x8xf32> to vector<8x8xf32>
    %94 = vector.shape_cast %93 : vector<8x8xf32> to vector<8x8x1xf32>
    %95 = vector.broadcast %94 : vector<8x8x1xf32> to vector<8x8x8xf32>
    %96 = arith.divf %92, %95 : vector<8x8x8xf32>
    %cst_29 = arith.constant dense<0.000000e+00> : vector<8x8x8xf32>
    %97 = tpu.matmul %96, %82, %cst_29 {dimension_numbers = #tpu.dot_dimension_numbers<[2], [1], [1], [2], [0, 0, 0, 1, 1, 2], [0], [0]>, precision = #tpu.contract_precision<fp32>} : vector<8x8x8xf32>, vector<8x8x8xf32>, vector<8x8x8xf32> -> vector<8x8x8xf32>
    %98 = vector.shape_cast %97 : vector<8x8x8xf32> to vector<64x8xf32>
    %99 = tpu.concatenate %32, %54, %76, %98 in 1 : vector<64x8xf32>, vector<64x8xf32>, vector<64x8xf32>, vector<64x8xf32> -> vector<64x32xf32>
    %c0_30 = arith.constant 0 : index
    %c0_31 = arith.constant 0 : index
    %100 = vector.load %arg6[%c0_30, %c0_31] : memref<32x32xf32, #tpu.memory_space<vmem>>, vector<32x32xf32>
    %cst_32 = arith.constant dense<0.000000e+00> : vector<64x32xf32>
    %101 = tpu.matmul %99, %100, %cst_32 {dimension_numbers = #tpu.dot_dimension_numbers<[1], [0], [0], [1], [0, 0, 1, 1], [], []>, precision = #tpu.contract_precision<fp32>} : vector<64x32xf32>, vector<32x32xf32>, vector<64x32xf32> -> vector<64x32xf32>
    %c0_33 = arith.constant 0 : index
    %c0_34 = arith.constant 0 : index
    %102 = vector.load %arg7[%c0_33, %c0_34] : memref<1x32xf32, #tpu.memory_space<vmem>>, vector<1x32xf32>
    %103 = vector.broadcast %102 : vector<1x32xf32> to vector<64x32xf32>
    %104 = arith.addf %101, %103 : vector<64x32xf32>
    %105 = arith.addf %4, %104 : vector<64x32xf32>
    %c0_35 = arith.constant 0 : index
    %c0_36 = arith.constant 0 : index
    %106 = vector.load %arg8[%c0_35, %c0_36] : memref<1x32xf32, #tpu.memory_space<vmem>>, vector<1x32xf32>
    %c0_37 = arith.constant 0 : index
    %c0_38 = arith.constant 0 : index
    %107 = vector.load %arg9[%c0_37, %c0_38] : memref<1x32xf32, #tpu.memory_space<vmem>>, vector<1x32xf32>
    %cst_39 = arith.constant dense<0.000000e+00> : vector<64xf32>
    %108 = vector.multi_reduction <add>, %105, %cst_39 [1] : vector<64x32xf32> to vector<64xf32>
    %109 = vector.shape_cast %108 : vector<64xf32> to vector<64x1xf32>
    %cst_40 = arith.constant 3.200000e+01 : f32
    %110 = vector.broadcast %cst_40 : f32 to vector<64x1xf32>
    %111 = arith.divf %109, %110 : vector<64x1xf32>
    %112 = vector.broadcast %111 : vector<64x1xf32> to vector<64x32xf32>
    %113 = arith.subf %105, %112 : vector<64x32xf32>
    %114 = arith.mulf %113, %113 : vector<64x32xf32>
    %cst_41 = arith.constant dense<0.000000e+00> : vector<64xf32>
    %115 = vector.multi_reduction <add>, %114, %cst_41 [1] : vector<64x32xf32> to vector<64xf32>
    %116 = vector.shape_cast %115 : vector<64xf32> to vector<64x1xf32>
    %cst_42 = arith.constant 3.200000e+01 : f32
    %117 = vector.broadcast %cst_42 : f32 to vector<64x1xf32>
    %118 = arith.divf %116, %117 : vector<64x1xf32>
    %cst_43 = arith.constant 9.99999974E-6 : f32
    %119 = vector.broadcast %cst_43 : f32 to vector<64x1xf32>
    %120 = arith.addf %118, %119 : vector<64x1xf32>
    %121 = math.rsqrt %120 : vector<64x1xf32>
    %122 = vector.broadcast %121 : vector<64x1xf32> to vector<64x32xf32>
    %123 = arith.mulf %113, %122 : vector<64x32xf32>
    %124 = vector.broadcast %106 : vector<1x32xf32> to vector<64x32xf32>
    %125 = arith.mulf %123, %124 : vector<64x32xf32>
    %126 = vector.broadcast %107 : vector<1x32xf32> to vector<64x32xf32>
    %127 = arith.addf %125, %126 : vector<64x32xf32>
    %c0_44 = arith.constant 0 : index
    %c0_45 = arith.constant 0 : index
    %128 = vector.load %arg10[%c0_44, %c0_45] : memref<32x64xf32, #tpu.memory_space<vmem>>, vector<32x64xf32>
    %cst_46 = arith.constant dense<0.000000e+00> : vector<64x64xf32>
    %129 = tpu.matmul %127, %128, %cst_46 {dimension_numbers = #tpu.dot_dimension_numbers<[1], [0], [0], [1], [0, 0, 1, 1], [], []>, precision = #tpu.contract_precision<fp32>} : vector<64x32xf32>, vector<32x64xf32>, vector<64x64xf32> -> vector<64x64xf32>
    %c0_47 = arith.constant 0 : index
    %c0_48 = arith.constant 0 : index
    %130 = vector.load %arg11[%c0_47, %c0_48] : memref<1x64xf32, #tpu.memory_space<vmem>>, vector<1x64xf32>
    %131 = vector.broadcast %130 : vector<1x64xf32> to vector<64x64xf32>
    %132 = arith.addf %129, %131 : vector<64x64xf32>
    %cst_49 = arith.constant 0.000000e+00 : f32
    %133 = vector.broadcast %cst_49 : f32 to vector<64x64xf32>
    %134 = arith.maximumf %132, %133 : vector<64x64xf32>
    %c0_50 = arith.constant 0 : index
    %c0_51 = arith.constant 0 : index
    %135 = vector.load %arg12[%c0_50, %c0_51] : memref<64x32xf32, #tpu.memory_space<vmem>>, vector<64x32xf32>
    %cst_52 = arith.constant dense<0.000000e+00> : vector<64x32xf32>
    %136 = tpu.matmul %134, %135, %cst_52 {dimension_numbers = #tpu.dot_dimension_numbers<[1], [0], [0], [1], [0, 0, 1, 1], [], []>, precision = #tpu.contract_precision<fp32>} : vector<64x64xf32>, vector<64x32xf32>, vector<64x32xf32> -> vector<64x32xf32>
    %c0_53 = arith.constant 0 : index
    %c0_54 = arith.constant 0 : index
    %137 = vector.load %arg13[%c0_53, %c0_54] : memref<1x32xf32, #tpu.memory_space<vmem>>, vector<1x32xf32>
    %138 = vector.broadcast %137 : vector<1x32xf32> to vector<64x32xf32>
    %139 = arith.addf %136, %138 : vector<64x32xf32>
    %140 = arith.addf %127, %139 : vector<64x32xf32>
    %c0_55 = arith.constant 0 : index
    %c0_56 = arith.constant 0 : index
    %141 = vector.load %arg14[%c0_55, %c0_56] : memref<1x32xf32, #tpu.memory_space<vmem>>, vector<1x32xf32>
    %c0_57 = arith.constant 0 : index
    %c0_58 = arith.constant 0 : index
    %142 = vector.load %arg15[%c0_57, %c0_58] : memref<1x32xf32, #tpu.memory_space<vmem>>, vector<1x32xf32>
    %cst_59 = arith.constant dense<0.000000e+00> : vector<64xf32>
    %143 = vector.multi_reduction <add>, %140, %cst_59 [1] : vector<64x32xf32> to vector<64xf32>
    %144 = vector.shape_cast %143 : vector<64xf32> to vector<64x1xf32>
    %cst_60 = arith.constant 3.200000e+01 : f32
    %145 = vector.broadcast %cst_60 : f32 to vector<64x1xf32>
    %146 = arith.divf %144, %145 : vector<64x1xf32>
    %147 = vector.broadcast %146 : vector<64x1xf32> to vector<64x32xf32>
    %148 = arith.subf %140, %147 : vector<64x32xf32>
    %149 = arith.mulf %148, %148 : vector<64x32xf32>
    %cst_61 = arith.constant dense<0.000000e+00> : vector<64xf32>
    %150 = vector.multi_reduction <add>, %149, %cst_61 [1] : vector<64x32xf32> to vector<64xf32>
    %151 = vector.shape_cast %150 : vector<64xf32> to vector<64x1xf32>
    %cst_62 = arith.constant 3.200000e+01 : f32
    %152 = vector.broadcast %cst_62 : f32 to vector<64x1xf32>
    %153 = arith.divf %151, %152 : vector<64x1xf32>
    %cst_63 = arith.constant 9.99999974E-6 : f32
    %154 = vector.broadcast %cst_63 : f32 to vector<64x1xf32>
    %155 = arith.addf %153, %154 : vector<64x1xf32>
    %156 = math.rsqrt %155 : vector<64x1xf32>
    %157 = vector.broadcast %156 : vector<64x1xf32> to vector<64x32xf32>
    %158 = arith.mulf %148, %157 : vector<64x32xf32>
    %159 = vector.broadcast %141 : vector<1x32xf32> to vector<64x32xf32>
    %160 = arith.mulf %158, %159 : vector<64x32xf32>
    %161 = vector.broadcast %142 : vector<1x32xf32> to vector<64x32xf32>
    %162 = arith.addf %160, %161 : vector<64x32xf32>
    %c0_64 = arith.constant 0 : index
    %c0_65 = arith.constant 0 : index
    %163 = vector.load %arg16[%c0_64, %c0_65] : memref<8x32xf32, #tpu.memory_space<vmem>>, vector<8x32xf32>
    %164 = vector.shape_cast %162 : vector<64x32xf32> to vector<8x8x32xf32>
    %c0_66 = arith.constant 0 : index
    %c0_67 = arith.constant 0 : index
    %c0_68 = arith.constant 0 : index
    %165 = vector.load %arg3[%c0_66, %c0_67, %c0_68] : memref<8x1x1xf32, #tpu.memory_space<vmem>>, vector<8x1x1xf32>
    %166 = vector.broadcast %165 : vector<8x1x1xf32> to vector<8x8x32xf32>
    %167 = arith.mulf %164, %166 : vector<8x8x32xf32>
    %cst_69 = arith.constant dense<0.000000e+00> : vector<8x32xf32>
    %168 = vector.multi_reduction <add>, %167, %cst_69 [0] : vector<8x8x32xf32> to vector<8x32xf32>
    %169 = arith.addf %163, %168 : vector<8x32xf32>
    %c0_70 = arith.constant 0 : index
    %c0_71 = arith.constant 0 : index
    %170 = vector.load %arg16[%c0_70, %c0_71] : memref<8x32xf32, #tpu.memory_space<vmem>>, vector<8x32xf32>
    tpu.vector_store %arg16[%c0_70, %c0_71], %169 {strides = array<i32>} : memref<8x32xf32, #tpu.memory_space<vmem>>, vector<8x32xf32>,
    return
  }
  func.func @transform_0(%arg0: i32) -> (i32, i32, i32) {
    %c0_i32 = arith.constant 0 : i32
    %c0_i32_0 = arith.constant 0 : i32
    %c0_i32_1 = arith.constant 0 : i32
    return %arg0, %c0_i32, %c0_i32_0 : i32, i32, i32
  }
  func.func @transform_1(%arg0: i32) -> (i32, i32, i32) {
    %c0_i32 = arith.constant 0 : i32
    %c0_i32_0 = arith.constant 0 : i32
    %c0_i32_1 = arith.constant 0 : i32
    return %arg0, %c0_i32, %c0_i32_0 : i32, i32, i32
  }
  func.func @transform_2(%arg0: i32) -> (i32, i32, i32) {
    %c0_i32 = arith.constant 0 : i32
    %c0_i32_0 = arith.constant 0 : i32
    %c0_i32_1 = arith.constant 0 : i32
    return %arg0, %c0_i32, %c0_i32_0 : i32, i32, i32
  }
  func.func @transform_3(%arg0: i32) -> (i32, i32) {
    %c0_i32 = arith.constant 0 : i32
    %c0_i32_0 = arith.constant 0 : i32
    %c0_i32_1 = arith.constant 0 : i32
    return %c0_i32, %c0_i32_0 : i32, i32
  }
  func.func @transform_4(%arg0: i32) -> (i32, i32) {
    %c0_i32 = arith.constant 0 : i32
    %c0_i32_0 = arith.constant 0 : i32
    %c0_i32_1 = arith.constant 0 : i32
    return %c0_i32, %c0_i32_0 : i32, i32
  }
  func.func @transform_5(%arg0: i32) -> (i32, i32) {
    %c0_i32 = arith.constant 0 : i32
    %c0_i32_0 = arith.constant 0 : i32
    %c0_i32_1 = arith.constant 0 : i32
    return %c0_i32, %c0_i32_0 : i32, i32
  }
  func.func @transform_6(%arg0: i32) -> (i32, i32) {
    %c0_i32 = arith.constant 0 : i32
    %c0_i32_0 = arith.constant 0 : i32
    %c0_i32_1 = arith.constant 0 : i32
    return %c0_i32, %c0_i32_0 : i32, i32
  }
  func.func @transform_7(%arg0: i32) -> (i32, i32) {
    %c0_i32 = arith.constant 0 : i32
    %c0_i32_0 = arith.constant 0 : i32
    %c0_i32_1 = arith.constant 0 : i32
    return %c0_i32, %c0_i32_0 : i32, i32
  }
  func.func @transform_8(%arg0: i32) -> (i32, i32) {
    %c0_i32 = arith.constant 0 : i32
    %c0_i32_0 = arith.constant 0 : i32
    %c0_i32_1 = arith.constant 0 : i32
    return %c0_i32, %c0_i32_0 : i32, i32
  }
  func.func @transform_9(%arg0: i32) -> (i32, i32) {
    %c0_i32 = arith.constant 0 : i32
    %c0_i32_0 = arith.constant 0 : i32
    %c0_i32_1 = arith.constant 0 : i32
    return %c0_i32, %c0_i32_0 : i32, i32
  }
  func.func @transform_10(%arg0: i32) -> (i32, i32) {
    %c0_i32 = arith.constant 0 : i32
    %c0_i32_0 = arith.constant 0 : i32
    %c0_i32_1 = arith.constant 0 : i32
    return %c0_i32, %c0_i32_0 : i32, i32
  }
  func.func @transform_11(%arg0: i32) -> (i32, i32) {
    %c0_i32 = arith.constant 0 : i32
    %c0_i32_0 = arith.constant 0 : i32
    %c0_i32_1 = arith.constant 0 : i32
    return %c0_i32, %c0_i32_0 : i32, i32
  }
  func.func @transform_12(%arg0: i32) -> (i32, i32) {
    %c0_i32 = arith.constant 0 : i32
    %c0_i32_0 = arith.constant 0 : i32
    %c0_i32_1 = arith.constant 0 : i32
    return %c0_i32, %c0_i32_0 : i32, i32
  }
  func.func @transform_13(%arg0: i32) -> (i32, i32) {
    %c0_i32 = arith.constant 0 : i32
    %c0_i32_0 = arith.constant 0 : i32
    %c0_i32_1 = arith.constant 0 : i32
    return %c0_i32, %c0_i32_0 : i32, i32
  }
  func.func @transform_14(%arg0: i32) -> (i32, i32) {
    %c0_i32 = arith.constant 0 : i32
    %c0_i32_0 = arith.constant 0 : i32
    %c0_i32_1 = arith.constant 0 : i32
    return %c0_i32, %c0_i32_0 : i32, i32
  }
  func.func @transform_15(%arg0: i32) -> (i32, i32) {
    %c0_i32 = arith.constant 0 : i32
    %c0_i32_0 = arith.constant 0 : i32
    %c0_i32_1 = arith.constant 0 : i32
    return %c0_i32, %c0_i32_0 : i32, i32
  }
}

</mosaic_0001>

<bundles_post_ra>
// kernel: tpu_custom_call.1
= control target key start
LH: loop header
LB: loop body
LE: loop exit
PB: predicated region body
PF: predicated region fallthrough
CT: control target
= control target key end

     0   :  { %20 = vsyncpa [#allocation3], 0  ;;  %s16366_s0 = inlined_call_operand.vmem [shape: f32[8,8,32], index: 0, kind: input, shape index: {}]   ;;  %s16367_s1 = inlined_call_operand.vmem [shape: f32[8,1,8], index: 1, kind: input, shape index: {}]   ;;  %s16368_s2 = inlined_call_operand.vmem [shape: f32[8,1,1], index: 2, kind: input, shape index: {}]   ;;  %s16369_s3 = inlined_call_operand.vmem [shape: f32[32,96], index: 3, kind: input, shape index: {}]   ;;  %s16370_s4 = inlined_call_operand.vmem [shape: f32[1,96], index: 4, kind: input, shape index: {}]   ;;  %s16371_s5 = inlined_call_operand.hbm [shape: f32[32,32], index: 5, kind: input, shape index: {}]   ;;  %s16372_s6 = inlined_call_operand.vmem [shape: f32[1,32], index: 6, kind: input, shape index: {}]   ;;  %s16373_s7 = inlined_call_operand.vmem [shape: f32[1,32], index: 7, kind: input, shape index: {}]   ;;  %s16374_s8 = inlined_call_operand.vmem [shape: f32[1,32], index: 8, kind: input, shape index: {}]   ;;  %s16375_s9 = inlined_call_operand.hbm [shape: f32[32,64], index: 9, kind: input, shape index: {}]   ;;  %s16376_s10 = inlined_call_operand.vmem [shape: f32[1,64], index: 10, kind: input, shape index: {}]   ;;  %s16377_s11 = inlined_call_operand.vmem [shape: f32[64,32], index: 11, kind: input, shape index: {}]   ;;  %s16378_s12 = inlined_call_operand.vmem [shape: f32[1,32], index: 12, kind: input, shape index: {}]   ;;  %s16379_s13 = inlined_call_operand.vmem [shape: f32[1,32], index: 13, kind: input, shape index: {}]   ;;  %s16380_s14 = inlined_call_operand.vmem [shape: f32[1,32], index: 14, kind: input, shape index: {}]   ;;  %s16381_s15 = inlined_call_operand.hbm [shape: f32[8,32], index: 15, kind: output, shape index: {}]  }
   0x1   :  { %21 = vsyncpa [#allocation6], 0 }
   0x2   :  { %22 = vsyncpa [#allocation4], 0  ;;  %s37_s20 = sshll.u32 %s16371_s5, 4  ;;  %s13521_s21 = smov [#allocation2]   ;;  %s38_s20 = int_to_ptr.hbm [resolvable:$true] %s37_s20 }
   0x3   :  { %s39_s22 = sshll.u32 %s13521_s21, 4  ;;  %s56_s25 = sshll.u32 %s16375_s9, 4  ;;  %s40_s22 = int_to_ptr.vmem [resolvable:$true] %s39_s22  ;;  %s57_s25 = int_to_ptr.hbm [resolvable:$true] %s56_s25 }
   0x4   :  { %s13522_s26 = smov 128   ;;  %s13523_s27 = smov 8  }
   0x5   :  { %45 = dma.hbm_to_vmem [thread:$0]  %s38_s20, 512, %s40_s22, [#allocation3], %s13522_s26, %s13522_s26, %s13523_s27  }
   0x6   :  { %s13524_s28 = smov [#allocation5]  }
   0x7   :  { %s58_s29 = sshll.u32 %s13524_s28, 4  ;;  %s59_s29 = int_to_ptr.vmem [resolvable:$true] %s58_s29 }
   0x8   :  { %64 = dma.hbm_to_vmem [thread:$0]  %s57_s25, 512, %s59_s29, [#allocation6], %s13522_s26, %s13522_s26, %s13523_s27  }
   0x9   :  { %13515 = dma.done.wait [#allocation3], 512  }
   0xa   :  { %13516 = vsyncadd [#allocation3], 4294966784 }
   0xb   :  { %13517 = dma.done.wait [#allocation6], 512  }
   0xc   :  { %13518 = vsyncadd [#allocation6], 4294966784  ;;  %vm87_vm0 = vcmask 261120   ;;  %v108_v0 = vld [vmem:[%s16369_s3 + $0x18] sm:$0xff]  ;;  %v107_v1 = vld [vmem:[%s16369_s3 + $0x10] sm:$0xff]  ;;  %vm543_vm1 = vcmask 64512  }
   0xd   :  { %v106_v2 = vld [vmem:[%s16369_s3 + $0x8] sm:$0xff]  ;;  %v13639_v3 = vand.u32 4294901760, %v108_v0  ;;  %v13641_v4 = vand.u32 4294901760, %v107_v1  ;;  %v105_v6 = vld [vmem:[%s16369_s3] sm:$0xff]  ;;  %v95_v13 = vld [vmem:[%s16366_s0 + $0x30] sm:$0xff]  ;;  %s13526_s19 = smov 64  }
   0xe   :  { %v13643_v5 = vand.u32 4294901760, %v106_v2  ;;  %v93_v7 = vld [vmem:[%s16366_s0 + $0x20] sm:$0xff]  ;;  %v94_v8 = vld [vmem:[%s16366_s0 + $0x28] sm:$0xff]  ;;  %v13654_v9 = vand.u32 4294901760, %v105_v6  ;;  %v133_v21 = vsel %vm87_vm0, %v95_v13, 0  ;;  %v91_v37 = vld [vmem:[%s16366_s0 + $0x10] sm:$0xff] }
   0xf   :  { %v127_v10 = vsel %vm87_vm0, %v93_v7, 0  ;;  %v130_v11 = vsel %vm87_vm0, %v94_v8, 0  ;;  %v89_v12 = vld [vmem:[%s16366_s0] sm:$0xff]  ;;  %13193 = vmatpush.msra.mxu2 %v13639_v3  ;;  %v236_v14 = vsub.f32 %v108_v0, %v13639_v3  ;;  %v242_v16 = vsub.f32 %v107_v1, %v13641_v4  ;;  %151 = vmatpush.msra.mxu0 %v13639_v3  ;;  %v90_v34 = vld [vmem:[%s16366_s0 + $0x8] sm:$0xff]  ;;  %v96_v44 = vld [vmem:[%s16366_s0 + $0x38] sm:$0xff]  ;;  %s13528_s22 = smov 88  }
  0x10   :  { %v13666_v15 = vand.u32 4294901760, %v127_v10  ;;  %v248_v17 = vsub.f32 %v106_v2, %v13643_v5  ;;  %v13672_v18 = vsub.f32 %v105_v6, %v13654_v9  ;;  %v13674_v19 = vand.u32 4294901760, %v130_v11  ;;  %v92_v58 = vld [vmem:[%s16366_s0 + $0x18] sm:$0xff]  ;;  %s13529_s20 = smov 56   ;;  %s13531_s23 = smov 80  }
  0x11   :  { %v115_v20 = vsel %vm87_vm0, %v89_v12, 0  ;;  %13194 = vmatpush.msra.mxu2 %v13641_v4  ;;  %v237_v22 = vand.u32 4294901760, %v236_v14  ;;  %v243_v24 = vand.u32 4294901760, %v242_v16  ;;  %153 = vmatpush.msra.mxu0 %v13641_v4  ;;  %v13689_v29 = vand.u32 4294901760, %v133_v21  ;;  %s13532_s21 = smov 48   ;;  %s13534_s24 = smov 72  }
  0x12   :  { %v13680_v23 = vsub.f32 %v127_v10, %v13666_v15  ;;  %v249_v25 = vand.u32 4294901760, %v248_v17  ;;  %v255_v26 = vand.u32 4294901760, %v13672_v18  ;;  %v13685_v27 = vsub.f32 %v130_v11, %v13674_v19  ;;  %s13182_s18 = sshll.u32 %s16381_s15, 4  ;;  %s13183_s18 = int_to_ptr.hbm [resolvable:$true] %s13182_s18 }
  0x13   :  { %v13687_v28 = vand.u32 4294901760, %v115_v20  ;;  %13195 = vmatpush.msra.mxu2 %v13643_v5  ;;  %v238_v30 = vsub.f32 %v236_v14, %v237_v22  ;;  %v244_v32 = vsub.f32 %v242_v16, %v243_v24  ;;  %155 = vmatpush.msra.mxu0 %v13643_v5  ;;  %v13714_v43 = vsub.f32 %v133_v21, %v13689_v29 }
  0x14   :  { %v192_v31 = vand.u32 4294901760, %v13680_v23  ;;  %v250_v33 = vsub.f32 %v248_v17, %v249_v25  ;;  %v200_v35 = vand.u32 4294901760, %v13685_v27  ;;  %v256_v41 = vsub.f32 %v13672_v18, %v255_v26 }
  0x15   :  { %v13699_v36 = vsub.f32 %v115_v20, %v13687_v28  ;;  %13196 = vmatpush.msra.mxu2 %v13654_v9  ;;  %v239_v38 = vand.u32 4294901760, %v238_v30  ;;  %v245_v40 = vand.u32 4294901760, %v244_v32  ;;  %157 = vmatpush.msra.mxu0 %v13654_v9  ;;  %v118_v47 = vsel %vm87_vm0, %v90_v34, 0 }
  0x16   :  { %v193_v39 = vsub.f32 %v13680_v23, %v192_v31  ;;  %v251_v46 = vand.u32 4294901760, %v250_v33  ;;  %v121_v48 = vsel %vm87_vm0, %v91_v37, 0  ;;  %v201_v49 = vsub.f32 %v13685_v27, %v200_v35 }
  0x17   :  { %v160_v42 = vand.u32 4294901760, %v13699_v36  ;;  %306 = vmatpush.msrb.mxu2 %v236_v14  ;;  %441 = vmatpush.msrb.mxu0 %v237_v22  ;;  %v13727_v51 = vand.u32 4294901760, %v118_v47  ;;  %v257_v52 = vand.u32 4294901760, %v256_v41  ;;  %v13729_v53 = vand.u32 4294901760, %v121_v48 }
  0x18   :  { %13197 = vmatpush.msra.mxu3 %v239_v38  ;;  %v194_v45 = vand.u32 4294901760, %v193_v39  ;;  %240 = vmatpush.msra.mxu1 %v239_v38  ;;  %v208_v55 = vand.u32 4294901760, %v13714_v43  ;;  %v136_v57 = vsel %vm87_vm0, %v96_v44, 0  ;;  %v202_v59 = vand.u32 4294901760, %v201_v49 }
  0x19   :  { %v161_v50 = vsub.f32 %v13699_v36, %v160_v42  ;;  %309 = vmatpush.msrb.mxu2 %v242_v16  ;;  %445 = vmatpush.msrb.mxu0 %v243_v24  ;;  %v167_v56 = vsub.f32 %v118_v47, %v13727_v51  ;;  %v175_v61 = vsub.f32 %v121_v48, %v13729_v53  ;;  %v13738_v62 = vand.u32 4294901760, %v136_v57 }
  0x1a   :  { %195 = vmatmul.f32.vlgmr.msra.gmra.mxu2 %v194_v45  ;;  %13198 = vmatpush.msra.mxu3 %v245_v40  ;;  %v124_v63 = vsel %vm87_vm0, %v92_v58, 0  ;;  %v209_v7 = vsub.f32 %v13714_v43, %v208_v55 }
  0x1b   :  { %246 = vmatpush.msra.mxu1 %v245_v40  ;;  %v162_v54 = vand.u32 4294901760, %v161_v50  ;;  %312 = vmatpush.msrb.mxu2 %v248_v17  ;;  %v168_v60 = vand.u32 4294901760, %v167_v56  ;;  %v176_v2 = vand.u32 4294901760, %v175_v61  ;;  %v182_v6 = vand.u32 4294901760, %v124_v63 }
  0x1c   :  { %13199 = vmatpush.msra.mxu3 %v251_v46  ;;  %449 = vmatpush.msrb.mxu0 %v249_v25  ;;  %v215_v8 = vsub.f32 %v136_v57, %v13738_v62 }
  0x1d   :  { %252 = vmatpush.msra.mxu1 %v251_v46  ;;  %163 = vmatmul.f32.vlgmr.msra.gmra.mxu0 %v162_v54  ;;  %v169_v0 = vsub.f32 %v167_v56, %v168_v60  ;;  %v177_v10 = vsub.f32 %v175_v61, %v176_v2  ;;  %v183_v11 = vsub.f32 %v124_v63, %v182_v6 }
  0x1e   :  { %13200 = vmatpush.msra.mxu3 %v257_v52  ;;  %315 = vmatpush.msrb.mxu2 %v13672_v18  ;;  %v216_v12 = vand.u32 4294901760, %v215_v8 }
  0x1f   :  { %276 = vmatmul.f32.vlgmr.msra.gmra.mxu3 %v13666_v15  ;;  %258 = vmatpush.msra.mxu1 %v257_v52  ;;  %v170_v1 = vand.u32 4294901760, %v169_v0  ;;  %v178_v13 = vand.u32 4294901760, %v177_v10  ;;  %v184_v14 = vand.u32 4294901760, %v183_v11 }
  0x20   :  { %260 = vmatmul.f32.vlgmr.msra.gmra.mxu1 %v13687_v28  ;;  %370 = vmatpush.msrb.mxu3 %v13639_v3 }
  0x21   :  { %500 = vmatpush.msrb.mxu1 %v13639_v3  ;;  %453 = vmatpush.msrb.mxu0 %v255_v26  ;;  %v210_v3 = vand.u32 4294901760, %v209_v7  ;;  %v185_v16 = vsub.f32 %v183_v11, %v184_v14 }
  0x22   :  { %203 = vmatmul.f32.gmra.mxu2 %v202_v59  ;;  %372 = vmatpush.msrb.mxu3 %v13641_v4 }
  0x23   :  { %502 = vmatpush.msrb.mxu1 %v13641_v4  ;;  %v217_v4 = vsub.f32 %v215_v8, %v216_v12 }
  0x24   :  { %374 = vmatpush.msrb.mxu3 %v13643_v5 }
  0x25   :  { %171 = vmatmul.f32.gmra.mxu0 %v170_v1  ;;  %504 = vmatpush.msrb.mxu1 %v13643_v5  ;;  %v218_v17 = vand.u32 4294901760, %v217_v4  ;;  %v186_v5 = vand.u32 4294901760, %v185_v16 }
  0x26   :  { %376 = vmatpush.msrb.mxu3 %v13654_v9 }
  0x27   :  { %280 = vmatmul.f32.gmra.mxu3 %v13674_v19  ;;  %506 = vmatpush.msrb.mxu1 %v13654_v9 }
  0x28   :  { %264 = vmatmul.f32.gmra.mxu1 %v13727_v51 }
  0x2a   :  { %211 = vmatmul.f32.gmra.mxu2 %v210_v3 }
  0x2d   :  { %179 = vmatmul.f32.gmra.mxu0 %v178_v13 }
  0x2f   :  { %284 = vmatmul.f32.gmra.mxu3 %v13689_v29 }
  0x30   :  { %268 = vmatmul.f32.gmra.mxu1 %v13729_v53 }
  0x32   :  { %219 = vmatmul.f32.gmra.mxu2 %v218_v17 }
  0x35   :  { %187 = vmatmul.f32.gmra.mxu0 %v186_v5 }
  0x37   :  { %288 = vmatmul.f32.gmra.mxu3 %v13738_v62 }
  0x38   :  { %272 = vmatmul.f32.gmra.mxu1 %v182_v6 }
  0x3a   :  { %318 = vmatmul.f32.vlgmr.msrb.gmra.mxu2 %v13699_v36 }
  0x3d   :  { %455 = vmatmul.f32.vlgmr.msrb.gmra.mxu0 %v13687_v28 }
  0x3f   :  { %380 = vmatmul.f32.vlgmr.msrb.gmra.mxu3 %v160_v42 }
  0x40   :  { %508 = vmatmul.f32.vlgmr.msrb.gmra.mxu1 %v13687_v28 }
  0x42   :  { %323 = vmatmul.f32.gmra.mxu2 %v167_v56 }
  0x45   :  { %459 = vmatmul.f32.gmra.mxu0 %v13727_v51 }
  0x47   :  { %386 = vmatmul.f32.gmra.mxu3 %v168_v60 }
  0x48   :  { %512 = vmatmul.f32.gmra.mxu1 %v13727_v51 }
  0x4a   :  { %328 = vmatmul.f32.gmra.mxu2 %v175_v61 }
  0x4d   :  { %463 = vmatmul.f32.gmra.mxu0 %v13729_v53 }
  0x4f   :  { %392 = vmatmul.f32.gmra.mxu3 %v176_v2 }
  0x50   :  { %516 = vmatmul.f32.gmra.mxu1 %v13729_v53 }
  0x52   :  { %333 = vmatmul.f32.gmra.mxu2 %v183_v11 }
  0x55   :  { %467 = vmatmul.f32.gmra.mxu0 %v182_v6 }
  0x57   :  { %398 = vmatmul.f32.gmra.mxu3 %v184_v14 }
  0x58   :  { %520 = vmatmul.f32.gmra.mxu1 %v182_v6 }
  0x5a   :  { %338 = vmatmul.f32.gmra.mxu2 %v13680_v23 }
  0x5d   :  { %471 = vmatmul.f32.gmra.mxu0 %v13666_v15 }
  0x5f   :  { %404 = vmatmul.f32.gmra.mxu3 %v192_v31  ;;  %v13802_v31 = vld [vmem:[%s16370_s4] ss:$0 sm:$0xff]  ;;  %s13525_s4 = smov 96  }
  0x60   :  { %524 = vmatmul.f32.gmra.mxu1 %v13666_v15 }
  0x62   :  { %343 = vmatmul.f32.gmra.mxu2 %v13685_v27 }
  0x65   :  { %475 = vmatmul.f32.gmra.mxu0 %v13674_v19 }
  0x67   :  { %410 = vmatmul.f32.gmra.mxu3 %v200_v35 }
  0x68   :  { %528 = vmatmul.f32.gmra.mxu1 %v13674_v19 }
  0x6a   :  { %348 = vmatmul.f32.gmra.mxu2 %v13714_v43 }
  0x6d   :  { %479 = vmatmul.f32.gmra.mxu0 %v13689_v29 }
  0x6f   :  { %416 = vmatmul.f32.gmra.mxu3 %v208_v55 }
  0x70   :  { %532 = vmatmul.f32.gmra.mxu1 %v13689_v29 }
  0x72   :  { %353 = vmatmul.f32.gmra.mxu2 %v215_v8 }
  0x75   :  { %483 = vmatmul.f32.gmra.mxu0 %v13738_v62 }
  0x77   :  { %422 = vmatmul.f32.gmra.mxu3 %v216_v12 }
  0x78   :  { %536 = vmatmul.f32.gmra.mxu1 %v13738_v62 }
  0x9a   :  { %v164_v9 = vpop.f32.mrf.mxu0 }
  0x9b   :  { %v165_v34 = vadd.f32 %v13802_v31, %v164_v9 }
  0x9d   :  { %v196_v15 = vpop.f32.mrf.mxu2  ;;  %v261_v18 = vpop.f32.mrf.mxu1 }
  0x9e   :  { %v262_v37 = vadd.f32 %v261_v18, %v165_v34  ;;  %v197_v10 = vadd.f32 %v13802_v31, %v196_v15 }
  0xa2   :  { %v277_v20 = vpop.f32.mrf.mxu3  ;;  %v172_v19 = vpop.f32.mrf.mxu0 }
  0xa3   :  { %v173_v41 = vadd.f32 %v13802_v31, %v172_v19  ;;  %v278_v4 = vadd.f32 %v277_v20, %v197_v10 }
  0xa5   :  { %v13789_v21 = vpop.f32.mrf.mxu2  ;;  %v265_v22 = vpop.f32.mrf.mxu1 }
  0xa6   :  { %v266_v46 = vadd.f32 %v265_v22, %v173_v41  ;;  %v205_v9 = vadd.f32 %v13802_v31, %v13789_v21 }
  0xaa   :  { %v13791_v23 = vpop.f32.mrf.mxu3  ;;  %v180_v24 = vpop.f32.mrf.mxu0 }
  0xab   :  { %v181_v51 = vadd.f32 %v13802_v31, %v180_v24  ;;  %v282_v24 = vadd.f32 %v13791_v23, %v205_v9 }
  0xad   :  { %v13793_v25 = vpop.f32.mrf.mxu2  ;;  %v269_v26 = vpop.f32.mrf.mxu1 }
  0xae   :  { %v270_v56 = vadd.f32 %v269_v26, %v181_v51 }
  0xb2   :  { %v13795_v27 = vpop.f32.mrf.mxu3  ;;  %v188_v28 = vpop.f32.mrf.mxu0 }
  0xb3   :  { %v189_v61 = vadd.f32 %v13802_v31, %v188_v28 }
  0xb5   :  { %v13797_v29 = vpop.f32.mrf.mxu2  ;;  %v273_v30 = vpop.f32.mrf.mxu1 }
  0xb6   :  { %v274_v2 = vadd.f32 %v273_v30, %v189_v61  ;;  %v221_v41 = vadd.f32 %v13802_v31, %v13797_v29 }
  0xba   :  { %v13804_v32 = vpop.f32.mrf.mxu3  ;;  %v456_v33 = vpop.f32.mrf.mxu0 }
  0xbd   :  { %v319_v35 = vpop.f32.mrf.mxu2  ;;  %v509_v36 = vpop.f32.mrf.mxu1 }
  0xbe   :  { %v320_v38 = vadd.f32 %v319_v35, %v262_v37 }
  0xc2   :  { %v381_v39 = vpop.f32.mrf.mxu3  ;;  %v460_v40 = vpop.f32.mrf.mxu0 }
  0xc3   :  { %v382_v42 = vadd.f32 %v381_v39, %v320_v38 }
  0xc5   :  { %v324_v43 = vpop.f32.mrf.mxu2  ;;  %v457_v44 = vadd.f32 %v456_v33, %v382_v42  ;;  %v513_v45 = vpop.f32.mrf.mxu1  ;;  %v213_v33 = vadd.f32 %v13802_v31, %v13793_v25 }
  0xc6   :  { %v325_v48 = vadd.f32 %v324_v43, %v266_v46 }
  0xc7   :  { %v13808_v47 = vadd.f32 %v509_v36, %v457_v44  ;;  %v286_v36 = vadd.f32 %v13795_v27, %v213_v33  ;;  %v290_v44 = vadd.f32 %v13804_v32, %v221_v41 }
  0xc9   :  { %541 = vrot.lane.b32.xlu0 %v13808_v47, %s13525_s4  ;;  %v544_v29 = vsel %vm543_vm1, %v13808_v47, 0 }
  0xca   :  { %v387_v49 = vpop.f32.mrf.mxu3  ;;  %v464_v50 = vpop.f32.mrf.mxu0  ;;  %v13854_v31 = vand.u32 4294901760, %v544_v29 }
  0xcb   :  { %v388_v52 = vadd.f32 %v387_v49, %v325_v48 }
  0xcc   :  { %v566_v32 = vsub.f32 %v544_v29, %v13854_v31 }
  0xcd   :  { %v329_v53 = vpop.f32.mrf.mxu2  ;;  %v461_v54 = vadd.f32 %v460_v40, %v388_v52  ;;  %v517_v55 = vpop.f32.mrf.mxu1 }
  0xce   :  { %v330_v58 = vadd.f32 %v329_v53, %v270_v56  ;;  %v567_v53 = vand.u32 4294901760, %v566_v32 }
  0xcf   :  { %v13813_v57 = vadd.f32 %v513_v45, %v461_v54 }
  0xd0   :  { %v568_v56 = vsub.f32 %v566_v32, %v567_v53 }
  0xd1   :  { %695 = vrot.lane.b32.xlu0 %v13813_v57, %s13525_s4  ;;  %v697_v10 = vsel %vm543_vm1, %v13813_v57, 0 }
  0xd2   :  { %v393_v59 = vpop.f32.mrf.mxu3  ;;  %v468_v60 = vpop.f32.mrf.mxu0 }
  0xd3   :  { %v394_v62 = vadd.f32 %v393_v59, %v330_v58 }
  0xd5   :  { %v334_v63 = vpop.f32.mrf.mxu2  ;;  %v465_v0 = vadd.f32 %v464_v50, %v394_v62  ;;  %v521_v1 = vpop.f32.mrf.mxu1 }
  0xd6   :  { %v335_v7 = vadd.f32 %v334_v63, %v274_v2 }
  0xd7   :  { %v13818_v6 = vadd.f32 %v517_v55, %v465_v0 }
  0xd9   :  { %848 = vrot.lane.b32.xlu1 %v13818_v6, %s13525_s4 }
  0xda   :  { %v399_v8 = vpop.f32.mrf.mxu3  ;;  %v472_v3 = vpop.f32.mrf.mxu0 }
  0xdb   :  { %v400_v11 = vadd.f32 %v399_v8, %v335_v7 }
  0xdd   :  { %v339_v12 = vpop.f32.mrf.mxu2  ;;  %v469_v13 = vadd.f32 %v468_v60, %v400_v11  ;;  %v525_v14 = vpop.f32.mrf.mxu1  ;;  %v569_v60 = vand.u32 4294901760, %v568_v56 }
  0xde   :  { %v340_v17 = vadd.f32 %v339_v12, %v278_v4  ;;  %v13867_v12 = vand.u32 4294901760, %v697_v10 }
  0xdf   :  { %v13823_v16 = vadd.f32 %v521_v1, %v469_v13 }
  0xe1   :  { %1001 = vrot.lane.b32.xlu1 %v13823_v16, %s13525_s4 }
  0xe2   :  { %v405_v5 = vpop.f32.mrf.mxu3  ;;  %v476_v15 = vpop.f32.mrf.mxu0 }
  0xe3   :  { %v406_v18 = vadd.f32 %v405_v5, %v340_v17  ;;  %v13876_v5 = vsub.f32 %v697_v10, %v13867_v12 }
  0xe5   :  { %v344_v19 = vpop.f32.mrf.mxu2  ;;  %v473_v22 = vadd.f32 %v472_v3, %v406_v18  ;;  %v529_v28 = vpop.f32.mrf.mxu1 }
  0xe6   :  { %v345_v20 = vadd.f32 %v344_v19, %v282_v24  ;;  %v1003_v24 = vsel %vm543_vm1, %v13823_v16, 0 }
  0xe7   :  { %v13830_v26 = vadd.f32 %v525_v14, %v473_v22 }
  0xe9   :  { %1154 = vrot.lane.b32.xlu2 %v13830_v26, %s13525_s4 }
  0xea   :  { %v411_v30 = vpop.f32.mrf.mxu3  ;;  %v480_v38 = vpop.f32.mrf.mxu0 }
  0xeb   :  { %v412_v34 = vadd.f32 %v411_v30, %v345_v20 }
  0xed   :  { %v349_v35 = vpop.f32.mrf.mxu2  ;;  %v477_v21 = vadd.f32 %v476_v15, %v412_v34  ;;  %v533_v40 = vpop.f32.mrf.mxu1  ;;  %v850_v15 = vsel %vm543_vm1, %v13818_v6, 0 }
  0xee   :  { %v350_v23 = vadd.f32 %v349_v35, %v286_v36  ;;  %v13893_v34 = vand.u32 4294901760, %v850_v15  ;;  %v13895_v35 = vand.u32 4294901760, %v1003_v24 }
  0xef   :  { %v13837_v37 = vadd.f32 %v529_v28, %v477_v21  ;;  %v720_v28 = vand.u32 4294901760, %v13876_v5  ;;  %v1156_v21 = vsel %vm543_vm1, %v13830_v26, 0 }
  0xf0   :  { %v13935_v29 = vsub.f32 %v850_v15, %v13893_v34 }
  0xf1   :  { %1307 = vrot.lane.b32.xlu2 %v13837_v37, %s13525_s4 }
  0xf2   :  { %v417_v39 = vpop.f32.mrf.mxu3  ;;  %v484_v48 = vpop.f32.mrf.mxu0 }
  0xf3   :  { %v418_v42 = vadd.f32 %v417_v39, %v350_v23  ;;  %v721_v23 = vsub.f32 %v13876_v5, %v720_v28 }
  0xf5   :  { %v481_v43 = vadd.f32 %v480_v38, %v418_v42  ;;  %v354_v25 = vpop.f32.mrf.mxu2  ;;  %v537_v50 = vpop.f32.mrf.mxu1  ;;  %v13905_v42 = vsub.f32 %v1003_v24, %v13895_v35 }
  0xf6   :  { %v355_v27 = vadd.f32 %v354_v25, %v290_v44  ;;  %v722_v25 = vand.u32 4294901760, %v721_v23 }
  0xf7   :  { %v13844_v45 = vadd.f32 %v533_v40, %v481_v43  ;;  %v1177_v40 = vand.u32 4294901760, %v1156_v21 }
  0xf9   :  { %1460 = vrot.lane.b32.xlu0 %v13844_v45, %s13525_s4  ;;  %v13913_v44 = vsub.f32 %v1156_v21, %v1177_v40 }
  0xfa   :  { %v423_v46 = vpop.f32.mrf.mxu3 }
  0xfb   :  { %v424_v49 = vadd.f32 %v423_v46, %v355_v27  ;;  %v1026_v27 = vand.u32 4294901760, %v13905_v42 }
  0xfd   :  { %v485_v51 = vadd.f32 %v484_v48, %v424_v49  ;;  %v1179_v48 = vand.u32 4294901760, %v13913_v44  ;;  %v1027_v24 = vsub.f32 %v13905_v42, %v1026_v27 }
  0xff   :  { %v13848_v52 = vadd.f32 %v537_v50, %v485_v51  ;;  %v1180_v50 = vsub.f32 %v13913_v44, %v1179_v48 }
 0x101   :  { %1613 = vrot.lane.b32.xlu1 %v13848_v52, %s13525_s4  ;;  %s13527_s4 = smov 120  }
 0x13b   :  { %v542_v54 = vpop.permute.xlu0 %541 }
 0x13c   :  { %v546_v55 = vsel %vm543_vm1, %v542_v54, 0  ;;  %v1309_v54 = vsel %vm543_vm1, %v13837_v37, 0 }
 0x13d   :  { %v563_v58 = vand.u32 4294901760, %v546_v55 }
 0x13f   :  { %v590_v59 = vsub.f32 %v546_v55, %v563_v58  ;;  %564 = vmatpush.xpose.msra.mxu2 %v563_v58  ;;  %v873_v55 = vand.u32 4294901760, %v13935_v29 }
 0x141   :  { %v591_v61 = vand.u32 4294901760, %v590_v59 }
 0x142   :  { %570 = vmatmul.f32.vlgmr.msra.gmra.mxu2 %v569_v60 }
 0x143   :  { %617 = vmatpush.xpose.msrb.mxu2 %v590_v59  ;;  %v592_v62 = vsub.f32 %v590_v59, %v591_v61  ;;  %v1155_v63 = vpop.permute.xlu2 %1154  ;;  %v696_v0 = vpop.permute.xlu0 %695  ;;  %v1462_v59 = vsel %vm543_vm1, %v13844_v45, 0 }
 0x144   :  { %v1158_v1 = vsel %vm543_vm1, %v1155_v63, 0  ;;  %v699_v2 = vsel %vm543_vm1, %v696_v0, 0  ;;  %v1483_v0 = vand.u32 4294901760, %v1462_v59 }
 0x145   :  { %v13860_v7 = vand.u32 4294901760, %v699_v2  ;;  %v593_v8 = vand.u32 4294901760, %v592_v62  ;;  %v13864_v11 = vand.u32 4294901760, %v1158_v1  ;;  %v874_v62 = vsub.f32 %v13935_v29, %v873_v55 }
 0x147   :  { %666 = vmatpush.xpose.msra.mxu2 %v591_v61  ;;  %v743_v3 = vsub.f32 %v699_v2, %v13860_v7  ;;  %594 = vmatpush.xpose.msra.mxu3 %v593_v8  ;;  %v13870_v14 = vsub.f32 %v1158_v1, %v13864_v11 }
 0x149   :  { %v744_v13 = vand.u32 4294901760, %v743_v3  ;;  %v1203_v19 = vand.u32 4294901760, %v13870_v14 }
 0x14a   :  { %596 = vmatmul.f32.vlgmr.msra.gmra.mxu3 %v13854_v31  ;;  %620 = vmatmul.f32.vlgmr.msrb.gmra.mxu2 %v566_v32  ;;  %v1181_v32 = vand.u32 4294901760, %v1180_v50 }
 0x14b   :  { %640 = vmatpush.xpose.msrb.mxu3 %v563_v58  ;;  %717 = vmatpush.xpose.msrb.mxu2 %v13860_v7  ;;  %v849_v4 = vpop.permute.xlu1 %848  ;;  %v745_v9 = vsub.f32 %v743_v3, %v744_v13  ;;  %v1204_v33 = vsub.f32 %v13870_v14, %v1203_v19  ;;  %v1308_v46 = vpop.permute.xlu2 %1307 }
 0x14c   :  { %v852_v17 = vsel %vm543_vm1, %v849_v4, 0  ;;  %v1311_v49 = vsel %vm543_vm1, %v1308_v46, 0 }
 0x14d   :  { %v13878_v18 = vand.u32 4294901760, %v852_v17  ;;  %v746_v30 = vand.u32 4294901760, %v745_v9  ;;  %v1205_v41 = vand.u32 4294901760, %v1204_v33  ;;  %v13928_v51 = vand.u32 4294901760, %v1311_v49 }
 0x14e   :  { %v1028_v33 = vand.u32 4294901760, %v1027_v24 }
 0x14f   :  { %688 = vmatpush.xpose.msra.mxu3 %v563_v58  ;;  %v13882_v22 = vsub.f32 %v852_v17, %v13878_v18  ;;  %994 = vmatpush.xpose.msra.mxu1 %v13878_v18  ;;  %v13947_v58 = vand.u32 4294901760, %v1309_v54 }
 0x151   :  { %v897_v20 = vand.u32 4294901760, %v13882_v22  ;;  %v1331_v1 = vsub.f32 %v1309_v54, %v13947_v58  ;;  %v13226_v54 = vld [vmem:[%s16367_s1] ss:$0 sm:$0xff] }
 0x152   :  { %644 = vmatmul.f32.vlgmr.msrb.gmra.mxu3 %v567_v53  ;;  %668 = vmatmul.f32.vlgmr.msra.gmra.mxu2 %v13854_v31  ;;  %v13940_v53 = vsub.f32 %v1311_v49, %v13928_v51 }
 0x153   :  { %747 = vmatpush.xpose.msrb.mxu3 %v746_v30  ;;  %770 = vmatpush.xpose.msra.mxu2 %v743_v3  ;;  %v1002_v36 = vpop.permute.xlu1 %1001  ;;  %v13963_v3 = vsub.f32 %v1462_v59, %v1483_v0  ;;  %v1615_v30 = vsel %vm543_vm1, %v13848_v52, 0 }
 0x154   :  { %996 = vmatmul.f32.vlgmr.msra.gmra.mxu1 %v13893_v34  ;;  %972 = vmatpush.xpose.msra.mxu0 %v897_v20  ;;  %v1005_v38 = vsel %vm543_vm1, %v1002_v36, 0  ;;  %v1356_v36 = vand.u32 4294901760, %v13940_v53 }
 0x155   :  { %v13902_v39 = vand.u32 4294901760, %v1005_v38 }
 0x156   :  { %v1357_v23 = vsub.f32 %v13940_v53, %v1356_v36 }
 0x157   :  { %v13908_v43 = vsub.f32 %v1005_v38, %v13902_v39  ;;  %974 = vmatmul.f32.vlgmr.msra.gmra.mxu0 %v13893_v34  ;;  %1099 = vmatpush.xpose.msrb.mxu1 %v13902_v39 }
 0x159   :  { %1076 = vmatpush.xpose.msrb.mxu0 %v13908_v43  ;;  %v1050_v8 = vand.u32 4294901760, %v13908_v43 }
 0x15a   :  { %690 = vmatmul.f32.vlgmr.msra.gmra.mxu3 %v13854_v31  ;;  %723 = vmatmul.f32.vlgmr.msrb.gmra.mxu2 %v722_v25  ;;  %v898_v31 = vsub.f32 %v13882_v22, %v897_v20 }
 0x15b   :  { %1206 = vmatpush.xpose.msra.mxu1 %v1205_v41  ;;  %793 = vmatpush.xpose.msra.mxu3 %v13860_v7 }
 0x15c   :  { %819 = vmatpush.xpose.msrb.mxu2 %v744_v13  ;;  %1103 = vmatmul.f32.vlgmr.msrb.gmra.mxu1 %v1026_v27  ;;  %v899_v56 = vand.u32 4294901760, %v898_v31  ;;  %v1332_v13 = vand.u32 4294901760, %v1331_v1 }
 0x15d   :  { %1176 = vmatpush.xpose.msra.mxu0 %v13864_v11 }
 0x15f   :  { %1300 = vmatpush.xpose.msrb.mxu1 %v13864_v11  ;;  %1079 = vmatmul.f32.vlgmr.msrb.gmra.mxu0 %v13905_v42 }
 0x161   :  { %1278 = vmatpush.xpose.msrb.mxu0 %v1203_v19  ;;  %v1485_v19 = vand.u32 4294901760, %v13963_v3 }
 0x162   :  { %749 = vmatmul.f32.vlgmr.msrb.gmra.mxu3 %v13867_v12  ;;  %773 = vmatmul.f32.vlgmr.msra.gmra.mxu2 %v13876_v5  ;;  %v1051_v5 = vsub.f32 %v13908_v43, %v1050_v8 }
 0x163   :  { %841 = vmatpush.xpose.msrb.mxu3 %v13860_v7  ;;  %870 = vmatpush.xpose.msra.mxu2 %v13878_v18  ;;  %v875_v7 = vand.u32 4294901760, %v874_v62  ;;  %v1486_v15 = vsub.f32 %v13963_v3, %v1485_v19 }
 0x164   :  { %1208 = vmatmul.f32.vlgmr.msra.gmra.mxu1 %v1177_v40 }
 0x165   :  { %1405 = vmatpush.xpose.msra.mxu1 %v13928_v51 }
 0x167   :  { %1182 = vmatmul.f32.vlgmr.msra.gmra.mxu0 %v1181_v32 }
 0x168   :  { %1382 = vmatpush.xpose.msra.mxu0 %v13940_v53 }
 0x16a   :  { %797 = vmatmul.f32.vlgmr.msra.gmra.mxu3 %v720_v28  ;;  %821 = vmatmul.f32.vlgmr.msrb.gmra.mxu2 %v13867_v12  ;;  %v1487_v28 = vand.u32 4294901760, %v1486_v15 }
 0x16b   :  { %900 = vmatpush.xpose.msra.mxu3 %v899_v56  ;;  %923 = vmatpush.xpose.msrb.mxu2 %v13882_v22  ;;  %v1461_v60 = vpop.permute.xlu0 %1460 }
 0x16c   :  { %1302 = vmatmul.f32.vlgmr.msrb.gmra.mxu1 %v1177_v40  ;;  %v1464_v61 = vsel %vm543_vm1, %v1461_v60, 0 }
 0x16d   :  { %v13954_v63 = vand.u32 4294901760, %v1464_v61 }
 0x16f   :  { %v13958_v2 = vsub.f32 %v1464_v61, %v13954_v63  ;;  %1280 = vmatmul.f32.vlgmr.msrb.gmra.mxu0 %v1177_v40 }
 0x170   :  { %1482 = vmatpush.xpose.msrb.mxu0 %v13954_v63 }
 0x171   :  { %v1509_v10 = vand.u32 4294901760, %v13958_v2 }
 0x172   :  { %843 = vmatmul.f32.vlgmr.msrb.gmra.mxu3 %v13867_v12  ;;  %876 = vmatmul.f32.vlgmr.msra.gmra.mxu2 %v875_v7  ;;  %v1052_v12 = vand.u32 4294901760, %v1051_v5 }
 0x173   :  { %v1510_v4 = vsub.f32 %v13958_v2, %v1509_v10  ;;  %946 = vmatpush.xpose.msrb.mxu3 %v13878_v18  ;;  %1023 = vmatpush.xpose.msra.mxu2 %v13902_v39  ;;  %v1614_v17 = vpop.permute.xlu1 %1613 }
 0x174   :  { %1409 = vmatmul.f32.vlgmr.msra.gmra.mxu1 %v1332_v13  ;;  %v1617_v22 = vsel %vm543_vm1, %v1614_v17, 0 }
 0x175   :  { %v1511_v9 = vand.u32 4294901760, %v1510_v4  ;;  %v1634_v18 = vand.u32 4294901760, %v1617_v22 }
 0x177   :  { %1385 = vmatmul.f32.vlgmr.msra.gmra.mxu0 %v1331_v1  ;;  %1512 = vmatpush.xpose.msrb.mxu1 %v1511_v9  ;;  %v1661_v20 = vsub.f32 %v1617_v22, %v1634_v18 }
 0x178   :  { %1584 = vmatpush.xpose.msra.mxu0 %v1509_v10 }
 0x17a   :  { %902 = vmatmul.f32.vlgmr.msra.gmra.mxu3 %v13893_v34  ;;  %926 = vmatmul.f32.vlgmr.msrb.gmra.mxu2 %v13935_v29  ;;  %v1636_v34 = vand.u32 4294901760, %v1615_v30 }
 0x17b   :  { %1606 = vmatpush.xpose.msra.mxu1 %v13954_v63  ;;  %1053 = vmatpush.xpose.msra.mxu3 %v1052_v12 }
 0x17c   :  { %1125 = vmatpush.xpose.msrb.mxu2 %v1050_v8  ;;  %1514 = vmatmul.f32.vlgmr.msrb.gmra.mxu1 %v1483_v0  ;;  %v1637_v21 = vsub.f32 %v1615_v30, %v1636_v34 }
 0x17e   :  { %v1638_v38 = vand.u32 4294901760, %v1637_v21 }
 0x17f   :  { %1711 = vmatpush.xpose.msrb.mxu1 %v1634_v18  ;;  %1488 = vmatmul.f32.vlgmr.msrb.gmra.mxu0 %v1487_v28 }
 0x180   :  { %1688 = vmatpush.xpose.msrb.mxu0 %v1661_v20  ;;  %v1639_v42 = vsub.f32 %v1637_v21, %v1638_v38 }
 0x182   :  { %950 = vmatmul.f32.vlgmr.msrb.gmra.mxu3 %v873_v55  ;;  %1029 = vmatmul.f32.vlgmr.msra.gmra.mxu2 %v1028_v33  ;;  %v1640_v43 = vand.u32 4294901760, %v1639_v42 }
 0x183   :  { %1147 = vmatpush.xpose.msrb.mxu3 %v13902_v39  ;;  %1229 = vmatpush.xpose.msra.mxu2 %v13870_v14  ;;  %v1358_v39 = vand.u32 4294901760, %v1357_v23  ;;  %v1333_v14 = vsub.f32 %v1331_v1, %v1332_v13 }
 0x184   :  { %1608 = vmatmul.f32.vlgmr.msra.gmra.mxu1 %v1483_v0 }
 0x185   :  { %v1334_v40 = vand.u32 4294901760, %v1333_v14 }
 0x187   :  { %1586 = vmatmul.f32.vlgmr.msra.gmra.mxu0 %v1483_v0 }
 0x18a   :  { %1055 = vmatmul.f32.vlgmr.msra.gmra.mxu3 %v13895_v35  ;;  %1127 = vmatmul.f32.vlgmr.msrb.gmra.mxu2 %v13895_v35 }
 0x18b   :  { %1252 = vmatpush.xpose.msra.mxu3 %v13864_v11  ;;  %1329 = vmatpush.xpose.msrb.mxu2 %v13928_v51  ;;  %v1662_v11 = vand.u32 4294901760, %v1661_v20 }
 0x18c   :  { %1715 = vmatmul.f32.vlgmr.msrb.gmra.mxu1 %v1638_v38 }
 0x18f   :  { %1691 = vmatmul.f32.vlgmr.msrb.gmra.mxu0 %v1637_v21  ;;  %v13228_v21 = vld [vmem:[%s16367_s1 + $0x2] ss:$0 sm:$0xff] }
 0x192   :  { %1149 = vmatmul.f32.vlgmr.msrb.gmra.mxu3 %v13895_v35  ;;  %1232 = vmatmul.f32.vlgmr.msra.gmra.mxu2 %v13913_v44  ;;  %v1663_v35 = vsub.f32 %v1661_v20, %v1662_v11 }
 0x193   :  { %1359 = vmatpush.xpose.msrb.mxu3 %v1358_v39  ;;  %1431 = vmatpush.xpose.msra.mxu2 %v1356_v36 }
 0x194   :  { %v1664_v41 = vand.u32 4294901760, %v1663_v35 }
 0x19a   :  { %1256 = vmatmul.f32.vlgmr.msra.gmra.mxu3 %v1179_v48  ;;  %1335 = vmatmul.f32.vlgmr.msrb.gmra.mxu2 %v1334_v40 }
 0x19b   :  { %1453 = vmatpush.xpose.msra.mxu3 %v13928_v51  ;;  %1535 = vmatpush.xpose.msrb.mxu2 %v13958_v2 }
 0x1a2   :  { %1361 = vmatmul.f32.vlgmr.msrb.gmra.mxu3 %v13947_v58  ;;  %1433 = vmatmul.f32.vlgmr.msra.gmra.mxu2 %v13947_v58 }
 0x1a3   :  { %1558 = vmatpush.xpose.msrb.mxu3 %v13954_v63  ;;  %1635 = vmatpush.xpose.msra.mxu2 %v1634_v18 }
 0x1aa   :  { %1455 = vmatmul.f32.vlgmr.msra.gmra.mxu3 %v13947_v58  ;;  %1538 = vmatmul.f32.vlgmr.msrb.gmra.mxu2 %v13963_v3  ;;  %v13227_v3 = vld [vmem:[%s16367_s1 + $0x1] ss:$0 sm:$0xff] }
 0x1ab   :  { %1665 = vmatpush.xpose.msra.mxu3 %v1664_v41  ;;  %1737 = vmatpush.xpose.msrb.mxu2 %v1662_v11 }
 0x1b2   :  { %1562 = vmatmul.f32.vlgmr.msrb.gmra.mxu3 %v1485_v19  ;;  %1641 = vmatmul.f32.vlgmr.msra.gmra.mxu2 %v1640_v43 }
 0x1b3   :  { %1759 = vmatpush.xpose.msrb.mxu3 %v1634_v18 }
 0x1ba   :  { %1667 = vmatmul.f32.vlgmr.msra.gmra.mxu3 %v1636_v34  ;;  %1739 = vmatmul.f32.vlgmr.msrb.gmra.mxu2 %v1636_v34 }
 0x1c2   :  { %1761 = vmatmul.f32.vlgmr.msrb.gmra.mxu3 %v1636_v34 }
 0x1c5   :  { %v571_v25 = vpop.f32.mrf.mxu2 }
 0x1cd   :  { %v597_v44 = vpop.f32.mrf.mxu3  ;;  %v621_v27 = vpop.f32.mrf.mxu2 }
 0x1ce   :  { %v598_v46 = vadd.f32 %v597_v44, %v571_v25 }
 0x1d0   :  { %v622_v50 = vadd.f32 %v621_v27, %v598_v46  ;;  %v13229_v46 = vld [vmem:[%s16367_s1 + $0x3] ss:$0 sm:$0xff] }
 0x1d1   :  { %v997_v17 = vpop.f32.mrf.mxu1 }
 0x1d4   :  { %v975_v13 = vpop.f32.mrf.mxu0 }
 0x1d5   :  { %v645_v48 = vpop.f32.mrf.mxu3  ;;  %v669_v49 = vpop.f32.mrf.mxu2 }
 0x1d6   :  { %v646_v51 = vadd.f32 %v645_v48, %v622_v50 }
 0x1d8   :  { %v670_v29 = vadd.f32 %v669_v49, %v646_v51 }
 0x1d9   :  { %v1104_v18 = vpop.f32.mrf.mxu1 }
 0x1dc   :  { %v1080_v15 = vpop.f32.mrf.mxu0 }
 0x1dd   :  { %v691_v31 = vpop.f32.mrf.mxu3  ;;  %v724_v32 = vpop.f32.mrf.mxu2 }
 0x1de   :  { %v692_v53 = vadd.f32 %v691_v31, %v670_v29 }
 0x1e0   :  { %v1765_v55 = vmul.f32 0.35355338, %v692_v53 }
 0x1e1   :  { %v1209_v11 = vpop.f32.mrf.mxu1 }
 0x1e2   :  { %v14003_v56 = vadd.f32 %v13226_v54, %v1765_v55 }
 0x1e4   :  { %v1805_v58 = vsel %vm543_vm1, %v14003_v56, -inf  ;;  %v1183_v36 = vpop.f32.mrf.mxu0 }
 0x1e5   :  { %v750_v59 = vpop.f32.mrf.mxu3  ;;  %v774_v60 = vpop.f32.mrf.mxu2  ;;  %1806 = vmax.xlane.f32.xlu2 %v1805_v58  ;;  %v1210_v51 = vadd.f32 %v1209_v11, %v1183_v36 }
 0x1e6   :  { %v751_v61 = vadd.f32 %v750_v59, %v724_v32 }
 0x1e8   :  { %v775_v0 = vadd.f32 %v774_v60, %v751_v61  ;;  %v13230_v61 = vld [vmem:[%s16367_s1 + $0x4] ss:$0 sm:$0xff] }
 0x1e9   :  { %v1303_v50 = vpop.f32.mrf.mxu1 }
 0x1ec   :  { %v1281_v48 = vpop.f32.mrf.mxu0 }
 0x1ed   :  { %v798_v62 = vpop.f32.mrf.mxu3  ;;  %v822_v63 = vpop.f32.mrf.mxu2 }
 0x1ee   :  { %v799_v1 = vadd.f32 %v798_v62, %v775_v0 }
 0x1f0   :  { %v823_v2 = vadd.f32 %v822_v63, %v799_v1 }
 0x1f1   :  { %v1410_v62 = vpop.f32.mrf.mxu1 }
 0x1f4   :  { %v1386_v59 = vpop.f32.mrf.mxu0 }
 0x1f5   :  { %v844_v7 = vpop.f32.mrf.mxu3  ;;  %v877_v8 = vpop.f32.mrf.mxu2 }
 0x1f6   :  { %v845_v10 = vadd.f32 %v844_v7, %v823_v2 }
 0x1f8   :  { %v1766_v4 = vmul.f32 0.35355338, %v845_v10 }
 0x1fa   :  { %v14010_v5 = vadd.f32 %v13227_v3, %v1766_v4 }
 0x1fc   :  { %v1808_v9 = vsel %vm543_vm1, %v14010_v5, -inf }
 0x1fd   :  { %v903_v19 = vpop.f32.mrf.mxu3  ;;  %v927_v22 = vpop.f32.mrf.mxu2  ;;  %1809 = vmax.xlane.f32.xlu0 %v1808_v9 }
 0x1fe   :  { %v904_v12 = vadd.f32 %v903_v19, %v877_v8 }
 0x200   :  { %v928_v24 = vadd.f32 %v927_v22, %v904_v12  ;;  %v13231_v22 = vld [vmem:[%s16367_s1 + $0x5] ss:$0 sm:$0xff] }
 0x205   :  { %v951_v28 = vpop.f32.mrf.mxu3  ;;  %v1030_v20 = vpop.f32.mrf.mxu2 }
 0x206   :  { %v952_v30 = vadd.f32 %v951_v28, %v928_v24 }
 0x208   :  { %v976_v33 = vadd.f32 %v975_v13, %v952_v30  ;;  %v1489_v13 = vpop.f32.mrf.mxu0 }
 0x20a   :  { %v998_v34 = vadd.f32 %v997_v17, %v976_v33  ;;  %v1515_v17 = vpop.f32.mrf.mxu1 }
 0x20c   :  { %v1767_v38 = vmul.f32 0.35355338, %v998_v34 }
 0x20d   :  { %v1056_v23 = vpop.f32.mrf.mxu3  ;;  %v1128_v39 = vpop.f32.mrf.mxu2 }
 0x20e   :  { %v1057_v14 = vadd.f32 %v1056_v23, %v1030_v20  ;;  %v14017_v40 = vadd.f32 %v13228_v21, %v1767_v38 }
 0x210   :  { %v1081_v35 = vadd.f32 %v1080_v15, %v1057_v14  ;;  %v1811_v41 = vsel %vm543_vm1, %v14017_v40, -inf  ;;  %v1587_v30 = vpop.f32.mrf.mxu0 }
 0x211   :  { %1812 = vmax.xlane.f32.xlu1 %v1811_v41 }
 0x212   :  { %v1105_v42 = vadd.f32 %v1104_v18, %v1081_v35  ;;  %v1516_v18 = vadd.f32 %v1515_v17, %v1489_v13  ;;  %v1609_v21 = vpop.f32.mrf.mxu1 }
 0x214   :  { %v1129_v43 = vadd.f32 %v1128_v39, %v1105_v42  ;;  %v13232_v39 = vld [vmem:[%s16367_s1 + $0x6] ss:$0 sm:$0xff] }
 0x215   :  { %v1150_v25 = vpop.f32.mrf.mxu3  ;;  %v1233_v44 = vpop.f32.mrf.mxu2 }
 0x216   :  { %v1151_v27 = vadd.f32 %v1150_v25, %v1129_v43  ;;  %v1234_v31 = vadd.f32 %v1233_v44, %v1210_v51  ;;  %v13233_v51 = vld [vmem:[%s16367_s1 + $0x7] ss:$0 sm:$0xff] }
 0x218   :  { %v1768_v49 = vmul.f32 0.35355338, %v1151_v27  ;;  %v1692_v42 = vpop.f32.mrf.mxu0 }
 0x21a   :  { %v14024_v29 = vadd.f32 %v13229_v46, %v1768_v49  ;;  %v1716_v44 = vpop.f32.mrf.mxu1 }
 0x21c   :  { %v1814_v32 = vsel %vm543_vm1, %v14024_v29, -inf }
 0x21d   :  { %v1257_v53 = vpop.f32.mrf.mxu3  ;;  %v1336_v54 = vpop.f32.mrf.mxu2  ;;  %1815 = vmax.xlane.f32.xlu2 %v1814_v32 }
 0x21e   :  { %v1258_v55 = vadd.f32 %v1257_v53, %v1234_v31 }
 0x220   :  { %v1282_v58 = vadd.f32 %v1281_v48, %v1258_v55 }
 0x222   :  { %v1304_v60 = vadd.f32 %v1303_v50, %v1282_v58 }
 0x224   :  { %v1769_v63 = vmul.f32 0.35355338, %v1304_v60 }
 0x225   :  { %v1362_v0 = vpop.f32.mrf.mxu3  ;;  %v1434_v1 = vpop.f32.mrf.mxu2 }
 0x226   :  { %v1363_v2 = vadd.f32 %v1362_v0, %v1336_v54  ;;  %v14031_v7 = vadd.f32 %v13230_v61, %v1769_v63 }
 0x228   :  { %v1387_v8 = vadd.f32 %v1386_v59, %v1363_v2  ;;  %v1817_v10 = vsel %vm543_vm1, %v14031_v7, -inf }
 0x229   :  { %1818 = vmax.xlane.f32.xlu2 %v1817_v10 }
 0x22a   :  { %v1411_v3 = vadd.f32 %v1410_v62, %v1387_v8 }
 0x22c   :  { %v1435_v4 = vadd.f32 %v1434_v1, %v1411_v3 }
 0x22d   :  { %v1456_v9 = vpop.f32.mrf.mxu3  ;;  %v1539_v12 = vpop.f32.mrf.mxu2 }
 0x22e   :  { %v1457_v19 = vadd.f32 %v1456_v9, %v1435_v4  ;;  %v1540_v28 = vadd.f32 %v1539_v12, %v1516_v18 }
 0x230   :  { %v1770_v15 = vmul.f32 0.35355338, %v1457_v19 }
 0x232   :  { %v14038_v24 = vadd.f32 %v13231_v22, %v1770_v15 }
 0x234   :  { %v1820_v20 = vsel %vm543_vm1, %v14038_v24, -inf }
 0x235   :  { %v1563_v33 = vpop.f32.mrf.mxu3  ;;  %1821 = vmax.xlane.f32.xlu1 %v1820_v20  ;;  %v1642_v38 = vpop.f32.mrf.mxu2 }
 0x236   :  { %v1564_v34 = vadd.f32 %v1563_v33, %v1540_v28 }
 0x238   :  { %v1588_v36 = vadd.f32 %v1587_v30, %v1564_v34 }
 0x23a   :  { %v1610_v23 = vadd.f32 %v1609_v21, %v1588_v36 }
 0x23c   :  { %v1771_v14 = vmul.f32 0.35355338, %v1610_v23 }
 0x23d   :  { %v1668_v11 = vpop.f32.mrf.mxu3  ;;  %v1740_v46 = vpop.f32.mrf.mxu2 }
 0x23e   :  { %v1669_v35 = vadd.f32 %v1668_v11, %v1642_v38  ;;  %v14045_v41 = vadd.f32 %v13232_v39, %v1771_v14 }
 0x240   :  { %v1693_v43 = vadd.f32 %v1692_v42, %v1669_v35  ;;  %v1823_v25 = vsel %vm543_vm1, %v14045_v41, -inf }
 0x241   :  { %1824 = vmax.xlane.f32.xlu0 %v1823_v25  ;;  %2149 = vrot.lane.b32.xlu2 %v13813_v57, %s13526_s19 }
 0x242   :  { %v1717_v27 = vadd.f32 %v1716_v44, %v1693_v43 }
 0x244   :  { %v1741_v48 = vadd.f32 %v1740_v46, %v1717_v27 }
 0x245   :  { %v1762_v49 = vpop.f32.mrf.mxu3 }
 0x246   :  { %v1763_v50 = vadd.f32 %v1762_v49, %v1741_v48 }
 0x248   :  { %v1772_v31 = vmul.f32 0.35355338, %v1763_v50 }
 0x24a   :  { %v14054_v32 = vadd.f32 %v13233_v51, %v1772_v31 }
 0x24c   :  { %v1826_v53 = vsel %vm543_vm1, %v14054_v32, -inf }
 0x24d   :  { %1827 = vmax.xlane.f32.xlu0 %v1826_v53 }
 0x24e   :  { %1997 = vrot.lane.b32.xlu1 %v13808_v47, %s13526_s19 }
 0x258   :  { %v1807_v54 = vpop.xlane.xlu2 %1806 }
 0x259   :  { %v1829_v55 = vsub.f32 %v14003_v56, %v1807_v54 }
 0x25b   :  { %v1837_v58 = vmul.f32 1.442695, %v1829_v55 }
 0x25d   :  { %13249 = vpow2.f32 %v1837_v58 }
 0x263   :  { %v14061_v59 = vpop.eup %13249 }
 0x264   :  { %v1853_v60 = vsel %vm543_vm1, %v14061_v59, 0.0 }
 0x265   :  { %1854 = vadd.xlane.f32.xlu0 %v1853_v60 }
 0x270   :  { %v1810_v61 = vpop.xlane.xlu0 %1809 }
 0x271   :  { %v1830_v62 = vsub.f32 %v14010_v5, %v1810_v61 }
 0x273   :  { %v1839_v63 = vmul.f32 1.442695, %v1830_v62 }
 0x275   :  { %13251 = vpow2.f32 %v1839_v63 }
 0x27b   :  { %v14066_v0 = vpop.eup %13251 }
 0x27c   :  { %v1856_v1 = vsel %vm543_vm1, %v14066_v0, 0.0 }
 0x27d   :  { %1857 = vadd.xlane.f32.xlu2 %v1856_v1 }
 0x284   :  { %v1813_v56 = vpop.xlane.xlu1 %1812 }
 0x285   :  { %v1831_v2 = vsub.f32 %v14017_v40, %v1813_v56 }
 0x287   :  { %v1841_v8 = vmul.f32 1.442695, %v1831_v2 }
 0x289   :  { %13253 = vpow2.f32 %v1841_v8 }
 0x28f   :  { %v14071_v10 = vpop.eup %13253 }
 0x290   :  { %v1816_v3 = vpop.xlane.xlu2 %1815  ;;  %v1859_v13 = vsel %vm543_vm1, %v14071_v10, 0.0 }
 0x291   :  { %v1832_v5 = vsub.f32 %v14024_v29, %v1816_v3  ;;  %1860 = vadd.xlane.f32.xlu2 %v1859_v13 }
 0x293   :  { %v1843_v4 = vmul.f32 1.442695, %v1832_v5 }
 0x295   :  { %13255 = vpow2.f32 %v1843_v4 }
 0x29b   :  { %v14076_v17 = vpop.eup %13255 }
 0x29c   :  { %v1819_v9 = vpop.xlane.xlu2 %1818  ;;  %v1862_v19 = vsel %vm543_vm1, %v14076_v17, 0.0 }
 0x29d   :  { %v1833_v40 = vsub.f32 %v14031_v7, %v1819_v9  ;;  %1863 = vadd.xlane.f32.xlu0 %v1862_v19 }
 0x29f   :  { %v1845_v22 = vmul.f32 1.442695, %v1833_v40 }
 0x2a1   :  { %13257 = vpow2.f32 %v1845_v22 }
 0x2a4   :  { %v2150_v29 = vpop.permute.xlu2 %2149 }
 0x2a5   :  { %v14091_v7 = vand.u32 4294901760, %v2150_v29 }
 0x2a7   :  { %v14081_v12 = vpop.eup %13257  ;;  %v14094_v18 = vsub.f32 %v2150_v29, %v14091_v7 }
 0x2a8   :  { %v1865_v15 = vsel %vm543_vm1, %v14081_v12, 0.0  ;;  %v1822_v28 = vpop.xlane.xlu1 %1821 }
 0x2a9   :  { %2453 = vrot.lane.b32.xlu2 %v13823_v16, %s13526_s19  ;;  %1866 = vadd.xlane.f32.xlu1 %v1865_v15  ;;  %v2198_v20 = vand.u32 4294901760, %v14094_v18  ;;  %v1834_v11 = vsub.f32 %v14038_v24, %v1822_v28 }
 0x2ab   :  { %v2199_v30 = vsub.f32 %v14094_v18, %v2198_v20  ;;  %v1847_v43 = vmul.f32 1.442695, %v1834_v11 }
 0x2ad   :  { %v2200_v21 = vand.u32 4294901760, %v2199_v30 }
 0x2b1   :  { %2605 = vrot.lane.b32.xlu2 %v13830_v26, %s13526_s19  ;;  %2301 = vrot.lane.b32.xlu0 %v13818_v6, %s13526_s19 }
 0x2b4   :  { %v1825_v38 = vpop.xlane.xlu0 %1824 }
 0x2b5   :  { %v1835_v14 = vsub.f32 %v14045_v41, %v1825_v38 }
 0x2b7   :  { %v1849_v42 = vmul.f32 1.442695, %v1835_v14 }
 0x2b9   :  { %13259 = vpow2.f32 %v1849_v42 }
 0x2ba   :  { %13261 = vpow2.f32 %v1847_v43 }
 0x2bf   :  { %v14110_v27 = vpop.eup %13259 }
 0x2c0   :  { %v1998_v33 = vpop.permute.xlu1 %1997  ;;  %v1828_v25 = vpop.xlane.xlu0 %1827  ;;  %v1871_v48 = vsel %vm543_vm1, %v14110_v27, 0.0 }
 0x2c1   :  { %v2018_v34 = vand.u32 4294901760, %v1998_v33  ;;  %v1836_v44 = vsub.f32 %v14054_v32, %v1828_v25  ;;  %v14112_v24 = vpop.eup %13261 }
 0x2c2   :  { %2757 = vrot.lane.b32.xlu1 %v13837_v37, %s13526_s19  ;;  %v1868_v49 = vsel %vm543_vm1, %v14112_v24, 0.0 }
 0x2c3   :  { %v2045_v36 = vsub.f32 %v1998_v33, %v2018_v34  ;;  %2019 = vmatpush.msra.mxu0 %v2018_v34  ;;  %2095 = vmatpush.msra.mxu3 %v2018_v34  ;;  %v1851_v41 = vmul.f32 1.442695, %v1836_v44 }
 0x2c5   :  { %2201 = vmatpush.msrb.mxu3 %v2200_v21  ;;  %2072 = vmatpush.msra.mxu2 %v2045_v36  ;;  %v2046_v23 = vand.u32 4294901760, %v2045_v36  ;;  %13263 = vpow2.f32 %v1851_v41 }
 0x2c7   :  { %2171 = vmatpush.msrb.mxu2 %v14091_v7  ;;  %2121 = vmatpush.msrb.mxu0 %v2046_v23  ;;  %v2047_v39 = vsub.f32 %v2045_v36, %v2046_v23 }
 0x2c9   :  { %v2048_v35 = vand.u32 4294901760, %v2047_v39 }
 0x2ca   :  { %2909 = vrot.lane.b32.xlu1 %v13844_v45, %s13526_s19 }
 0x2cb   :  { %2049 = vmatpush.msra.mxu1 %v2048_v35  ;;  %v14120_v50 = vpop.eup %13263 }
 0x2cc   :  { %v1874_v53 = vsel %vm543_vm1, %v14120_v50, 0.0 }
 0x2cd   :  { %2143 = vmatpush.msrb.mxu1 %v2018_v34 }
 0x2d2   :  { %3213 = vrot.lane.b32.xlu1 %v13808_v47, %s13527_s4 }
 0x2d8   :  { %v1855_v46 = vpop.xlane.xlu0 %1854 }
 0x2d9   :  { %13265 = vrcp.f32 %v1855_v46  ;;  %v1888_v54 = vand.u32 2147483648, %v1855_v46  ;;  %v1886_v58 = vand.u32 2147483647, %v1855_v46  ;;  %vm1882_vm3 = vweird.f32 %v1855_v46 }
 0x2da   :  { %1872 = vadd.xlane.f32.xlu2 %v1871_v48  ;;  %3369 = vrot.lane.b32.xlu1 %v13813_v57, %s13528_s22 }
 0x2db   :  { %1869 = vadd.xlane.f32.xlu0 %v1868_v49  ;;  %v1889_v61 = vor.u32 1.1754944e-38, %v1888_v54  ;;  %vm1887_vm5 = vcmp.eq.f32.partialorder %v1886_v58, 8.507059e+37 }
 0x2df   :  { %v13266_v51 = vpop.eup %13265 }
 0x2e0   :  { %v1878_v31 = vmul.f32 %v13266_v51, %v1855_v46  ;;  %vm1883_vm2 = vweird.f32 %v13266_v51 }
 0x2e1   :  { %vm1884_vm4 = vmor %vm1882_vm3, %vm1883_vm2 }
 0x2e2   :  { %v1879_v32 = vsub.f32 1.0, %v1878_v31  ;;  %3523 = vrot.lane.b32.xlu1 %v13818_v6, %s13528_s22 }
 0x2e3   :  { %1875 = vadd.xlane.f32.xlu0 %v1874_v53 }
 0x2e4   :  { %v1880_v55 = vmul.f32 %v13266_v51, %v1879_v32 }
 0x2e6   :  { %v1881_v60 = vadd.f32 %v13266_v51, %v1880_v55 }
 0x2e8   :  { %v1885_v62 = vsel %vm1884_vm4, %v13266_v51, %v1881_v60 }
 0x2e9   :  { %v1890_v63 = vsel %vm1887_vm5, %v1889_v61, %v1885_v62 }
 0x2ea   :  { %3675 = vrot.lane.b32.xlu1 %v13823_v16, %s13527_s4  ;;  %v1891_v1 = vmul.f32 %v14061_v59, %v1890_v63 }
 0x2ec   :  { %v2001_v56 = vsel %vm543_vm1, %v1891_v1, 0 }
 0x2ed   :  { %v2020_v2 = vand.u32 4294901760, %v2001_v56 }
 0x2ef   :  { %v2021_v8 = vsub.f32 %v2001_v56, %v2020_v2  ;;  %2051 = vmatmul.f32.vlgmr.msra.gmra.mxu1 %v2020_v2 }
 0x2f0   :  { %2247 = vmatpush.msra.mxu1 %v14091_v7  ;;  %v1858_v3 = vpop.xlane.xlu2 %1857 }
 0x2f1   :  { %13267 = vrcp.f32 %v1858_v3  ;;  %2075 = vmatmul.f32.vlgmr.msra.gmra.mxu2 %v2021_v8  ;;  %v2022_v13 = vand.u32 4294901760, %v2021_v8  ;;  %v1903_v40 = vand.u32 2147483648, %v1858_v3  ;;  %v1901_v15 = vand.u32 2147483647, %v1858_v3 }
 0x2f2   :  { %2273 = vmatpush.msra.mxu2 %v2198_v20  ;;  %3215 = vrot.lane.b32.xlu2 %v13808_v47, %s13528_s22  ;;  %vm1897_vm7 = vweird.f32 %v1858_v3 }
 0x2f3   :  { %3985 = vrot.lane.b32.xlu1 %v13837_v37, %s13528_s22  ;;  %2099 = vmatmul.f32.vlgmr.msra.gmra.mxu3 %v2022_v13  ;;  %v2023_v59 = vsub.f32 %v2021_v8, %v2022_v13  ;;  %vm1902_vm9 = vcmp.eq.f32.partialorder %v1901_v15, 8.507059e+37 }
 0x2f4   :  { %2295 = vmatpush.msra.mxu3 %v14091_v7  ;;  %v1904_v7 = vor.u32 1.1754944e-38, %v1903_v40 }
 0x2f5   :  { %v2024_v5 = vand.u32 4294901760, %v2023_v59 }
 0x2f7   :  { %v13268_v4 = vpop.eup %13267  ;;  %2145 = vmatmul.f32.vlgmr.msrb.gmra.mxu1 %v2020_v2  ;;  %3061 = vrot.lane.b32.xlu0 %v13848_v52, %s13526_s19 }
 0x2f8   :  { %v1893_v9 = vmul.f32 %v13268_v4, %v1858_v3  ;;  %2025 = vmatmul.f32.vlgmr.msra.gmra.mxu0 %v2024_v5  ;;  %vm1898_vm6 = vweird.f32 %v13268_v4 }
 0x2f9   :  { %2224 = vmatpush.msra.mxu0 %v14094_v18  ;;  %vm1899_vm8 = vmor %vm1897_vm7, %vm1898_vm6 }
 0x2fa   :  { %v1894_v19 = vsub.f32 1.0, %v1893_v9  ;;  %3521 = vrot.lane.b32.xlu2 %v13818_v6, %s13527_s4 }
 0x2fb   :  { %4137 = vrot.lane.b32.xlu1 %v13844_v45, %s13527_s4 }
 0x2fc   :  { %v1895_v22 = vmul.f32 %v13268_v4, %v1894_v19 }
 0x2fe   :  { %v1896_v29 = vadd.f32 %v13268_v4, %v1895_v22 }
 0x2ff   :  { %3367 = vrot.lane.b32.xlu0 %v13813_v57, %s13527_s4 }
 0x300   :  { %v1900_v28 = vsel %vm1899_vm8, %v13268_v4, %v1896_v29  ;;  %2123 = vmatmul.f32.vlgmr.msrb.gmra.mxu0 %v2020_v2 }
 0x301   :  { %v1905_v18 = vsel %vm1902_vm9, %v1904_v7, %v1900_v28 }
 0x302   :  { %3831 = vrot.lane.b32.xlu2 %v13830_v26, %s13528_s22  ;;  %v1906_v20 = vmul.f32 %v14066_v0, %v1905_v18 }
 0x304   :  { %v1861_v30 = vpop.xlane.xlu2 %1860  ;;  %v2153_v33 = vsel %vm543_vm1, %v1906_v20, 0 }
 0x305   :  { %13269 = vrcp.f32 %v1861_v30  ;;  %v2172_v34 = vand.u32 4294901760, %v2153_v33  ;;  %v1918_v11 = vand.u32 2147483648, %v1861_v30  ;;  %v1916_v42 = vand.u32 2147483647, %v1861_v30 }
 0x306   :  { %vm1912_vm11 = vweird.f32 %v1861_v30 }
 0x307   :  { %3677 = vrot.lane.b32.xlu0 %v13823_v16, %s13528_s22  ;;  %2203 = vmatmul.f32.vlgmr.msrb.gmra.mxu3 %v2172_v34  ;;  %v2173_v21 = vsub.f32 %v2153_v33, %v2172_v34  ;;  %v1919_v44 = vor.u32 1.1754944e-38, %v1918_v11  ;;  %vm1917_vm13 = vcmp.eq.f32.partialorder %v1916_v42, 8.507059e+37 }
 0x309   :  { %2227 = vmatmul.f32.vlgmr.msra.gmra.mxu0 %v2173_v21  ;;  %v2174_v36 = vand.u32 4294901760, %v2173_v21 }
 0x30a   :  { %3983 = vrot.lane.b32.xlu2 %v13837_v37, %s13527_s4 }
 0x30b   :  { %v13270_v38 = vpop.eup %13269  ;;  %v2175_v39 = vsub.f32 %v2173_v21, %v2174_v36  ;;  %2251 = vmatmul.f32.vlgmr.msra.gmra.mxu1 %v2174_v36 }
 0x30c   :  { %v1908_v23 = vmul.f32 %v13270_v38, %v1861_v30  ;;  %vm1913_vm10 = vweird.f32 %v13270_v38  ;;  %v2454_v41 = vpop.permute.xlu2 %2453 }
 0x30d   :  { %v2176_v14 = vand.u32 4294901760, %v2175_v39  ;;  %vm1914_vm12 = vmor %vm1912_vm11, %vm1913_vm10  ;;  %v14159_v49 = vand.u32 4294901760, %v2454_v41 }
 0x30e   :  { %v1909_v0 = vsub.f32 1.0, %v1908_v23 }
 0x30f   :  { %3829 = vrot.lane.b32.xlu0 %v13830_v26, %s13527_s4  ;;  %2177 = vmatmul.f32.vlgmr.msrb.gmra.mxu2 %v2176_v14  ;;  %v2501_v55 = vsub.f32 %v2454_v41, %v14159_v49 }
 0x310   :  { %v1910_v35 = vmul.f32 %v13270_v38, %v1909_v0  ;;  %2297 = vmatmul.f32.vlgmr.msra.gmra.mxu3 %v2172_v34  ;;  %v1864_v43 = vpop.xlane.xlu0 %1863 }
 0x311   :  { %13271 = vrcp.f32 %v1864_v43  ;;  %v1933_v60 = vand.u32 2147483648, %v1864_v43  ;;  %v1931_v63 = vand.u32 2147483647, %v1864_v43  ;;  %v2502_v1 = vand.u32 4294901760, %v2501_v55 }
 0x312   :  { %v1911_v25 = vadd.f32 %v13270_v38, %v1910_v35  ;;  %4293 = vrot.lane.b32.xlu2 %v13848_v52, %s13528_s22  ;;  %vm1927_vm15 = vweird.f32 %v1864_v43 }
 0x313   :  { %v1934_v8 = vor.u32 1.1754944e-38, %v1933_v60  ;;  %vm1932_vm3 = vcmp.eq.f32.partialorder %v1931_v63, 8.507059e+37  ;;  %v2503_v5 = vsub.f32 %v2501_v55, %v2502_v1 }
 0x314   :  { %v1915_v46 = vsel %vm1914_vm12, %v13270_v38, %v1911_v25  ;;  %v2606_v19 = vpop.permute.xlu2 %2605 }
 0x315   :  { %v1920_v48 = vsel %vm1917_vm13, %v1919_v44, %v1915_v46  ;;  %v14175_v18 = vand.u32 4294901760, %v2606_v19  ;;  %v2504_v33 = vand.u32 4294901760, %v2503_v5 }
 0x316   :  { %v1921_v51 = vmul.f32 %v14071_v10, %v1920_v48 }
 0x317   :  { %v13272_v31 = vpop.eup %13271  ;;  %4139 = vrot.lane.b32.xlu0 %v13844_v45, %s13528_s22  ;;  %2275 = vmatmul.f32.vlgmr.msra.gmra.mxu2 %v2172_v34  ;;  %v2653_v39 = vsub.f32 %v2606_v19, %v14175_v18  ;;  %s13530_s22 = smov 112  }
 0x318   :  { %v1923_v32 = vmul.f32 %v13272_v31, %v1864_v43  ;;  %v2305_v53 = vsel %vm543_vm1, %v1921_v51, 0  ;;  %vm1928_vm14 = vweird.f32 %v13272_v31 }
 0x319   :  { %v14165_v54 = vand.u32 4294901760, %v2305_v53  ;;  %vm1929_vm2 = vmor %vm1927_vm15, %vm1928_vm14  ;;  %v2654_v44 = vand.u32 4294901760, %v2653_v39 }
 0x31a   :  { %v1924_v58 = vsub.f32 1.0, %v1923_v32 }
 0x31b   :  { %v2325_v61 = vsub.f32 %v2305_v53, %v14165_v54 }
 0x31c   :  { %v1925_v62 = vmul.f32 %v13272_v31, %v1924_v58  ;;  %v1867_v10 = vpop.xlane.xlu1 %1866 }
 0x31d   :  { %13273 = vrcp.f32 %v1867_v10  ;;  %v2326_v2 = vand.u32 4294901760, %v2325_v61  ;;  %v1948_v34 = vand.u32 2147483648, %v1867_v10  ;;  %v1946_v36 = vand.u32 2147483647, %v1867_v10 }
 0x31e   :  { %v1926_v56 = vadd.f32 %v13272_v31, %v1925_v62  ;;  %vm1942_vm5 = vweird.f32 %v1867_v10 }
 0x31f   :  { %4291 = vrot.lane.b32.xlu0 %v13848_v52, %s13527_s4  ;;  %v2327_v59 = vsub.f32 %v2325_v61, %v2326_v2  ;;  %v1949_v11 = vor.u32 1.1754944e-38, %v1948_v34  ;;  %vm1947_vm7 = vcmp.eq.f32.partialorder %v1946_v36, 8.507059e+37  ;;  %s13535_s4 = smov 40  }
 0x320   :  { %v1930_v3 = vsel %vm1929_vm2, %v13272_v31, %v1926_v56 }
 0x321   :  { %v1935_v13 = vsel %vm1932_vm3, %v1934_v8, %v1930_v3  ;;  %v2328_v7 = vand.u32 4294901760, %v2327_v59 }
 0x322   :  { %v1936_v4 = vmul.f32 %v14076_v17, %v1935_v13 }
 0x323   :  { %v13274_v9 = vpop.eup %13273  ;;  %v2302_v40 = vpop.permute.xlu0 %2301 }
 0x324   :  { %v1938_v22 = vmul.f32 %v13274_v9, %v1867_v10  ;;  %v2322_v15 = vand.u32 4294901760, %v2302_v40  ;;  %v2457_v29 = vsel %vm543_vm1, %v1936_v4, 0  ;;  %vm1943_vm4 = vweird.f32 %v13274_v9 }
 0x325   :  { %v14173_v28 = vand.u32 4294901760, %v2457_v29  ;;  %vm1944_vm6 = vmor %vm1942_vm5, %vm1943_vm4 }
 0x326   :  { %v1939_v20 = vsub.f32 1.0, %v1938_v22  ;;  %v2349_v30 = vsub.f32 %v2302_v40, %v2322_v15  ;;  %2323 = vmatpush.msrb.mxu0 %v2322_v15  ;;  %2399 = vmatpush.msrb.mxu3 %v2322_v15 }
 0x327   :  { %2329 = vmatmul.f32.vlgmr.msrb.gmra.mxu0 %v2328_v7  ;;  %2403 = vmatmul.f32.vlgmr.msrb.gmra.mxu3 %v2326_v2  ;;  %v2477_v17 = vsub.f32 %v2457_v29, %v14173_v28 }
 0x328   :  { %v1940_v21 = vmul.f32 %v13274_v9, %v1939_v20  ;;  %2505 = vmatpush.msra.mxu3 %v2504_v33  ;;  %2376 = vmatpush.msrb.mxu2 %v2349_v30  ;;  %v2350_v38 = vand.u32 4294901760, %v2349_v30 }
 0x329   :  { %2379 = vmatmul.f32.vlgmr.msrb.gmra.mxu2 %v2325_v61  ;;  %v2478_v23 = vand.u32 4294901760, %v2477_v17 }
 0x32a   :  { %2599 = vmatpush.msrb.mxu3 %v14159_v49  ;;  %v1941_v0 = vadd.f32 %v13274_v9, %v1940_v21  ;;  %2475 = vmatpush.msra.mxu2 %v14159_v49  ;;  %v2351_v14 = vsub.f32 %v2349_v30, %v2350_v38 }
 0x32b   :  { %2425 = vmatpush.msra.mxu0 %v2350_v38  ;;  %v2479_v43 = vsub.f32 %v2477_v17, %v2478_v23 }
 0x32c   :  { %2577 = vmatpush.msrb.mxu2 %v2502_v1  ;;  %v1945_v35 = vsel %vm1944_vm6, %v13274_v9, %v1941_v0  ;;  %v2352_v42 = vand.u32 4294901760, %v2351_v14 }
 0x32d   :  { %2528 = vmatpush.msrb.mxu0 %v2501_v55  ;;  %v1950_v25 = vsel %vm1947_vm7, %v1949_v11, %v1945_v35  ;;  %v2480_v48 = vand.u32 4294901760, %v2479_v43 }
 0x32e   :  { %v1951_v41 = vmul.f32 %v14081_v12, %v1950_v25  ;;  %2353 = vmatpush.msrb.mxu1 %v2352_v42  ;;  %v2655_v12 = vsub.f32 %v2653_v39, %v2654_v44 }
 0x32f   :  { %2355 = vmatmul.f32.vlgmr.msrb.gmra.mxu1 %v14165_v54  ;;  %2427 = vmatmul.f32.vlgmr.msra.gmra.mxu0 %v14165_v54 }
 0x330   :  { %v2609_v46 = vsel %vm543_vm1, %v1951_v41, 0  ;;  %2447 = vmatpush.msra.mxu1 %v2322_v15  ;;  %2507 = vmatmul.f32.vlgmr.msra.gmra.mxu3 %v14173_v28  ;;  %v2656_v58 = vand.u32 4294901760, %v2655_v12 }
 0x331   :  { %v2628_v51 = vand.u32 4294901760, %v2609_v46  ;;  %2627 = vmatpush.msra.mxu0 %v14175_v18  ;;  %2703 = vmatpush.msra.mxu3 %v14175_v18 }
 0x332   :  { %2551 = vmatpush.msrb.mxu1 %v14159_v49  ;;  %2481 = vmatmul.f32.vlgmr.msra.gmra.mxu2 %v2480_v48 }
 0x333   :  { %2680 = vmatpush.msra.mxu2 %v2653_v39  ;;  %v2629_v31 = vsub.f32 %v2609_v46, %v2628_v51 }
 0x334   :  { %v2758_v32 = vpop.permute.xlu1 %2757 }
 0x335   :  { %v2778_v53 = vand.u32 4294901760, %v2758_v32  ;;  %v2630_v55 = vand.u32 4294901760, %v2629_v31 }
 0x337   :  { %v2805_v60 = vsub.f32 %v2758_v32, %v2778_v53  ;;  %2449 = vmatmul.f32.vlgmr.msra.gmra.mxu1 %v14165_v54  ;;  %2531 = vmatmul.f32.vlgmr.msrb.gmra.mxu0 %v2477_v17  ;;  %v2631_v62 = vsub.f32 %v2629_v31, %v2630_v55 }
 0x338   :  { %2601 = vmatmul.f32.vlgmr.msrb.gmra.mxu3 %v14173_v28  ;;  %2657 = vmatpush.msra.mxu1 %v2656_v58 }
 0x339   :  { %v2806_v61 = vand.u32 4294901760, %v2805_v60  ;;  %2729 = vmatpush.msrb.mxu0 %v2654_v44  ;;  %v2632_v10 = vand.u32 4294901760, %v2631_v62 }
 0x33a   :  { %2579 = vmatmul.f32.vlgmr.msrb.gmra.mxu2 %v14173_v28 }
 0x33b   :  { %2779 = vmatpush.msrb.mxu2 %v2778_v53  ;;  %v2807_v49 = vsub.f32 %v2805_v60, %v2806_v61 }
 0x33c   :  { %v2910_v63 = vpop.permute.xlu1 %2909 }
 0x33d   :  { %v2808_v1 = vand.u32 4294901760, %v2807_v49  ;;  %v14192_v56 = vand.u32 4294901760, %v2910_v63 }
 0x33f   :  { %2555 = vmatmul.f32.vlgmr.msrb.gmra.mxu1 %v2478_v23  ;;  %2633 = vmatmul.f32.vlgmr.msra.gmra.mxu0 %v2632_v10  ;;  %v14196_v54 = vsub.f32 %v2910_v63, %v14192_v56 }
 0x340   :  { %2707 = vmatmul.f32.vlgmr.msra.gmra.mxu3 %v2630_v55  ;;  %2751 = vmatpush.msrb.mxu1 %v14175_v18 }
 0x341   :  { %2809 = vmatpush.msrb.mxu3 %v2808_v1  ;;  %2832 = vmatpush.msra.mxu0 %v2805_v60  ;;  %v2958_v2 = vand.u32 4294901760, %v14196_v54 }
 0x342   :  { %2683 = vmatmul.f32.vlgmr.msra.gmra.mxu2 %v2629_v31 }
 0x343   :  { %2903 = vmatpush.msra.mxu3 %v2778_v53  ;;  %2881 = vmatpush.msra.mxu2 %v2806_v61  ;;  %v2959_v8 = vsub.f32 %v14196_v54, %v2958_v2 }
 0x345   :  { %v2960_v59 = vand.u32 4294901760, %v2959_v8 }
 0x347   :  { %2659 = vmatmul.f32.vlgmr.msra.gmra.mxu1 %v2628_v51  ;;  %2731 = vmatmul.f32.vlgmr.msrb.gmra.mxu0 %v2628_v51 }
 0x348   :  { %2855 = vmatpush.msra.mxu1 %v2778_v53  ;;  %2931 = vmatpush.msrb.mxu0 %v14192_v56 }
 0x34d   :  { %v1873_v3 = vpop.xlane.xlu2 %1872 }
 0x34e   :  { %13275 = vrcp.f32 %v1873_v3  ;;  %v1870_v13 = vpop.xlane.xlu0 %1869  ;;  %v1978_v15 = vand.u32 2147483648, %v1873_v3  ;;  %v1976_v28 = vand.u32 2147483647, %v1873_v3  ;;  %vm1972_vm10 = vweird.f32 %v1873_v3 }
 0x34f   :  { %13277 = vrcp.f32 %v1870_v13  ;;  %2753 = vmatmul.f32.vlgmr.msrb.gmra.mxu1 %v2628_v51  ;;  %v1963_v18 = vand.u32 2147483648, %v1870_v13  ;;  %v1961_v30 = vand.u32 2147483647, %v1870_v13  ;;  %vm1957_vm12 = vweird.f32 %v1870_v13  ;;  %v3214_v51 = vpop.permute.xlu1 %3213 }
 0x350   :  { %2961 = vmatpush.msrb.mxu1 %v2960_v59  ;;  %v1979_v34 = vor.u32 1.1754944e-38, %v1978_v15  ;;  %vm1977_vm13 = vcmp.eq.f32.partialorder %v1976_v28, 8.507059e+37  ;;  %v3217_v15 = vsel %vm543_vm1, %v3214_v51, 0 }
 0x351   :  { %v1964_v38 = vor.u32 1.1754944e-38, %v1963_v18  ;;  %vm1962_vm15 = vcmp.eq.f32.partialorder %v1961_v30, 8.507059e+37  ;;  %v14225_v28 = vand.u32 4294901760, %v3217_v15 }
 0x353   :  { %v14231_v30 = vsub.f32 %v3217_v15, %v14225_v28 }
 0x354   :  { %v13276_v5 = vpop.eup %13275 }
 0x355   :  { %v13278_v4 = vpop.eup %13277  ;;  %v1968_v9 = vmul.f32 %v13276_v5, %v1873_v3  ;;  %vm1973_vm8 = vweird.f32 %v13276_v5  ;;  %v3216_v46 = vpop.permute.xlu2 %3215 }
 0x356   :  { %v1953_v19 = vmul.f32 %v13278_v4, %v1870_v13  ;;  %v1876_v40 = vpop.xlane.xlu0 %1875  ;;  %vm1958_vm9 = vweird.f32 %v13278_v4  ;;  %vm1974_vm11 = vmor %vm1972_vm10, %vm1973_vm8  ;;  %v3219_v53 = vsel %vm543_vm1, %v3216_v46, 0 }
 0x357   :  { %v1969_v22 = vsub.f32 1.0, %v1968_v9  ;;  %13279 = vrcp.f32 %v1876_v40  ;;  %vm1959_vm14 = vmor %vm1957_vm12, %vm1958_vm9  ;;  %v1993_v31 = vand.u32 2147483648, %v1876_v40  ;;  %vm1987_vm3 = vweird.f32 %v1876_v40 }
 0x358   :  { %v1954_v29 = vsub.f32 1.0, %v1953_v19  ;;  %v3236_v62 = vand.u32 4294901760, %v3219_v53 }
 0x359   :  { %v1970_v7 = vmul.f32 %v13276_v5, %v1969_v22  ;;  %v1994_v58 = vor.u32 1.1754944e-38, %v1993_v31 }
 0x35a   :  { %v1955_v20 = vmul.f32 %v13278_v4, %v1954_v29  ;;  %v3263_v59 = vsub.f32 %v3219_v53, %v3236_v62 }
 0x35b   :  { %v1971_v33 = vadd.f32 %v13276_v5, %v1970_v7 }
 0x35c   :  { %v1956_v17 = vadd.f32 %v13278_v4, %v1955_v20  ;;  %v3264_v22 = vand.u32 4294901760, %v3263_v59 }
 0x35d   :  { %v13280_v21 = vpop.eup %13279  ;;  %v1975_v36 = vsel %vm1974_vm11, %v13276_v5, %v1971_v33 }
 0x35e   :  { %v1980_v23 = vsel %vm1977_vm13, %v1979_v34, %v1975_v36  ;;  %v1960_v39 = vsel %vm1959_vm14, %v13278_v4, %v1956_v17  ;;  %v1983_v0 = vmul.f32 %v13280_v21, %v1876_v40  ;;  %vm1988_vm2 = vweird.f32 %v13280_v21  ;;  %v3370_v4 = vpop.permute.xlu1 %3369 }
 0x35f   :  { %v1981_v14 = vmul.f32 %v14110_v27, %v1980_v23  ;;  %v1965_v11 = vsel %vm1962_vm15, %v1964_v38, %v1960_v39  ;;  %v1991_v27 = vand.u32 2147483647, %v1876_v40  ;;  %vm1989_vm4 = vmor %vm1987_vm3, %vm1988_vm2  ;;  %v3373_v40 = vsel %vm543_vm1, %v3370_v4, 0 }
 0x360   :  { %v1984_v35 = vsub.f32 1.0, %v1983_v0  ;;  %v1966_v42 = vmul.f32 %v14112_v24, %v1965_v11  ;;  %v3240_v38 = vand.u32 4294901760, %v14231_v30 }
 0x361   :  { %v2913_v43 = vsel %vm543_vm1, %v1981_v14, 0  ;;  %vm1992_vm5 = vcmp.eq.f32.partialorder %v1991_v27, 8.507059e+37 }
 0x362   :  { %v14206_v25 = vand.u32 4294901760, %v2913_v43  ;;  %v1985_v44 = vmul.f32 %v13280_v21, %v1984_v35  ;;  %v2761_v41 = vsel %vm543_vm1, %v1966_v42, 0  ;;  %v3241_v14 = vsub.f32 %v14231_v30, %v3240_v38 }
 0x363   :  { %v2780_v48 = vand.u32 4294901760, %v2761_v41 }
 0x364   :  { %v1986_v12 = vadd.f32 %v13280_v21, %v1985_v44  ;;  %v14210_v32 = vsub.f32 %v2913_v43, %v14206_v25  ;;  %v3242_v43 = vand.u32 4294901760, %v3241_v14 }
 0x365   :  { %2811 = vmatmul.f32.vlgmr.msrb.gmra.mxu3 %v2780_v48  ;;  %v2781_v24 = vsub.f32 %v2761_v41, %v2780_v48  ;;  %v3522_v41 = vpop.permute.xlu2 %3521 }
 0x366   :  { %3007 = vmatpush.msrb.mxu3 %v14192_v56  ;;  %v1990_v55 = vsel %vm1989_vm4, %v13280_v21, %v1986_v12  ;;  %v2934_v61 = vand.u32 4294901760, %v14210_v32  ;;  %v3524_v34 = vpop.permute.xlu1 %3523  ;;  %v3525_v12 = vsel %vm543_vm1, %v3522_v41, 0 }
 0x367   :  { %2835 = vmatmul.f32.vlgmr.msra.gmra.mxu0 %v2781_v24  ;;  %v2782_v60 = vand.u32 4294901760, %v2781_v24  ;;  %v1995_v63 = vsel %vm1992_vm5, %v1994_v58, %v1990_v55  ;;  %v3527_v23 = vsel %vm543_vm1, %v3524_v34, 0 }
 0x368   :  { %3033 = vmatpush.msra.mxu0 %v2958_v2  ;;  %v2935_v8 = vsub.f32 %v14210_v32, %v2934_v61  ;;  %v1996_v2 = vmul.f32 %v14120_v50, %v1995_v63  ;;  %v3390_v50 = vand.u32 4294901760, %v3373_v40  ;;  %v3544_v11 = vand.u32 4294901760, %v3527_v23 }
 0x369   :  { %v3062_v49 = vpop.permute.xlu0 %3061  ;;  %2859 = vmatmul.f32.vlgmr.msra.gmra.mxu1 %v2782_v60  ;;  %v2783_v1 = vsub.f32 %v2781_v24, %v2782_v60  ;;  %v14245_v24 = vand.u32 4294901760, %v3525_v12 }
 0x36a   :  { %v3082_v10 = vand.u32 4294901760, %v3062_v49  ;;  %3055 = vmatpush.msra.mxu1 %v14192_v56  ;;  %v2936_v5 = vand.u32 4294901760, %v2935_v8  ;;  %v3065_v56 = vsel %vm543_vm1, %v1996_v2, 0  ;;  %v14228_v18 = vsub.f32 %v3373_v40, %v3390_v50 }
 0x36b   :  { %v2784_v13 = vand.u32 4294901760, %v2783_v1  ;;  %v3084_v7 = vand.u32 4294901760, %v3065_v56  ;;  %v14251_v58 = vsub.f32 %v3525_v12, %v14245_v24 }
 0x36c   :  { %v3109_v3 = vsub.f32 %v3062_v49, %v3082_v10  ;;  %v3418_v17 = vand.u32 4294901760, %v14228_v18  ;;  %v14266_v40 = vpop.f32.mrf.mxu1 }
 0x36d   :  { %2905 = vmatmul.f32.vlgmr.msra.gmra.mxu3 %v2780_v48  ;;  %2785 = vmatmul.f32.vlgmr.msrb.gmra.mxu2 %v2784_v13  ;;  %v3085_v20 = vsub.f32 %v3065_v56, %v3084_v7  ;;  %16387 = vst [vmem:[#allocation12_spill] sm:$0xff] %v14266_v40 }
 0x36e   :  { %v3110_v9 = vand.u32 4294901760, %v3109_v3  ;;  %2984 = vmatpush.msrb.mxu2 %v14196_v54  ;;  %v3265_v54 = vsub.f32 %v3263_v59, %v3264_v22  ;;  %v3419_v39 = vsub.f32 %v14228_v18, %v3418_v17 }
 0x36f   :  { %2937 = vmatmul.f32.vlgmr.msrb.gmra.mxu0 %v2936_v5  ;;  %v3086_v36 = vand.u32 4294901760, %v3085_v20 }
 0x370   :  { %3136 = vmatpush.msrb.mxu0 %v3109_v3  ;;  %v3111_v19 = vsub.f32 %v3109_v3, %v3110_v9  ;;  %v3266_v33 = vand.u32 4294901760, %v3265_v54  ;;  %v3420_v42 = vand.u32 4294901760, %v3419_v39 }
 0x371   :  { %2963 = vmatmul.f32.vlgmr.msrb.gmra.mxu1 %v14206_v25  ;;  %v3368_v21 = vpop.permute.xlu0 %3367  ;;  %v3087_v0 = vsub.f32 %v3085_v20, %v3086_v36 }
 0x372   :  { %v3112_v29 = vand.u32 4294901760, %v3111_v19  ;;  %3159 = vmatpush.msrb.mxu1 %v3082_v10 }
 0x373   :  { %v3088_v35 = vand.u32 4294901760, %v3087_v0 }
 0x374   :  { %3113 = vmatpush.msra.mxu3 %v3112_v29 }
 0x375   :  { %3011 = vmatmul.f32.vlgmr.msrb.gmra.mxu3 %v2934_v61  ;;  %2883 = vmatmul.f32.vlgmr.msra.gmra.mxu2 %v2780_v48  ;;  %v3371_v48 = vsel %vm543_vm1, %v3368_v21, 0  ;;  %v3832_v61 = vpop.permute.xlu2 %3831  ;;  %v14262_v5 = vpop.f32.mrf.mxu0 }
 0x376   :  { %3207 = vmatpush.msrb.mxu3 %v3082_v10  ;;  %3083 = vmatpush.msra.mxu2 %v3082_v10  ;;  %v3392_v31 = vand.u32 4294901760, %v3371_v48  ;;  %v3548_v10 = vand.u32 4294901760, %v14251_v58  ;;  %v3835_v1 = vsel %vm543_vm1, %v3832_v61, 0  ;;  %16386 = vst [vmem:[#allocation11_spill] sm:$0xff] %v14262_v5  ;;  %v14290_v21 = vpop.f32.mrf.mxu3 }
 0x377   :  { %3035 = vmatmul.f32.vlgmr.msra.gmra.mxu0 %v14206_v25  ;;  %16390 = vst [vmem:[#allocation15_spill] sm:$0xff] %v14290_v21 }
 0x378   :  { %3237 = vmatpush.xpose.msra.mxu0 %v3236_v62  ;;  %v3393_v53 = vsub.f32 %v3371_v48, %v3392_v31  ;;  %v3549_v13 = vsub.f32 %v14251_v58, %v3548_v10 }
 0x379   :  { %3057 = vmatmul.f32.vlgmr.msra.gmra.mxu1 %v14206_v25  ;;  %v3571_v25 = vsub.f32 %v3527_v23, %v3544_v11  ;;  %v3678_v44 = vpop.permute.xlu0 %3677 }
 0x37a   :  { %3267 = vmatpush.xpose.msra.mxu1 %v3266_v33  ;;  %v3681_v51 = vsel %vm543_vm1, %v3678_v44, 0  ;;  %v3394_v49 = vand.u32 4294901760, %v3393_v53  ;;  %v14283_v33 = vpop.f32.mrf.mxu1 }
 0x37b   :  { %v3572_v46 = vand.u32 4294901760, %v3571_v25  ;;  %16389 = vst [vmem:[#allocation14_spill] sm:$0xff] %v14283_v33 }
 0x37c   :  { %v3395_v8 = vsub.f32 %v3393_v53, %v3394_v49 }
 0x37d   :  { %3115 = vmatmul.f32.vlgmr.msra.gmra.mxu3 %v3084_v7  ;;  %2987 = vmatmul.f32.vlgmr.msrb.gmra.mxu2 %v14210_v32  ;;  %v3698_v32 = vand.u32 4294901760, %v3681_v51  ;;  %v3573_v27 = vsub.f32 %v3571_v25, %v3572_v46  ;;  %v3984_v14 = vpop.permute.xlu2 %3983 }
 0x37e   :  { %3313 = vmatpush.xpose.msra.mxu3 %v3236_v62  ;;  %3185 = vmatpush.msrb.mxu2 %v3110_v9  ;;  %v3396_v2 = vand.u32 4294901760, %v3395_v8  ;;  %v3550_v9 = vand.u32 4294901760, %v3549_v13 }
 0x37f   :  { %3139 = vmatmul.f32.vlgmr.msrb.gmra.mxu0 %v3085_v20  ;;  %v14248_v55 = vsub.f32 %v3681_v51, %v3698_v32  ;;  %v3574_v60 = vand.u32 4294901760, %v3573_v27 }
 0x380   :  { %3339 = vmatpush.xpose.msrb.mxu0 %v3264_v22 }
 0x381   :  { %3163 = vmatmul.f32.vlgmr.msrb.gmra.mxu1 %v3086_v36  ;;  %v3726_v63 = vand.u32 4294901760, %v14248_v55  ;;  %v3830_v56 = vpop.permute.xlu0 %3829 }
 0x382   :  { %3361 = vmatpush.xpose.msrb.mxu1 %v3236_v62  ;;  %v3676_v62 = vpop.permute.xlu1 %3675 }
 0x383   :  { %v3727_v3 = vsub.f32 %v14248_v55, %v3726_v63  ;;  %v3679_v15 = vsel %vm543_vm1, %v3676_v62, 0 }
 0x385   :  { %3209 = vmatmul.f32.vlgmr.msrb.gmra.mxu3 %v3084_v7  ;;  %3089 = vmatmul.f32.vlgmr.msra.gmra.mxu2 %v3088_v35  ;;  %v3728_v4 = vand.u32 4294901760, %v3727_v3 }
 0x386   :  { %3421 = vmatpush.xpose.msrb.mxu3 %v3420_v42  ;;  %3290 = vmatpush.xpose.msra.mxu2 %v3263_v59  ;;  %v3852_v59 = vand.u32 4294901760, %v3835_v1 }
 0x387   :  { %3243 = vmatmul.f32.vlgmr.msra.gmra.mxu0 %v3242_v43 }
 0x388   :  { %3444 = vmatpush.xpose.msra.mxu0 %v14228_v18  ;;  %v14264_v19 = vsub.f32 %v3835_v1, %v3852_v59  ;;  %v14278_v18 = vpop.f32.mrf.mxu0  ;;  %v14303_v43 = vpop.f32.mrf.mxu1 }
 0x389   :  { %3269 = vmatmul.f32.vlgmr.msra.gmra.mxu1 %v14225_v28  ;;  %16388 = vst [vmem:[#allocation13_spill] sm:$0xff] %v14278_v18  ;;  %v4140_v23 = vpop.permute.xlu0 %4139 }
 0x38a   :  { %3467 = vmatpush.xpose.msra.mxu1 %v3390_v50  ;;  %v3986_v22 = vpop.permute.xlu1 %3985  ;;  %v4143_v42 = vsel %vm543_vm1, %v4140_v23, 0  ;;  %16392 = vst [vmem:[#allocation17_spill] sm:$0xff] %v14303_v43  ;;  %v14310_v41 = vpop.f32.mrf.mxu3 }
 0x38b   :  { %v3989_v29 = vsel %vm543_vm1, %v3986_v22, 0  ;;  %16393 = vst [vmem:[#allocation18_spill] sm:$0xff] %v14310_v41  ;;  %v4160_v51 = vand.u32 4294901760, %v4143_v42 }
 0x38c   :  { %v14276_v54 = vand.u32 4294901760, %v3989_v29 }
 0x38d   :  { %3317 = vmatmul.f32.vlgmr.msra.gmra.mxu3 %v3240_v38  ;;  %3187 = vmatmul.f32.vlgmr.msrb.gmra.mxu2 %v3084_v7  ;;  %v3833_v7 = vsel %vm543_vm1, %v3830_v56, 0 }
 0x38e   :  { %3515 = vmatpush.xpose.msra.mxu3 %v3390_v50  ;;  %3391 = vmatpush.xpose.msrb.mxu2 %v3390_v50  ;;  %v3880_v50 = vand.u32 4294901760, %v14264_v19 }
 0x38f   :  { %3341 = vmatmul.f32.vlgmr.msrb.gmra.mxu0 %v14225_v28 }
 0x390   :  { %3545 = vmatpush.xpose.msrb.mxu0 %v3544_v11  ;;  %v3881_v20 = vsub.f32 %v14264_v19, %v3880_v50 }
 0x391   :  { %3363 = vmatmul.f32.vlgmr.msrb.gmra.mxu1 %v14225_v28  ;;  %v14274_v28 = vand.u32 4294901760, %v3679_v15 }
 0x392   :  { %3575 = vmatpush.xpose.msrb.mxu1 %v3574_v60  ;;  %v3882_v38 = vand.u32 4294901760, %v3881_v20  ;;  %v3987_v60 = vsel %vm543_vm1, %v3984_v14, 0 }
 0x393   :  { %v3701_v34 = vsub.f32 %v3679_v15, %v14274_v28  ;;  %v4008_v1 = vand.u32 4294901760, %v3987_v60 }
 0x395   :  { %3423 = vmatmul.f32.vlgmr.msrb.gmra.mxu3 %v3392_v31  ;;  %3293 = vmatmul.f32.vlgmr.msra.gmra.mxu2 %v14231_v30  ;;  %v14281_v30 = vand.u32 4294901760, %v3833_v7  ;;  %v3702_v39 = vand.u32 4294901760, %v3701_v34 }
 0x396   :  { %3621 = vmatpush.xpose.msrb.mxu3 %v3544_v11  ;;  %3493 = vmatpush.xpose.msra.mxu2 %v3418_v17  ;;  %v14288_v17 = vsub.f32 %v3989_v29, %v14276_v54 }
 0x397   :  { %3447 = vmatmul.f32.vlgmr.msra.gmra.mxu0 %v3393_v53  ;;  %v14293_v36 = vsub.f32 %v3833_v7, %v14281_v30  ;;  %v4294_v53 = vpop.permute.xlu2 %4293 }
 0x398   :  { %3647 = vmatpush.xpose.msra.mxu0 %v3572_v46  ;;  %v4034_v0 = vand.u32 4294901760, %v14288_v17  ;;  %v14312_v46 = vpop.f32.mrf.mxu2  ;;  %v4297_v61 = vsel %vm543_vm1, %v4294_v53, 0 }
 0x399   :  { %3471 = vmatmul.f32.vlgmr.msra.gmra.mxu1 %v3394_v49  ;;  %v3856_v35 = vand.u32 4294901760, %v14293_v36  ;;  %16394 = vst [vmem:[#allocation19_spill] sm:$0xff] %v14312_v46  ;;  %v4314_v8 = vand.u32 4294901760, %v4297_v61 }
 0x39a   :  { %3669 = vmatpush.xpose.msra.mxu1 %v3544_v11  ;;  %v14297_v11 = vpop.f32.mrf.mxu0  ;;  %v4035_v44 = vsub.f32 %v14288_v17, %v4034_v0 }
 0x39b   :  { %16391 = vst [vmem:[#allocation16_spill] sm:$0xff] %v14297_v11  ;;  %v3857_v48 = vsub.f32 %v14293_v36, %v3856_v35 }
 0x39d   :  { %3517 = vmatmul.f32.vlgmr.msra.gmra.mxu3 %v3392_v31  ;;  %3397 = vmatmul.f32.vlgmr.msrb.gmra.mxu2 %v3396_v2  ;;  %v3858_v27 = vand.u32 4294901760, %v3857_v48  ;;  %v4009_v2 = vsub.f32 %v3987_v60, %v4008_v1 }
 0x39e   :  { %3729 = vmatpush.xpose.msra.mxu3 %v3728_v4  ;;  %3598 = vmatpush.xpose.msrb.mxu2 %v3571_v25  ;;  %v3703_v25 = vsub.f32 %v3701_v34, %v3702_v39  ;;  %v4341_v4 = vsub.f32 %v4297_v61, %v4314_v8 }
 0x39f   :  { %3551 = vmatmul.f32.vlgmr.msrb.gmra.mxu0 %v3550_v9  ;;  %v4010_v29 = vand.u32 4294901760, %v4009_v2 }
 0x3a0   :  { %3752 = vmatpush.xpose.msrb.mxu0 %v14248_v55  ;;  %v3704_v12 = vand.u32 4294901760, %v3703_v25  ;;  %v4138_v55 = vpop.permute.xlu1 %4137  ;;  %v14324_v49 = vpop.f32.mrf.mxu2 }
 0x3a1   :  { %3577 = vmatmul.f32.vlgmr.msrb.gmra.mxu1 %v14245_v24  ;;  %16397 = vst [vmem:[#allocation22_spill] sm:$0xff] %v14324_v49 }
 0x3a2   :  { %3775 = vmatpush.xpose.msrb.mxu1 %v3698_v32 }
 0x3a5   :  { %3625 = vmatmul.f32.vlgmr.msrb.gmra.mxu3 %v3548_v10  ;;  %3495 = vmatmul.f32.vlgmr.msra.gmra.mxu2 %v3392_v31  ;;  %v14315_v31 = vpop.f32.mrf.mxu0  ;;  %v14327_v10 = vpop.f32.mrf.mxu3 }
 0x3a6   :  { %3823 = vmatpush.xpose.msrb.mxu3 %v3698_v32  ;;  %3699 = vmatpush.xpose.msra.mxu2 %v3698_v32  ;;  %16395 = vst [vmem:[#allocation20_spill] sm:$0xff] %v14315_v31  ;;  %v4036_v32 = vand.u32 4294901760, %v4035_v44 }
 0x3a7   :  { %3649 = vmatmul.f32.vlgmr.msra.gmra.mxu0 %v14245_v24  ;;  %16398 = vst [vmem:[#allocation23_spill] sm:$0xff] %v14327_v10 }
 0x3a8   :  { %3853 = vmatpush.xpose.msra.mxu0 %v3852_v59  ;;  %v14342_v15 = vpop.f32.mrf.mxu2 }
 0x3a9   :  { %3671 = vmatmul.f32.vlgmr.msra.gmra.mxu1 %v14245_v24  ;;  %v4187_v24 = vsub.f32 %v4143_v42, %v4160_v51  ;;  %16402 = vst [vmem:[#allocation27_spill] sm:$0xff] %v14342_v15 }
 0x3aa   :  { %3883 = vmatpush.xpose.msra.mxu1 %v3882_v38 }
 0x3ab   :  { %v4188_v62 = vand.u32 4294901760, %v4187_v24 }
 0x3ad   :  { %3731 = vmatmul.f32.vlgmr.msra.gmra.mxu3 %v14274_v28  ;;  %3601 = vmatmul.f32.vlgmr.msrb.gmra.mxu2 %v14251_v58  ;;  %v14318_v58 = vpop.f32.mrf.mxu1  ;;  %v4189_v13 = vsub.f32 %v4187_v24, %v4188_v62  ;;  %v14339_v56 = vpop.f32.mrf.mxu3 }
 0x3ae   :  { %3929 = vmatpush.xpose.msra.mxu3 %v3852_v59  ;;  %3801 = vmatpush.xpose.msrb.mxu2 %v3726_v63  ;;  %16396 = vst [vmem:[#allocation21_spill] sm:$0xff] %v14318_v58  ;;  %v4141_v63 = vsel %vm543_vm1, %v4138_v55, 0 }
 0x3af   :  { %3755 = vmatmul.f32.vlgmr.msrb.gmra.mxu0 %v3701_v34  ;;  %v4162_v3 = vand.u32 4294901760, %v4141_v63  ;;  %v4190_v22 = vand.u32 4294901760, %v4189_v13  ;;  %16401 = vst [vmem:[#allocation26_spill] sm:$0xff] %v14339_v56 }
 0x3b0   :  { %3955 = vmatpush.xpose.msrb.mxu0 %v3880_v50  ;;  %v4342_v50 = vand.u32 4294901760, %v4341_v4  ;;  %v14349_v34 = vpop.f32.mrf.mxu2 }
 0x3b1   :  { %3779 = vmatmul.f32.vlgmr.msrb.gmra.mxu1 %v3702_v39  ;;  %v4163_v9 = vsub.f32 %v4141_v63, %v4162_v3  ;;  %16404 = vst [vmem:[#allocation29_spill] sm:$0xff] %v14349_v34 }
 0x3b2   :  { %3977 = vmatpush.xpose.msrb.mxu1 %v3852_v59  ;;  %v14331_v59 = vpop.f32.mrf.mxu0 }
 0x3b3   :  { %16399 = vst [vmem:[#allocation24_spill] sm:$0xff] %v14331_v59  ;;  %v4164_v7 = vand.u32 4294901760, %v4163_v9 }
 0x3b5   :  { %3825 = vmatmul.f32.vlgmr.msrb.gmra.mxu3 %v14274_v28  ;;  %3705 = vmatmul.f32.vlgmr.msra.gmra.mxu2 %v3704_v12  ;;  %v14353_v39 = vpop.f32.mrf.mxu3 }
 0x3b6   :  { %4037 = vmatpush.xpose.msrb.mxu3 %v4036_v32  ;;  %3906 = vmatpush.xpose.msra.mxu2 %v14264_v19  ;;  %v14337_v19 = vpop.f32.mrf.mxu1  ;;  %16406 = vst [vmem:[#allocation31_spill] sm:$0xff] %v14353_v39 }
 0x3b7   :  { %3859 = vmatmul.f32.vlgmr.msra.gmra.mxu0 %v3858_v27  ;;  %16400 = vst [vmem:[#allocation25_spill] sm:$0xff] %v14337_v19 }
 0x3b8   :  { %4060 = vmatpush.xpose.msra.mxu0 %v14288_v17  ;;  %v4292_v17 = vpop.permute.xlu0 %4291  ;;  %v14358_v25 = vpop.f32.mrf.mxu2 }
 0x3b9   :  { %3885 = vmatmul.f32.vlgmr.msra.gmra.mxu1 %v14281_v30  ;;  %16408 = vst [vmem:[#allocation33_spill] sm:$0xff] %v14358_v25 }
 0x3ba   :  { %4083 = vmatpush.xpose.msra.mxu1 %v14276_v54  ;;  %v14347_v20 = vpop.f32.mrf.mxu0 }
 0x3bb   :  { %16403 = vst [vmem:[#allocation28_spill] sm:$0xff] %v14347_v20 }
 0x3bd   :  { %3933 = vmatmul.f32.vlgmr.msra.gmra.mxu3 %v3856_v35  ;;  %3803 = vmatmul.f32.vlgmr.msrb.gmra.mxu2 %v14274_v28  ;;  %v4011_v28 = vsub.f32 %v4009_v2, %v4010_v29  ;;  %v14362_v48 = vpop.f32.mrf.mxu3 }
 0x3be   :  { %4131 = vmatpush.xpose.msra.mxu3 %v14276_v54  ;;  %4007 = vmatpush.xpose.msrb.mxu2 %v14276_v54  ;;  %v4343_v54 = vsub.f32 %v4341_v4, %v4342_v50  ;;  %v14351_v38 = vpop.f32.mrf.mxu1  ;;  %16410 = vst [vmem:[#allocation35_spill] sm:$0xff] %v14362_v48 }
 0x3bf   :  { %3957 = vmatmul.f32.vlgmr.msrb.gmra.mxu0 %v14281_v30  ;;  %16405 = vst [vmem:[#allocation30_spill] sm:$0xff] %v14351_v38  ;;  %v4012_v23 = vand.u32 4294901760, %v4011_v28 }
 0x3c0   :  { %4161 = vmatpush.xpose.msrb.mxu0 %v4160_v51  ;;  %v14366_v27 = vpop.f32.mrf.mxu2 }
 0x3c1   :  { %3979 = vmatmul.f32.vlgmr.msrb.gmra.mxu1 %v14281_v30  ;;  %v4165_v30 = vsub.f32 %v4163_v9, %v4164_v7  ;;  %16412 = vst [vmem:[#allocation37_spill] sm:$0xff] %v14366_v27 }
 0x3c2   :  { %4191 = vmatpush.xpose.msrb.mxu1 %v4190_v22  ;;  %v14356_v35 = vpop.f32.mrf.mxu0 }
 0x3c3   :  { %v4166_v14 = vand.u32 4294901760, %v4165_v30  ;;  %16407 = vst [vmem:[#allocation32_spill] sm:$0xff] %v14356_v35 }
 0x3c5   :  { %4039 = vmatmul.f32.vlgmr.msrb.gmra.mxu3 %v4008_v1  ;;  %3909 = vmatmul.f32.vlgmr.msra.gmra.mxu2 %v14293_v36  ;;  %v4344_v36 = vand.u32 4294901760, %v4343_v54  ;;  %v14370_v55 = vpop.f32.mrf.mxu3 }
 0x3c6   :  { %4237 = vmatpush.xpose.msrb.mxu3 %v4160_v51  ;;  %4109 = vmatpush.xpose.msra.mxu2 %v4034_v0  ;;  %v4295_v0 = vsel %vm543_vm1, %v4292_v17, 0  ;;  %v14360_v44 = vpop.f32.mrf.mxu1  ;;  %16414 = vst [vmem:[#allocation39_spill] sm:$0xff] %v14370_v55 }
 0x3c7   :  { %4063 = vmatmul.f32.vlgmr.msra.gmra.mxu0 %v4009_v2  ;;  %v4316_v42 = vand.u32 4294901760, %v4295_v0  ;;  %16409 = vst [vmem:[#allocation34_spill] sm:$0xff] %v14360_v44 }
 0x3c8   :  { %4263 = vmatpush.xpose.msra.mxu0 %v4188_v62 }
 0x3c9   :  { %4087 = vmatmul.f32.vlgmr.msra.gmra.mxu1 %v4010_v29 }
 0x3ca   :  { %4285 = vmatpush.xpose.msra.mxu1 %v4160_v51  ;;  %v4317_v51 = vsub.f32 %v4295_v0, %v4316_v42  ;;  %v14364_v32 = vpop.f32.mrf.mxu0 }
 0x3cb   :  { %16411 = vst [vmem:[#allocation36_spill] sm:$0xff] %v14364_v32 }
 0x3cc   :  { %v4318_v12 = vand.u32 4294901760, %v4317_v51 }
 0x3cd   :  { %4133 = vmatmul.f32.vlgmr.msra.gmra.mxu3 %v4008_v1  ;;  %4013 = vmatmul.f32.vlgmr.msrb.gmra.mxu2 %v4012_v23 }
 0x3ce   :  { %4345 = vmatpush.xpose.msra.mxu3 %v4344_v36  ;;  %4214 = vmatpush.xpose.msrb.mxu2 %v4187_v24  ;;  %v14368_v24 = vpop.f32.mrf.mxu1  ;;  %v4319_v53 = vsub.f32 %v4317_v51, %v4318_v12 }
 0x3cf   :  { %4167 = vmatmul.f32.vlgmr.msrb.gmra.mxu0 %v4166_v14  ;;  %16413 = vst [vmem:[#allocation38_spill] sm:$0xff] %v14368_v24 }
 0x3d0   :  { %4368 = vmatpush.xpose.msrb.mxu0 %v4341_v4  ;;  %v4320_v60 = vand.u32 4294901760, %v4319_v53 }
 0x3d1   :  { %4193 = vmatmul.f32.vlgmr.msrb.gmra.mxu1 %v4162_v3 }
 0x3d2   :  { %4391 = vmatpush.xpose.msrb.mxu1 %v4314_v8 }
 0x3d5   :  { %4241 = vmatmul.f32.vlgmr.msrb.gmra.mxu3 %v4164_v7  ;;  %4111 = vmatmul.f32.vlgmr.msra.gmra.mxu2 %v4008_v1  ;;  %v14378_v1 = vpop.f32.mrf.mxu2 }
 0x3d6   :  { %4439 = vmatpush.xpose.msrb.mxu3 %v4314_v8  ;;  %4315 = vmatpush.xpose.msra.mxu2 %v4314_v8  ;;  %16418 = vst [vmem:[#allocation43_spill] sm:$0xff] %v14378_v1 }
 0x3d7   :  { %4265 = vmatmul.f32.vlgmr.msra.gmra.mxu0 %v4162_v3 }
 0x3d9   :  { %4287 = vmatmul.f32.vlgmr.msra.gmra.mxu1 %v4162_v3 }
 0x3dd   :  { %4347 = vmatmul.f32.vlgmr.msra.gmra.mxu3 %v4316_v42  ;;  %4217 = vmatmul.f32.vlgmr.msrb.gmra.mxu2 %v4163_v9 }
 0x3de   :  { %4417 = vmatpush.xpose.msrb.mxu2 %v4342_v50 }
 0x3df   :  { %4371 = vmatmul.f32.vlgmr.msrb.gmra.mxu0 %v4317_v51 }
 0x3e1   :  { %4395 = vmatmul.f32.vlgmr.msrb.gmra.mxu1 %v4318_v12 }
 0x3e4   :  { %v14372_v61 = vpop.f32.mrf.mxu0 }
 0x3e5   :  { %16415 = vst [vmem:[#allocation40_spill] sm:$0xff] %v14372_v61  ;;  %4441 = vmatmul.f32.vlgmr.msrb.gmra.mxu3 %v4316_v42  ;;  %4321 = vmatmul.f32.vlgmr.msra.gmra.mxu2 %v4320_v60 }
 0x3e6   :  { %v14374_v62 = vpop.f32.mrf.mxu1 }
 0x3e7   :  { %16416 = vst [vmem:[#allocation41_spill] sm:$0xff] %v14374_v62 }
 0x3e8   :  { %v14376_v63 = vpop.f32.mrf.mxu3 }
 0x3e9   :  { %16417 = vst [vmem:[#allocation42_spill] sm:$0xff] %v14376_v63 }
 0x3ec   :  { %v14380_v8 = vpop.f32.mrf.mxu0 }
 0x3ed   :  { %16419 = vst [vmem:[#allocation44_spill] sm:$0xff] %v14380_v8  ;;  %4419 = vmatmul.f32.vlgmr.msrb.gmra.mxu2 %v4316_v42 }
 0x3ee   :  { %v14382_v3 = vpop.f32.mrf.mxu1 }
 0x3ef   :  { %16420 = vst [vmem:[#allocation45_spill] sm:$0xff] %v14382_v3 }
 0x3f0   :  { %v14384_v13 = vpop.f32.mrf.mxu3  ;;  %v14386_v2 = vpop.f32.mrf.mxu2 }
 0x3f1   :  { %16421 = vst [vmem:[#allocation46_spill] sm:$0xff] %v14384_v13 }
 0x3f2   :  { %16422 = vst [vmem:[#allocation47_spill] sm:$0xff] %v14386_v2 }
 0x3f4   :  { %v14388_v4 = vpop.f32.mrf.mxu0 }
 0x3f5   :  { %16423 = vst [vmem:[#allocation48_spill] sm:$0xff] %v14388_v4 }
 0x3f6   :  { %v14390_v9 = vpop.f32.mrf.mxu1 }
 0x3f7   :  { %16424 = vst [vmem:[#allocation49_spill] sm:$0xff] %v14390_v9 }
 0x3f8   :  { %v14392_v22 = vpop.f32.mrf.mxu3  ;;  %v14394_v29 = vpop.f32.mrf.mxu2 }
 0x3f9   :  { %16425 = vst [vmem:[#allocation50_spill] sm:$0xff] %v14392_v22 }
 0x3fa   :  { %16426 = vst [vmem:[#allocation51_spill] sm:$0xff] %v14394_v29 }
 0x3fc   :  { %v14396_v50 = vpop.f32.mrf.mxu0 }
 0x3fd   :  { %16427 = vst [vmem:[#allocation52_spill] sm:$0xff] %v14396_v50 }
 0x3fe   :  { %v14398_v7 = vpop.f32.mrf.mxu1 }
 0x3ff   :  { %16428 = vst [vmem:[#allocation53_spill] sm:$0xff] %v14398_v7 }
 0x400   :  { %v14400_v28 = vpop.f32.mrf.mxu3  ;;  %v14402_v54 = vpop.f32.mrf.mxu2 }
 0x401   :  { %16429 = vst [vmem:[#allocation54_spill] sm:$0xff] %v14400_v28 }
 0x402   :  { %16430 = vst [vmem:[#allocation55_spill] sm:$0xff] %v14402_v54 }
 0x404   :  { %v3244_v30 = vpop.f32.mrf.mxu0 }
 0x406   :  { %v3270_v23 = vpop.f32.mrf.mxu1 }
 0x407   :  { %v3271_v60 = vadd.f32 %v3270_v23, %v3244_v30 }
 0x408   :  { %v14404_v36 = vpop.f32.mrf.mxu3  ;;  %v14406_v14 = vpop.f32.mrf.mxu2 }
 0x409   :  { %16431 = vst [vmem:[#allocation56_spill] sm:$0xff] %v14404_v36 }
 0x40a   :  { %16432 = vst [vmem:[#allocation57_spill] sm:$0xff] %v14406_v14 }
 0x40c   :  { %v3342_v17 = vpop.f32.mrf.mxu0 }
 0x40e   :  { %v3364_v0 = vpop.f32.mrf.mxu1 }
 0x410   :  { %v3318_v42 = vpop.f32.mrf.mxu3  ;;  %v14408_v51 = vpop.f32.mrf.mxu2 }
 0x411   :  { %16433 = vst [vmem:[#allocation58_spill] sm:$0xff] %v14408_v51  ;;  %v13411_v51 = vld [vmem:[%s16367_s1] ss:$0 sm:$0xff] }
 0x414   :  { %v3448_v12 = vpop.f32.mrf.mxu0 }
 0x416   :  { %v3472_v53 = vpop.f32.mrf.mxu1 }
 0x418   :  { %v3424_v50 = vpop.f32.mrf.mxu3  ;;  %v3294_v7 = vpop.f32.mrf.mxu2 }
 0x419   :  { %v3295_v9 = vadd.f32 %v3294_v7, %v3271_v60 }
 0x41b   :  { %v3319_v28 = vadd.f32 %v3318_v42, %v3295_v9 }
 0x41c   :  { %v3552_v4 = vpop.f32.mrf.mxu0 }
 0x41d   :  { %v3343_v22 = vadd.f32 %v3342_v17, %v3319_v28 }
 0x41e   :  { %v3578_v54 = vpop.f32.mrf.mxu1 }
 0x41f   :  { %v3365_v3 = vadd.f32 %v3364_v0, %v3343_v22 }
 0x420   :  { %v3518_v13 = vpop.f32.mrf.mxu3  ;;  %v3398_v36 = vpop.f32.mrf.mxu2 }
 0x421   :  { %v3425_v8 = vadd.f32 %v3424_v50, %v3398_v36  ;;  %v4445_v14 = vmul.f32 0.35355338, %v3365_v3 }
 0x423   :  { %v3449_v29 = vadd.f32 %v3448_v12, %v3425_v8  ;;  %v14413_v62 = vadd.f32 %v13411_v51, %v4445_v14  ;;  %v3579_v8 = vadd.f32 %v3578_v54, %v3552_v4  ;;  %v13412_v14 = vld [vmem:[%s16367_s1 + $0x1] ss:$0 sm:$0xff] }
 0x424   :  { %v3650_v30 = vpop.f32.mrf.mxu0 }
 0x425   :  { %v4461_v7 = vsel %vm543_vm1, %v14413_v62, -inf  ;;  %v3473_v9 = vadd.f32 %v3472_v53, %v3449_v29 }
 0x426   :  { %4462 = vmax.xlane.f32.xlu1 %v4461_v7  ;;  %v3672_v23 = vpop.f32.mrf.mxu1 }
 0x428   :  { %v3626_v28 = vpop.f32.mrf.mxu3  ;;  %v3496_v17 = vpop.f32.mrf.mxu2 }
 0x429   :  { %v3497_v22 = vadd.f32 %v3496_v17, %v3473_v9 }
 0x42b   :  { %v3519_v0 = vadd.f32 %v3518_v13, %v3497_v22 }
 0x42c   :  { %v3756_v3 = vpop.f32.mrf.mxu0 }
 0x42d   :  { %v4446_v50 = vmul.f32 0.35355338, %v3519_v0 }
 0x42e   :  { %v3780_v53 = vpop.f32.mrf.mxu1 }
 0x42f   :  { %v14420_v42 = vadd.f32 %v13412_v14, %v4446_v50  ;;  %v13413_v50 = vld [vmem:[%s16367_s1 + $0x2] ss:$0 sm:$0xff] }
 0x430   :  { %v3732_v36 = vpop.f32.mrf.mxu3  ;;  %v3602_v51 = vpop.f32.mrf.mxu2 }
 0x431   :  { %v3603_v12 = vadd.f32 %v3602_v51, %v3579_v8  ;;  %v4464_v29 = vsel %vm543_vm1, %v14420_v42, -inf }
 0x432   :  { %4465 = vmax.xlane.f32.xlu2 %v4464_v29 }
 0x433   :  { %v3627_v60 = vadd.f32 %v3626_v28, %v3603_v12 }
 0x434   :  { %v3860_v17 = vpop.f32.mrf.mxu0 }
 0x435   :  { %v3651_v7 = vadd.f32 %v3650_v30, %v3627_v60 }
 0x436   :  { %v3886_v8 = vpop.f32.mrf.mxu1 }
 0x437   :  { %v3673_v9 = vadd.f32 %v3672_v23, %v3651_v7 }
 0x438   :  { %v3826_v13 = vpop.f32.mrf.mxu3  ;;  %v3706_v4 = vpop.f32.mrf.mxu2 }
 0x439   :  { %v3733_v54 = vadd.f32 %v3732_v36, %v3706_v4  ;;  %v4447_v22 = vmul.f32 0.35355338, %v3673_v9  ;;  %v13414_v9 = vld [vmem:[%s16367_s1 + $0x3] ss:$0 sm:$0xff] }
 0x43b   :  { %v3757_v0 = vadd.f32 %v3756_v3, %v3733_v54  ;;  %v14427_v14 = vadd.f32 %v13413_v50, %v4447_v22  ;;  %v3887_v3 = vadd.f32 %v3886_v8, %v3860_v17 }
 0x43c   :  { %v3958_v29 = vpop.f32.mrf.mxu0 }
 0x43d   :  { %v4467_v51 = vsel %vm543_vm1, %v14427_v14, -inf  ;;  %v3781_v28 = vadd.f32 %v3780_v53, %v3757_v0 }
 0x43e   :  { %4468 = vmax.xlane.f32.xlu0 %v4467_v51  ;;  %v3980_v7 = vpop.f32.mrf.mxu1 }
 0x440   :  { %v3804_v30 = vpop.f32.mrf.mxu2  ;;  %v3934_v12 = vpop.f32.mrf.mxu3 }
 0x441   :  { %v3805_v23 = vadd.f32 %v3804_v30, %v3781_v28 }
 0x443   :  { %v3827_v60 = vadd.f32 %v3826_v13, %v3805_v23 }
 0x444   :  { %v4064_v51 = vpop.f32.mrf.mxu0 }
 0x445   :  { %v4448_v36 = vmul.f32 0.35355338, %v3827_v60 }
 0x446   :  { %v4088_v30 = vpop.f32.mrf.mxu1 }
 0x447   :  { %v14434_v4 = vadd.f32 %v13414_v9, %v4448_v36  ;;  %v13415_v36 = vld [vmem:[%s16367_s1 + $0x4] ss:$0 sm:$0xff] }
 0x448   :  { %v3910_v54 = vpop.f32.mrf.mxu2  ;;  %v4040_v53 = vpop.f32.mrf.mxu3 }
 0x449   :  { %v3911_v22 = vadd.f32 %v3910_v54, %v3887_v3  ;;  %v4470_v50 = vsel %vm543_vm1, %v14434_v4, -inf }
 0x44a   :  { %4471 = vmax.xlane.f32.xlu1 %v4470_v50 }
 0x44b   :  { %v3935_v0 = vadd.f32 %v3934_v12, %v3911_v22 }
 0x44c   :  { %v4168_v50 = vpop.f32.mrf.mxu0 }
 0x44d   :  { %v3959_v28 = vadd.f32 %v3958_v29, %v3935_v0 }
 0x44e   :  { %v4194_v22 = vpop.f32.mrf.mxu1 }
 0x44f   :  { %v3981_v13 = vadd.f32 %v3980_v7, %v3959_v28 }
 0x450   :  { %v4014_v23 = vpop.f32.mrf.mxu2  ;;  %v4134_v3 = vpop.f32.mrf.mxu3 }
 0x451   :  { %v4041_v17 = vadd.f32 %v4040_v53, %v4014_v23  ;;  %v4449_v8 = vmul.f32 0.35355338, %v3981_v13  ;;  %v13416_v13 = vld [vmem:[%s16367_s1 + $0x5] ss:$0 sm:$0xff] }
 0x453   :  { %v4065_v60 = vadd.f32 %v4064_v51, %v4041_v17  ;;  %v14441_v9 = vadd.f32 %v13415_v36, %v4449_v8  ;;  %v4195_v51 = vadd.f32 %v4194_v22, %v4168_v50 }
 0x454   :  { %v4266_v17 = vpop.f32.mrf.mxu0 }
 0x455   :  { %v4473_v54 = vsel %vm543_vm1, %v14441_v9, -inf  ;;  %v4089_v12 = vadd.f32 %v4088_v30, %v4065_v60 }
 0x456   :  { %4474 = vmax.xlane.f32.xlu2 %v4473_v54  ;;  %v4288_v60 = vpop.f32.mrf.mxu1 }
 0x458   :  { %v4112_v29 = vpop.f32.mrf.mxu2  ;;  %v4242_v28 = vpop.f32.mrf.mxu3 }
 0x459   :  { %v4113_v7 = vadd.f32 %v4112_v29, %v4089_v12 }
 0x45b   :  { %v4135_v0 = vadd.f32 %v4134_v3, %v4113_v7 }
 0x45d   :  { %v4450_v53 = vmul.f32 0.35355338, %v4135_v0  ;;  %v4372_v0 = vpop.f32.mrf.mxu0 }
 0x45f   :  { %v14448_v23 = vadd.f32 %v13416_v13, %v4450_v53  ;;  %v13417_v53 = vld [vmem:[%s16367_s1 + $0x6] ss:$0 sm:$0xff] }
 0x460   :  { %v4218_v8 = vpop.f32.mrf.mxu2  ;;  %v4348_v29 = vpop.f32.mrf.mxu3 }
 0x461   :  { %v4219_v36 = vadd.f32 %v4218_v8, %v4195_v51  ;;  %v4476_v54 = vsel %vm543_vm1, %v14448_v23, -inf  ;;  %v4396_v8 = vpop.f32.mrf.mxu1 }
 0x462   :  { %4477 = vmax.xlane.f32.xlu1 %v4476_v54 }
 0x463   :  { %v4243_v30 = vadd.f32 %v4242_v28, %v4219_v36 }
 0x465   :  { %v4267_v12 = vadd.f32 %v4266_v17, %v4243_v30 }
 0x467   :  { %v4289_v3 = vadd.f32 %v4288_v60, %v4267_v12  ;;  %v13418_v12 = vld [vmem:[%s16367_s1 + $0x7] ss:$0 sm:$0xff] }
 0x468   :  { %v4322_v7 = vpop.f32.mrf.mxu2  ;;  %v4442_v54 = vpop.f32.mrf.mxu3 }
 0x469   :  { %v4349_v50 = vadd.f32 %v4348_v29, %v4322_v7  ;;  %v4451_v22 = vmul.f32 0.35355338, %v4289_v3 }
 0x46b   :  { %v4373_v61 = vadd.f32 %v4372_v0, %v4349_v50  ;;  %v14455_v13 = vadd.f32 %v13417_v53, %v4451_v22 }
 0x46d   :  { %v4479_v51 = vsel %vm543_vm1, %v14455_v13, -inf  ;;  %v4397_v28 = vadd.f32 %v4396_v8, %v4373_v61 }
 0x46e   :  { %4805 = vrot.lane.b32.xlu2 %v13813_v57, %s13529_s20  ;;  %4480 = vmax.xlane.f32.xlu0 %v4479_v51 }
 0x470   :  { %v4420_v17 = vpop.f32.mrf.mxu2 }
 0x471   :  { %v4421_v36 = vadd.f32 %v4420_v17, %v4397_v28 }
 0x473   :  { %v4443_v30 = vadd.f32 %v4442_v54, %v4421_v36 }
 0x475   :  { %v4452_v60 = vmul.f32 0.35355338, %v4443_v30 }
 0x477   :  { %v14464_v3 = vadd.f32 %v13418_v12, %v4452_v60 }
 0x479   :  { %v4482_v29 = vsel %vm543_vm1, %v14464_v3, -inf }
 0x47a   :  { %4483 = vmax.xlane.f32.xlu0 %v4482_v29 }
 0x47b   :  { %4653 = vrot.lane.b32.xlu1 %v13808_v47, %s13529_s20 }
 0x499   :  { %v4463_v7 = vpop.xlane.xlu1 %4462 }
 0x49a   :  { %v4485_v61 = vsub.f32 %v14413_v62, %v4463_v7 }
 0x49c   :  { %v4493_v50 = vmul.f32 1.442695, %v4485_v61 }
 0x49e   :  { %13281 = vpow2.f32 %v4493_v50 }
 0x4a4   :  { %v14471_v22 = vpop.eup %13281 }
 0x4a5   :  { %v4466_v0 = vpop.xlane.xlu2 %4465  ;;  %v4509_v53 = vsel %vm543_vm1, %v14471_v22, 0.0 }
 0x4a6   :  { %v4486_v51 = vsub.f32 %v14420_v42, %v4466_v0  ;;  %4510 = vadd.xlane.f32.xlu0 %v4509_v53 }
 0x4a8   :  { %v4495_v8 = vmul.f32 1.442695, %v4486_v51 }
 0x4aa   :  { %13283 = vpow2.f32 %v4495_v8 }
 0x4b0   :  { %v14476_v28 = vpop.eup %13283 }
 0x4b1   :  { %v4469_v17 = vpop.xlane.xlu0 %4468  ;;  %v4512_v36 = vsel %vm543_vm1, %v14476_v28, 0.0 }
 0x4b2   :  { %v4487_v62 = vsub.f32 %v14427_v14, %v4469_v17  ;;  %4513 = vadd.xlane.f32.xlu2 %v4512_v36 }
 0x4b4   :  { %v4497_v54 = vmul.f32 1.442695, %v4487_v62 }
 0x4b6   :  { %13285 = vpow2.f32 %v4497_v54 }
 0x4bc   :  { %v14481_v30 = vpop.eup %13285 }
 0x4bd   :  { %v4472_v60 = vpop.xlane.xlu1 %4471  ;;  %v4515_v42 = vsel %vm543_vm1, %v14481_v30, 0.0 }
 0x4be   :  { %v4488_v12 = vsub.f32 %v14434_v4, %v4472_v60  ;;  %4516 = vadd.xlane.f32.xlu2 %v4515_v42 }
 0x4c0   :  { %v4499_v29 = vmul.f32 1.442695, %v4488_v12 }
 0x4c2   :  { %13287 = vpow2.f32 %v4499_v29 }
 0x4c8   :  { %v14486_v7 = vpop.eup %13287 }
 0x4c9   :  { %v4475_v61 = vpop.xlane.xlu2 %4474  ;;  %v4518_v14 = vsel %vm543_vm1, %v14486_v7, 0.0 }
 0x4ca   :  { %v4489_v50 = vsub.f32 %v14441_v9, %v4475_v61  ;;  %4519 = vadd.xlane.f32.xlu0 %v4518_v14 }
 0x4cc   :  { %v4501_v0 = vmul.f32 1.442695, %v4489_v50 }
 0x4ce   :  { %13289 = vpow2.f32 %v4501_v0 }
 0x4d1   :  { %v4806_v4 = vpop.permute.xlu2 %4805 }
 0x4d2   :  { %v14501_v9 = vand.u32 4294901760, %v4806_v4 }
 0x4d4   :  { %v14491_v53 = vpop.eup %13289  ;;  %v14504_v8 = vsub.f32 %v4806_v4, %v14501_v9 }
 0x4d5   :  { %v4521_v51 = vsel %vm543_vm1, %v14491_v53, 0.0  ;;  %v4478_v17 = vpop.xlane.xlu1 %4477 }
 0x4d6   :  { %5109 = vrot.lane.b32.xlu2 %v13823_v16, %s13529_s20  ;;  %4522 = vadd.xlane.f32.xlu1 %v4521_v51  ;;  %v16382_v36 = vand.u32 4294901760, %v14504_v8  ;;  %v4490_v0 = vsub.f32 %v14448_v23, %v4478_v17 }
 0x4d8   :  { %v4855_v62 = vsub.f32 %v14504_v8, %v16382_v36 }
 0x4da   :  { %v4856_v42 = vand.u32 4294901760, %v4855_v62  ;;  %v4503_v62 = vmul.f32 1.442695, %v4490_v0 }
 0x4de   :  { %4957 = vrot.lane.b32.xlu0 %v13818_v6, %s13529_s20  ;;  %5261 = vrot.lane.b32.xlu2 %v13830_v26, %s13529_s20 }
 0x4e1   :  { %v4481_v29 = vpop.xlane.xlu0 %4480 }
 0x4e2   :  { %v4491_v50 = vsub.f32 %v14455_v13, %v4481_v29 }
 0x4e4   :  { %v4505_v4 = vmul.f32 1.442695, %v4491_v50 }
 0x4e6   :  { %13291 = vpow2.f32 %v4505_v4 }
 0x4e7   :  { %13293 = vpow2.f32 %v4503_v62 }
 0x4ed   :  { %v4654_v54 = vpop.permute.xlu1 %4653 }
 0x4ee   :  { %v4674_v60 = vand.u32 4294901760, %v4654_v54 }
 0x4ef   :  { %5413 = vrot.lane.b32.xlu1 %v13837_v37, %s13529_s20 }
 0x4f0   :  { %v4701_v12 = vsub.f32 %v4654_v54, %v4674_v60  ;;  %4675 = vmatpush.msra.mxu0 %v4674_v60  ;;  %4751 = vmatpush.msra.mxu3 %v4674_v60  ;;  %v4484_v54 = vpop.xlane.xlu0 %4483 }
 0x4f2   :  { %4857 = vmatpush.msrb.mxu3 %v4856_v42  ;;  %4728 = vmatpush.msra.mxu2 %v4701_v12  ;;  %v4702_v61 = vand.u32 4294901760, %v4701_v12  ;;  %v4492_v42 = vsub.f32 %v14464_v3, %v4484_v54 }
 0x4f4   :  { %4827 = vmatpush.msrb.mxu2 %v14501_v9  ;;  %4777 = vmatpush.msrb.mxu0 %v4702_v61  ;;  %v4703_v14 = vsub.f32 %v4701_v12, %v4702_v61  ;;  %v4507_v13 = vmul.f32 1.442695, %v4492_v42  ;;  %v14520_v12 = vpop.eup %13291 }
 0x4f5   :  { %v14522_v23 = vpop.eup %13293  ;;  %v4527_v17 = vsel %vm543_vm1, %v14520_v12, 0.0 }
 0x4f6   :  { %v4704_v51 = vand.u32 4294901760, %v4703_v14  ;;  %13295 = vpow2.f32 %v4507_v13  ;;  %v4524_v3 = vsel %vm543_vm1, %v14522_v23, 0.0 }
 0x4f7   :  { %5717 = vrot.lane.b32.xlu1 %v13848_v52, %s13529_s20 }
 0x4f8   :  { %4705 = vmatpush.msra.mxu1 %v4704_v51 }
 0x4fa   :  { %4799 = vmatpush.msrb.mxu1 %v4674_v60 }
 0x4fc   :  { %v14530_v60 = vpop.eup %13295 }
 0x4fd   :  { %v4530_v29 = vsel %vm543_vm1, %v14530_v60, 0.0 }
 0x4ff   :  { %5869 = vrot.lane.b32.xlu1 %v13808_v47, %s13530_s22 }
 0x507   :  { %4528 = vadd.xlane.f32.xlu2 %v4527_v17  ;;  %6025 = vrot.lane.b32.xlu1 %v13813_v57, %s13531_s23 }
 0x508   :  { %4525 = vadd.xlane.f32.xlu0 %v4524_v3 }
 0x50f   :  { %6179 = vrot.lane.b32.xlu1 %v13818_v6, %s13531_s23 }
 0x510   :  { %4531 = vadd.xlane.f32.xlu0 %v4530_v29 }
 0x517   :  { %6331 = vrot.lane.b32.xlu1 %v13823_v16, %s13530_s22 }
 0x519   :  { %v4511_v61 = vpop.xlane.xlu0 %4510 }
 0x51a   :  { %13297 = vrcp.f32 %v4511_v61  ;;  %v4544_v51 = vand.u32 2147483648, %v4511_v61  ;;  %v4542_v62 = vand.u32 2147483647, %v4511_v61  ;;  %vm4538_vm7 = vweird.f32 %v4511_v61 }
 0x51c   :  { %v4545_v13 = vor.u32 1.1754944e-38, %v4544_v51  ;;  %vm4543_vm9 = vcmp.eq.f32.partialorder %v4542_v62, 8.507059e+37 }
 0x51f   :  { %5871 = vrot.lane.b32.xlu2 %v13808_v47, %s13531_s23  ;;  %6641 = vrot.lane.b32.xlu1 %v13837_v37, %s13531_s23 }
 0x520   :  { %v13298_v14 = vpop.eup %13297 }
 0x521   :  { %v4534_v50 = vmul.f32 %v13298_v14, %v4511_v61  ;;  %vm4539_vm6 = vweird.f32 %v13298_v14 }
 0x522   :  { %vm4540_vm8 = vmor %vm4538_vm7, %vm4539_vm6 }
 0x523   :  { %v4535_v0 = vsub.f32 1.0, %v4534_v50 }
 0x524   :  { %5565 = vrot.lane.b32.xlu0 %v13844_v45, %s13529_s20 }
 0x525   :  { %v4536_v4 = vmul.f32 %v13298_v14, %v4535_v0  ;;  %v4514_v54 = vpop.xlane.xlu2 %4513 }
 0x526   :  { %13299 = vrcp.f32 %v4514_v54  ;;  %v4559_v63 = vand.u32 2147483648, %v4514_v54  ;;  %v4557_v62 = vand.u32 2147483647, %v4514_v54  ;;  %vm4553_vm11 = vweird.f32 %v4514_v54 }
 0x527   :  { %v4537_v42 = vadd.f32 %v13298_v14, %v4536_v4  ;;  %6177 = vrot.lane.b32.xlu2 %v13818_v6, %s13530_s22  ;;  %6793 = vrot.lane.b32.xlu1 %v13844_v45, %s13530_s22 }
 0x528   :  { %vm4558_vm13 = vcmp.eq.f32.partialorder %v4557_v62, 8.507059e+37 }
 0x529   :  { %v4541_v17 = vsel %vm4540_vm8, %v13298_v14, %v4537_v42 }
 0x52a   :  { %v4546_v3 = vsel %vm4543_vm9, %v4545_v13, %v4541_v17  ;;  %v16434_v13 = vand.u32 4294901760, %v14504_v8 }
 0x52b   :  { %v4547_v29 = vmul.f32 %v14471_v22, %v4546_v3  ;;  %v4560_v3 = vor.u32 1.1754944e-38, %v4559_v63 }
 0x52c   :  { %v13300_v50 = vpop.eup %13299  ;;  %6023 = vrot.lane.b32.xlu0 %v13813_v57, %s13530_s22 }
 0x52d   :  { %v4549_v0 = vmul.f32 %v13300_v50, %v4514_v54  ;;  %v4657_v61 = vsel %vm543_vm1, %v4547_v29, 0  ;;  %vm4554_vm10 = vweird.f32 %v13300_v50 }
 0x52e   :  { %v4676_v4 = vand.u32 4294901760, %v4657_v61  ;;  %vm4555_vm12 = vmor %vm4553_vm11, %vm4554_vm10 }
 0x52f   :  { %v4550_v36 = vsub.f32 1.0, %v4549_v0  ;;  %6487 = vrot.lane.b32.xlu2 %v13830_v26, %s13531_s23 }
 0x530   :  { %4707 = vmatmul.f32.vlgmr.msra.gmra.mxu1 %v4676_v4  ;;  %v4677_v51 = vsub.f32 %v4657_v61, %v4676_v4 }
 0x531   :  { %v4551_v14 = vmul.f32 %v13300_v50, %v4550_v36  ;;  %4903 = vmatpush.msra.mxu1 %v14501_v9  ;;  %v4517_v22 = vpop.xlane.xlu2 %4516 }
 0x532   :  { %13301 = vrcp.f32 %v4517_v22  ;;  %4731 = vmatmul.f32.vlgmr.msra.gmra.mxu2 %v4677_v51  ;;  %v4678_v17 = vand.u32 4294901760, %v4677_v51  ;;  %vm4568_vm15 = vweird.f32 %v4517_v22 }
 0x533   :  { %v4552_v42 = vadd.f32 %v13300_v50, %v4551_v14  ;;  %4929 = vmatpush.msra.mxu2 %v16434_v13 }
 0x534   :  { %6333 = vrot.lane.b32.xlu0 %v13823_v16, %s13531_s23  ;;  %4755 = vmatmul.f32.vlgmr.msra.gmra.mxu3 %v4678_v17  ;;  %v4679_v36 = vsub.f32 %v4677_v51, %v4678_v17  ;;  %v4574_v51 = vand.u32 2147483648, %v4517_v22  ;;  %v4572_v17 = vand.u32 2147483647, %v4517_v22 }
 0x535   :  { %v4556_v29 = vsel %vm4555_vm12, %v13300_v50, %v4552_v42  ;;  %4951 = vmatpush.msra.mxu3 %v14501_v9 }
 0x536   :  { %v4561_v0 = vsel %vm4558_vm13, %v4560_v3, %v4556_v29  ;;  %v4680_v54 = vand.u32 4294901760, %v4679_v36  ;;  %vm4573_vm3 = vcmp.eq.f32.partialorder %v4572_v17, 8.507059e+37 }
 0x537   :  { %6639 = vrot.lane.b32.xlu2 %v13837_v37, %s13530_s22  ;;  %v4562_v61 = vmul.f32 %v14476_v28, %v4561_v0 }
 0x538   :  { %v13302_v14 = vpop.eup %13301  ;;  %4801 = vmatmul.f32.vlgmr.msrb.gmra.mxu1 %v4676_v4  ;;  %4681 = vmatmul.f32.vlgmr.msra.gmra.mxu0 %v4680_v54 }
 0x539   :  { %v4564_v13 = vmul.f32 %v13302_v14, %v4517_v22  ;;  %v4809_v63 = vsel %vm543_vm1, %v4562_v61, 0  ;;  %4880 = vmatpush.msra.mxu0 %v14504_v8  ;;  %vm4569_vm14 = vweird.f32 %v13302_v14  ;;  %v4575_v8 = vor.u32 1.1754944e-38, %v4574_v51  ;;  %v5110_v36 = vpop.permute.xlu2 %5109 }
 0x53a   :  { %v4828_v50 = vand.u32 4294901760, %v4809_v63  ;;  %vm4570_vm2 = vmor %vm4568_vm15, %vm4569_vm14 }
 0x53b   :  { %v4565_v62 = vsub.f32 1.0, %v4564_v13 }
 0x53c   :  { %6485 = vrot.lane.b32.xlu0 %v13830_v26, %s13530_s22  ;;  %v4829_v9 = vsub.f32 %v4809_v63, %v4828_v50  ;;  %4859 = vmatmul.f32.vlgmr.msrb.gmra.mxu3 %v4828_v50  ;;  %v14570_v63 = vand.u32 4294901760, %v5110_v36 }
 0x53d   :  { %v4566_v42 = vmul.f32 %v13302_v14, %v4565_v62  ;;  %v4520_v28 = vpop.xlane.xlu0 %4519 }
 0x53e   :  { %13303 = vrcp.f32 %v4520_v28  ;;  %v4830_v29 = vand.u32 4294901760, %v4829_v9  ;;  %v4589_v17 = vand.u32 2147483648, %v4520_v28  ;;  %vm4583_vm5 = vweird.f32 %v4520_v28 }
 0x53f   :  { %v4567_v3 = vadd.f32 %v13302_v14, %v4566_v42  ;;  %6949 = vrot.lane.b32.xlu2 %v13848_v52, %s13531_s23 }
 0x540   :  { %4779 = vmatmul.f32.vlgmr.msrb.gmra.mxu0 %v4676_v4  ;;  %4907 = vmatmul.f32.vlgmr.msra.gmra.mxu1 %v4830_v29  ;;  %v4831_v54 = vsub.f32 %v4829_v9, %v4830_v29  ;;  %v5157_v4 = vsub.f32 %v5110_v36, %v14570_v63  ;;  %v4587_v29 = vand.u32 2147483647, %v4520_v28 }
 0x541   :  { %v4571_v0 = vsel %vm4570_vm2, %v13302_v14, %v4567_v3  ;;  %v5262_v24 = vpop.permute.xlu2 %5261 }
 0x542   :  { %v4576_v61 = vsel %vm4573_vm3, %v4575_v8, %v4571_v0  ;;  %v4832_v62 = vand.u32 4294901760, %v4831_v54  ;;  %v5158_v0 = vand.u32 4294901760, %v5157_v4  ;;  %vm4588_vm7 = vcmp.eq.f32.partialorder %v4587_v29, 8.507059e+37 }
 0x543   :  { %v4577_v13 = vmul.f32 %v14481_v30, %v4576_v61  ;;  %v14585_v48 = vand.u32 4294901760, %v5262_v24 }
 0x544   :  { %v13304_v42 = vpop.eup %13303  ;;  %6795 = vrot.lane.b32.xlu0 %v13844_v45, %s13531_s23  ;;  %4833 = vmatmul.f32.vlgmr.msrb.gmra.mxu2 %v4832_v62  ;;  %s13533_s23 = smov 104  }
 0x545   :  { %v4961_v22 = vsel %vm543_vm1, %v4577_v13, 0  ;;  %v4579_v2 = vmul.f32 %v13304_v42, %v4520_v28  ;;  %4953 = vmatmul.f32.vlgmr.msra.gmra.mxu3 %v4828_v50  ;;  %vm4584_vm4 = vweird.f32 %v13304_v42  ;;  %v4590_v13 = vor.u32 1.1754944e-38, %v4589_v17 }
 0x546   :  { %v14575_v14 = vand.u32 4294901760, %v4961_v22  ;;  %vm4585_vm6 = vmor %vm4583_vm5, %vm4584_vm4 }
 0x547   :  { %v4580_v51 = vsub.f32 1.0, %v4579_v2 }
 0x548   :  { %v4981_v30 = vsub.f32 %v4961_v22, %v14575_v14  ;;  %4883 = vmatmul.f32.vlgmr.msra.gmra.mxu0 %v4829_v9  ;;  %v5159_v22 = vsub.f32 %v5157_v4, %v5158_v0 }
 0x549   :  { %v4581_v3 = vmul.f32 %v13304_v42, %v4580_v51  ;;  %v4523_v8 = vpop.xlane.xlu1 %4522 }
 0x54a   :  { %13305 = vrcp.f32 %v4523_v8  ;;  %v4982_v61 = vand.u32 4294901760, %v4981_v30  ;;  %vm4598_vm9 = vweird.f32 %v4523_v8 }
 0x54b   :  { %v4582_v54 = vadd.f32 %v13304_v42, %v4581_v3 }
 0x54c   :  { %6947 = vrot.lane.b32.xlu0 %v13848_v52, %s13530_s22  ;;  %4931 = vmatmul.f32.vlgmr.msra.gmra.mxu2 %v4828_v50  ;;  %v4983_v62 = vsub.f32 %v4981_v30, %v4982_v61  ;;  %v5160_v50 = vand.u32 4294901760, %v5159_v22 }
 0x54d   :  { %v4586_v36 = vsel %vm4585_vm6, %v13304_v42, %v4582_v54  ;;  %v4604_v54 = vand.u32 2147483648, %v4523_v8 }
 0x54e   :  { %v4591_v2 = vsel %vm4588_vm7, %v4590_v13, %v4586_v36  ;;  %v4984_v1 = vand.u32 4294901760, %v4983_v62  ;;  %v4602_v36 = vand.u32 2147483647, %v4523_v8 }
 0x54f   :  { %v4592_v51 = vmul.f32 %v14486_v7, %v4591_v2 }
 0x550   :  { %v13306_v9 = vpop.eup %13305  ;;  %v4958_v32 = vpop.permute.xlu0 %4957  ;;  %vm4603_vm11 = vcmp.eq.f32.partialorder %v4602_v36, 8.507059e+37 }
 0x551   :  { %v4594_v55 = vmul.f32 %v13306_v9, %v4523_v8  ;;  %v4978_v3 = vand.u32 4294901760, %v4958_v32  ;;  %v5113_v28 = vsel %vm543_vm1, %v4592_v51, 0  ;;  %vm4599_vm8 = vweird.f32 %v13306_v9 }
 0x552   :  { %v14583_v17 = vand.u32 4294901760, %v5113_v28  ;;  %vm4600_vm10 = vmor %vm4598_vm9, %vm4599_vm8 }
 0x553   :  { %v4595_v42 = vsub.f32 1.0, %v4594_v55  ;;  %v5005_v29 = vsub.f32 %v4958_v32, %v4978_v3  ;;  %4979 = vmatpush.msrb.mxu0 %v4978_v3  ;;  %5055 = vmatpush.msrb.mxu3 %v4978_v3  ;;  %v5309_v32 = vsub.f32 %v5262_v24, %v14585_v48 }
 0x554   :  { %4985 = vmatmul.f32.vlgmr.msrb.gmra.mxu0 %v4984_v1  ;;  %5059 = vmatmul.f32.vlgmr.msrb.gmra.mxu3 %v4982_v61  ;;  %v5133_v7 = vsub.f32 %v5113_v28, %v14583_v17  ;;  %v4605_v61 = vor.u32 1.1754944e-38, %v4604_v54 }
 0x555   :  { %v4596_v13 = vmul.f32 %v13306_v9, %v4595_v42  ;;  %5161 = vmatpush.msra.mxu3 %v5160_v50  ;;  %5032 = vmatpush.msrb.mxu2 %v5005_v29  ;;  %v5006_v2 = vand.u32 4294901760, %v5005_v29  ;;  %v5310_v50 = vand.u32 4294901760, %v5309_v32 }
 0x556   :  { %5035 = vmatmul.f32.vlgmr.msrb.gmra.mxu2 %v4981_v30  ;;  %v5134_v62 = vand.u32 4294901760, %v5133_v7 }
 0x557   :  { %5255 = vmatpush.msrb.mxu3 %v14570_v63  ;;  %v4597_v55 = vadd.f32 %v13306_v9, %v4596_v13  ;;  %5131 = vmatpush.msra.mxu2 %v14570_v63  ;;  %v5007_v1 = vsub.f32 %v5005_v29, %v5006_v2 }
 0x558   :  { %5081 = vmatpush.msra.mxu0 %v5006_v2  ;;  %v5135_v28 = vsub.f32 %v5133_v7, %v5134_v62 }
 0x559   :  { %5233 = vmatpush.msrb.mxu2 %v5158_v0  ;;  %v4601_v22 = vsel %vm4600_vm10, %v13306_v9, %v4597_v55  ;;  %v5008_v51 = vand.u32 4294901760, %v5007_v1 }
 0x55a   :  { %5184 = vmatpush.msrb.mxu0 %v5157_v4  ;;  %v4606_v42 = vsel %vm4603_vm11, %v4605_v61, %v4601_v22  ;;  %v5136_v8 = vand.u32 4294901760, %v5135_v28 }
 0x55b   :  { %v4607_v30 = vmul.f32 %v14491_v53, %v4606_v42  ;;  %5009 = vmatpush.msrb.mxu1 %v5008_v51  ;;  %v5311_v53 = vsub.f32 %v5309_v32, %v5310_v50 }
 0x55c   :  { %5011 = vmatmul.f32.vlgmr.msrb.gmra.mxu1 %v14575_v14  ;;  %5083 = vmatmul.f32.vlgmr.msra.gmra.mxu0 %v14575_v14 }
 0x55d   :  { %v5265_v24 = vsel %vm543_vm1, %v4607_v30, 0  ;;  %5103 = vmatpush.msra.mxu1 %v4978_v3  ;;  %5163 = vmatmul.f32.vlgmr.msra.gmra.mxu3 %v14583_v17  ;;  %v5312_v13 = vand.u32 4294901760, %v5311_v53 }
 0x55e   :  { %v5284_v4 = vand.u32 4294901760, %v5265_v24  ;;  %5283 = vmatpush.msra.mxu0 %v14585_v48  ;;  %5359 = vmatpush.msra.mxu3 %v14585_v48 }
 0x55f   :  { %5207 = vmatpush.msrb.mxu1 %v14570_v63  ;;  %5137 = vmatmul.f32.vlgmr.msra.gmra.mxu2 %v5136_v8 }
 0x560   :  { %5336 = vmatpush.msra.mxu2 %v5309_v32  ;;  %v5285_v0 = vsub.f32 %v5265_v24, %v5284_v4 }
 0x561   :  { %v5414_v9 = vpop.permute.xlu1 %5413 }
 0x562   :  { %v5434_v29 = vand.u32 4294901760, %v5414_v9  ;;  %v5286_v54 = vand.u32 4294901760, %v5285_v0 }
 0x564   :  { %v5461_v36 = vsub.f32 %v5414_v9, %v5434_v29  ;;  %5105 = vmatmul.f32.vlgmr.msra.gmra.mxu1 %v14575_v14  ;;  %5187 = vmatmul.f32.vlgmr.msrb.gmra.mxu0 %v5133_v7  ;;  %v5287_v2 = vsub.f32 %v5285_v0, %v5286_v54 }
 0x565   :  { %5257 = vmatmul.f32.vlgmr.msrb.gmra.mxu3 %v14583_v17  ;;  %5313 = vmatpush.msra.mxu1 %v5312_v13 }
 0x566   :  { %v5462_v3 = vand.u32 4294901760, %v5461_v36  ;;  %5385 = vmatpush.msrb.mxu0 %v5310_v50  ;;  %v5288_v32 = vand.u32 4294901760, %v5287_v2 }
 0x567   :  { %5235 = vmatmul.f32.vlgmr.msrb.gmra.mxu2 %v14583_v17 }
 0x568   :  { %5435 = vmatpush.msrb.mxu2 %v5434_v29  ;;  %v5463_v63 = vsub.f32 %v5461_v36, %v5462_v3 }
 0x569   :  { %v5718_v42 = vpop.permute.xlu1 %5717 }
 0x56a   :  { %v5464_v55 = vand.u32 4294901760, %v5463_v63 }
 0x56c   :  { %5211 = vmatmul.f32.vlgmr.msrb.gmra.mxu1 %v5134_v62  ;;  %5289 = vmatmul.f32.vlgmr.msra.gmra.mxu0 %v5288_v32 }
 0x56d   :  { %5363 = vmatmul.f32.vlgmr.msra.gmra.mxu3 %v5286_v54  ;;  %5407 = vmatpush.msrb.mxu1 %v14585_v48 }
 0x56e   :  { %5465 = vmatpush.msrb.mxu3 %v5464_v55  ;;  %5488 = vmatpush.msra.mxu0 %v5461_v36 }
 0x56f   :  { %5339 = vmatmul.f32.vlgmr.msra.gmra.mxu2 %v5285_v0 }
 0x570   :  { %5559 = vmatpush.msra.mxu3 %v5434_v29  ;;  %5537 = vmatpush.msra.mxu2 %v5462_v3 }
 0x574   :  { %5315 = vmatmul.f32.vlgmr.msra.gmra.mxu1 %v5284_v4  ;;  %5387 = vmatmul.f32.vlgmr.msrb.gmra.mxu0 %v5284_v4 }
 0x575   :  { %5511 = vmatpush.msra.mxu1 %v5434_v29 }
 0x57a   :  { %v4529_v14 = vpop.xlane.xlu2 %4528 }
 0x57b   :  { %13307 = vrcp.f32 %v4529_v14  ;;  %v4526_v17 = vpop.xlane.xlu0 %4525  ;;  %v4634_v48 = vand.u32 2147483648, %v4529_v14  ;;  %v4632_v30 = vand.u32 2147483647, %v4529_v14  ;;  %vm4628_vm14 = vweird.f32 %v4529_v14 }
 0x57c   :  { %13309 = vrcp.f32 %v4526_v17  ;;  %5409 = vmatmul.f32.vlgmr.msrb.gmra.mxu1 %v5284_v4  ;;  %v4619_v24 = vand.u32 2147483648, %v4526_v17  ;;  %v4617_v53 = vand.u32 2147483647, %v4526_v17  ;;  %v14603_v4 = vand.u32 4294901760, %v5718_v42 }
 0x57d   :  { %v4635_v9 = vor.u32 1.1754944e-38, %v4634_v48  ;;  %vm4613_vm2 = vweird.f32 %v4526_v17  ;;  %vm4633_vm3 = vcmp.eq.f32.partialorder %v4632_v30, 8.507059e+37 }
 0x57e   :  { %v4620_v36 = vor.u32 1.1754944e-38, %v4619_v24  ;;  %vm4618_vm5 = vcmp.eq.f32.partialorder %v4617_v53, 8.507059e+37 }
 0x581   :  { %v13308_v7 = vpop.eup %13307 }
 0x582   :  { %v13310_v1 = vpop.eup %13309  ;;  %v4624_v62 = vmul.f32 %v13308_v7, %v4529_v14  ;;  %vm4629_vm12 = vweird.f32 %v13308_v7  ;;  %v14607_v14 = vsub.f32 %v5718_v42, %v14603_v4  ;;  %v5870_v42 = vpop.permute.xlu1 %5869 }
 0x583   :  { %v4609_v61 = vmul.f32 %v13310_v1, %v4526_v17  ;;  %v4532_v22 = vpop.xlane.xlu0 %4531  ;;  %vm4614_vm13 = vweird.f32 %v13310_v1  ;;  %vm4630_vm15 = vmor %vm4628_vm14, %vm4629_vm12  ;;  %v5872_v53 = vpop.permute.xlu2 %5871 }
 0x584   :  { %v4625_v51 = vsub.f32 1.0, %v4624_v62  ;;  %13311 = vrcp.f32 %v4532_v22  ;;  %vm4615_vm4 = vmor %vm4613_vm2, %vm4614_vm13  ;;  %vm4643_vm7 = vweird.f32 %v4532_v22 }
 0x585   :  { %v4610_v28 = vsub.f32 1.0, %v4609_v61 }
 0x586   :  { %v4626_v50 = vmul.f32 %v13308_v7, %v4625_v51 }
 0x587   :  { %v4611_v8 = vmul.f32 %v13310_v1, %v4610_v28 }
 0x588   :  { %v4627_v0 = vadd.f32 %v13308_v7, %v4626_v50  ;;  %v4647_v50 = vand.u32 2147483647, %v4532_v22 }
 0x589   :  { %v4612_v29 = vadd.f32 %v13310_v1, %v4611_v8 }
 0x58a   :  { %v13312_v54 = vpop.eup %13311  ;;  %v4631_v13 = vsel %vm4630_vm15, %v13308_v7, %v4627_v0  ;;  %vm4648_vm9 = vcmp.eq.f32.partialorder %v4647_v50, 8.507059e+37 }
 0x58b   :  { %v4636_v3 = vsel %vm4633_vm3, %v4635_v9, %v4631_v13  ;;  %v4616_v2 = vsel %vm4615_vm4, %v13310_v1, %v4612_v29  ;;  %v4639_v55 = vmul.f32 %v13312_v54, %v4532_v22  ;;  %vm4644_vm6 = vweird.f32 %v13312_v54 }
 0x58c   :  { %v4637_v63 = vmul.f32 %v14520_v12, %v4636_v3  ;;  %v4621_v32 = vsel %vm4618_vm5, %v4620_v36, %v4616_v2  ;;  %v4649_v1 = vand.u32 2147483648, %v4532_v22  ;;  %v5766_v12 = vand.u32 4294901760, %v14607_v14  ;;  %vm4645_vm8 = vmor %vm4643_vm7, %vm4644_vm6 }
 0x58d   :  { %v4622_v62 = vmul.f32 %v14522_v23, %v4621_v32  ;;  %v4640_v17 = vsub.f32 1.0, %v4639_v55 }
 0x58e   :  { %v5569_v61 = vsel %vm543_vm1, %v4637_v63, 0  ;;  %v4650_v9 = vor.u32 1.1754944e-38, %v4649_v1  ;;  %v5767_v13 = vsub.f32 %v14607_v14, %v5766_v12  ;;  %v5875_v63 = vsel %vm543_vm1, %v5872_v53, 0  ;;  %v6026_v1 = vpop.permute.xlu1 %6025 }
 0x58f   :  { %v14611_v51 = vand.u32 4294901760, %v5569_v61  ;;  %v5417_v7 = vsel %vm543_vm1, %v4622_v62, 0  ;;  %v4641_v48 = vmul.f32 %v13312_v54, %v4640_v17  ;;  %v5892_v17 = vand.u32 4294901760, %v5875_v63 }
 0x590   :  { %v5436_v28 = vand.u32 4294901760, %v5417_v7  ;;  %v5768_v62 = vand.u32 4294901760, %v5767_v13 }
 0x591   :  { %v14616_v30 = vsub.f32 %v5569_v61, %v14611_v51  ;;  %v4642_v24 = vadd.f32 %v13312_v54, %v4641_v48 }
 0x592   :  { %5467 = vmatmul.f32.vlgmr.msrb.gmra.mxu3 %v5436_v28  ;;  %v5437_v23 = vsub.f32 %v5417_v7, %v5436_v28 }
 0x593   :  { %v5590_v8 = vand.u32 4294901760, %v14616_v30  ;;  %v4646_v0 = vsel %vm4645_vm8, %v13312_v54, %v4642_v24 }
 0x594   :  { %5491 = vmatmul.f32.vlgmr.msra.gmra.mxu0 %v5437_v23  ;;  %v5438_v29 = vand.u32 4294901760, %v5437_v23  ;;  %v4651_v36 = vsel %vm4648_vm9, %v4650_v9, %v4646_v0  ;;  %v5873_v0 = vsel %vm543_vm1, %v5870_v42, 0 }
 0x595   :  { %v5591_v22 = vsub.f32 %v14616_v30, %v5590_v8  ;;  %v4652_v54 = vmul.f32 %v14530_v60, %v4651_v36  ;;  %v6029_v60 = vsel %vm543_vm1, %v6026_v1, 0  ;;  %v14630_v36 = vand.u32 4294901760, %v5873_v0 }
 0x596   :  { %v5566_v3 = vpop.permute.xlu0 %5565  ;;  %5515 = vmatmul.f32.vlgmr.msra.gmra.mxu1 %v5438_v29  ;;  %v5439_v2 = vsub.f32 %v5437_v23, %v5438_v29  ;;  %v5919_v23 = vsub.f32 %v5875_v63, %v5892_v17  ;;  %v6046_v29 = vand.u32 4294901760, %v6029_v60 }
 0x597   :  { %v5586_v32 = vand.u32 4294901760, %v5566_v3  ;;  %v5592_v7 = vand.u32 4294901760, %v5591_v22  ;;  %v5721_v24 = vsel %vm543_vm1, %v4652_v54, 0 }
 0x598   :  { %v5440_v55 = vand.u32 4294901760, %v5439_v2  ;;  %v5740_v9 = vand.u32 4294901760, %v5721_v24  ;;  %v5920_v13 = vand.u32 4294901760, %v5919_v23  ;;  %v14636_v42 = vsub.f32 %v6029_v60, %v6046_v29 }
 0x599   :  { %v5613_v61 = vsub.f32 %v5566_v3, %v5586_v32  ;;  %5587 = vmatpush.msrb.mxu0 %v5586_v32  ;;  %5663 = vmatpush.msrb.mxu3 %v5586_v32 }
 0x59a   :  { %5441 = vmatmul.f32.vlgmr.msrb.gmra.mxu2 %v5440_v55  ;;  %5561 = vmatmul.f32.vlgmr.msra.gmra.mxu3 %v5436_v28  ;;  %v5741_v3 = vsub.f32 %v5721_v24, %v5740_v9  ;;  %v5921_v2 = vsub.f32 %v5919_v23, %v5920_v13  ;;  %v6074_v63 = vand.u32 4294901760, %v14636_v42 }
 0x59b   :  { %v5614_v48 = vand.u32 4294901760, %v5613_v61  ;;  %5769 = vmatpush.msra.mxu3 %v5768_v62  ;;  %5640 = vmatpush.msrb.mxu2 %v5613_v61 }
 0x59c   :  { %5593 = vmatmul.f32.vlgmr.msrb.gmra.mxu0 %v5592_v7  ;;  %v5742_v22 = vand.u32 4294901760, %v5741_v3  ;;  %v6075_v54 = vsub.f32 %v14636_v42, %v6074_v63 }
 0x59d   :  { %v5615_v50 = vsub.f32 %v5613_v61, %v5614_v48  ;;  %5689 = vmatpush.msra.mxu0 %v5614_v48 }
 0x59e   :  { %v5743_v62 = vsub.f32 %v5741_v3, %v5742_v22 }
 0x59f   :  { %5792 = vmatpush.msrb.mxu0 %v14607_v14  ;;  %v5616_v53 = vand.u32 4294901760, %v5615_v50 }
 0x5a0   :  { %v5744_v48 = vand.u32 4294901760, %v5743_v62 }
 0x5a1   :  { %5617 = vmatpush.msrb.mxu1 %v5616_v53 }
 0x5a2   :  { %5539 = vmatmul.f32.vlgmr.msra.gmra.mxu2 %v5436_v28  ;;  %5619 = vmatmul.f32.vlgmr.msrb.gmra.mxu1 %v14611_v51  ;;  %v5895_v28 = vsub.f32 %v5873_v0, %v14630_v36 }
 0x5a3   :  { %5667 = vmatmul.f32.vlgmr.msrb.gmra.mxu3 %v5590_v8  ;;  %5711 = vmatpush.msra.mxu1 %v5586_v32  ;;  %v5922_v8 = vand.u32 4294901760, %v5921_v2  ;;  %v6024_v32 = vpop.permute.xlu0 %6023 }
 0x5a4   :  { %5739 = vmatpush.msra.mxu2 %v14603_v4  ;;  %5863 = vmatpush.msrb.mxu3 %v14603_v4  ;;  %v5896_v55 = vand.u32 4294901760, %v5895_v28  ;;  %v6027_v50 = vsel %vm543_vm1, %v6024_v32, 0 }
 0x5a5   :  { %5815 = vmatpush.msrb.mxu1 %v14603_v4  ;;  %5691 = vmatmul.f32.vlgmr.msra.gmra.mxu0 %v14611_v51  ;;  %v6180_v4 = vpop.permute.xlu1 %6179  ;;  %v6048_v0 = vand.u32 4294901760, %v6027_v50 }
 0x5a6   :  { %5893 = vmatpush.xpose.msra.mxu0 %v5892_v17  ;;  %v5897_v61 = vsub.f32 %v5895_v28, %v5896_v55  ;;  %v6183_v7 = vsel %vm543_vm1, %v6180_v4, 0 }
 0x5a7   :  { %v6200_v1 = vand.u32 4294901760, %v6183_v7 }
 0x5a9   :  { %v6227_v24 = vsub.f32 %v6183_v7, %v6200_v1 }
 0x5aa   :  { %5643 = vmatmul.f32.vlgmr.msrb.gmra.mxu2 %v14616_v30  ;;  %5713 = vmatmul.f32.vlgmr.msra.gmra.mxu1 %v14611_v51  ;;  %v6076_v30 = vand.u32 4294901760, %v6075_v54  ;;  %v5898_v51 = vand.u32 4294901760, %v5897_v61 }
 0x5ab   :  { %5771 = vmatmul.f32.vlgmr.msra.gmra.mxu3 %v5740_v9  ;;  %5841 = vmatpush.msrb.mxu2 %v5766_v12  ;;  %v6334_v14 = vpop.permute.xlu0 %6333  ;;  %v6178_v12 = vpop.permute.xlu2 %6177 }
 0x5ac   :  { %5923 = vmatpush.xpose.msra.mxu1 %v5922_v8  ;;  %5969 = vmatpush.xpose.msra.mxu3 %v5892_v17  ;;  %v6337_v60 = vsel %vm543_vm1, %v6334_v14, 0  ;;  %v6181_v53 = vsel %vm543_vm1, %v6178_v12, 0 }
 0x5ad   :  { %5795 = vmatmul.f32.vlgmr.msrb.gmra.mxu0 %v5741_v3  ;;  %v14650_v3 = vand.u32 4294901760, %v6337_v60  ;;  %v6332_v32 = vpop.permute.xlu1 %6331 }
 0x5ae   :  { %5995 = vmatpush.xpose.msrb.mxu0 %v5920_v13  ;;  %v6228_v13 = vand.u32 4294901760, %v6227_v24  ;;  %v6335_v12 = vsel %vm543_vm1, %v6332_v32, 0 }
 0x5af   :  { %v14657_v2 = vsub.f32 %v6337_v60, %v14650_v3 }
 0x5b1   :  { %v6382_v4 = vand.u32 4294901760, %v14657_v2 }
 0x5b2   :  { %5745 = vmatmul.f32.vlgmr.msra.gmra.mxu2 %v5744_v48  ;;  %5819 = vmatmul.f32.vlgmr.msrb.gmra.mxu1 %v5742_v22 }
 0x5b3   :  { %5865 = vmatmul.f32.vlgmr.msrb.gmra.mxu3 %v5740_v9  ;;  %5946 = vmatpush.xpose.msra.mxu2 %v5919_v23  ;;  %v6049_v23 = vsub.f32 %v6027_v50, %v6048_v0  ;;  %v6383_v61 = vsub.f32 %v14657_v2, %v6382_v4  ;;  %v6486_v50 = vpop.permute.xlu0 %6485 }
 0x5b4   :  { %6017 = vmatpush.xpose.msrb.mxu1 %v5892_v17  ;;  %6077 = vmatpush.xpose.msrb.mxu3 %v6076_v30  ;;  %v14653_v17 = vand.u32 4294901760, %v6181_v53 }
 0x5b5   :  { %5899 = vmatmul.f32.vlgmr.msra.gmra.mxu0 %v5898_v51  ;;  %v6050_v8 = vand.u32 4294901760, %v6049_v23  ;;  %v14662_v54 = vpop.f32.mrf.mxu0  ;;  %v14668_v51 = vpop.f32.mrf.mxu1 }
 0x5b6   :  { %6100 = vmatpush.xpose.msra.mxu0 %v14636_v42  ;;  %v6229_v42 = vsub.f32 %v6227_v24, %v6228_v13  ;;  %v6203_v22 = vsub.f32 %v6181_v53, %v14653_v17  ;;  %v6642_v14 = vpop.permute.xlu1 %6641 }
 0x5b7   :  { %v6051_v62 = vsub.f32 %v6049_v23, %v6050_v8  ;;  %v6645_v53 = vsel %vm543_vm1, %v6642_v14, 0  ;;  %v14707_v14 = vpop.f32.mrf.mxu2 }
 0x5b9   :  { %v6052_v30 = vand.u32 4294901760, %v6051_v62 }
 0x5ba   :  { %5843 = vmatmul.f32.vlgmr.msrb.gmra.mxu2 %v5740_v9  ;;  %5925 = vmatmul.f32.vlgmr.msra.gmra.mxu1 %v14630_v36  ;;  %v6230_v9 = vand.u32 4294901760, %v6229_v42  ;;  %v6489_v42 = vsel %vm543_vm1, %v6486_v50, 0 }
 0x5bb   :  { %5973 = vmatmul.f32.vlgmr.msra.gmra.mxu3 %v5896_v55  ;;  %6047 = vmatpush.xpose.msrb.mxu2 %v6046_v29  ;;  %v6204_v55 = vand.u32 4294901760, %v6203_v22 }
 0x5bc   :  { %6123 = vmatpush.xpose.msra.mxu1 %v6046_v29  ;;  %6171 = vmatpush.xpose.msra.mxu3 %v6046_v29  ;;  %v6488_v29 = vpop.permute.xlu2 %6487 }
 0x5bd   :  { %5997 = vmatmul.f32.vlgmr.msrb.gmra.mxu0 %v14630_v36  ;;  %v6205_v7 = vsub.f32 %v6203_v22, %v6204_v55  ;;  %v6491_v48 = vsel %vm543_vm1, %v6488_v29, 0  ;;  %v14690_v32 = vpop.f32.mrf.mxu1 }
 0x5be   :  { %6201 = vmatpush.xpose.msrb.mxu0 %v6200_v1 }
 0x5c2   :  { %5949 = vmatmul.f32.vlgmr.msra.gmra.mxu2 %v5895_v28  ;;  %6019 = vmatmul.f32.vlgmr.msrb.gmra.mxu1 %v14630_v36  ;;  %v14666_v28 = vand.u32 4294901760, %v6491_v48  ;;  %v6384_v36 = vand.u32 4294901760, %v6383_v61 }
 0x5c3   :  { %6079 = vmatmul.f32.vlgmr.msrb.gmra.mxu3 %v6048_v0  ;;  %6149 = vmatpush.xpose.msra.mxu2 %v6074_v63  ;;  %v6206_v63 = vand.u32 4294901760, %v6205_v7 }
 0x5c4   :  { %6231 = vmatpush.xpose.msrb.mxu1 %v6230_v9  ;;  %6277 = vmatpush.xpose.msrb.mxu3 %v6200_v1  ;;  %v6535_v60 = vsub.f32 %v6491_v48, %v14666_v28  ;;  %v14684_v9 = vpop.f32.mrf.mxu3 }
 0x5c5   :  { %6103 = vmatmul.f32.vlgmr.msra.gmra.mxu0 %v6049_v23  ;;  %v14676_v23 = vand.u32 4294901760, %v6335_v12 }
 0x5c6   :  { %6303 = vmatpush.xpose.msra.mxu0 %v6228_v13  ;;  %v14674_v13 = vpop.f32.mrf.mxu0 }
 0x5c7   :  { %v14725_v44 = vpop.f32.mrf.mxu2 }
 0x5ca   :  { %6053 = vmatmul.f32.vlgmr.msrb.gmra.mxu2 %v6052_v30  ;;  %6127 = vmatmul.f32.vlgmr.msra.gmra.mxu1 %v6050_v8  ;;  %v14682_v8 = vand.u32 4294901760, %v6489_v42 }
 0x5cb   :  { %6173 = vmatmul.f32.vlgmr.msra.gmra.mxu3 %v6048_v0  ;;  %6254 = vmatpush.xpose.msrb.mxu2 %v6227_v24  ;;  %v14679_v24 = vand.u32 4294901760, %v6645_v53 }
 0x5cc   :  { %6325 = vmatpush.xpose.msra.mxu1 %v6200_v1  ;;  %6385 = vmatpush.xpose.msra.mxu3 %v6384_v36  ;;  %v6536_v1 = vand.u32 4294901760, %v6535_v60 }
 0x5cd   :  { %6207 = vmatmul.f32.vlgmr.msrb.gmra.mxu0 %v6206_v63  ;;  %v6796_v63 = vpop.permute.xlu0 %6795 }
 0x5ce   :  { %6408 = vmatpush.xpose.msrb.mxu0 %v14657_v2  ;;  %v6357_v2 = vsub.f32 %v6335_v12, %v14676_v23  ;;  %v6537_v29 = vsub.f32 %v6535_v60, %v6536_v1  ;;  %v14700_v61 = vpop.f32.mrf.mxu0  ;;  %v14709_v12 = vpop.f32.mrf.mxu3  ;;  %v6799_v50 = vsel %vm543_vm1, %v6796_v63, 0 }
 0x5cf   :  { %v14744_v35 = vpop.f32.mrf.mxu2 }
 0x5d0   :  { %v6358_v62 = vand.u32 4294901760, %v6357_v2  ;;  %v6538_v48 = vand.u32 4294901760, %v6537_v29 }
 0x5d2   :  { %6151 = vmatmul.f32.vlgmr.msra.gmra.mxu2 %v6048_v0  ;;  %6233 = vmatmul.f32.vlgmr.msrb.gmra.mxu1 %v14653_v17  ;;  %v14694_v0 = vsub.f32 %v6645_v53, %v14679_v24  ;;  %v6359_v36 = vsub.f32 %v6357_v2, %v6358_v62 }
 0x5d3   :  { %6281 = vmatmul.f32.vlgmr.msrb.gmra.mxu3 %v6204_v55  ;;  %6355 = vmatpush.xpose.msra.mxu2 %v14650_v3  ;;  %v14698_v55 = vsub.f32 %v6489_v42, %v14682_v8 }
 0x5d4   :  { %6431 = vmatpush.xpose.msrb.mxu1 %v14650_v3  ;;  %6479 = vmatpush.xpose.msrb.mxu3 %v14650_v3  ;;  %v16383_v7 = vand.u32 4294901760, %v14694_v0  ;;  %v6640_v3 = vpop.permute.xlu2 %6639  ;;  %v6360_v53 = vand.u32 4294901760, %v6359_v36 }
 0x5d5   :  { %6305 = vmatmul.f32.vlgmr.msra.gmra.mxu0 %v14653_v17  ;;  %v6512_v30 = vand.u32 4294901760, %v14698_v55  ;;  %v6643_v63 = vsel %vm543_vm1, %v6640_v3, 0  ;;  %v6948_v56 = vpop.permute.xlu0 %6947 }
 0x5d6   :  { %6509 = vmatpush.xpose.msra.mxu0 %v14666_v28  ;;  %v14718_v42 = vpop.f32.mrf.mxu0 }
 0x5da   :  { %6257 = vmatmul.f32.vlgmr.msrb.gmra.mxu2 %v6203_v22  ;;  %6327 = vmatmul.f32.vlgmr.msra.gmra.mxu1 %v14653_v17  ;;  %v6691_v22 = vsub.f32 %v14694_v0, %v16383_v7  ;;  %v6513_v17 = vsub.f32 %v14698_v55, %v6512_v30 }
 0x5db   :  { %6387 = vmatmul.f32.vlgmr.msra.gmra.mxu3 %v14676_v23  ;;  %6457 = vmatpush.xpose.msrb.mxu2 %v6382_v4  ;;  %v14716_v4 = vpop.f32.mrf.mxu1 }
 0x5dc   :  { %6539 = vmatpush.xpose.msra.mxu1 %v6538_v48  ;;  %6585 = vmatpush.xpose.msra.mxu3 %v14666_v28  ;;  %v6692_v29 = vand.u32 4294901760, %v6691_v22  ;;  %v14720_v48 = vand.u32 4294901760, %v6799_v50  ;;  %v6950_v7 = vpop.permute.xlu2 %6949  ;;  %v14730_v22 = vpop.f32.mrf.mxu3 }
 0x5dd   :  { %6411 = vmatmul.f32.vlgmr.msrb.gmra.mxu0 %v6357_v2  ;;  %v6514_v2 = vand.u32 4294901760, %v6513_v17 }
 0x5de   :  { %6611 = vmatpush.xpose.msrb.mxu0 %v6536_v1  ;;  %v6794_v1 = vpop.permute.xlu1 %6793  ;;  %v6843_v36 = vsub.f32 %v6799_v50, %v14720_v48 }
 0x5e2   :  { %6361 = vmatmul.f32.vlgmr.msra.gmra.mxu2 %v6360_v53  ;;  %6435 = vmatmul.f32.vlgmr.msrb.gmra.mxu1 %v6358_v62  ;;  %v6953_v62 = vsel %vm543_vm1, %v6950_v7, 0 }
 0x5e3   :  { %6481 = vmatmul.f32.vlgmr.msrb.gmra.mxu3 %v14676_v23  ;;  %6562 = vmatpush.xpose.msra.mxu2 %v6535_v60  ;;  %v14732_v17 = vpop.f32.mrf.mxu1  ;;  %v6797_v60 = vsel %vm543_vm1, %v6794_v1, 0  ;;  %v6970_v53 = vand.u32 4294901760, %v6953_v62 }
 0x5e4   :  { %6633 = vmatpush.xpose.msrb.mxu1 %v14666_v28  ;;  %6693 = vmatpush.xpose.msrb.mxu3 %v6692_v29  ;;  %v6664_v28 = vand.u32 4294901760, %v6643_v63  ;;  %v6844_v29 = vand.u32 4294901760, %v6843_v36  ;;  %v6818_v3 = vand.u32 4294901760, %v6797_v60  ;;  %v14746_v27 = vpop.f32.mrf.mxu3 }
 0x5e5   :  { %6515 = vmatmul.f32.vlgmr.msra.gmra.mxu0 %v6514_v2  ;;  %v14737_v2 = vpop.f32.mrf.mxu0  ;;  %v6997_v50 = vsub.f32 %v6953_v62, %v6970_v53  ;;  %v16435_v62 = vand.u32 4294901760, %v14694_v0 }
 0x5e6   :  { %6716 = vmatpush.xpose.msra.mxu0 %v14694_v0  ;;  %v6665_v7 = vsub.f32 %v6643_v63, %v6664_v28  ;;  %v6845_v1 = vsub.f32 %v6843_v36, %v6844_v29 }
 0x5e7   :  { %v6998_v20 = vand.u32 4294901760, %v6997_v50 }
 0x5e8   :  { %v6666_v38 = vand.u32 4294901760, %v6665_v7  ;;  %v6846_v63 = vand.u32 4294901760, %v6845_v1  ;;  %v14757_v1 = vpop.f32.mrf.mxu2 }
 0x5e9   :  { %v6999_v39 = vsub.f32 %v6997_v50, %v6998_v20 }
 0x5ea   :  { %6459 = vmatmul.f32.vlgmr.msrb.gmra.mxu2 %v14676_v23  ;;  %6541 = vmatmul.f32.vlgmr.msra.gmra.mxu1 %v14682_v8  ;;  %v6819_v23 = vsub.f32 %v6797_v60, %v6818_v3  ;;  %v6667_v19 = vsub.f32 %v6665_v7, %v6666_v38 }
 0x5eb   :  { %6589 = vmatmul.f32.vlgmr.msra.gmra.mxu3 %v6512_v30  ;;  %6663 = vmatpush.xpose.msrb.mxu2 %v14679_v24  ;;  %v14748_v30 = vpop.f32.mrf.mxu1 }
 0x5ec   :  { %6739 = vmatpush.xpose.msra.mxu1 %v14679_v24  ;;  %6787 = vmatpush.xpose.msra.mxu3 %v14679_v24  ;;  %v6820_v24 = vand.u32 4294901760, %v6819_v23  ;;  %v14759_v59 = vpop.f32.mrf.mxu3 }
 0x5ed   :  { %6613 = vmatmul.f32.vlgmr.msrb.gmra.mxu0 %v14682_v8  ;;  %v14755_v60 = vpop.f32.mrf.mxu0 }
 0x5ee   :  { %6817 = vmatpush.xpose.msrb.mxu0 %v14720_v48  ;;  %v6821_v25 = vsub.f32 %v6819_v23, %v6820_v24 }
 0x5f0   :  { %v6822_v0 = vand.u32 4294901760, %v6821_v25 }
 0x5f2   :  { %6565 = vmatmul.f32.vlgmr.msra.gmra.mxu2 %v14698_v55  ;;  %6635 = vmatmul.f32.vlgmr.msrb.gmra.mxu1 %v14682_v8  ;;  %v6668_v55 = vand.u32 4294901760, %v6667_v19  ;;  %v7000_v8 = vand.u32 4294901760, %v6999_v39 }
 0x5f3   :  { %6695 = vmatmul.f32.vlgmr.msrb.gmra.mxu3 %v6664_v28  ;;  %6765 = vmatpush.xpose.msra.mxu2 %v16435_v62  ;;  %v14761_v62 = vpop.f32.mrf.mxu1 }
 0x5f4   :  { %6847 = vmatpush.xpose.msrb.mxu1 %v6846_v63  ;;  %6893 = vmatpush.xpose.msrb.mxu3 %v14720_v48  ;;  %v14767_v63 = vpop.f32.mrf.mxu2 }
 0x5f5   :  { %6719 = vmatmul.f32.vlgmr.msra.gmra.mxu0 %v6665_v7  ;;  %v14765_v7 = vpop.f32.mrf.mxu0 }
 0x5f6   :  { %6919 = vmatpush.xpose.msra.mxu0 %v6844_v29  ;;  %v6951_v29 = vsel %vm543_vm1, %v6948_v56, 0 }
 0x5f7   :  { %v6972_v19 = vand.u32 4294901760, %v6951_v29 }
 0x5f9   :  { %v6973_v39 = vsub.f32 %v6951_v29, %v6972_v19 }
 0x5fa   :  { %6669 = vmatmul.f32.vlgmr.msrb.gmra.mxu2 %v6668_v55  ;;  %6743 = vmatmul.f32.vlgmr.msra.gmra.mxu1 %v6666_v38  ;;  %v14769_v38 = vpop.f32.mrf.mxu3 }
 0x5fb   :  { %6789 = vmatmul.f32.vlgmr.msra.gmra.mxu3 %v6664_v28  ;;  %6870 = vmatpush.xpose.msrb.mxu2 %v6843_v36  ;;  %16436 = vst [vmem:[#allocation59_spill] sm:$0xff] %v14769_v38  ;;  %v14771_v25 = vpop.f32.mrf.mxu1  ;;  %v6974_v56 = vand.u32 4294901760, %v6973_v39 }
 0x5fc   :  { %6941 = vmatpush.xpose.msra.mxu1 %v14720_v48  ;;  %7001 = vmatpush.xpose.msra.mxu3 %v7000_v8  ;;  %v14775_v36 = vpop.f32.mrf.mxu2 }
 0x5fd   :  { %6823 = vmatmul.f32.vlgmr.msrb.gmra.mxu0 %v6822_v0  ;;  %v14773_v48 = vpop.f32.mrf.mxu0  ;;  %16438 = vst [vmem:[#allocation61_spill] sm:$0xff] %v14775_v36 }
 0x5fe   :  { %7024 = vmatpush.xpose.msrb.mxu0 %v6997_v50  ;;  %16437 = vst [vmem:[#allocation60_spill] sm:$0xff] %v14773_v48 }
 0x602   :  { %6767 = vmatmul.f32.vlgmr.msra.gmra.mxu2 %v6664_v28  ;;  %6849 = vmatmul.f32.vlgmr.msrb.gmra.mxu1 %v6818_v3  ;;  %v6975_v28 = vsub.f32 %v6973_v39, %v6974_v56  ;;  %v14777_v50 = vpop.f32.mrf.mxu3 }
 0x603   :  { %6897 = vmatmul.f32.vlgmr.msrb.gmra.mxu3 %v6820_v24  ;;  %6971 = vmatpush.xpose.msra.mxu2 %v6970_v53  ;;  %16439 = vst [vmem:[#allocation62_spill] sm:$0xff] %v14777_v50  ;;  %v14779_v24 = vpop.f32.mrf.mxu1 }
 0x604   :  { %7047 = vmatpush.xpose.msrb.mxu1 %v6970_v53  ;;  %7095 = vmatpush.xpose.msrb.mxu3 %v6970_v53  ;;  %16440 = vst [vmem:[#allocation63_spill] sm:$0xff] %v14779_v24  ;;  %v6976_v55 = vand.u32 4294901760, %v6975_v28  ;;  %v14783_v8 = vpop.f32.mrf.mxu2 }
 0x605   :  { %6921 = vmatmul.f32.vlgmr.msra.gmra.mxu0 %v6818_v3  ;;  %16442 = vst [vmem:[#allocation65_spill] sm:$0xff] %v14783_v8 }
 0x60a   :  { %6873 = vmatmul.f32.vlgmr.msrb.gmra.mxu2 %v6819_v23  ;;  %6943 = vmatmul.f32.vlgmr.msra.gmra.mxu1 %v6818_v3 }
 0x60b   :  { %7003 = vmatmul.f32.vlgmr.msra.gmra.mxu3 %v6972_v19  ;;  %7073 = vmatpush.xpose.msrb.mxu2 %v6998_v20 }
 0x60d   :  { %7027 = vmatmul.f32.vlgmr.msrb.gmra.mxu0 %v6973_v39 }
 0x611   :  { %v14781_v53 = vpop.f32.mrf.mxu0 }
 0x612   :  { %16441 = vst [vmem:[#allocation64_spill] sm:$0xff] %v14781_v53  ;;  %6977 = vmatmul.f32.vlgmr.msra.gmra.mxu2 %v6976_v55  ;;  %7051 = vmatmul.f32.vlgmr.msrb.gmra.mxu1 %v6974_v56 }
 0x613   :  { %7097 = vmatmul.f32.vlgmr.msrb.gmra.mxu3 %v6972_v19  ;;  %v14787_v3 = vpop.f32.mrf.mxu1 }
 0x614   :  { %16444 = vst [vmem:[#allocation67_spill] sm:$0xff] %v14787_v3 }
 0x615   :  { %v14785_v23 = vpop.f32.mrf.mxu3 }
 0x616   :  { %16443 = vst [vmem:[#allocation66_spill] sm:$0xff] %v14785_v23 }
 0x619   :  { %v14789_v0 = vpop.f32.mrf.mxu0 }
 0x61a   :  { %16445 = vst [vmem:[#allocation68_spill] sm:$0xff] %v14789_v0  ;;  %7075 = vmatmul.f32.vlgmr.msrb.gmra.mxu2 %v6972_v19 }
 0x61d   :  { %v14791_v20 = vpop.f32.mrf.mxu2  ;;  %v14793_v29 = vpop.f32.mrf.mxu3 }
 0x61e   :  { %16446 = vst [vmem:[#allocation69_spill] sm:$0xff] %v14791_v20 }
 0x61f   :  { %16447 = vst [vmem:[#allocation70_spill] sm:$0xff] %v14793_v29  ;;  %v14795_v39 = vpop.f32.mrf.mxu1 }
 0x620   :  { %16448 = vst [vmem:[#allocation71_spill] sm:$0xff] %v14795_v39 }
 0x622   :  { %v14797_v28 = vpop.f32.mrf.mxu0 }
 0x623   :  { %16449 = vst [vmem:[#allocation72_spill] sm:$0xff] %v14797_v28 }
 0x625   :  { %v14799_v55 = vpop.f32.mrf.mxu2 }
 0x626   :  { %16450 = vst [vmem:[#allocation73_spill] sm:$0xff] %v14799_v55  ;;  %v14801_v56 = vpop.f32.mrf.mxu3 }
 0x627   :  { %16451 = vst [vmem:[#allocation74_spill] sm:$0xff] %v14801_v56  ;;  %v14803_v34 = vpop.f32.mrf.mxu1 }
 0x628   :  { %16452 = vst [vmem:[#allocation75_spill] sm:$0xff] %v14803_v34 }
 0x62a   :  { %v14805_v10 = vpop.f32.mrf.mxu0 }
 0x62b   :  { %16453 = vst [vmem:[#allocation76_spill] sm:$0xff] %v14805_v10 }
 0x62d   :  { %v14807_v58 = vpop.f32.mrf.mxu2 }
 0x62e   :  { %16454 = vst [vmem:[#allocation77_spill] sm:$0xff] %v14807_v58  ;;  %v14809_v31 = vpop.f32.mrf.mxu3 }
 0x62f   :  { %16455 = vst [vmem:[#allocation78_spill] sm:$0xff] %v14809_v31  ;;  %v14811_v19 = vpop.f32.mrf.mxu1 }
 0x630   :  { %16456 = vst [vmem:[#allocation79_spill] sm:$0xff] %v14811_v19 }
 0x632   :  { %v5900_v15 = vpop.f32.mrf.mxu0 }
 0x635   :  { %v14813_v43 = vpop.f32.mrf.mxu2 }
 0x636   :  { %16457 = vst [vmem:[#allocation80_spill] sm:$0xff] %v14813_v43  ;;  %v14815_v11 = vpop.f32.mrf.mxu3 }
 0x637   :  { %16458 = vst [vmem:[#allocation81_spill] sm:$0xff] %v14815_v11  ;;  %v5926_v41 = vpop.f32.mrf.mxu1 }
 0x638   :  { %v5927_v40 = vadd.f32 %v5926_v41, %v5900_v15 }
 0x63a   :  { %v5998_v49 = vpop.f32.mrf.mxu0 }
 0x63d   :  { %v14817_v33 = vpop.f32.mrf.mxu2 }
 0x63e   :  { %16459 = vst [vmem:[#allocation82_spill] sm:$0xff] %v14817_v33  ;;  %v5974_v18 = vpop.f32.mrf.mxu3  ;;  %v13419_v33 = vld [vmem:[%s16367_s1] ss:$0 sm:$0xff] }
 0x63f   :  { %v6020_v21 = vpop.f32.mrf.mxu1 }
 0x642   :  { %v6104_v46 = vpop.f32.mrf.mxu0 }
 0x645   :  { %v5950_v5 = vpop.f32.mrf.mxu2 }
 0x646   :  { %v5951_v34 = vadd.f32 %v5950_v5, %v5927_v40  ;;  %v6080_v10 = vpop.f32.mrf.mxu3 }
 0x647   :  { %v6128_v28 = vpop.f32.mrf.mxu1 }
 0x648   :  { %v5975_v31 = vadd.f32 %v5974_v18, %v5951_v34 }
 0x64a   :  { %v5999_v56 = vadd.f32 %v5998_v49, %v5975_v31  ;;  %v6208_v19 = vpop.f32.mrf.mxu0 }
 0x64c   :  { %v6021_v29 = vadd.f32 %v6020_v21, %v5999_v56 }
 0x64d   :  { %v6054_v58 = vpop.f32.mrf.mxu2 }
 0x64e   :  { %v6081_v43 = vadd.f32 %v6080_v10, %v6054_v58  ;;  %v6174_v55 = vpop.f32.mrf.mxu3  ;;  %v7101_v11 = vmul.f32 0.35355338, %v6021_v29 }
 0x64f   :  { %v6234_v3 = vpop.f32.mrf.mxu1 }
 0x650   :  { %v6105_v39 = vadd.f32 %v6104_v46, %v6081_v43  ;;  %v14822_v0 = vadd.f32 %v13419_v33, %v7101_v11  ;;  %v6235_v43 = vadd.f32 %v6234_v3, %v6208_v19  ;;  %v13420_v46 = vld [vmem:[%s16367_s1 + $0x1] ss:$0 sm:$0xff] }
 0x652   :  { %v6306_v41 = vpop.f32.mrf.mxu0  ;;  %v7117_v5 = vsel %vm543_vm1, %v14822_v0, -inf  ;;  %v6129_v40 = vadd.f32 %v6128_v28, %v6105_v39 }
 0x653   :  { %7118 = vmax.xlane.f32.xlu1 %v7117_v5 }
 0x655   :  { %v6152_v18 = vpop.f32.mrf.mxu2 }
 0x656   :  { %v6153_v21 = vadd.f32 %v6152_v18, %v6129_v40  ;;  %v6282_v31 = vpop.f32.mrf.mxu3 }
 0x657   :  { %v6328_v58 = vpop.f32.mrf.mxu1 }
 0x658   :  { %v6175_v49 = vadd.f32 %v6174_v55, %v6153_v21 }
 0x65a   :  { %v7102_v10 = vmul.f32 0.35355338, %v6175_v49  ;;  %v6412_v15 = vpop.f32.mrf.mxu0 }
 0x65c   :  { %v14829_v33 = vadd.f32 %v13420_v46, %v7102_v10  ;;  %v13421_v10 = vld [vmem:[%s16367_s1 + $0x2] ss:$0 sm:$0xff] }
 0x65d   :  { %v6258_v11 = vpop.f32.mrf.mxu2 }
 0x65e   :  { %v6259_v34 = vadd.f32 %v6258_v11, %v6235_v43  ;;  %v6388_v29 = vpop.f32.mrf.mxu3  ;;  %v7120_v39 = vsel %vm543_vm1, %v14829_v33, -inf }
 0x65f   :  { %7121 = vmax.xlane.f32.xlu2 %v7120_v39  ;;  %v6436_v28 = vpop.f32.mrf.mxu1 }
 0x660   :  { %v6283_v56 = vadd.f32 %v6282_v31, %v6259_v34 }
 0x662   :  { %v6307_v5 = vadd.f32 %v6306_v41, %v6283_v56  ;;  %v6516_v40 = vpop.f32.mrf.mxu0 }
 0x664   :  { %v6329_v55 = vadd.f32 %v6328_v58, %v6307_v5 }
 0x665   :  { %v6362_v18 = vpop.f32.mrf.mxu2 }
 0x666   :  { %v6389_v3 = vadd.f32 %v6388_v29, %v6362_v18  ;;  %v6482_v19 = vpop.f32.mrf.mxu3  ;;  %v7103_v21 = vmul.f32 0.35355338, %v6329_v55  ;;  %v13422_v55 = vld [vmem:[%s16367_s1 + $0x3] ss:$0 sm:$0xff] }
 0x667   :  { %v6542_v46 = vpop.f32.mrf.mxu1 }
 0x668   :  { %v6413_v49 = vadd.f32 %v6412_v15, %v6389_v3  ;;  %v14836_v43 = vadd.f32 %v13421_v10, %v7103_v21  ;;  %v6543_v15 = vadd.f32 %v6542_v46, %v6516_v40 }
 0x66a   :  { %v7123_v11 = vsel %vm543_vm1, %v14836_v43, -inf  ;;  %v6437_v31 = vadd.f32 %v6436_v28, %v6413_v49  ;;  %v6614_v39 = vpop.f32.mrf.mxu0 }
 0x66b   :  { %7124 = vmax.xlane.f32.xlu0 %v7123_v11 }
 0x66d   :  { %v6460_v41 = vpop.f32.mrf.mxu2 }
 0x66e   :  { %v6461_v58 = vadd.f32 %v6460_v41, %v6437_v31  ;;  %v6590_v34 = vpop.f32.mrf.mxu3 }
 0x66f   :  { %v6636_v5 = vpop.f32.mrf.mxu1 }
 0x670   :  { %v6483_v29 = vadd.f32 %v6482_v19, %v6461_v58 }
 0x672   :  { %v7104_v56 = vmul.f32 0.35355338, %v6483_v29  ;;  %v6720_v11 = vpop.f32.mrf.mxu0 }
 0x674   :  { %v14843_v18 = vadd.f32 %v13422_v55, %v7104_v56  ;;  %v13423_v56 = vld [vmem:[%s16367_s1 + $0x4] ss:$0 sm:$0xff] }
 0x675   :  { %v6566_v3 = vpop.f32.mrf.mxu2 }
 0x676   :  { %v6567_v21 = vadd.f32 %v6566_v3, %v6543_v15  ;;  %v7126_v10 = vsel %vm543_vm1, %v14843_v18, -inf  ;;  %v6696_v28 = vpop.f32.mrf.mxu3 }
 0x677   :  { %7127 = vmax.xlane.f32.xlu2 %v7126_v10  ;;  %v6744_v41 = vpop.f32.mrf.mxu1 }
 0x678   :  { %v6591_v49 = vadd.f32 %v6590_v34, %v6567_v21 }
 0x67a   :  { %v6615_v31 = vadd.f32 %v6614_v39, %v6591_v49  ;;  %v6824_v10 = vpop.f32.mrf.mxu0 }
 0x67c   :  { %v6637_v19 = vadd.f32 %v6636_v5, %v6615_v31 }
 0x67d   :  { %v6670_v58 = vpop.f32.mrf.mxu2 }
 0x67e   :  { %v6697_v40 = vadd.f32 %v6696_v28, %v6670_v58  ;;  %v7105_v46 = vmul.f32 0.35355338, %v6637_v19  ;;  %v6790_v15 = vpop.f32.mrf.mxu3  ;;  %v13424_v19 = vld [vmem:[%s16367_s1 + $0x5] ss:$0 sm:$0xff] }
 0x67f   :  { %v6850_v21 = vpop.f32.mrf.mxu1 }
 0x680   :  { %v6721_v29 = vadd.f32 %v6720_v11, %v6697_v40  ;;  %v14850_v55 = vadd.f32 %v13423_v56, %v7105_v46  ;;  %v6851_v11 = vadd.f32 %v6850_v21, %v6824_v10 }
 0x682   :  { %v7129_v3 = vsel %vm543_vm1, %v14850_v55, -inf  ;;  %v6745_v34 = vadd.f32 %v6744_v41, %v6721_v29  ;;  %v6922_v40 = vpop.f32.mrf.mxu0 }
 0x683   :  { %7130 = vmax.xlane.f32.xlu1 %v7129_v3 }
 0x685   :  { %v6768_v39 = vpop.f32.mrf.mxu2 }
 0x686   :  { %v6769_v5 = vadd.f32 %v6768_v39, %v6745_v34  ;;  %v6898_v31 = vpop.f32.mrf.mxu3 }
 0x687   :  { %v6944_v29 = vpop.f32.mrf.mxu1 }
 0x688   :  { %v6791_v49 = vadd.f32 %v6790_v15, %v6769_v5 }
 0x68a   :  { %v7106_v28 = vmul.f32 0.35355338, %v6791_v49  ;;  %v7028_v49 = vpop.f32.mrf.mxu0 }
 0x68c   :  { %v14857_v58 = vadd.f32 %v13424_v19, %v7106_v28  ;;  %v13425_v28 = vld [vmem:[%s16367_s1 + $0x6] ss:$0 sm:$0xff] }
 0x68d   :  { %v6874_v46 = vpop.f32.mrf.mxu2 }
 0x68e   :  { %v6875_v56 = vadd.f32 %v6874_v46, %v6851_v11  ;;  %v7132_v3 = vsel %vm543_vm1, %v14857_v58, -inf  ;;  %v7004_v39 = vpop.f32.mrf.mxu3 }
 0x68f   :  { %7133 = vmax.xlane.f32.xlu2 %v7132_v3  ;;  %v7052_v46 = vpop.f32.mrf.mxu1 }
 0x690   :  { %v6899_v41 = vadd.f32 %v6898_v31, %v6875_v56 }
 0x692   :  { %v6923_v34 = vadd.f32 %v6922_v40, %v6899_v41 }
 0x694   :  { %v6945_v15 = vadd.f32 %v6944_v29, %v6923_v34  ;;  %v13426_v34 = vld [vmem:[%s16367_s1 + $0x7] ss:$0 sm:$0xff] }
 0x695   :  { %v6978_v5 = vpop.f32.mrf.mxu2 }
 0x696   :  { %v7005_v10 = vadd.f32 %v7004_v39, %v6978_v5  ;;  %v7107_v21 = vmul.f32 0.35355338, %v6945_v15  ;;  %v7098_v3 = vpop.f32.mrf.mxu3 }
 0x698   :  { %v7029_v24 = vadd.f32 %v7028_v49, %v7005_v10  ;;  %v14864_v19 = vadd.f32 %v13425_v28, %v7107_v21 }
 0x69a   :  { %v7135_v11 = vsel %vm543_vm1, %v14864_v19, -inf  ;;  %v7053_v31 = vadd.f32 %v7052_v46, %v7029_v24 }
 0x69b   :  { %7136 = vmax.xlane.f32.xlu0 %v7135_v11 }
 0x69c   :  { %7461 = vrot.lane.b32.xlu1 %v13813_v57, %s13532_s21 }
 0x69d   :  { %v7076_v40 = vpop.f32.mrf.mxu2 }
 0x69e   :  { %v7077_v56 = vadd.f32 %v7076_v40, %v7053_v31 }
 0x6a0   :  { %v7099_v41 = vadd.f32 %v7098_v3, %v7077_v56 }
 0x6a2   :  { %v7108_v29 = vmul.f32 0.35355338, %v7099_v41 }
 0x6a4   :  { %v14873_v15 = vadd.f32 %v13426_v34, %v7108_v29 }
 0x6a6   :  { %v7138_v39 = vsel %vm543_vm1, %v14873_v15, -inf }
 0x6a7   :  { %7309 = vrot.lane.b32.xlu2 %v13808_v47, %s13532_s21  ;;  %7139 = vmax.xlane.f32.xlu0 %v7138_v39 }
 0x6c6   :  { %v7119_v5 = vpop.xlane.xlu1 %7118 }
 0x6c7   :  { %v7141_v24 = vsub.f32 %v14822_v0, %v7119_v5 }
 0x6c9   :  { %v7149_v10 = vmul.f32 1.442695, %v7141_v24 }
 0x6cb   :  { %13313 = vpow2.f32 %v7149_v10 }
 0x6d1   :  { %v14880_v21 = vpop.eup %13313 }
 0x6d2   :  { %v7122_v49 = vpop.xlane.xlu2 %7121  ;;  %v7165_v28 = vsel %vm543_vm1, %v14880_v21, 0.0 }
 0x6d3   :  { %v7142_v11 = vsub.f32 %v14829_v33, %v7122_v49  ;;  %7166 = vadd.xlane.f32.xlu0 %v7165_v28 }
 0x6d5   :  { %v7151_v46 = vmul.f32 1.442695, %v7142_v11 }
 0x6d7   :  { %13315 = vpow2.f32 %v7151_v46 }
 0x6dd   :  { %v14885_v31 = vpop.eup %13315 }
 0x6de   :  { %v7125_v40 = vpop.xlane.xlu0 %7124  ;;  %v7168_v56 = vsel %vm543_vm1, %v14885_v31, 0.0 }
 0x6df   :  { %v7143_v0 = vsub.f32 %v14836_v43, %v7125_v40  ;;  %7169 = vadd.xlane.f32.xlu1 %v7168_v56 }
 0x6e1   :  { %v7153_v3 = vmul.f32 1.442695, %v7143_v0 }
 0x6e3   :  { %13317 = vpow2.f32 %v7153_v3 }
 0x6e9   :  { %v14890_v41 = vpop.eup %13317 }
 0x6ea   :  { %v7128_v29 = vpop.xlane.xlu2 %7127  ;;  %v7171_v33 = vsel %vm543_vm1, %v14890_v41, 0.0 }
 0x6eb   :  { %v7144_v34 = vsub.f32 %v14843_v18, %v7128_v29  ;;  %7172 = vadd.xlane.f32.xlu1 %v7171_v33 }
 0x6ed   :  { %v7155_v39 = vmul.f32 1.442695, %v7144_v34 }
 0x6ef   :  { %13319 = vpow2.f32 %v7155_v39 }
 0x6f5   :  { %v14895_v5 = vpop.eup %13319 }
 0x6f6   :  { %v7131_v24 = vpop.xlane.xlu1 %7130  ;;  %v7174_v43 = vsel %vm543_vm1, %v14895_v5, 0.0 }
 0x6f7   :  { %v7145_v10 = vsub.f32 %v14850_v55, %v7131_v24  ;;  %7175 = vadd.xlane.f32.xlu0 %v7174_v43 }
 0x6f9   :  { %v7157_v49 = vmul.f32 1.442695, %v7145_v10 }
 0x6fb   :  { %13321 = vpow2.f32 %v7157_v49 }
 0x701   :  { %v14900_v28 = vpop.eup %13321 }
 0x702   :  { %v7134_v11 = vpop.xlane.xlu2 %7133  ;;  %v7177_v18 = vsel %vm543_vm1, %v14900_v28, 0.0 }
 0x703   :  { %7178 = vadd.xlane.f32.xlu2 %v7177_v18  ;;  %v7146_v49 = vsub.f32 %v14857_v58, %v7134_v11 }
 0x704   :  { %7765 = vrot.lane.b32.xlu1 %v13823_v16, %s13532_s21 }
 0x70a   :  { %v7310_v46 = vpop.permute.xlu2 %7309 }
 0x70b   :  { %v7330_v40 = vand.u32 4294901760, %v7310_v46  ;;  %7613 = vrot.lane.b32.xlu0 %v13818_v6, %s13532_s21 }
 0x70c   :  { %7917 = vrot.lane.b32.xlu1 %v13830_v26, %s13532_s21 }
 0x70d   :  { %v7357_v55 = vsub.f32 %v7310_v46, %v7330_v40  ;;  %7331 = vmatpush.msra.mxu0 %v7330_v40  ;;  %7407 = vmatpush.msra.mxu3 %v7330_v40  ;;  %v7159_v46 = vmul.f32 1.442695, %v7146_v49 }
 0x70e   :  { %v7462_v56 = vpop.permute.xlu1 %7461  ;;  %v7137_v10 = vpop.xlane.xlu0 %7136 }
 0x70f   :  { %v7358_v0 = vand.u32 4294901760, %v7357_v55  ;;  %v14910_v3 = vand.u32 4294901760, %v7462_v56  ;;  %7384 = vmatpush.msra.mxu2 %v7357_v55  ;;  %v7147_v18 = vsub.f32 %v14864_v19, %v7137_v10  ;;  %13323 = vpow2.f32 %v7159_v46 }
 0x711   :  { %v7359_v29 = vsub.f32 %v7357_v55, %v7358_v0  ;;  %v14913_v33 = vsub.f32 %v7462_v56, %v14910_v3  ;;  %7433 = vmatpush.msrb.mxu0 %v7358_v0  ;;  %7483 = vmatpush.msrb.mxu2 %v14910_v3  ;;  %v7161_v55 = vmul.f32 1.442695, %v7147_v18 }
 0x713   :  { %v7360_v34 = vand.u32 4294901760, %v7359_v29  ;;  %v16384_v39 = vand.u32 4294901760, %v14913_v33  ;;  %13325 = vpow2.f32 %v7161_v55 }
 0x715   :  { %v7511_v24 = vsub.f32 %v14913_v33, %v16384_v39  ;;  %7361 = vmatpush.msra.mxu1 %v7360_v34  ;;  %v14929_v29 = vpop.eup %13323 }
 0x716   :  { %v7180_v19 = vsel %vm543_vm1, %v14929_v29, 0.0 }
 0x717   :  { %7455 = vmatpush.msrb.mxu1 %v7330_v40  ;;  %v7512_v43 = vand.u32 4294901760, %v7511_v24 }
 0x719   :  { %7513 = vmatpush.msrb.mxu3 %v7512_v43  ;;  %v14931_v58 = vpop.eup %13325 }
 0x71a   :  { %v7140_v56 = vpop.xlane.xlu0 %7139 }
 0x71b   :  { %8069 = vrot.lane.b32.xlu2 %v13837_v37, %s13532_s21  ;;  %v7148_v0 = vsub.f32 %v14873_v15, %v7140_v56  ;;  %v7183_v15 = vsel %vm543_vm1, %v14931_v58, 0.0 }
 0x71d   :  { %v7163_v40 = vmul.f32 1.442695, %v7148_v0 }
 0x71f   :  { %13327 = vpow2.f32 %v7163_v40 }
 0x723   :  { %8221 = vrot.lane.b32.xlu2 %v13844_v45, %s13532_s21 }
 0x725   :  { %v14939_v11 = vpop.eup %13327 }
 0x726   :  { %v7186_v34 = vsel %vm543_vm1, %v14939_v11, 0.0 }
 0x72b   :  { %8525 = vrot.lane.b32.xlu2 %v13808_v47, %s13533_s23 }
 0x733   :  { %8681 = vrot.lane.b32.xlu2 %v13813_v57, %s13534_s24 }
 0x735   :  { %7181 = vadd.xlane.f32.xlu0 %v7180_v19 }
 0x736   :  { %7184 = vadd.xlane.f32.xlu1 %v7183_v15 }
 0x73b   :  { %8835 = vrot.lane.b32.xlu2 %v13818_v6, %s13534_s24 }
 0x73d   :  { %7187 = vadd.xlane.f32.xlu0 %v7186_v34 }
 0x743   :  { %8987 = vrot.lane.b32.xlu2 %v13823_v16, %s13533_s23 }
 0x746   :  { %v7167_v24 = vpop.xlane.xlu0 %7166 }
 0x747   :  { %13329 = vrcp.f32 %v7167_v24  ;;  %v7200_v18 = vand.u32 2147483648, %v7167_v24  ;;  %v7198_v55 = vand.u32 2147483647, %v7167_v24  ;;  %vm7194_vm11 = vweird.f32 %v7167_v24 }
 0x749   :  { %v7201_v40 = vor.u32 1.1754944e-38, %v7200_v18  ;;  %vm7199_vm13 = vcmp.eq.f32.partialorder %v7198_v55, 8.507059e+37 }
 0x74b   :  { %9297 = vrot.lane.b32.xlu2 %v13837_v37, %s13534_s24 }
 0x74d   :  { %v13330_v43 = vpop.eup %13329 }
 0x74e   :  { %v7190_v10 = vmul.f32 %v13330_v43, %v7167_v24  ;;  %vm7195_vm10 = vweird.f32 %v13330_v43 }
 0x74f   :  { %8527 = vrot.lane.b32.xlu1 %v13808_v47, %s13534_s24  ;;  %vm7196_vm12 = vmor %vm7194_vm11, %vm7195_vm10 }
 0x750   :  { %v7191_v49 = vsub.f32 1.0, %v7190_v10 }
 0x751   :  { %8373 = vrot.lane.b32.xlu0 %v13848_v52, %s13532_s21 }
 0x752   :  { %v7192_v46 = vmul.f32 %v13330_v43, %v7191_v49  ;;  %v7170_v56 = vpop.xlane.xlu1 %7169 }
 0x753   :  { %13331 = vrcp.f32 %v7170_v56  ;;  %9449 = vrot.lane.b32.xlu2 %v13844_v45, %s13533_s23  ;;  %v7215_v24 = vand.u32 2147483648, %v7170_v56  ;;  %v7213_v55 = vand.u32 2147483647, %v7170_v56  ;;  %vm7209_vm15 = vweird.f32 %v7170_v56 }
 0x754   :  { %v7193_v0 = vadd.f32 %v13330_v43, %v7192_v46 }
 0x755   :  { %vm7214_vm3 = vcmp.eq.f32.partialorder %v7213_v55, 8.507059e+37 }
 0x756   :  { %v7197_v19 = vsel %vm7196_vm12, %v13330_v43, %v7193_v0 }
 0x757   :  { %v7202_v15 = vsel %vm7199_vm13, %v7201_v40, %v7197_v19  ;;  %8833 = vrot.lane.b32.xlu1 %v13818_v6, %s13533_s23  ;;  %v16460_v40 = vand.u32 4294901760, %v14913_v33 }
 0x758   :  { %v7203_v34 = vmul.f32 %v14880_v21, %v7202_v15  ;;  %v7216_v15 = vor.u32 1.1754944e-38, %v7215_v24 }
 0x759   :  { %v13332_v10 = vpop.eup %13331  ;;  %8679 = vrot.lane.b32.xlu0 %v13813_v57, %s13533_s23 }
 0x75a   :  { %v7205_v49 = vmul.f32 %v13332_v10, %v7170_v56  ;;  %v7313_v39 = vsel %vm543_vm1, %v7203_v34, 0  ;;  %vm7210_vm14 = vweird.f32 %v13332_v10 }
 0x75b   :  { %v7332_v53 = vand.u32 4294901760, %v7313_v39  ;;  %vm7211_vm2 = vmor %vm7209_vm15, %vm7210_vm14 }
 0x75c   :  { %v7206_v46 = vsub.f32 1.0, %v7205_v49 }
 0x75d   :  { %7363 = vmatmul.f32.vlgmr.msra.gmra.mxu1 %v7332_v53  ;;  %v7333_v18 = vsub.f32 %v7313_v39, %v7332_v53 }
 0x75e   :  { %v7207_v43 = vmul.f32 %v13332_v10, %v7206_v46  ;;  %7559 = vmatpush.msra.mxu1 %v14910_v3  ;;  %v7173_v0 = vpop.xlane.xlu1 %7172 }
 0x75f   :  { %13333 = vrcp.f32 %v7173_v0  ;;  %9143 = vrot.lane.b32.xlu1 %v13830_v26, %s13534_s24  ;;  %7387 = vmatmul.f32.vlgmr.msra.gmra.mxu2 %v7333_v18  ;;  %v7334_v19 = vand.u32 4294901760, %v7333_v18  ;;  %v7228_v55 = vand.u32 2147483647, %v7173_v0  ;;  %vm7224_vm5 = vweird.f32 %v7173_v0 }
 0x760   :  { %v7208_v21 = vadd.f32 %v13332_v10, %v7207_v43  ;;  %7585 = vmatpush.msra.mxu2 %v16460_v40 }
 0x761   :  { %8989 = vrot.lane.b32.xlu0 %v13823_v16, %s13534_s24  ;;  %7411 = vmatmul.f32.vlgmr.msra.gmra.mxu3 %v7334_v19  ;;  %v7335_v34 = vsub.f32 %v7333_v18, %v7334_v19  ;;  %v7230_v18 = vand.u32 2147483648, %v7173_v0  ;;  %vm7229_vm7 = vcmp.eq.f32.partialorder %v7228_v55, 8.507059e+37 }
 0x762   :  { %v7212_v39 = vsel %vm7211_vm2, %v13332_v10, %v7208_v21  ;;  %7607 = vmatpush.msra.mxu3 %v14910_v3 }
 0x763   :  { %v7217_v49 = vsel %vm7214_vm3, %v7216_v15, %v7212_v39  ;;  %v7336_v43 = vand.u32 4294901760, %v7335_v34 }
 0x764   :  { %v7218_v46 = vmul.f32 %v14885_v31, %v7217_v49 }
 0x765   :  { %v13334_v56 = vpop.eup %13333  ;;  %7457 = vmatmul.f32.vlgmr.msrb.gmra.mxu1 %v7332_v53  ;;  %7337 = vmatmul.f32.vlgmr.msra.gmra.mxu0 %v7336_v43 }
 0x766   :  { %v7220_v48 = vmul.f32 %v13334_v56, %v7173_v0  ;;  %v7465_v40 = vsel %vm543_vm1, %v7218_v46, 0  ;;  %7536 = vmatpush.msra.mxu0 %v14913_v33  ;;  %vm7225_vm4 = vweird.f32 %v13334_v56  ;;  %v7231_v33 = vor.u32 1.1754944e-38, %v7230_v18 }
 0x767   :  { %9295 = vrot.lane.b32.xlu1 %v13837_v37, %s13533_s23  ;;  %v7484_v10 = vand.u32 4294901760, %v7465_v40  ;;  %vm7226_vm6 = vmor %vm7224_vm5, %vm7225_vm4 }
 0x768   :  { %v7221_v24 = vsub.f32 1.0, %v7220_v48 }
 0x769   :  { %9141 = vrot.lane.b32.xlu0 %v13830_v26, %s13533_s23  ;;  %v7485_v3 = vsub.f32 %v7465_v40, %v7484_v10  ;;  %7515 = vmatmul.f32.vlgmr.msrb.gmra.mxu3 %v7484_v10 }
 0x76a   :  { %v7222_v31 = vmul.f32 %v13334_v56, %v7221_v24  ;;  %v7176_v21 = vpop.xlane.xlu0 %7175 }
 0x76b   :  { %13335 = vrcp.f32 %v7176_v21  ;;  %v7486_v15 = vand.u32 4294901760, %v7485_v3  ;;  %v7245_v18 = vand.u32 2147483648, %v7176_v21  ;;  %v7243_v55 = vand.u32 2147483647, %v7176_v21 }
 0x76c   :  { %v7223_v19 = vadd.f32 %v13334_v56, %v7222_v31  ;;  %vm7239_vm9 = vweird.f32 %v7176_v21 }
 0x76d   :  { %7435 = vmatmul.f32.vlgmr.msrb.gmra.mxu0 %v7332_v53  ;;  %7563 = vmatmul.f32.vlgmr.msra.gmra.mxu1 %v7486_v15  ;;  %v7487_v48 = vsub.f32 %v7485_v3, %v7486_v15  ;;  %vm7244_vm11 = vcmp.eq.f32.partialorder %v7243_v55, 8.507059e+37 }
 0x76e   :  { %v7227_v39 = vsel %vm7226_vm6, %v13334_v56, %v7223_v19 }
 0x76f   :  { %v7232_v34 = vsel %vm7229_vm7, %v7231_v33, %v7227_v39  ;;  %9605 = vrot.lane.b32.xlu1 %v13848_v52, %s13534_s24  ;;  %v7488_v46 = vand.u32 4294901760, %v7487_v48  ;;  %v7246_v48 = vor.u32 1.1754944e-38, %v7245_v18 }
 0x770   :  { %v7233_v49 = vmul.f32 %v14890_v41, %v7232_v34 }
 0x771   :  { %v13336_v43 = vpop.eup %13335  ;;  %9451 = vrot.lane.b32.xlu0 %v13844_v45, %s13534_s24  ;;  %7489 = vmatmul.f32.vlgmr.msrb.gmra.mxu2 %v7488_v46 }
 0x772   :  { %v7617_v0 = vsel %vm543_vm1, %v7233_v49, 0  ;;  %v7235_v40 = vmul.f32 %v13336_v43, %v7176_v21  ;;  %7609 = vmatmul.f32.vlgmr.msra.gmra.mxu3 %v7484_v10  ;;  %vm7240_vm8 = vweird.f32 %v13336_v43 }
 0x773   :  { %v14982_v56 = vand.u32 4294901760, %v7617_v0  ;;  %vm7241_vm10 = vmor %vm7239_vm9, %vm7240_vm8 }
 0x774   :  { %v7236_v53 = vsub.f32 1.0, %v7235_v40 }
 0x775   :  { %v7637_v24 = vsub.f32 %v7617_v0, %v14982_v56  ;;  %7539 = vmatmul.f32.vlgmr.msra.gmra.mxu0 %v7485_v3 }
 0x776   :  { %v7237_v31 = vmul.f32 %v13336_v43, %v7236_v53  ;;  %v7766_v41 = vpop.permute.xlu1 %7765  ;;  %v7179_v19 = vpop.xlane.xlu2 %7178 }
 0x777   :  { %v14985_v15 = vand.u32 4294901760, %v7766_v41  ;;  %13337 = vrcp.f32 %v7179_v19  ;;  %v7638_v39 = vand.u32 4294901760, %v7637_v24  ;;  %vm7254_vm13 = vweird.f32 %v7179_v19 }
 0x778   :  { %v7238_v33 = vadd.f32 %v13336_v43, %v7237_v31 }
 0x779   :  { %v7813_v34 = vsub.f32 %v7766_v41, %v14985_v15  ;;  %9603 = vrot.lane.b32.xlu0 %v13848_v52, %s13533_s23  ;;  %7587 = vmatmul.f32.vlgmr.msra.gmra.mxu2 %v7484_v10  ;;  %v7639_v0 = vsub.f32 %v7637_v24, %v7638_v39 }
 0x77a   :  { %v7242_v49 = vsel %vm7241_vm10, %v13336_v43, %v7238_v33 }
 0x77b   :  { %v7247_v46 = vsel %vm7244_vm11, %v7246_v48, %v7242_v49  ;;  %v7814_v3 = vand.u32 4294901760, %v7813_v34  ;;  %v7640_v8 = vand.u32 4294901760, %v7639_v0 }
 0x77c   :  { %v7248_v40 = vmul.f32 %v14895_v5, %v7247_v46  ;;  %v7260_v5 = vand.u32 2147483648, %v7179_v19  ;;  %v7258_v46 = vand.u32 2147483647, %v7179_v19 }
 0x77d   :  { %v13338_v53 = vpop.eup %13337  ;;  %v7815_v23 = vsub.f32 %v7813_v34, %v7814_v3  ;;  %v7614_v31 = vpop.permute.xlu0 %7613 }
 0x77e   :  { %v7250_v21 = vmul.f32 %v13338_v53, %v7179_v19  ;;  %v7634_v20 = vand.u32 4294901760, %v7614_v31  ;;  %v7918_v50 = vpop.permute.xlu1 %7917  ;;  %v8070_v18 = vpop.permute.xlu2 %8069  ;;  %v7769_v41 = vsel %vm543_vm1, %v7248_v40, 0  ;;  %vm7255_vm12 = vweird.f32 %v13338_v53 }
 0x77f   :  { %v7816_v38 = vand.u32 4294901760, %v7815_v23  ;;  %v14992_v36 = vand.u32 4294901760, %v7769_v41  ;;  %v14994_v55 = vand.u32 4294901760, %v7918_v50  ;;  %v14996_v33 = vand.u32 4294901760, %v8070_v18  ;;  %vm7256_vm14 = vmor %vm7254_vm13, %vm7255_vm12 }
 0x780   :  { %v7251_v43 = vsub.f32 1.0, %v7250_v21  ;;  %v7661_v10 = vsub.f32 %v7614_v31, %v7634_v20  ;;  %7635 = vmatpush.msrb.mxu0 %v7634_v20  ;;  %7711 = vmatpush.msrb.mxu3 %v7634_v20  ;;  %vm7259_vm15 = vcmp.eq.f32.partialorder %v7258_v46, 8.507059e+37 }
 0x781   :  { %7641 = vmatmul.f32.vlgmr.msrb.gmra.mxu0 %v7640_v8  ;;  %7715 = vmatmul.f32.vlgmr.msrb.gmra.mxu3 %v7638_v39  ;;  %v7789_v48 = vsub.f32 %v7769_v41, %v14992_v36  ;;  %v7965_v21 = vsub.f32 %v7918_v50, %v14994_v55  ;;  %v7261_v8 = vor.u32 1.1754944e-38, %v7260_v5  ;;  %v8117_v39 = vsub.f32 %v8070_v18, %v14996_v33 }
 0x782   :  { %v7252_v49 = vmul.f32 %v13338_v53, %v7251_v43  ;;  %v7662_v23 = vand.u32 4294901760, %v7661_v10  ;;  %7817 = vmatpush.msra.mxu3 %v7816_v38  ;;  %7688 = vmatpush.msrb.mxu2 %v7661_v10 }
 0x783   :  { %7691 = vmatmul.f32.vlgmr.msrb.gmra.mxu2 %v7637_v24  ;;  %v7790_v0 = vand.u32 4294901760, %v7789_v48  ;;  %v7966_v19 = vand.u32 4294901760, %v7965_v21 }
 0x784   :  { %7911 = vmatpush.msrb.mxu3 %v14985_v15  ;;  %v7253_v40 = vadd.f32 %v13338_v53, %v7252_v49  ;;  %v7663_v31 = vsub.f32 %v7661_v10, %v7662_v23  ;;  %7787 = vmatpush.msra.mxu2 %v14985_v15  ;;  %v8118_v10 = vand.u32 4294901760, %v8117_v39 }
 0x785   :  { %7737 = vmatpush.msra.mxu0 %v7662_v23  ;;  %v7791_v43 = vsub.f32 %v7789_v48, %v7790_v0 }
 0x786   :  { %7889 = vmatpush.msrb.mxu2 %v7814_v3  ;;  %v7257_v38 = vsel %vm7256_vm14, %v13338_v53, %v7253_v40  ;;  %v7664_v41 = vand.u32 4294901760, %v7663_v31  ;;  %v7967_v53 = vsub.f32 %v7965_v21, %v7966_v19  ;;  %v8119_v18 = vsub.f32 %v8117_v39, %v8118_v10  ;;  %v8222_v40 = vpop.permute.xlu2 %8221 }
 0x787   :  { %7840 = vmatpush.msrb.mxu0 %v7813_v34  ;;  %v7262_v24 = vsel %vm7259_vm15, %v7261_v8, %v7257_v38  ;;  %v7792_v34 = vand.u32 4294901760, %v7791_v43  ;;  %v15015_v31 = vand.u32 4294901760, %v8222_v40 }
 0x788   :  { %v7263_v49 = vmul.f32 %v14900_v28, %v7262_v24  ;;  %7665 = vmatpush.msrb.mxu1 %v7664_v41  ;;  %v7968_v46 = vand.u32 4294901760, %v7967_v53  ;;  %v8120_v23 = vand.u32 4294901760, %v8119_v18 }
 0x789   :  { %7667 = vmatmul.f32.vlgmr.msrb.gmra.mxu1 %v14982_v56  ;;  %7739 = vmatmul.f32.vlgmr.msra.gmra.mxu0 %v14982_v56 }
 0x78a   :  { %v7921_v50 = vsel %vm543_vm1, %v7263_v49, 0  ;;  %7759 = vmatpush.msra.mxu1 %v7634_v20  ;;  %7819 = vmatmul.f32.vlgmr.msra.gmra.mxu3 %v14992_v36 }
 0x78b   :  { %v7940_v3 = vand.u32 4294901760, %v7921_v50  ;;  %7939 = vmatpush.msra.mxu0 %v14994_v55  ;;  %8015 = vmatpush.msra.mxu3 %v14994_v55 }
 0x78c   :  { %7863 = vmatpush.msrb.mxu1 %v14985_v15  ;;  %7793 = vmatmul.f32.vlgmr.msra.gmra.mxu2 %v7792_v34 }
 0x78d   :  { %v7941_v28 = vsub.f32 %v7921_v50, %v7940_v3  ;;  %7992 = vmatpush.msra.mxu2 %v7965_v21 }
 0x78f   :  { %v7942_v5 = vand.u32 4294901760, %v7941_v28 }
 0x791   :  { %7761 = vmatmul.f32.vlgmr.msra.gmra.mxu1 %v14982_v56  ;;  %7843 = vmatmul.f32.vlgmr.msrb.gmra.mxu0 %v7789_v48  ;;  %v7943_v20 = vsub.f32 %v7941_v28, %v7942_v5  ;;  %v15020_v56 = vsub.f32 %v8222_v40, %v15015_v31 }
 0x792   :  { %7913 = vmatmul.f32.vlgmr.msrb.gmra.mxu3 %v14992_v36  ;;  %7969 = vmatpush.msra.mxu1 %v7968_v46 }
 0x793   :  { %8041 = vmatpush.msrb.mxu0 %v7966_v19  ;;  %8121 = vmatpush.msrb.mxu3 %v8120_v23  ;;  %v7944_v15 = vand.u32 4294901760, %v7943_v20 }
 0x794   :  { %7891 = vmatmul.f32.vlgmr.msrb.gmra.mxu2 %v14992_v36  ;;  %v8270_v36 = vand.u32 4294901760, %v15020_v56 }
 0x795   :  { %8091 = vmatpush.msrb.mxu2 %v14996_v33 }
 0x799   :  { %7867 = vmatmul.f32.vlgmr.msrb.gmra.mxu1 %v7790_v0  ;;  %7945 = vmatmul.f32.vlgmr.msra.gmra.mxu0 %v7944_v15 }
 0x79a   :  { %8019 = vmatmul.f32.vlgmr.msra.gmra.mxu3 %v7942_v5  ;;  %8063 = vmatpush.msrb.mxu1 %v14994_v55  ;;  %v8271_v55 = vsub.f32 %v15020_v56, %v8270_v36 }
 0x79b   :  { %8144 = vmatpush.msra.mxu0 %v8117_v39  ;;  %8215 = vmatpush.msra.mxu3 %v14996_v33 }
 0x79c   :  { %7995 = vmatmul.f32.vlgmr.msra.gmra.mxu2 %v7941_v28  ;;  %v8272_v48 = vand.u32 4294901760, %v8271_v55 }
 0x79d   :  { %8193 = vmatpush.msra.mxu2 %v8118_v10 }
 0x7a1   :  { %7971 = vmatmul.f32.vlgmr.msra.gmra.mxu1 %v7940_v3  ;;  %8043 = vmatmul.f32.vlgmr.msrb.gmra.mxu0 %v7940_v3 }
 0x7a2   :  { %8167 = vmatpush.msra.mxu1 %v14996_v33  ;;  %8243 = vmatpush.msrb.mxu0 %v15015_v31 }
 0x7a8   :  { %v7182_v0 = vpop.xlane.xlu0 %7181 }
 0x7a9   :  { %13339 = vrcp.f32 %v7182_v0  ;;  %v7185_v21 = vpop.xlane.xlu1 %7184  ;;  %8065 = vmatmul.f32.vlgmr.msrb.gmra.mxu1 %v7940_v3  ;;  %v7275_v24 = vand.u32 2147483648, %v7182_v0  ;;  %v7273_v10 = vand.u32 2147483647, %v7182_v0  ;;  %vm7269_vm4 = vweird.f32 %v7182_v0 }
 0x7aa   :  { %13341 = vrcp.f32 %v7185_v21  ;;  %8273 = vmatpush.msrb.mxu1 %v8272_v48  ;;  %v7290_v50 = vand.u32 2147483648, %v7185_v21  ;;  %v7288_v53 = vand.u32 2147483647, %v7185_v21  ;;  %vm7284_vm6 = vweird.f32 %v7185_v21 }
 0x7ab   :  { %v7276_v18 = vor.u32 1.1754944e-38, %v7275_v24  ;;  %vm7274_vm7 = vcmp.eq.f32.partialorder %v7273_v10, 8.507059e+37 }
 0x7ac   :  { %v7291_v23 = vor.u32 1.1754944e-38, %v7290_v50  ;;  %vm7289_vm9 = vcmp.eq.f32.partialorder %v7288_v53, 8.507059e+37 }
 0x7af   :  { %v13340_v8 = vpop.eup %13339 }
 0x7b0   :  { %v13342_v39 = vpop.eup %13341  ;;  %v7265_v38 = vmul.f32 %v13340_v8, %v7182_v0  ;;  %v7188_v41 = vpop.xlane.xlu0 %7187  ;;  %vm7270_vm2 = vweird.f32 %v13340_v8 }
 0x7b1   :  { %v7280_v43 = vmul.f32 %v13342_v39, %v7185_v21  ;;  %13343 = vrcp.f32 %v7188_v41  ;;  %vm7285_vm3 = vweird.f32 %v13342_v39  ;;  %vm7271_vm5 = vmor %vm7269_vm4, %vm7270_vm2  ;;  %vm7299_vm11 = vweird.f32 %v7188_v41 }
 0x7b2   :  { %v7266_v33 = vsub.f32 1.0, %v7265_v38  ;;  %vm7286_vm8 = vmor %vm7284_vm6, %vm7285_vm3 }
 0x7b3   :  { %v7281_v49 = vsub.f32 1.0, %v7280_v43 }
 0x7b4   :  { %v7267_v19 = vmul.f32 %v13340_v8, %v7266_v33 }
 0x7b5   :  { %v7282_v34 = vmul.f32 %v13342_v39, %v7281_v49  ;;  %v8526_v49 = vpop.permute.xlu2 %8525 }
 0x7b6   :  { %v7268_v28 = vadd.f32 %v13340_v8, %v7267_v19 }
 0x7b7   :  { %v13344_v3 = vpop.eup %13343  ;;  %v7283_v5 = vadd.f32 %v13342_v39, %v7282_v34 }
 0x7b8   :  { %v7272_v46 = vsel %vm7271_vm5, %v13340_v8, %v7268_v28  ;;  %v7295_v20 = vmul.f32 %v13344_v3, %v7188_v41  ;;  %vm7300_vm10 = vweird.f32 %v13344_v3  ;;  %v7305_v8 = vand.u32 2147483648, %v7188_v41 }
 0x7b9   :  { %v7277_v40 = vsel %vm7274_vm7, %v7276_v18, %v7272_v46  ;;  %v7287_v15 = vsel %vm7286_vm8, %v13342_v39, %v7283_v5  ;;  %v7303_v39 = vand.u32 2147483647, %v7188_v41  ;;  %vm7301_vm12 = vmor %vm7299_vm11, %vm7300_vm10 }
 0x7ba   :  { %v7278_v55 = vmul.f32 %v14929_v29, %v7277_v40  ;;  %v7292_v48 = vsel %vm7289_vm9, %v7291_v23, %v7287_v15  ;;  %v7296_v38 = vsub.f32 1.0, %v7295_v20 }
 0x7bb   :  { %v7293_v43 = vmul.f32 %v14931_v58, %v7292_v48  ;;  %v7306_v58 = vor.u32 1.1754944e-38, %v7305_v8  ;;  %vm7304_vm13 = vcmp.eq.f32.partialorder %v7303_v39, 8.507059e+37 }
 0x7bc   :  { %v7297_v0 = vmul.f32 %v13344_v3, %v7296_v38  ;;  %v8073_v33 = vsel %vm543_vm1, %v7278_v55, 0 }
 0x7bd   :  { %v8225_v21 = vsel %vm543_vm1, %v7293_v43, 0  ;;  %v8092_v24 = vand.u32 4294901760, %v8073_v33 }
 0x7be   :  { %v8244_v19 = vand.u32 4294901760, %v8225_v21  ;;  %v7298_v10 = vadd.f32 %v13344_v3, %v7297_v0  ;;  %v8682_v0 = vpop.permute.xlu2 %8681 }
 0x7bf   :  { %8123 = vmatmul.f32.vlgmr.msrb.gmra.mxu3 %v8092_v24  ;;  %v8093_v29 = vsub.f32 %v8073_v33, %v8092_v24 }
 0x7c0   :  { %v8245_v50 = vsub.f32 %v8225_v21, %v8244_v19  ;;  %v7302_v34 = vsel %vm7301_vm12, %v13344_v3, %v7298_v10  ;;  %8319 = vmatpush.msrb.mxu3 %v15015_v31 }
 0x7c1   :  { %v8528_v53 = vpop.permute.xlu1 %8527  ;;  %8147 = vmatmul.f32.vlgmr.msra.gmra.mxu0 %v8093_v29  ;;  %v8094_v28 = vand.u32 4294901760, %v8093_v29  ;;  %v7307_v46 = vsel %vm7304_vm13, %v7306_v58, %v7302_v34 }
 0x7c2   :  { %v8531_v18 = vsel %vm543_vm1, %v8528_v53, 0  ;;  %8345 = vmatpush.msra.mxu0 %v8270_v36  ;;  %v8246_v5 = vand.u32 4294901760, %v8245_v50  ;;  %v7308_v55 = vmul.f32 %v14939_v11, %v7307_v46  ;;  %v8529_v11 = vsel %vm543_vm1, %v8526_v49, 0 }
 0x7c3   :  { %v8548_v41 = vand.u32 4294901760, %v8531_v18  ;;  %v8374_v23 = vpop.permute.xlu0 %8373  ;;  %8171 = vmatmul.f32.vlgmr.msra.gmra.mxu1 %v8094_v28  ;;  %v8095_v20 = vsub.f32 %v8093_v29, %v8094_v28  ;;  %v15042_v58 = vand.u32 4294901760, %v8529_v11 }
 0x7c4   :  { %v8394_v40 = vand.u32 4294901760, %v8374_v23  ;;  %8367 = vmatpush.msra.mxu1 %v15015_v31  ;;  %v8247_v3 = vsub.f32 %v8245_v50, %v8246_v5  ;;  %v8377_v8 = vsel %vm543_vm1, %v7308_v55, 0  ;;  %v8685_v31 = vsel %vm543_vm1, %v8682_v0, 0 }
 0x7c5   :  { %v8096_v15 = vand.u32 4294901760, %v8095_v20  ;;  %v8575_v48 = vsub.f32 %v8531_v18, %v8548_v41  ;;  %v8396_v39 = vand.u32 4294901760, %v8377_v8  ;;  %v8702_v29 = vand.u32 4294901760, %v8685_v31 }
 0x7c6   :  { %v8421_v38 = vsub.f32 %v8374_v23, %v8394_v40  ;;  %v8248_v43 = vand.u32 4294901760, %v8247_v3  ;;  %v8551_v49 = vsub.f32 %v8529_v11, %v15042_v58  ;;  %v8836_v18 = vpop.permute.xlu2 %8835 }
 0x7c7   :  { %8097 = vmatmul.f32.vlgmr.msrb.gmra.mxu2 %v8096_v15  ;;  %8217 = vmatmul.f32.vlgmr.msra.gmra.mxu3 %v8092_v24  ;;  %v8576_v33 = vand.u32 4294901760, %v8575_v48  ;;  %v15044_v53 = vsub.f32 %v8685_v31, %v8702_v29 }
 0x7c8   :  { %v8422_v36 = vand.u32 4294901760, %v8421_v38  ;;  %8296 = vmatpush.msrb.mxu2 %v15020_v56  ;;  %v8397_v56 = vsub.f32 %v8377_v8, %v8396_v39  ;;  %v8552_v3 = vand.u32 4294901760, %v8551_v49 }
 0x7c9   :  { %8249 = vmatmul.f32.vlgmr.msrb.gmra.mxu0 %v8248_v43  ;;  %v8577_v34 = vsub.f32 %v8575_v48, %v8576_v33  ;;  %v8730_v23 = vand.u32 4294901760, %v15044_v53 }
 0x7ca   :  { %v8423_v21 = vsub.f32 %v8421_v38, %v8422_v36  ;;  %8448 = vmatpush.msrb.mxu0 %v8421_v38  ;;  %v8398_v46 = vand.u32 4294901760, %v8397_v56 }
 0x7cb   :  { %8275 = vmatmul.f32.vlgmr.msrb.gmra.mxu1 %v8244_v19  ;;  %v8578_v28 = vand.u32 4294901760, %v8577_v34  ;;  %v8680_v20 = vpop.permute.xlu0 %8679 }
 0x7cc   :  { %v8424_v10 = vand.u32 4294901760, %v8423_v21  ;;  %8471 = vmatpush.msrb.mxu1 %v8394_v40  ;;  %v8683_v8 = vsel %vm543_vm1, %v8680_v20, 0 }
 0x7cd   :  { %v8704_v31 = vand.u32 4294901760, %v8683_v8 }
 0x7ce   :  { %8425 = vmatpush.msra.mxu3 %v8424_v10  ;;  %v8988_v20 = vpop.permute.xlu2 %8987 }
 0x7cf   :  { %8195 = vmatmul.f32.vlgmr.msra.gmra.mxu2 %v8092_v24  ;;  %8323 = vmatmul.f32.vlgmr.msrb.gmra.mxu3 %v8246_v5  ;;  %v8839_v24 = vsel %vm543_vm1, %v8836_v18, 0  ;;  %v8399_v5 = vsub.f32 %v8397_v56, %v8398_v46 }
 0x7d0   :  { %8395 = vmatpush.msra.mxu2 %v8394_v40  ;;  %8519 = vmatpush.msrb.mxu3 %v8394_v40  ;;  %v8731_v40 = vsub.f32 %v15044_v53, %v8730_v23  ;;  %v8856_v15 = vand.u32 4294901760, %v8839_v24 }
 0x7d1   :  { %8347 = vmatmul.f32.vlgmr.msra.gmra.mxu0 %v8244_v19  ;;  %v8400_v55 = vand.u32 4294901760, %v8399_v5 }
 0x7d2   :  { %8549 = vmatpush.xpose.msra.mxu0 %v8548_v41  ;;  %v8732_v38 = vand.u32 4294901760, %v8731_v40  ;;  %v8883_v43 = vsub.f32 %v8839_v24, %v8856_v15 }
 0x7d3   :  { %8369 = vmatmul.f32.vlgmr.msra.gmra.mxu1 %v8244_v19  ;;  %v8553_v19 = vsub.f32 %v8551_v49, %v8552_v3  ;;  %v8990_v21 = vpop.permute.xlu0 %8989 }
 0x7d4   :  { %8579 = vmatpush.xpose.msra.mxu1 %v8578_v28 }
 0x7d5   :  { %v8554_v0 = vand.u32 4294901760, %v8553_v19 }
 0x7d7   :  { %8299 = vmatmul.f32.vlgmr.msrb.gmra.mxu2 %v8245_v50  ;;  %8427 = vmatmul.f32.vlgmr.msra.gmra.mxu3 %v8396_v39  ;;  %v8834_v50 = vpop.permute.xlu1 %8833 }
 0x7d8   :  { %8497 = vmatpush.msrb.mxu2 %v8422_v36  ;;  %8625 = vmatpush.xpose.msra.mxu3 %v8548_v41  ;;  %v8884_v36 = vand.u32 4294901760, %v8883_v43 }
 0x7d9   :  { %8451 = vmatmul.f32.vlgmr.msrb.gmra.mxu0 %v8397_v56 }
 0x7da   :  { %8651 = vmatpush.xpose.msrb.mxu0 %v8576_v33  ;;  %v8993_v33 = vsel %vm543_vm1, %v8990_v21, 0  ;;  %v8885_v11 = vsub.f32 %v8883_v43, %v8884_v36  ;;  %v9298_v21 = vpop.permute.xlu2 %9297 }
 0x7db   :  { %8475 = vmatmul.f32.vlgmr.msrb.gmra.mxu1 %v8398_v46  ;;  %v9010_v10 = vand.u32 4294901760, %v8993_v33 }
 0x7dc   :  { %8673 = vmatpush.xpose.msrb.mxu1 %v8548_v41  ;;  %v8837_v41 = vsel %vm543_vm1, %v8834_v50, 0  ;;  %v8886_v56 = vand.u32 4294901760, %v8885_v11  ;;  %v9142_v50 = vpop.permute.xlu0 %9141 }
 0x7dd   :  { %v15055_v34 = vand.u32 4294901760, %v8837_v41 }
 0x7df   :  { %8401 = vmatmul.f32.vlgmr.msra.gmra.mxu2 %v8400_v55  ;;  %8521 = vmatmul.f32.vlgmr.msrb.gmra.mxu3 %v8396_v39  ;;  %v15061_v28 = vsub.f32 %v8837_v41, %v15055_v34  ;;  %v9144_v18 = vpop.permute.xlu1 %9143  ;;  %v15075_v55 = vpop.f32.mrf.mxu1 }
 0x7e0   :  { %8602 = vmatpush.xpose.msra.mxu2 %v8575_v48  ;;  %8733 = vmatpush.xpose.msrb.mxu3 %v8732_v38  ;;  %v8705_v48 = vsub.f32 %v8683_v8, %v8704_v31 }
 0x7e1   :  { %8555 = vmatmul.f32.vlgmr.msra.gmra.mxu0 %v8554_v0 }
 0x7e2   :  { %8756 = vmatpush.xpose.msra.mxu0 %v15044_v53  ;;  %v15058_v53 = vsub.f32 %v8993_v33, %v9010_v10  ;;  %v8706_v46 = vand.u32 4294901760, %v8705_v48  ;;  %v15072_v40 = vpop.f32.mrf.mxu0  ;;  %v9145_v33 = vsel %vm543_vm1, %v9142_v50, 0 }
 0x7e3   :  { %8581 = vmatmul.f32.vlgmr.msra.gmra.mxu1 %v15042_v58 }
 0x7e4   :  { %8779 = vmatpush.xpose.msra.mxu1 %v8702_v29  ;;  %v8707_v24 = vsub.f32 %v8705_v48, %v8706_v46 }
 0x7e7   :  { %8499 = vmatmul.f32.vlgmr.msrb.gmra.mxu2 %v8396_v39  ;;  %8629 = vmatmul.f32.vlgmr.msra.gmra.mxu3 %v8552_v3  ;;  %v9038_v39 = vand.u32 4294901760, %v15058_v53  ;;  %v9147_v3 = vsel %vm543_vm1, %v9144_v18, 0  ;;  %v15095_v18 = vand.u32 4294901760, %v9145_v33 }
 0x7e8   :  { %8703 = vmatpush.xpose.msrb.mxu2 %v8702_v29  ;;  %8827 = vmatpush.xpose.msra.mxu3 %v8702_v29  ;;  %v8860_v29 = vand.u32 4294901760, %v15061_v28  ;;  %v15067_v5 = vand.u32 4294901760, %v9147_v3 }
 0x7e9   :  { %8653 = vmatmul.f32.vlgmr.msrb.gmra.mxu0 %v15042_v58 }
 0x7ea   :  { %8857 = vmatpush.xpose.msrb.mxu0 %v8856_v15  ;;  %v8861_v19 = vsub.f32 %v15061_v28, %v8860_v29  ;;  %v15086_v41 = vpop.f32.mrf.mxu0 }
 0x7eb   :  { %8675 = vmatmul.f32.vlgmr.msrb.gmra.mxu1 %v15042_v58  ;;  %v9039_v58 = vsub.f32 %v15058_v53, %v9038_v39 }
 0x7ec   :  { %8887 = vmatpush.xpose.msrb.mxu1 %v8886_v56  ;;  %v8862_v0 = vand.u32 4294901760, %v8861_v19  ;;  %v15093_v56 = vpop.f32.mrf.mxu1  ;;  %v9296_v19 = vpop.permute.xlu1 %9295 }
 0x7ed   :  { %v9040_v38 = vand.u32 4294901760, %v9039_v58  ;;  %v15106_v58 = vsub.f32 %v9145_v33, %v15095_v18 }
 0x7ef   :  { %8605 = vmatmul.f32.vlgmr.msra.gmra.mxu2 %v8551_v49  ;;  %8735 = vmatmul.f32.vlgmr.msrb.gmra.mxu3 %v8704_v31  ;;  %v8708_v49 = vand.u32 4294901760, %v8707_v24 }
 0x7f0   :  { %8805 = vmatpush.xpose.msra.mxu2 %v8730_v23  ;;  %8933 = vmatpush.xpose.msrb.mxu3 %v8856_v15  ;;  %v15078_v23 = vsub.f32 %v9147_v3, %v15067_v5 }
 0x7f1   :  { %8759 = vmatmul.f32.vlgmr.msra.gmra.mxu0 %v8705_v48 }
 0x7f2   :  { %8959 = vmatpush.xpose.msra.mxu0 %v8884_v36  ;;  %v8991_v36 = vsel %vm543_vm1, %v8988_v20, 0  ;;  %v9192_v8 = vand.u32 4294901760, %v15078_v23 }
 0x7f3   :  { %8783 = vmatmul.f32.vlgmr.msra.gmra.mxu1 %v8706_v46  ;;  %v15088_v11 = vand.u32 4294901760, %v8991_v36  ;;  %v15097_v46 = vpop.f32.mrf.mxu3 }
 0x7f4   :  { %8981 = vmatpush.xpose.msra.mxu1 %v8856_v15  ;;  %v9301_v15 = vsel %vm543_vm1, %v9298_v21, 0  ;;  %v9193_v48 = vsub.f32 %v15078_v23, %v9192_v8  ;;  %v15116_v21 = vpop.f32.mrf.mxu1 }
 0x7f5   :  { %v9013_v20 = vsub.f32 %v8991_v36, %v15088_v11  ;;  %16462 = vst [vmem:[#allocation84_spill] sm:$0xff] %v15116_v21  ;;  %v15124_v36 = vpop.f32.mrf.mxu2 }
 0x7f6   :  { %v9194_v24 = vand.u32 4294901760, %v9193_v48 }
 0x7f7   :  { %8709 = vmatmul.f32.vlgmr.msrb.gmra.mxu2 %v8708_v49  ;;  %8829 = vmatmul.f32.vlgmr.msra.gmra.mxu3 %v8704_v31  ;;  %v15110_v49 = vpop.f32.mrf.mxu0 }
 0x7f8   :  { %8910 = vmatpush.xpose.msrb.mxu2 %v8883_v43  ;;  %9041 = vmatpush.xpose.msra.mxu3 %v9040_v38  ;;  %v15090_v43 = vand.u32 4294901760, %v9301_v15  ;;  %16461 = vst [vmem:[#allocation83_spill] sm:$0xff] %v15110_v49  ;;  %v9168_v38 = vand.u32 4294901760, %v15106_v58 }
 0x7f9   :  { %8863 = vmatmul.f32.vlgmr.msrb.gmra.mxu0 %v8862_v0 }
 0x7fa   :  { %9064 = vmatpush.xpose.msrb.mxu0 %v15058_v53  ;;  %v15102_v3 = vsub.f32 %v9301_v15, %v15090_v43  ;;  %v9169_v33 = vsub.f32 %v15106_v58, %v9168_v38 }
 0x7fb   :  { %8889 = vmatmul.f32.vlgmr.msrb.gmra.mxu1 %v15055_v34 }
 0x7fc   :  { %9087 = vmatpush.xpose.msrb.mxu1 %v9010_v10 }
 0x7ff   :  { %8807 = vmatmul.f32.vlgmr.msra.gmra.mxu2 %v8704_v31  ;;  %8937 = vmatmul.f32.vlgmr.msrb.gmra.mxu3 %v8860_v29  ;;  %v9452_v31 = vpop.permute.xlu0 %9451  ;;  %v9014_v29 = vand.u32 4294901760, %v9013_v20 }
 0x800   :  { %9011 = vmatpush.xpose.msra.mxu2 %v9010_v10  ;;  %9135 = vmatpush.xpose.msrb.mxu3 %v9010_v10  ;;  %v16385_v10 = vand.u32 4294901760, %v15102_v3  ;;  %v9455_v0 = vsel %vm543_vm1, %v9452_v31, 0  ;;  %v9606_v31 = vpop.permute.xlu1 %9605 }
 0x801   :  { %8961 = vmatmul.f32.vlgmr.msra.gmra.mxu0 %v15055_v34  ;;  %v15126_v15 = vand.u32 4294901760, %v9455_v0 }
 0x802   :  { %9165 = vmatpush.xpose.msra.mxu0 %v15067_v5  ;;  %v9347_v50 = vsub.f32 %v15102_v3, %v16385_v10 }
 0x803   :  { %8983 = vmatmul.f32.vlgmr.msra.gmra.mxu1 %v15055_v34  ;;  %v9015_v34 = vsub.f32 %v9013_v20, %v9014_v29  ;;  %v15133_v48 = vsub.f32 %v9455_v0, %v15126_v15  ;;  %v15143_v0 = vpop.f32.mrf.mxu2 }
 0x804   :  { %9195 = vmatpush.xpose.msra.mxu1 %v9194_v24  ;;  %v9170_v24 = vand.u32 4294901760, %v9169_v33 }
 0x805   :  { %v9016_v53 = vand.u32 4294901760, %v9015_v34  ;;  %v9609_v34 = vsel %vm543_vm1, %v9606_v31, 0 }
 0x806   :  { %v15138_v10 = vpop.f32.mrf.mxu1 }
 0x807   :  { %8913 = vmatmul.f32.vlgmr.msrb.gmra.mxu2 %v15061_v28  ;;  %9043 = vmatmul.f32.vlgmr.msra.gmra.mxu3 %v15088_v11  ;;  %v15128_v28 = vpop.f32.mrf.mxu3  ;;  %16464 = vst [vmem:[#allocation86_spill] sm:$0xff] %v15138_v10 }
 0x808   :  { %9113 = vmatpush.xpose.msrb.mxu2 %v9038_v39  ;;  %9241 = vmatpush.xpose.msra.mxu3 %v15067_v5  ;;  %v9348_v39 = vand.u32 4294901760, %v9347_v50 }
 0x809   :  { %9067 = vmatmul.f32.vlgmr.msrb.gmra.mxu0 %v9013_v20  ;;  %v15135_v20 = vpop.f32.mrf.mxu0 }
 0x80a   :  { %9267 = vmatpush.xpose.msrb.mxu0 %v9192_v8  ;;  %16463 = vst [vmem:[#allocation85_spill] sm:$0xff] %v15135_v20  ;;  %v9450_v8 = vpop.permute.xlu2 %9449 }
 0x80b   :  { %9091 = vmatmul.f32.vlgmr.msrb.gmra.mxu1 %v9014_v29  ;;  %v9500_v29 = vand.u32 4294901760, %v15133_v48  ;;  %v9453_v50 = vsel %vm543_vm1, %v9450_v8, 0 }
 0x80c   :  { %9289 = vmatpush.xpose.msrb.mxu1 %v15067_v5  ;;  %v9299_v5 = vsel %vm543_vm1, %v9296_v19, 0 }
 0x80d   :  { %v9501_v19 = vsub.f32 %v15133_v48, %v9500_v29 }
 0x80e   :  { %v15159_v21 = vpop.f32.mrf.mxu1 }
 0x80f   :  { %9017 = vmatmul.f32.vlgmr.msra.gmra.mxu2 %v9016_v53  ;;  %9137 = vmatmul.f32.vlgmr.msrb.gmra.mxu3 %v15088_v11  ;;  %v15149_v33 = vpop.f32.mrf.mxu3  ;;  %v9626_v53 = vand.u32 4294901760, %v9609_v34  ;;  %16467 = vst [vmem:[#allocation89_spill] sm:$0xff] %v15159_v21 }
 0x810   :  { %9218 = vmatpush.xpose.msra.mxu2 %v15078_v23  ;;  %9349 = vmatpush.xpose.msrb.mxu3 %v9348_v39  ;;  %16465 = vst [vmem:[#allocation87_spill] sm:$0xff] %v15149_v33  ;;  %v9320_v23 = vand.u32 4294901760, %v9299_v5  ;;  %v9474_v39 = vand.u32 4294901760, %v9453_v50  ;;  %v9502_v33 = vand.u32 4294901760, %v9501_v19 }
 0x811   :  { %9171 = vmatmul.f32.vlgmr.msra.gmra.mxu0 %v9170_v24  ;;  %v15154_v24 = vpop.f32.mrf.mxu0  ;;  %v9653_v8 = vsub.f32 %v9609_v34, %v9626_v53 }
 0x812   :  { %9372 = vmatpush.xpose.msra.mxu0 %v15102_v3  ;;  %16466 = vst [vmem:[#allocation88_spill] sm:$0xff] %v15154_v24  ;;  %v9321_v31 = vsub.f32 %v9299_v5, %v9320_v23  ;;  %v9475_v10 = vsub.f32 %v9453_v50, %v9474_v39  ;;  %v16470_v5 = vand.u32 4294901760, %v15102_v3 }
 0x813   :  { %9197 = vmatmul.f32.vlgmr.msra.gmra.mxu1 %v15095_v18  ;;  %v9654_v20 = vand.u32 4294901760, %v9653_v8 }
 0x814   :  { %9395 = vmatpush.xpose.msra.mxu1 %v15090_v43  ;;  %v9322_v24 = vand.u32 4294901760, %v9321_v31 }
 0x815   :  { %v9655_v50 = vsub.f32 %v9653_v8, %v9654_v20 }
 0x816   :  { %v9323_v34 = vsub.f32 %v9321_v31, %v9322_v24  ;;  %v15175_v21 = vpop.f32.mrf.mxu1 }
 0x817   :  { %9115 = vmatmul.f32.vlgmr.msrb.gmra.mxu2 %v15088_v11  ;;  %9245 = vmatmul.f32.vlgmr.msra.gmra.mxu3 %v9168_v38  ;;  %v15163_v11 = vpop.f32.mrf.mxu2  ;;  %v15165_v38 = vpop.f32.mrf.mxu3  ;;  %16473 = vst [vmem:[#allocation94_spill] sm:$0xff] %v15175_v21 }
 0x818   :  { %9319 = vmatpush.xpose.msrb.mxu2 %v15090_v43  ;;  %9443 = vmatpush.xpose.msra.mxu3 %v15090_v43  ;;  %16468 = vst [vmem:[#allocation90_spill] sm:$0xff] %v15163_v11  ;;  %v9476_v43 = vand.u32 4294901760, %v9475_v10  ;;  %v9604_v11 = vpop.permute.xlu0 %9603 }
 0x819   :  { %9269 = vmatmul.f32.vlgmr.msrb.gmra.mxu0 %v15095_v18  ;;  %16469 = vst [vmem:[#allocation91_spill] sm:$0xff] %v15165_v38  ;;  %v9656_v38 = vand.u32 4294901760, %v9655_v50 }
 0x81a   :  { %9473 = vmatpush.xpose.msrb.mxu0 %v15126_v15  ;;  %v9477_v19 = vsub.f32 %v9475_v10, %v9476_v43 }
 0x81b   :  { %9291 = vmatmul.f32.vlgmr.msrb.gmra.mxu1 %v15095_v18  ;;  %v15171_v18 = vpop.f32.mrf.mxu0 }
 0x81c   :  { %9503 = vmatpush.xpose.msrb.mxu1 %v9502_v33  ;;  %16471 = vst [vmem:[#allocation92_spill] sm:$0xff] %v15171_v18 }
 0x81f   :  { %9221 = vmatmul.f32.vlgmr.msra.gmra.mxu2 %v15106_v58  ;;  %9351 = vmatmul.f32.vlgmr.msrb.gmra.mxu3 %v9320_v23  ;;  %v15173_v33 = vpop.f32.mrf.mxu2  ;;  %v9324_v58 = vand.u32 4294901760, %v9323_v34  ;;  %v15178_v3 = vpop.f32.mrf.mxu3 }
 0x820   :  { %9421 = vmatpush.xpose.msra.mxu2 %v16470_v5  ;;  %9549 = vmatpush.xpose.msrb.mxu3 %v15126_v15  ;;  %16472 = vst [vmem:[#allocation93_spill] sm:$0xff] %v15173_v33  ;;  %v9478_v5 = vand.u32 4294901760, %v9477_v19  ;;  %v15186_v34 = vpop.f32.mrf.mxu1 }
 0x821   :  { %9375 = vmatmul.f32.vlgmr.msra.gmra.mxu0 %v9321_v31  ;;  %16474 = vst [vmem:[#allocation95_spill] sm:$0xff] %v15178_v3 }
 0x822   :  { %9575 = vmatpush.xpose.msra.mxu0 %v9500_v29  ;;  %v9607_v29 = vsel %vm543_vm1, %v9604_v11, 0  ;;  %16477 = vst [vmem:[#allocation98_spill] sm:$0xff] %v15186_v34 }
 0x823   :  { %9399 = vmatmul.f32.vlgmr.msra.gmra.mxu1 %v9322_v24  ;;  %v15182_v24 = vpop.f32.mrf.mxu0 }
 0x824   :  { %9597 = vmatpush.xpose.msra.mxu1 %v15126_v15  ;;  %16475 = vst [vmem:[#allocation96_spill] sm:$0xff] %v15182_v24  ;;  %v9628_v15 = vand.u32 4294901760, %v9607_v29 }
 0x827   :  { %9325 = vmatmul.f32.vlgmr.msrb.gmra.mxu2 %v9324_v58  ;;  %9445 = vmatmul.f32.vlgmr.msra.gmra.mxu3 %v9320_v23  ;;  %v15184_v31 = vpop.f32.mrf.mxu2  ;;  %v15188_v50 = vpop.f32.mrf.mxu3 }
 0x828   :  { %9526 = vmatpush.xpose.msrb.mxu2 %v15133_v48  ;;  %9657 = vmatpush.xpose.msra.mxu3 %v9656_v38  ;;  %16476 = vst [vmem:[#allocation97_spill] sm:$0xff] %v15184_v31  ;;  %v9629_v48 = vsub.f32 %v9607_v29, %v9628_v15  ;;  %v15194_v19 = vpop.f32.mrf.mxu1 }
 0x829   :  { %9479 = vmatmul.f32.vlgmr.msrb.gmra.mxu0 %v9478_v5  ;;  %16478 = vst [vmem:[#allocation99_spill] sm:$0xff] %v15188_v50 }
 0x82a   :  { %9680 = vmatpush.xpose.msrb.mxu0 %v9653_v8  ;;  %v9630_v11 = vand.u32 4294901760, %v9629_v48  ;;  %16481 = vst [vmem:[#allocation102_spill] sm:$0xff] %v15194_v19 }
 0x82b   :  { %9505 = vmatmul.f32.vlgmr.msrb.gmra.mxu1 %v9474_v39  ;;  %v15190_v8 = vpop.f32.mrf.mxu0 }
 0x82c   :  { %9703 = vmatpush.xpose.msrb.mxu1 %v9626_v53  ;;  %16479 = vst [vmem:[#allocation100_spill] sm:$0xff] %v15190_v8  ;;  %v9631_v58 = vsub.f32 %v9629_v48, %v9630_v11 }
 0x82f   :  { %9423 = vmatmul.f32.vlgmr.msra.gmra.mxu2 %v9320_v23  ;;  %9553 = vmatmul.f32.vlgmr.msrb.gmra.mxu3 %v9476_v43  ;;  %v15192_v38 = vpop.f32.mrf.mxu2  ;;  %v15196_v23 = vpop.f32.mrf.mxu3  ;;  %v9632_v43 = vand.u32 4294901760, %v9631_v58 }
 0x830   :  { %9627 = vmatpush.xpose.msra.mxu2 %v9626_v53  ;;  %9751 = vmatpush.xpose.msrb.mxu3 %v9626_v53  ;;  %16480 = vst [vmem:[#allocation101_spill] sm:$0xff] %v15192_v38 }
 0x831   :  { %9577 = vmatmul.f32.vlgmr.msra.gmra.mxu0 %v9474_v39  ;;  %16482 = vst [vmem:[#allocation103_spill] sm:$0xff] %v15196_v23 }
 0x833   :  { %9599 = vmatmul.f32.vlgmr.msra.gmra.mxu1 %v9474_v39 }
 0x837   :  { %9529 = vmatmul.f32.vlgmr.msrb.gmra.mxu2 %v9475_v10  ;;  %9659 = vmatmul.f32.vlgmr.msra.gmra.mxu3 %v9628_v15  ;;  %v15202_v5 = vpop.f32.mrf.mxu2 }
 0x838   :  { %9729 = vmatpush.xpose.msrb.mxu2 %v9654_v20  ;;  %16485 = vst [vmem:[#allocation106_spill] sm:$0xff] %v15202_v5 }
 0x839   :  { %9683 = vmatmul.f32.vlgmr.msrb.gmra.mxu0 %v9629_v48 }
 0x83b   :  { %9707 = vmatmul.f32.vlgmr.msrb.gmra.mxu1 %v9630_v11 }
 0x83e   :  { %v15198_v53 = vpop.f32.mrf.mxu0 }
 0x83f   :  { %16483 = vst [vmem:[#allocation104_spill] sm:$0xff] %v15198_v53  ;;  %9633 = vmatmul.f32.vlgmr.msra.gmra.mxu2 %v9632_v43  ;;  %9753 = vmatmul.f32.vlgmr.msrb.gmra.mxu3 %v9628_v15 }
 0x840   :  { %v15200_v39 = vpop.f32.mrf.mxu1 }
 0x841   :  { %16484 = vst [vmem:[#allocation105_spill] sm:$0xff] %v15200_v39 }
 0x842   :  { %v15204_v10 = vpop.f32.mrf.mxu3 }
 0x843   :  { %16486 = vst [vmem:[#allocation107_spill] sm:$0xff] %v15204_v10 }
 0x846   :  { %v15206_v29 = vpop.f32.mrf.mxu0 }
 0x847   :  { %16487 = vst [vmem:[#allocation108_spill] sm:$0xff] %v15206_v29  ;;  %9731 = vmatmul.f32.vlgmr.msrb.gmra.mxu2 %v9628_v15 }
 0x848   :  { %v15208_v20 = vpop.f32.mrf.mxu1 }
 0x849   :  { %16488 = vst [vmem:[#allocation109_spill] sm:$0xff] %v15208_v20 }
 0x84a   :  { %v15210_v48 = vpop.f32.mrf.mxu2  ;;  %v15212_v19 = vpop.f32.mrf.mxu3 }
 0x84b   :  { %16489 = vst [vmem:[#allocation110_spill] sm:$0xff] %v15210_v48 }
 0x84c   :  { %16490 = vst [vmem:[#allocation111_spill] sm:$0xff] %v15212_v19 }
 0x84e   :  { %v15214_v11 = vpop.f32.mrf.mxu0 }
 0x84f   :  { %16491 = vst [vmem:[#allocation112_spill] sm:$0xff] %v15214_v11 }
 0x850   :  { %v15216_v58 = vpop.f32.mrf.mxu1 }
 0x851   :  { %16492 = vst [vmem:[#allocation113_spill] sm:$0xff] %v15216_v58 }
 0x852   :  { %v15218_v43 = vpop.f32.mrf.mxu2  ;;  %v15220_v39 = vpop.f32.mrf.mxu3 }
 0x853   :  { %16493 = vst [vmem:[#allocation114_spill] sm:$0xff] %v15218_v43 }
 0x854   :  { %16494 = vst [vmem:[#allocation115_spill] sm:$0xff] %v15220_v39 }
 0x856   :  { %v15222_v53 = vpop.f32.mrf.mxu0 }
 0x857   :  { %16495 = vst [vmem:[#allocation116_spill] sm:$0xff] %v15222_v53 }
 0x858   :  { %v15224_v8 = vpop.f32.mrf.mxu1 }
 0x859   :  { %16496 = vst [vmem:[#allocation117_spill] sm:$0xff] %v15224_v8 }
 0x85a   :  { %v15226_v29 = vpop.f32.mrf.mxu2  ;;  %v15228_v15 = vpop.f32.mrf.mxu3 }
 0x85b   :  { %16497 = vst [vmem:[#allocation118_spill] sm:$0xff] %v15226_v29 }
 0x85c   :  { %16498 = vst [vmem:[#allocation119_spill] sm:$0xff] %v15228_v15 }
 0x85e   :  { %v8556_v20 = vpop.f32.mrf.mxu0 }
 0x860   :  { %v8582_v10 = vpop.f32.mrf.mxu1 }
 0x861   :  { %v8583_v53 = vadd.f32 %v8582_v10, %v8556_v20 }
 0x862   :  { %v15230_v48 = vpop.f32.mrf.mxu2  ;;  %v15232_v19 = vpop.f32.mrf.mxu3 }
 0x863   :  { %16499 = vst [vmem:[#allocation120_spill] sm:$0xff] %v15230_v48 }
 0x864   :  { %16500 = vst [vmem:[#allocation121_spill] sm:$0xff] %v15232_v19 }
 0x866   :  { %v8654_v11 = vpop.f32.mrf.mxu0 }
 0x868   :  { %v8676_v58 = vpop.f32.mrf.mxu1 }
 0x86a   :  { %v15234_v23 = vpop.f32.mrf.mxu2  ;;  %v8630_v43 = vpop.f32.mrf.mxu3 }
 0x86b   :  { %16501 = vst [vmem:[#allocation122_spill] sm:$0xff] %v15234_v23  ;;  %v13427_v23 = vld [vmem:[%s16367_s1] ss:$0 sm:$0xff] }
 0x86e   :  { %v8760_v39 = vpop.f32.mrf.mxu0 }
 0x870   :  { %v8784_v50 = vpop.f32.mrf.mxu1 }
 0x872   :  { %v8606_v5 = vpop.f32.mrf.mxu2  ;;  %v8736_v8 = vpop.f32.mrf.mxu3 }
 0x873   :  { %v8607_v38 = vadd.f32 %v8606_v5, %v8583_v53 }
 0x875   :  { %v8631_v29 = vadd.f32 %v8630_v43, %v8607_v38 }
 0x876   :  { %v8864_v34 = vpop.f32.mrf.mxu0 }
 0x877   :  { %v8655_v15 = vadd.f32 %v8654_v11, %v8631_v29 }
 0x878   :  { %v8890_v24 = vpop.f32.mrf.mxu1 }
 0x879   :  { %v8677_v21 = vadd.f32 %v8676_v58, %v8655_v15 }
 0x87a   :  { %v8710_v18 = vpop.f32.mrf.mxu2  ;;  %v8830_v48 = vpop.f32.mrf.mxu3 }
 0x87b   :  { %v8737_v3 = vadd.f32 %v8736_v8, %v8710_v18  ;;  %v9757_v19 = vmul.f32 0.35355338, %v8677_v21  ;;  %v13428_v8 = vld [vmem:[%s16367_s1 + $0x1] ss:$0 sm:$0xff] }
 0x87d   :  { %v8761_v31 = vadd.f32 %v8760_v39, %v8737_v3  ;;  %v15239_v33 = vadd.f32 %v13427_v23, %v9757_v19  ;;  %v8891_v3 = vadd.f32 %v8890_v24, %v8864_v34 }
 0x87e   :  { %v8962_v10 = vpop.f32.mrf.mxu0 }
 0x87f   :  { %v9773_v53 = vsel %vm543_vm1, %v15239_v33, -inf  ;;  %v8785_v5 = vadd.f32 %v8784_v50, %v8761_v31 }
 0x880   :  { %9774 = vmax.xlane.f32.xlu2 %v9773_v53  ;;  %v8984_v38 = vpop.f32.mrf.mxu1 }
 0x882   :  { %v8808_v29 = vpop.f32.mrf.mxu2  ;;  %v8938_v20 = vpop.f32.mrf.mxu3 }
 0x883   :  { %v8809_v11 = vadd.f32 %v8808_v29, %v8785_v5 }
 0x885   :  { %v8831_v58 = vadd.f32 %v8830_v48, %v8809_v11 }
 0x886   :  { %v9068_v21 = vpop.f32.mrf.mxu0 }
 0x887   :  { %v9758_v18 = vmul.f32 0.35355338, %v8831_v58 }
 0x888   :  { %v9092_v31 = vpop.f32.mrf.mxu1 }
 0x889   :  { %v15246_v19 = vadd.f32 %v13428_v8, %v9758_v18  ;;  %v13429_v18 = vld [vmem:[%s16367_s1 + $0x2] ss:$0 sm:$0xff] }
 0x88a   :  { %v8914_v23 = vpop.f32.mrf.mxu2  ;;  %v9044_v39 = vpop.f32.mrf.mxu3 }
 0x88b   :  { %v8915_v43 = vadd.f32 %v8914_v23, %v8891_v3  ;;  %v9776_v15 = vsel %vm543_vm1, %v15246_v19, -inf }
 0x88c   :  { %9777 = vmax.xlane.f32.xlu1 %v9776_v15 }
 0x88d   :  { %v8939_v50 = vadd.f32 %v8938_v20, %v8915_v43 }
 0x88e   :  { %v9172_v48 = vpop.f32.mrf.mxu0 }
 0x88f   :  { %v8963_v53 = vadd.f32 %v8962_v10, %v8939_v50 }
 0x890   :  { %v9198_v3 = vpop.f32.mrf.mxu1 }
 0x891   :  { %v8985_v5 = vadd.f32 %v8984_v38, %v8963_v53 }
 0x892   :  { %v9018_v29 = vpop.f32.mrf.mxu2  ;;  %v9138_v24 = vpop.f32.mrf.mxu3 }
 0x893   :  { %v9045_v34 = vadd.f32 %v9044_v39, %v9018_v29  ;;  %v9759_v11 = vmul.f32 0.35355338, %v8985_v5  ;;  %v13430_v5 = vld [vmem:[%s16367_s1 + $0x3] ss:$0 sm:$0xff] }
 0x895   :  { %v9069_v58 = vadd.f32 %v9068_v21, %v9045_v34  ;;  %v15253_v8 = vadd.f32 %v13429_v18, %v9759_v11  ;;  %v9199_v21 = vadd.f32 %v9198_v3, %v9172_v48 }
 0x896   :  { %v9270_v15 = vpop.f32.mrf.mxu0 }
 0x897   :  { %v9779_v23 = vsel %vm543_vm1, %v15253_v8, -inf  ;;  %v9093_v20 = vadd.f32 %v9092_v31, %v9069_v58 }
 0x898   :  { %9780 = vmax.xlane.f32.xlu0 %v9779_v23  ;;  %v9292_v53 = vpop.f32.mrf.mxu1 }
 0x89a   :  { %v9116_v10 = vpop.f32.mrf.mxu2  ;;  %v9246_v43 = vpop.f32.mrf.mxu3 }
 0x89b   :  { %v9117_v38 = vadd.f32 %v9116_v10, %v9093_v20 }
 0x89d   :  { %v9139_v50 = vadd.f32 %v9138_v24, %v9117_v38 }
 0x89e   :  { %v9376_v23 = vpop.f32.mrf.mxu0 }
 0x89f   :  { %v9760_v39 = vmul.f32 0.35355338, %v9139_v50 }
 0x8a0   :  { %v9400_v10 = vpop.f32.mrf.mxu1 }
 0x8a1   :  { %v15260_v29 = vadd.f32 %v13430_v5, %v9760_v39  ;;  %v13431_v39 = vld [vmem:[%s16367_s1 + $0x4] ss:$0 sm:$0xff] }
 0x8a2   :  { %v9222_v34 = vpop.f32.mrf.mxu2  ;;  %v9352_v31 = vpop.f32.mrf.mxu3 }
 0x8a3   :  { %v9223_v11 = vadd.f32 %v9222_v34, %v9199_v21  ;;  %v9782_v18 = vsel %vm543_vm1, %v15260_v29, -inf }
 0x8a4   :  { %9783 = vmax.xlane.f32.xlu2 %v9782_v18 }
 0x8a5   :  { %v9247_v58 = vadd.f32 %v9246_v43, %v9223_v11 }
 0x8a6   :  { %v9480_v18 = vpop.f32.mrf.mxu0 }
 0x8a7   :  { %v9271_v20 = vadd.f32 %v9270_v15, %v9247_v58 }
 0x8a8   :  { %v9506_v11 = vpop.f32.mrf.mxu1 }
 0x8a9   :  { %v9293_v24 = vadd.f32 %v9292_v53, %v9271_v20 }
 0x8aa   :  { %v9326_v38 = vpop.f32.mrf.mxu2  ;;  %v9446_v21 = vpop.f32.mrf.mxu3 }
 0x8ab   :  { %v9353_v48 = vadd.f32 %v9352_v31, %v9326_v38  ;;  %v9761_v3 = vmul.f32 0.35355338, %v9293_v24  ;;  %v13432_v24 = vld [vmem:[%s16367_s1 + $0x5] ss:$0 sm:$0xff] }
 0x8ad   :  { %v9377_v50 = vadd.f32 %v9376_v23, %v9353_v48  ;;  %v15267_v5 = vadd.f32 %v13431_v39, %v9761_v3  ;;  %v9507_v23 = vadd.f32 %v9506_v11, %v9480_v18 }
 0x8ae   :  { %v9578_v48 = vpop.f32.mrf.mxu0 }
 0x8af   :  { %v9785_v34 = vsel %vm543_vm1, %v15267_v5, -inf  ;;  %v9401_v43 = vadd.f32 %v9400_v10, %v9377_v50 }
 0x8b0   :  { %9786 = vmax.xlane.f32.xlu1 %v9785_v34  ;;  %v9600_v50 = vpop.f32.mrf.mxu1 }
 0x8b2   :  { %v9424_v15 = vpop.f32.mrf.mxu2  ;;  %v9554_v20 = vpop.f32.mrf.mxu3 }
 0x8b3   :  { %v9425_v53 = vadd.f32 %v9424_v15, %v9401_v43 }
 0x8b5   :  { %v9447_v58 = vadd.f32 %v9446_v21, %v9425_v53 }
 0x8b7   :  { %v9762_v31 = vmul.f32 0.35355338, %v9447_v58  ;;  %v9684_v58 = vpop.f32.mrf.mxu0 }
 0x8b9   :  { %v15274_v38 = vadd.f32 %v13432_v24, %v9762_v31  ;;  %v13433_v31 = vld [vmem:[%s16367_s1 + $0x6] ss:$0 sm:$0xff] }
 0x8ba   :  { %v9530_v3 = vpop.f32.mrf.mxu2  ;;  %v9660_v15 = vpop.f32.mrf.mxu3 }
 0x8bb   :  { %v9531_v39 = vadd.f32 %v9530_v3, %v9507_v23  ;;  %v9788_v34 = vsel %vm543_vm1, %v15274_v38, -inf  ;;  %v9708_v3 = vpop.f32.mrf.mxu1 }
 0x8bc   :  { %9789 = vmax.xlane.f32.xlu2 %v9788_v34 }
 0x8bd   :  { %v9555_v10 = vadd.f32 %v9554_v20, %v9531_v39 }
 0x8bf   :  { %v9579_v43 = vadd.f32 %v9578_v48, %v9555_v10 }
 0x8c1   :  { %v9601_v21 = vadd.f32 %v9600_v50, %v9579_v43  ;;  %v13434_v43 = vld [vmem:[%s16367_s1 + $0x7] ss:$0 sm:$0xff]  ;;  %s13536_s1 = smov 16  }
 0x8c2   :  { %v9634_v53 = vpop.f32.mrf.mxu2  ;;  %v9754_v34 = vpop.f32.mrf.mxu3 }
 0x8c3   :  { %v9661_v18 = vadd.f32 %v9660_v15, %v9634_v53  ;;  %v9763_v11 = vmul.f32 0.35355338, %v9601_v21 }
 0x8c5   :  { %v9685_v49 = vadd.f32 %v9684_v58, %v9661_v18  ;;  %v15281_v24 = vadd.f32 %v13433_v31, %v9763_v11 }
 0x8c7   :  { %v9791_v23 = vsel %vm543_vm1, %v15281_v24, -inf  ;;  %v9709_v20 = vadd.f32 %v9708_v3, %v9685_v49 }
 0x8c8   :  { %9792 = vmax.xlane.f32.xlu0 %v9791_v23 }
 0x8c9   :  { %10117 = vrot.lane.b32.xlu1 %v13813_v57, %s13535_s4 }
 0x8ca   :  { %v9732_v48 = vpop.f32.mrf.mxu2 }
 0x8cb   :  { %v9733_v39 = vadd.f32 %v9732_v48, %v9709_v20 }
 0x8cd   :  { %v9755_v10 = vadd.f32 %v9754_v34, %v9733_v39 }
 0x8cf   :  { %v9764_v50 = vmul.f32 0.35355338, %v9755_v10 }
 0x8d1   :  { %v15290_v21 = vadd.f32 %v13434_v43, %v9764_v50 }
 0x8d3   :  { %v9794_v15 = vsel %vm543_vm1, %v15290_v21, -inf }
 0x8d4   :  { %9965 = vrot.lane.b32.xlu2 %v13808_v47, %s13535_s4  ;;  %9795 = vmax.xlane.f32.xlu0 %v9794_v15 }
 0x8f3   :  { %v9775_v57 = vpop.xlane.xlu2 %9774 }
 0x8f4   :  { %v9797_v49 = vsub.f32 %v15239_v33, %v9775_v57 }
 0x8f6   :  { %v9805_v53 = vmul.f32 1.442695, %v9797_v49 }
 0x8f8   :  { %13345 = vpow2.f32 %v9805_v53 }
 0x8fe   :  { %v15297_v18 = vpop.eup %13345 }
 0x8ff   :  { %v9778_v11 = vpop.xlane.xlu1 %9777  ;;  %v9821_v58 = vsel %vm543_vm1, %v15297_v18, 0.0 }
 0x900   :  { %v9798_v31 = vsub.f32 %v15246_v19, %v9778_v11  ;;  %9822 = vadd.xlane.f32.xlu0 %v9821_v58 }
 0x902   :  { %v9807_v23 = vmul.f32 1.442695, %v9798_v31 }
 0x904   :  { %13347 = vpow2.f32 %v9807_v23 }
 0x90a   :  { %v15302_v3 = vpop.eup %13347 }
 0x90b   :  { %v9781_v47 = vpop.xlane.xlu0 %9780  ;;  %v9824_v20 = vsel %vm543_vm1, %v15302_v3, 0.0 }
 0x90c   :  { %v9799_v33 = vsub.f32 %v15253_v8, %v9781_v47  ;;  %9825 = vadd.xlane.f32.xlu1 %v9824_v20 }
 0x90e   :  { %v9809_v48 = vmul.f32 1.442695, %v9799_v33 }
 0x910   :  { %13349 = vpow2.f32 %v9809_v48 }
 0x916   :  { %v15307_v39 = vpop.eup %13349 }
 0x917   :  { %v9784_v34 = vpop.xlane.xlu2 %9783  ;;  %v9827_v19 = vsel %vm543_vm1, %v15307_v39, 0.0 }
 0x918   :  { %v9800_v10 = vsub.f32 %v15260_v29, %v9784_v34  ;;  %9828 = vadd.xlane.f32.xlu1 %v9827_v19  ;;  %v7365_v19 = vadd.f32 %v15075_v55, %v15072_v40 }
 0x91a   :  { %v9811_v50 = vmul.f32 1.442695, %v9800_v10  ;;  %v7389_v10 = vadd.f32 %v15124_v36, %v7365_v19 }
 0x91c   :  { %13351 = vpow2.f32 %v9811_v50 }
 0x922   :  { %v15312_v43 = vpop.eup %13351 }
 0x923   :  { %v9787_v15 = vpop.xlane.xlu1 %9786  ;;  %v9830_v8 = vsel %vm543_vm1, %v15312_v43, 0.0 }
 0x924   :  { %v9801_v57 = vsub.f32 %v15267_v5, %v9787_v15  ;;  %9831 = vadd.xlane.f32.xlu0 %v9830_v8  ;;  %v7413_v15 = vadd.f32 %v15097_v46, %v7389_v10 }
 0x926   :  { %v9813_v49 = vmul.f32 1.442695, %v9801_v57 }
 0x928   :  { %13353 = vpow2.f32 %v9813_v49  ;;  %v7437_v49 = vadd.f32 %v15086_v41, %v7413_v15  ;;  %v16502_v15 = vld [vmem:[#allocation61_spill] sm:$0xff] }
 0x92a   :  { %v7459_v55 = vadd.f32 %v15093_v56, %v7437_v49 }
 0x92e   :  { %v15317_v53 = vpop.eup %13353 }
 0x92f   :  { %v9790_v11 = vpop.xlane.xlu2 %9789  ;;  %v9833_v29 = vsel %vm543_vm1, %v15317_v53, 0.0 }
 0x930   :  { %9834 = vadd.xlane.f32.xlu2 %v9833_v29  ;;  %v9802_v8 = vsub.f32 %v15274_v38, %v9790_v11 }
 0x931   :  { %10421 = vrot.lane.b32.xlu1 %v13823_v16, %s13535_s4 }
 0x932   :  { %v9815_v29 = vmul.f32 1.442695, %v9802_v8 }
 0x934   :  { %13355 = vpow2.f32 %v9815_v29  ;;  %v16504_v29 = vld [vmem:[#allocation59_spill] sm:$0xff] }
 0x937   :  { %v9966_v58 = vpop.permute.xlu2 %9965 }
 0x938   :  { %v9986_v31 = vand.u32 4294901760, %v9966_v58  ;;  %10269 = vrot.lane.b32.xlu0 %v13818_v6, %s13535_s4 }
 0x939   :  { %10573 = vrot.lane.b32.xlu1 %v13830_v26, %s13535_s4 }
 0x93a   :  { %v10013_v5 = vsub.f32 %v9966_v58, %v9986_v31  ;;  %9987 = vmatpush.msra.mxu0 %v9986_v31  ;;  %10063 = vmatpush.msra.mxu3 %v9986_v31  ;;  %v15351_v36 = vpop.eup %13355 }
 0x93b   :  { %v10118_v23 = vpop.permute.xlu1 %10117  ;;  %v9793_v50 = vpop.xlane.xlu0 %9792  ;;  %v9836_v41 = vsel %vm543_vm1, %v15351_v36, 0.0 }
 0x93c   :  { %v10014_v47 = vand.u32 4294901760, %v10013_v5  ;;  %v15327_v20 = vand.u32 4294901760, %v10118_v23  ;;  %10040 = vmatpush.msra.mxu2 %v10013_v5  ;;  %v9803_v57 = vsub.f32 %v15281_v24, %v9793_v50 }
 0x93e   :  { %v10015_v33 = vsub.f32 %v10013_v5, %v10014_v47  ;;  %v15330_v48 = vsub.f32 %v10118_v23, %v15327_v20  ;;  %10089 = vmatpush.msrb.mxu0 %v10014_v47  ;;  %10139 = vmatpush.msrb.mxu2 %v15327_v20  ;;  %v9817_v58 = vmul.f32 1.442695, %v9803_v57 }
 0x940   :  { %v10016_v16 = vand.u32 4294901760, %v10015_v33  ;;  %v10166_v6 = vand.u32 4294901760, %v15330_v48  ;;  %13357 = vpow2.f32 %v9817_v58  ;;  %v4861_v33 = vadd.f32 %v14709_v12, %v14725_v44  ;;  %v16505_v58 = vld [vmem:[#allocation62_spill] sm:$0xff] }
 0x942   :  { %v10167_v26 = vsub.f32 %v15330_v48, %v10166_v6  ;;  %10017 = vmatpush.msra.mxu1 %v10016_v16 }
 0x944   :  { %10111 = vmatpush.msrb.mxu1 %v9986_v31  ;;  %v10168_v34 = vand.u32 4294901760, %v10167_v26  ;;  %v5013_v31 = vadd.f32 %v14732_v17, %v14718_v42  ;;  %v5165_v42 = vadd.f32 %v14759_v59, %v14767_v63 }
 0x946   :  { %10169 = vmatpush.msrb.mxu3 %v10168_v34  ;;  %v5037_v16 = vadd.f32 %v14757_v1, %v5013_v31  ;;  %v5189_v1 = vadd.f32 %v14755_v60, %v5165_v42 }
 0x947   :  { %v9796_v40 = vpop.xlane.xlu0 %9795 }
 0x948   :  { %10725 = vrot.lane.b32.xlu2 %v13837_v37, %s13535_s4  ;;  %v9804_v37 = vsub.f32 %v15290_v21, %v9796_v40  ;;  %v4709_v21 = vadd.f32 %v14668_v51, %v14662_v54  ;;  %v4885_v54 = vadd.f32 %v14700_v61, %v4861_v33  ;;  %v5061_v51 = vadd.f32 %v14746_v27, %v5037_v16 }
 0x94a   :  { %v9819_v46 = vmul.f32 1.442695, %v9804_v37  ;;  %v4733_v11 = vadd.f32 %v14707_v14, %v4709_v21  ;;  %v5085_v44 = vadd.f32 %v14737_v2, %v5061_v51  ;;  %v5317_v2 = vadd.f32 %v14771_v25, %v14765_v7 }
 0x94c   :  { %13359 = vpow2.f32 %v9819_v46  ;;  %v4757_v23 = vadd.f32 %v14684_v9, %v4733_v11  ;;  %v5107_v63 = vadd.f32 %v14748_v30, %v5085_v44  ;;  %v16503_v30 = vld [vmem:[#allocation65_spill] sm:$0xff] }
 0x94d   :  { %v5341_v57 = vadd.f32 %v16503_v30, %v5317_v2 }
 0x94e   :  { %v4781_v47 = vadd.f32 %v14674_v13, %v4757_v23  ;;  %v4909_v13 = vadd.f32 %v14716_v4, %v4885_v54  ;;  %v5213_v4 = vadd.f32 %v14761_v62, %v5189_v1  ;;  %v16514_v1 = vld [vmem:[#allocation73_spill] sm:$0xff] }
 0x94f   :  { %v5365_v40 = vadd.f32 %v16505_v58, %v5341_v57 }
 0x950   :  { %10877 = vrot.lane.b32.xlu2 %v13844_v45, %s13535_s4  ;;  %v15353_v45 = vpop.eup %13357  ;;  %v4803_v34 = vadd.f32 %v14690_v32, %v4781_v47  ;;  %v4933_v27 = vadd.f32 %v14744_v35, %v4909_v13  ;;  %v5237_v8 = vadd.f32 %v16502_v15, %v5213_v4 }
 0x951   :  { %v9839_v56 = vsel %vm543_vm1, %v15353_v45, 0.0 }
 0x952   :  { %v15359_v38 = vpop.eup %13359  ;;  %v4955_v10 = vadd.f32 %v14730_v22, %v4933_v27  ;;  %v5259_v22 = vadd.f32 %v16504_v29, %v5237_v8  ;;  %v16517_v8 = vld [vmem:[#allocation74_spill] sm:$0xff] }
 0x953   :  { %v9842_v24 = vsel %vm543_vm1, %v15359_v38, 0.0  ;;  %v16519_v29 = vld [vmem:[#allocation78_spill] sm:$0xff] }
 0x958   :  { %11221 = vrot.lane.b32.xlu2 %v7459_v55, %s13536_s1 }
 0x962   :  { %9837 = vadd.xlane.f32.xlu0 %v9836_v41 }
 0x963   :  { %9840 = vadd.xlane.f32.xlu1 %v9839_v56  ;;  %v16506_v56 = vld [vmem:[#allocation69_spill] sm:$0xff] }
 0x96a   :  { %9843 = vadd.xlane.f32.xlu0 %v9842_v24  ;;  %v16507_v24 = vld [vmem:[#allocation66_spill] sm:$0xff] }
 0x96b   :  { %v5469_v21 = vadd.f32 %v16507_v24, %v16506_v56 }
 0x973   :  { %v9823_v5 = vpop.xlane.xlu0 %9822 }
 0x974   :  { %13361 = vrcp.f32 %v9823_v5  ;;  %v9856_v12 = vand.u32 2147483648, %v9823_v5  ;;  %v9854_v61 = vand.u32 2147483647, %v9823_v5  ;;  %vm9850_vm15 = vweird.f32 %v9823_v5 }
 0x976   :  { %vm9855_vm3 = vcmp.eq.f32.partialorder %v9854_v61, 8.507059e+37 }
 0x97a   :  { %v13362_v26 = vpop.eup %13361 }
 0x97b   :  { %v9846_v14 = vmul.f32 %v13362_v26, %v9823_v5  ;;  %vm9851_vm14 = vweird.f32 %v13362_v26  ;;  %v16508_v5 = vld [vmem:[#allocation60_spill] sm:$0xff] }
 0x97c   :  { %11189 = vrot.lane.b32.xlu1 %v4803_v34, %s13523_s27  ;;  %vm9852_vm2 = vmor %vm9850_vm15, %vm9851_vm14  ;;  %v5389_v23 = vadd.f32 %v16508_v5, %v5365_v40 }
 0x97d   :  { %v9847_v9 = vsub.f32 1.0, %v9846_v14 }
 0x97e   :  { %11029 = vrot.lane.b32.xlu0 %v13848_v52, %s13535_s4  ;;  %v9857_v52 = vor.u32 1.1754944e-38, %v9856_v12  ;;  %v16511_v12 = vld [vmem:[#allocation68_spill] sm:$0xff] }
 0x97f   :  { %v9848_v32 = vmul.f32 %v13362_v26, %v9847_v9  ;;  %v9826_v17 = vpop.xlane.xlu1 %9825  ;;  %v16510_v9 = vld [vmem:[#allocation63_spill] sm:$0xff] }
 0x980   :  { %13363 = vrcp.f32 %v9826_v17  ;;  %v9871_v55 = vand.u32 2147483648, %v9826_v17  ;;  %v9869_v46 = vand.u32 2147483647, %v9826_v17  ;;  %vm9865_vm5 = vweird.f32 %v9826_v17 }
 0x981   :  { %v9849_v59 = vadd.f32 %v13362_v26, %v9848_v32  ;;  %v16512_v32 = vld [vmem:[#allocation71_spill] sm:$0xff] }
 0x982   :  { %v9872_v47 = vor.u32 1.1754944e-38, %v9871_v55  ;;  %vm9870_vm7 = vcmp.eq.f32.partialorder %v9869_v46, 8.507059e+37  ;;  %v5621_v61 = vadd.f32 %v16512_v32, %v16511_v12 }
 0x983   :  { %v9853_v19 = vsel %vm9852_vm2, %v13362_v26, %v9849_v59  ;;  %v16509_v26 = vld [vmem:[#allocation64_spill] sm:$0xff] }
 0x984   :  { %v9858_v50 = vsel %vm9855_vm3, %v9857_v52, %v9853_v19  ;;  %11193 = vrot.lane.b32.xlu1 %v5107_v63, %s13523_s27  ;;  %v5493_v34 = vadd.f32 %v16509_v26, %v5469_v21  ;;  %v16515_v63 = vld [vmem:[#allocation77_spill] sm:$0xff] }
 0x985   :  { %v9859_v35 = vmul.f32 %v15297_v18, %v9858_v50  ;;  %v5645_v4 = vadd.f32 %v16515_v63, %v5621_v61 }
 0x986   :  { %v13364_v60 = vpop.eup %13363  ;;  %11191 = vrot.lane.b32.xlu0 %v4955_v10, %s13523_s27 }
 0x987   :  { %v9861_v62 = vmul.f32 %v13364_v60, %v9826_v17  ;;  %v9969_v7 = vsel %vm543_vm1, %v9859_v35, 0  ;;  %vm9866_vm4 = vweird.f32 %v13364_v60  ;;  %v16513_v17 = vld [vmem:[#allocation67_spill] sm:$0xff]  ;;  %v5669_v30 = vadd.f32 %v16517_v8, %v5645_v4 }
 0x988   :  { %v15396_v25 = vand.u32 4294901760, %v9969_v7  ;;  %vm9867_vm6 = vmor %vm9865_vm5, %vm9866_vm4  ;;  %v5517_v27 = vadd.f32 %v16513_v17, %v5493_v34  ;;  %v16523_v34 = vld [vmem:[#allocation79_spill] sm:$0xff] }
 0x989   :  { %v9862_v49 = vsub.f32 1.0, %v9861_v62 }
 0x98a   :  { %10019 = vmatmul.f32.vlgmr.msra.gmra.mxu1 %v15396_v25  ;;  %v9989_v18 = vsub.f32 %v9969_v7, %v15396_v25  ;;  %v5541_v59 = vadd.f32 %v16514_v1, %v5517_v27  ;;  %v16525_v1 = vld [vmem:[#allocation81_spill] sm:$0xff] }
 0x98b   :  { %v9863_v37 = vmul.f32 %v13364_v60, %v9862_v49  ;;  %10215 = vmatpush.msra.mxu1 %v15327_v20  ;;  %v9829_v41 = vpop.xlane.xlu1 %9828  ;;  %v16518_v49 = vld [vmem:[#allocation80_spill] sm:$0xff] }
 0x98c   :  { %13365 = vrcp.f32 %v9829_v41  ;;  %11195 = vrot.lane.b32.xlu1 %v5259_v22, %s13523_s27  ;;  %10043 = vmatmul.f32.vlgmr.msra.gmra.mxu2 %v9989_v18  ;;  %v9990_v31 = vand.u32 4294901760, %v9989_v18  ;;  %v9886_v2 = vand.u32 2147483648, %v9829_v41  ;;  %v9884_v10 = vand.u32 2147483647, %v9829_v41 }
 0x98d   :  { %v9864_v11 = vadd.f32 %v13364_v60, %v9863_v37  ;;  %10241 = vmatpush.msra.mxu2 %v10166_v6  ;;  %v5411_v6 = vadd.f32 %v16510_v9, %v5389_v23  ;;  %vm9880_vm9 = vweird.f32 %v9829_v41  ;;  %v5773_v22 = vadd.f32 %v16519_v29, %v16518_v49  ;;  %v16520_v37 = vld [vmem:[#allocation72_spill] sm:$0xff]  ;;  %v16522_v23 = vld [vmem:[#allocation75_spill] sm:$0xff]  ;;  %v16524_v9 = vld [vmem:[#allocation82_spill] sm:$0xff] }
 0x98e   :  { %10067 = vmatmul.f32.vlgmr.msra.gmra.mxu3 %v9990_v31  ;;  %v9991_v16 = vsub.f32 %v9989_v18, %v9990_v31  ;;  %v9887_v57 = vor.u32 1.1754944e-38, %v9886_v2  ;;  %vm9885_vm11 = vcmp.eq.f32.partialorder %v9884_v10, 8.507059e+37  ;;  %v5693_v46 = vadd.f32 %v16520_v37, %v5669_v30 }
 0x98f   :  { %v9868_v33 = vsel %vm9867_vm6, %v13364_v60, %v9864_v11  ;;  %10263 = vmatpush.msra.mxu3 %v15327_v20 }
 0x990   :  { %v9873_v54 = vsel %vm9870_vm7, %v9872_v47, %v9868_v33  ;;  %v9992_v14 = vand.u32 4294901760, %v9991_v16  ;;  %v5715_v47 = vadd.f32 %v16522_v23, %v5693_v46 }
 0x991   :  { %v9874_v51 = vmul.f32 %v15302_v3, %v9873_v54 }
 0x992   :  { %v13366_v42 = vpop.eup %13365  ;;  %10113 = vmatmul.f32.vlgmr.msrb.gmra.mxu1 %v15396_v25  ;;  %9993 = vmatmul.f32.vlgmr.msra.gmra.mxu0 %v9992_v14 }
 0x993   :  { %v9876_v13 = vmul.f32 %v13366_v42, %v9829_v41  ;;  %v10121_v44 = vsel %vm543_vm1, %v9874_v51, 0  ;;  %10192 = vmatpush.msra.mxu0 %v15330_v48  ;;  %vm9881_vm8 = vweird.f32 %v13366_v42  ;;  %v16516_v48 = vld [vmem:[#allocation70_spill] sm:$0xff] }
 0x994   :  { %11197 = vrot.lane.b32.xlu1 %v5411_v6, %s13523_s27  ;;  %v10140_v3 = vand.u32 4294901760, %v10121_v44  ;;  %v5563_v15 = vadd.f32 %v16516_v48, %v5541_v59  ;;  %vm9882_vm10 = vmor %vm9880_vm9, %vm9881_vm8 }
 0x995   :  { %v9877_v20 = vsub.f32 1.0, %v9876_v13 }
 0x996   :  { %v10141_v52 = vsub.f32 %v10121_v44, %v10140_v3  ;;  %10171 = vmatmul.f32.vlgmr.msrb.gmra.mxu3 %v10140_v3 }
 0x997   :  { %v9878_v19 = vmul.f32 %v13366_v42, %v9877_v20  ;;  %v9832_v50 = vpop.xlane.xlu0 %9831 }
 0x998   :  { %13367 = vrcp.f32 %v9832_v50  ;;  %v10142_v60 = vand.u32 4294901760, %v10141_v52  ;;  %v9901_v5 = vand.u32 2147483648, %v9832_v50  ;;  %v9899_v33 = vand.u32 2147483647, %v9832_v50 }
 0x999   :  { %v9879_v35 = vadd.f32 %v13366_v42, %v9878_v19  ;;  %vm9895_vm13 = vweird.f32 %v9832_v50 }
 0x99a   :  { %10091 = vmatmul.f32.vlgmr.msrb.gmra.mxu0 %v15396_v25  ;;  %10219 = vmatmul.f32.vlgmr.msra.gmra.mxu1 %v10142_v60  ;;  %v10143_v7 = vsub.f32 %v10141_v52, %v10142_v60  ;;  %v16521_v25 = vld [vmem:[#allocation76_spill] sm:$0xff]  ;;  %v9902_v13 = vor.u32 1.1754944e-38, %v9901_v5  ;;  %vm9900_vm15 = vcmp.eq.f32.partialorder %v9899_v33, 8.507059e+37 }
 0x99b   :  { %v9883_v62 = vsel %vm9882_vm10, %v13366_v42, %v9879_v35  ;;  %v5797_v24 = vadd.f32 %v16521_v25, %v5773_v22 }
 0x99c   :  { %v9888_v58 = vsel %vm9885_vm11, %v9887_v57, %v9883_v62  ;;  %11199 = vrot.lane.b32.xlu1 %v5563_v15, %s13523_s27  ;;  %v10144_v55 = vand.u32 4294901760, %v10143_v7 }
 0x99d   :  { %v9889_v40 = vmul.f32 %v15307_v39, %v9888_v58  ;;  %v5821_v54 = vadd.f32 %v16523_v34, %v5797_v24 }
 0x99e   :  { %v13368_v18 = vpop.eup %13367  ;;  %10145 = vmatmul.f32.vlgmr.msrb.gmra.mxu2 %v10144_v55  ;;  %10265 = vmatmul.f32.vlgmr.msra.gmra.mxu3 %v10140_v3 }
 0x99f   :  { %v10273_v41 = vsel %vm543_vm1, %v9889_v40, 0  ;;  %v9891_v56 = vmul.f32 %v13368_v18, %v9832_v50  ;;  %vm9896_vm12 = vweird.f32 %v13368_v18  ;;  %v5845_v6 = vadd.f32 %v16524_v9, %v5821_v54 }
 0x9a0   :  { %v15432_v21 = vand.u32 4294901760, %v10273_v41  ;;  %vm9897_vm14 = vmor %vm9895_vm13, %vm9896_vm12 }
 0x9a1   :  { %v9892_v11 = vsub.f32 1.0, %v9891_v56  ;;  %v5867_v59 = vadd.f32 %v16525_v1, %v5845_v6 }
 0x9a2   :  { %v10293_v31 = vsub.f32 %v10273_v41, %v15432_v21  ;;  %10195 = vmatmul.f32.vlgmr.msra.gmra.mxu0 %v10141_v52 }
 0x9a3   :  { %v9893_v39 = vmul.f32 %v13368_v18, %v9892_v11  ;;  %v10422_v16 = vpop.permute.xlu1 %10421  ;;  %v15436_v26 = vpop.xlane.xlu2 %9834 }
 0x9a4   :  { %v15439_v51 = vand.u32 4294901760, %v10422_v16  ;;  %13369 = vrcp.f32 %v15436_v26  ;;  %11201 = vrot.lane.b32.xlu1 %v5715_v47, %s13523_s27  ;;  %v10294_v42 = vand.u32 4294901760, %v10293_v31  ;;  %v9916_v8 = vand.u32 2147483648, %v15436_v26 }
 0x9a5   :  { %v9894_v14 = vadd.f32 %v13368_v18, %v9893_v39  ;;  %v9914_v7 = vand.u32 2147483647, %v15436_v26  ;;  %vm9910_vm3 = vweird.f32 %v15436_v26 }
 0x9a6   :  { %v10469_v44 = vsub.f32 %v10422_v16, %v15439_v51  ;;  %10243 = vmatmul.f32.vlgmr.msra.gmra.mxu2 %v10140_v3  ;;  %v10295_v17 = vsub.f32 %v10293_v31, %v10294_v42  ;;  %v9917_v55 = vor.u32 1.1754944e-38, %v9916_v8 }
 0x9a7   :  { %v9898_v12 = vsel %vm9897_vm14, %v13368_v18, %v9894_v14  ;;  %vm9915_vm5 = vcmp.eq.f32.partialorder %v9914_v7, 8.507059e+37 }
 0x9a8   :  { %v9903_v32 = vsel %vm9900_vm15, %v9902_v13, %v9898_v12  ;;  %v10470_v61 = vand.u32 4294901760, %v10469_v44  ;;  %v10296_v3 = vand.u32 4294901760, %v10295_v17 }
 0x9a9   :  { %v9904_v27 = vmul.f32 %v15312_v43, %v9903_v32 }
 0x9aa   :  { %v13370_v20 = vpop.eup %13369  ;;  %v10471_v63 = vsub.f32 %v10469_v44, %v10470_v61  ;;  %v10270_v4 = vpop.permute.xlu0 %10269 }
 0x9ab   :  { %v9906_v2 = vmul.f32 %v13370_v20, %v15436_v26  ;;  %v10290_v52 = vand.u32 4294901760, %v10270_v4  ;;  %v10574_v19 = vpop.permute.xlu1 %10573  ;;  %v10726_v10 = vpop.permute.xlu2 %10725  ;;  %v10425_v50 = vsel %vm543_vm1, %v9904_v27, 0  ;;  %vm9911_vm2 = vweird.f32 %v13370_v20 }
 0x9ac   :  { %v10472_v35 = vand.u32 4294901760, %v10471_v63  ;;  %11203 = vrot.lane.b32.xlu1 %v5867_v59, %s13523_s27  ;;  %v15450_v60 = vand.u32 4294901760, %v10425_v50  ;;  %v15452_v15 = vand.u32 4294901760, %v10574_v19  ;;  %v15455_v30 = vand.u32 4294901760, %v10726_v10  ;;  %vm9912_vm4 = vmor %vm9910_vm3, %vm9911_vm2  ;;  %s13537_s27 = smov 24  }
 0x9ad   :  { %v9907_v48 = vsub.f32 1.0, %v9906_v2  ;;  %v10317_v43 = vsub.f32 %v10270_v4, %v10290_v52  ;;  %10291 = vmatpush.msrb.mxu0 %v10290_v52  ;;  %10367 = vmatpush.msrb.mxu3 %v10290_v52 }
 0x9ae   :  { %10297 = vmatmul.f32.vlgmr.msrb.gmra.mxu0 %v10296_v3  ;;  %10371 = vmatmul.f32.vlgmr.msrb.gmra.mxu3 %v10294_v42  ;;  %v10445_v57 = vsub.f32 %v10425_v50, %v15450_v60  ;;  %v10621_v40 = vsub.f32 %v10574_v19, %v15452_v15  ;;  %v10773_v18 = vsub.f32 %v10726_v10, %v15455_v30 }
 0x9af   :  { %v9908_v62 = vmul.f32 %v13370_v20, %v9907_v48  ;;  %v10318_v49 = vand.u32 4294901760, %v10317_v43  ;;  %10473 = vmatpush.msra.mxu3 %v10472_v35  ;;  %10344 = vmatpush.msrb.mxu2 %v10317_v43 }
 0x9b0   :  { %10347 = vmatmul.f32.vlgmr.msrb.gmra.mxu2 %v10293_v31  ;;  %v10446_v29 = vand.u32 4294901760, %v10445_v57  ;;  %v10622_v24 = vand.u32 4294901760, %v10621_v40  ;;  %v10774_v11 = vand.u32 4294901760, %v10773_v18 }
 0x9b1   :  { %10567 = vmatpush.msrb.mxu3 %v15439_v51  ;;  %v9909_v22 = vadd.f32 %v13370_v20, %v9908_v62  ;;  %v10319_v58 = vsub.f32 %v10317_v43, %v10318_v49  ;;  %10443 = vmatpush.msra.mxu2 %v15439_v51 }
 0x9b2   :  { %10393 = vmatpush.msra.mxu0 %v10318_v49  ;;  %v10447_v41 = vsub.f32 %v10445_v57, %v10446_v29  ;;  %v10623_v47 = vsub.f32 %v10621_v40, %v10622_v24  ;;  %v10775_v39 = vsub.f32 %v10773_v18, %v10774_v11 }
 0x9b3   :  { %10545 = vmatpush.msrb.mxu2 %v10470_v61  ;;  %v9913_v37 = vsel %vm9912_vm4, %v13370_v20, %v9909_v22  ;;  %v10320_v46 = vand.u32 4294901760, %v10319_v58  ;;  %v10878_v54 = vpop.permute.xlu2 %10877  ;;  %vm11285_vm4 = vcmask 130048  }
 0x9b4   :  { %10496 = vmatpush.msrb.mxu0 %v10469_v44  ;;  %v9918_v56 = vsel %vm9915_vm5, %v9917_v55, %v9913_v37  ;;  %v10448_v5 = vand.u32 4294901760, %v10447_v41  ;;  %v10624_v16 = vand.u32 4294901760, %v10623_v47  ;;  %v10776_v26 = vand.u32 4294901760, %v10775_v39 }
 0x9b5   :  { %v9919_v25 = vmul.f32 %v15317_v53, %v9918_v56  ;;  %10321 = vmatpush.msrb.mxu1 %v10320_v46  ;;  %v15476_v14 = vand.u32 4294901760, %v10878_v54  ;;  %vm11294_vm5 = vcmask 195584  }
 0x9b6   :  { %10323 = vmatmul.f32.vlgmr.msrb.gmra.mxu1 %v15432_v21  ;;  %10395 = vmatmul.f32.vlgmr.msra.gmra.mxu0 %v15432_v21 }
 0x9b7   :  { %v10577_v31 = vsel %vm543_vm1, %v9919_v25, 0  ;;  %10415 = vmatpush.msra.mxu1 %v10290_v52  ;;  %10475 = vmatmul.f32.vlgmr.msra.gmra.mxu3 %v15450_v60 }
 0x9b8   :  { %v10596_v23 = vand.u32 4294901760, %v10577_v31  ;;  %10595 = vmatpush.msra.mxu0 %v15452_v15  ;;  %10671 = vmatpush.msra.mxu3 %v15452_v15 }
 0x9b9   :  { %10519 = vmatpush.msrb.mxu1 %v15439_v51  ;;  %10449 = vmatmul.f32.vlgmr.msra.gmra.mxu2 %v10448_v5 }
 0x9ba   :  { %v10597_v53 = vsub.f32 %v10577_v31, %v10596_v23  ;;  %10648 = vmatpush.msra.mxu2 %v10621_v40 }
 0x9bc   :  { %v10598_v33 = vand.u32 4294901760, %v10597_v53 }
 0x9be   :  { %10417 = vmatmul.f32.vlgmr.msra.gmra.mxu1 %v15432_v21  ;;  %10499 = vmatmul.f32.vlgmr.msrb.gmra.mxu0 %v10445_v57  ;;  %v10599_v34 = vsub.f32 %v10597_v53, %v10598_v33  ;;  %v15481_v21 = vsub.f32 %v10878_v54, %v15476_v14 }
 0x9bf   :  { %10569 = vmatmul.f32.vlgmr.msrb.gmra.mxu3 %v15450_v60  ;;  %10625 = vmatpush.msra.mxu1 %v10624_v16 }
 0x9c0   :  { %10697 = vmatpush.msrb.mxu0 %v10622_v24  ;;  %10777 = vmatpush.msrb.mxu3 %v10776_v26  ;;  %v10600_v51 = vand.u32 4294901760, %v10599_v34  ;;  %v10926_v42 = vand.u32 4294901760, %v15481_v21 }
 0x9c1   :  { %10547 = vmatmul.f32.vlgmr.msrb.gmra.mxu2 %v15450_v60 }
 0x9c2   :  { %10747 = vmatpush.msrb.mxu2 %v15455_v30  ;;  %v10927_v9 = vsub.f32 %v15481_v21, %v10926_v42 }
 0x9c4   :  { %v10928_v6 = vand.u32 4294901760, %v10927_v9 }
 0x9c6   :  { %10523 = vmatmul.f32.vlgmr.msrb.gmra.mxu1 %v10446_v29  ;;  %10601 = vmatmul.f32.vlgmr.msra.gmra.mxu0 %v10600_v51 }
 0x9c7   :  { %10675 = vmatmul.f32.vlgmr.msra.gmra.mxu3 %v10598_v33  ;;  %10719 = vmatpush.msrb.mxu1 %v15452_v15 }
 0x9c8   :  { %10800 = vmatpush.msra.mxu0 %v10773_v18  ;;  %10871 = vmatpush.msra.mxu3 %v15455_v30 }
 0x9c9   :  { %10651 = vmatmul.f32.vlgmr.msra.gmra.mxu2 %v10597_v53 }
 0x9ca   :  { %10849 = vmatpush.msra.mxu2 %v10774_v11 }
 0x9ce   :  { %10627 = vmatmul.f32.vlgmr.msra.gmra.mxu1 %v10596_v23  ;;  %10699 = vmatmul.f32.vlgmr.msrb.gmra.mxu0 %v10596_v23 }
 0x9cf   :  { %10823 = vmatpush.msra.mxu1 %v15455_v30  ;;  %10899 = vmatpush.msrb.mxu0 %v15476_v14 }
 0x9d5   :  { %v9838_v13 = vpop.xlane.xlu0 %9837 }
 0x9d6   :  { %13371 = vrcp.f32 %v9838_v13  ;;  %v9841_v44 = vpop.xlane.xlu1 %9840  ;;  %10721 = vmatmul.f32.vlgmr.msrb.gmra.mxu1 %v10596_v23  ;;  %v9931_v1 = vand.u32 2147483648, %v9838_v13  ;;  %v9929_v4 = vand.u32 2147483647, %v9838_v13  ;;  %vm9925_vm8 = vweird.f32 %v9838_v13 }
 0x9d7   :  { %13373 = vrcp.f32 %v9841_v44  ;;  %10929 = vmatpush.msrb.mxu1 %v10928_v6  ;;  %v9946_v2 = vand.u32 2147483648, %v9841_v44  ;;  %v9944_v19 = vand.u32 2147483647, %v9841_v44  ;;  %vm9940_vm10 = vweird.f32 %v9841_v44 }
 0x9d8   :  { %v9932_v35 = vor.u32 1.1754944e-38, %v9931_v1  ;;  %vm9930_vm11 = vcmp.eq.f32.partialorder %v9929_v4, 8.507059e+37  ;;  %v16527_v4 = vld [vmem:[#allocation85_spill] sm:$0xff] }
 0x9d9   :  { %v9947_v48 = vor.u32 1.1754944e-38, %v9946_v2  ;;  %vm9945_vm13 = vcmp.eq.f32.partialorder %v9944_v19, 8.507059e+37  ;;  %v16528_v2 = vld [vmem:[#allocation86_spill] sm:$0xff] }
 0x9dc   :  { %v13372_v12 = vpop.eup %13371 }
 0x9dd   :  { %v13374_v32 = vpop.eup %13373  ;;  %v9921_v61 = vmul.f32 %v13372_v12, %v9838_v13  ;;  %v9844_v17 = vpop.xlane.xlu0 %9843  ;;  %vm9926_vm6 = vweird.f32 %v13372_v12 }
 0x9de   :  { %v9936_v27 = vmul.f32 %v13374_v32, %v9841_v44  ;;  %13375 = vrcp.f32 %v9844_v17  ;;  %vm9941_vm7 = vweird.f32 %v13374_v32  ;;  %vm9927_vm9 = vmor %vm9925_vm8, %vm9926_vm6  ;;  %v9961_v58 = vand.u32 2147483648, %v9844_v17 }
 0x9df   :  { %v9922_v20 = vsub.f32 1.0, %v9921_v61  ;;  %vm9942_vm12 = vmor %vm9940_vm10, %vm9941_vm7  ;;  %vm9955_vm15 = vweird.f32 %v9844_v17  ;;  %v9959_v37 = vand.u32 2147483647, %v9844_v17 }
 0x9e0   :  { %v9937_v59 = vsub.f32 1.0, %v9936_v27 }
 0x9e1   :  { %v9923_v63 = vmul.f32 %v13372_v12, %v9922_v20  ;;  %vm9960_vm3 = vcmp.eq.f32.partialorder %v9959_v37, 8.507059e+37  ;;  %v16526_v20 = vld [vmem:[#allocation83_spill] sm:$0xff] }
 0x9e2   :  { %v9938_v52 = vmul.f32 %v13374_v32, %v9937_v59 }
 0x9e3   :  { %v9924_v10 = vadd.f32 %v13372_v12, %v9923_v63 }
 0x9e4   :  { %v13376_v50 = vpop.eup %13375  ;;  %v9939_v3 = vadd.f32 %v13374_v32, %v9938_v52  ;;  %v7669_v52 = vadd.f32 %v16528_v2, %v16527_v4 }
 0x9e5   :  { %v9928_v60 = vsel %vm9927_vm9, %v13372_v12, %v9924_v10  ;;  %v9951_v43 = vmul.f32 %v13376_v50, %v9844_v17  ;;  %vm9956_vm14 = vweird.f32 %v13376_v50  ;;  %v16529_v10 = vld [vmem:[#allocation84_spill] sm:$0xff] }
 0x9e6   :  { %v9933_v15 = vsel %vm9930_vm11, %v9932_v35, %v9928_v60  ;;  %v9943_v8 = vsel %vm9942_vm12, %v13374_v32, %v9939_v3  ;;  %vm9957_vm2 = vmor %vm9955_vm15, %vm9956_vm14  ;;  %v7517_v32 = vadd.f32 %v15128_v28, %v15143_v0  ;;  %v16530_v35 = vld [vmem:[#allocation90_spill] sm:$0xff]  ;;  %v16531_v60 = vld [vmem:[#allocation93_spill] sm:$0xff] }
 0x9e7   :  { %v9934_v30 = vmul.f32 %v15351_v36, %v9933_v15  ;;  %v9948_v57 = vsel %vm9945_vm13, %v9947_v48, %v9943_v8  ;;  %v9952_v62 = vsub.f32 1.0, %v9951_v43  ;;  %v7693_v28 = vadd.f32 %v16531_v60, %v7669_v52  ;;  %v16532_v43 = vld [vmem:[#allocation87_spill] sm:$0xff]  ;;  %v16553_v60 = vld [vmem:[#allocation105_spill] sm:$0xff] }
 0x9e8   :  { %v9949_v7 = vmul.f32 %v15353_v45, %v9948_v57  ;;  %v9962_v45 = vor.u32 1.1754944e-38, %v9961_v58  ;;  %v7541_v1 = vadd.f32 %v16526_v20, %v7517_v32  ;;  %v16533_v8 = vld [vmem:[#allocation91_spill] sm:$0xff]  ;;  %v16536_v58 = vld [vmem:[#allocation88_spill] sm:$0xff] }
 0x9e9   :  { %v9953_v49 = vmul.f32 %v13376_v50, %v9952_v62  ;;  %v10729_v29 = vsel %vm543_vm1, %v9934_v30, 0  ;;  %v7717_v30 = vadd.f32 %v16533_v8, %v7693_v28  ;;  %v16549_v20 = vld [vmem:[#allocation104_spill] sm:$0xff]  ;;  %v16555_v8 = vld [vmem:[#allocation118_spill] sm:$0xff] }
 0x9ea   :  { %v10881_v22 = vsel %vm543_vm1, %v9949_v7, 0  ;;  %v10748_v40 = vand.u32 4294901760, %v10729_v29  ;;  %v16534_v7 = vld [vmem:[#allocation97_spill] sm:$0xff] }
 0x9eb   :  { %v10900_v55 = vand.u32 4294901760, %v10881_v22  ;;  %v9954_v18 = vadd.f32 %v13376_v50, %v9953_v49  ;;  %v16535_v49 = vld [vmem:[#allocation95_spill] sm:$0xff] }
 0x9ec   :  { %10779 = vmatmul.f32.vlgmr.msrb.gmra.mxu3 %v10748_v40  ;;  %v10749_v46 = vsub.f32 %v10729_v29, %v10748_v40  ;;  %v7821_v29 = vadd.f32 %v16535_v49, %v16534_v7  ;;  %v16557_v49 = vld [vmem:[#allocation115_spill] sm:$0xff] }
 0x9ed   :  { %v10901_v36 = vsub.f32 %v10881_v22, %v10900_v55  ;;  %v9958_v41 = vsel %vm9957_vm2, %v13376_v50, %v9954_v18  ;;  %10975 = vmatpush.msrb.mxu3 %v15476_v14  ;;  %v7565_v50 = vadd.f32 %v16529_v10, %v7541_v1  ;;  %v16537_v18 = vld [vmem:[#allocation92_spill] sm:$0xff] }
 0x9ee   :  { %10803 = vmatmul.f32.vlgmr.msra.gmra.mxu0 %v10749_v46  ;;  %v10750_v56 = vand.u32 4294901760, %v10749_v46  ;;  %v9963_v24 = vsel %vm9960_vm3, %v9962_v45, %v9958_v41  ;;  %v7845_v37 = vadd.f32 %v16537_v18, %v7821_v29  ;;  %v16538_v45 = vld [vmem:[#allocation89_spill] sm:$0xff]  ;;  %v16559_v18 = vld [vmem:[#allocation119_spill] sm:$0xff] }
 0x9ef   :  { %11001 = vmatpush.msra.mxu0 %v10926_v42  ;;  %v10902_v25 = vand.u32 4294901760, %v10901_v36  ;;  %v9964_v53 = vmul.f32 %v15359_v38, %v9963_v24  ;;  %v7589_v3 = vadd.f32 %v16530_v35, %v7565_v50  ;;  %v16551_v50 = vld [vmem:[#allocation108_spill] sm:$0xff]  ;;  %v16552_v35 = vld [vmem:[#allocation109_spill] sm:$0xff] }
 0x9f0   :  { %v11030_v11 = vpop.permute.xlu0 %11029  ;;  %10827 = vmatmul.f32.vlgmr.msra.gmra.mxu1 %v10750_v56  ;;  %v10751_v31 = vsub.f32 %v10749_v46, %v10750_v56 }
 0x9f1   :  { %v11050_v5 = vand.u32 4294901760, %v11030_v11  ;;  %11023 = vmatpush.msra.mxu1 %v15476_v14  ;;  %v10903_v23 = vsub.f32 %v10901_v36, %v10902_v25  ;;  %v11033_v34 = vsel %vm543_vm1, %v9964_v53, 0  ;;  %v7611_v15 = vadd.f32 %v16532_v43, %v7589_v3  ;;  %v16554_v43 = vld [vmem:[#allocation114_spill] sm:$0xff] }
 0x9f2   :  { %v10752_v47 = vand.u32 4294901760, %v10751_v31  ;;  %v11052_v51 = vand.u32 4294901760, %v11033_v34  ;;  %v16541_v31 = vld [vmem:[#allocation98_spill] sm:$0xff]  ;;  %v8277_v3 = vadd.f32 %v16552_v35, %v16551_v50 }
 0x9f3   :  { %v11077_v39 = vsub.f32 %v11030_v11, %v11050_v5  ;;  %v10904_v33 = vand.u32 4294901760, %v10903_v23  ;;  %v16540_v11 = vld [vmem:[#allocation96_spill] sm:$0xff] }
 0x9f4   :  { %10753 = vmatmul.f32.vlgmr.msrb.gmra.mxu2 %v10752_v47  ;;  %10873 = vmatmul.f32.vlgmr.msra.gmra.mxu3 %v10748_v40  ;;  %v11053_v38 = vsub.f32 %v11033_v34, %v11052_v51 }
 0x9f5   :  { %v11078_v16 = vand.u32 4294901760, %v11077_v39  ;;  %10952 = vmatpush.msrb.mxu2 %v15481_v21 }
 0x9f6   :  { %10905 = vmatmul.f32.vlgmr.msrb.gmra.mxu0 %v10904_v33  ;;  %v11054_v14 = vand.u32 4294901760, %v11053_v38 }
 0x9f7   :  { %v11079_v26 = vsub.f32 %v11077_v39, %v11078_v16  ;;  %11104 = vmatpush.msrb.mxu0 %v11077_v39  ;;  %v16542_v39 = vld [vmem:[#allocation101_spill] sm:$0xff] }
 0x9f8   :  { %10931 = vmatmul.f32.vlgmr.msrb.gmra.mxu1 %v10900_v55  ;;  %v11055_v21 = vsub.f32 %v11053_v38, %v11054_v14 }
 0x9f9   :  { %v11080_v54 = vand.u32 4294901760, %v11079_v26  ;;  %11127 = vmatpush.msrb.mxu1 %v11050_v5 }
 0x9fa   :  { %v11056_v42 = vand.u32 4294901760, %v11055_v21 }
 0x9fb   :  { %11081 = vmatpush.msra.mxu3 %v11080_v54  ;;  %v16544_v54 = vld [vmem:[#allocation99_spill] sm:$0xff] }
 0x9fc   :  { %10851 = vmatmul.f32.vlgmr.msra.gmra.mxu2 %v10748_v40  ;;  %10979 = vmatmul.f32.vlgmr.msrb.gmra.mxu3 %v10902_v25  ;;  %v7741_v40 = vadd.f32 %v16536_v58, %v7717_v30  ;;  %v16539_v25 = vld [vmem:[#allocation94_spill] sm:$0xff]  ;;  %v8301_v30 = vadd.f32 %v16555_v8, %v8277_v3  ;;  %v16567_v8 = vld [vmem:[#allocation12_spill] sm:$0xff] }
 0x9fd   :  { %11051 = vmatpush.msra.mxu2 %v11050_v5  ;;  %11175 = vmatpush.msrb.mxu3 %v11050_v5  ;;  %v7869_v24 = vadd.f32 %v16539_v25, %v7845_v37  ;;  %v7973_v5 = vadd.f32 %v16541_v31, %v16540_v11 }
 0x9fe   :  { %11003 = vmatmul.f32.vlgmr.msra.gmra.mxu0 %v10900_v55  ;;  %v7763_v56 = vadd.f32 %v16538_v45, %v7741_v40  ;;  %v8325_v29 = vadd.f32 %v16557_v49, %v8301_v30 }
 0x9ff   :  { %v7893_v33 = vadd.f32 %v16542_v39, %v7869_v24  ;;  %v16561_v24 = vld [vmem:[#allocation116_spill] sm:$0xff] }
 0xa00   :  { %11025 = vmatmul.f32.vlgmr.msra.gmra.mxu1 %v10900_v55 }
 0xa04   :  { %10955 = vmatmul.f32.vlgmr.msrb.gmra.mxu2 %v10901_v36  ;;  %11083 = vmatmul.f32.vlgmr.msra.gmra.mxu3 %v11052_v51 }
 0xa05   :  { %11153 = vmatpush.msrb.mxu2 %v11078_v16  ;;  %v16543_v16 = vld [vmem:[#allocation106_spill] sm:$0xff] }
 0xa06   :  { %11107 = vmatmul.f32.vlgmr.msrb.gmra.mxu0 %v11053_v38  ;;  %v7997_v26 = vadd.f32 %v16543_v16, %v7973_v5  ;;  %v16545_v38 = vld [vmem:[#allocation103_spill] sm:$0xff]  ;;  %v16562_v5 = vld [vmem:[#allocation113_spill] sm:$0xff] }
 0xa07   :  { %v10020_v9 = vpop.f32.mrf.mxu1 }
 0xa08   :  { %11131 = vmatmul.f32.vlgmr.msrb.gmra.mxu1 %v11054_v14  ;;  %v8021_v14 = vadd.f32 %v16545_v38, %v7997_v26 }
 0xa0c   :  { %11057 = vmatmul.f32.vlgmr.msra.gmra.mxu2 %v11056_v42  ;;  %11177 = vmatmul.f32.vlgmr.msrb.gmra.mxu3 %v11052_v51 }
 0xa0f   :  { %v9994_v6 = vpop.f32.mrf.mxu0  ;;  %v10044_v44 = vpop.f32.mrf.mxu2 }
 0xa10   :  { %v10021_v13 = vadd.f32 %v10020_v9, %v9994_v6  ;;  %v10114_v63 = vpop.f32.mrf.mxu1 }
 0xa11   :  { %v10068_v61 = vpop.f32.mrf.mxu3 }
 0xa12   :  { %v10045_v12 = vadd.f32 %v10044_v44, %v10021_v13  ;;  %v16546_v13 = vld [vmem:[#allocation110_spill] sm:$0xff]  ;;  %v16547_v44 = vld [vmem:[#allocation107_spill] sm:$0xff] }
 0xa14   :  { %11155 = vmatmul.f32.vlgmr.msrb.gmra.mxu2 %v11052_v51  ;;  %v10069_v17 = vadd.f32 %v10068_v61, %v10045_v12  ;;  %v7915_v51 = vadd.f32 %v16544_v54, %v7893_v33  ;;  %v8125_v12 = vadd.f32 %v16547_v44, %v16546_v13  ;;  %v16548_v61 = vld [vmem:[#allocation100_spill] sm:$0xff]  ;;  %v16563_v33 = vld [vmem:[#allocation117_spill] sm:$0xff] }
 0xa16   :  { %v8149_v1 = vadd.f32 %v16549_v20, %v8125_v12 }
 0xa17   :  { %v10092_v27 = vpop.f32.mrf.mxu0 }
 0xa18   :  { %v10093_v59 = vadd.f32 %v10092_v27, %v10069_v17  ;;  %v10220_v55 = vpop.f32.mrf.mxu1  ;;  %v8045_v17 = vadd.f32 %v16548_v61, %v8021_v14  ;;  %v8173_v28 = vadd.f32 %v16553_v60, %v8149_v1  ;;  %v16564_v14 = vld [vmem:[#allocation122_spill] sm:$0xff] }
 0xa19   :  { %v10172_v0 = vpop.f32.mrf.mxu3  ;;  %v11303_v61 = vld [vmem:[#allocation2] sm:$0xff] }
 0xa1a   :  { %v10115_v19 = vadd.f32 %v10114_v63, %v10093_v59  ;;  %v16550_v63 = vld [vmem:[#allocation102_spill] sm:$0xff] }
 0xa1b   :  { %v8067_v4 = vadd.f32 %v16550_v63, %v8045_v17 }
 0xa1c   :  { %11253 = vrot.lane.b32.xlu2 %v10115_v19, %s13537_s27 }
 0xa1f   :  { %v10196_v57 = vpop.f32.mrf.mxu0 }
 0xa21   :  { %v10146_v48 = vpop.f32.mrf.mxu2  ;;  %v10266_v46 = vpop.f32.mrf.mxu3 }
 0xa22   :  { %v10173_v62 = vadd.f32 %v10172_v0, %v10146_v48 }
 0xa24   :  { %v10197_v22 = vadd.f32 %v10196_v57, %v10173_v62  ;;  %11223 = vrot.lane.b32.xlu2 %v7611_v15, %s13536_s1  ;;  %v8197_v15 = vadd.f32 %v16554_v43, %v8173_v28  ;;  %v16556_v62 = vld [vmem:[#allocation111_spill] sm:$0xff] }
 0xa26   :  { %v10221_v36 = vadd.f32 %v10220_v55, %v10197_v22  ;;  %v8219_v7 = vadd.f32 %v16556_v62, %v8197_v15  ;;  %v16558_v55 = vld [vmem:[#allocation120_spill] sm:$0xff]  ;;  %v16566_v15 = vld [vmem:[#allocation11_spill] sm:$0xff] }
 0xa27   :  { %v8429_v37 = vadd.f32 %v16559_v18, %v16558_v55  ;;  %v2053_v30 = vadd.f32 %v16567_v8, %v16566_v15  ;;  %v16571_v18 = vld [vmem:[#allocation14_spill] sm:$0xff] }
 0xa29   :  { %v10244_v41 = vpop.f32.mrf.mxu2  ;;  %v8453_v11 = vadd.f32 %v16561_v24, %v8429_v37 }
 0xa2a   :  { %v10245_v23 = vadd.f32 %v10244_v41, %v10221_v36  ;;  %v16560_v41 = vld [vmem:[#allocation112_spill] sm:$0xff] }
 0xa2b   :  { %v10298_v47 = vpop.f32.mrf.mxu0  ;;  %v8349_v45 = vadd.f32 %v16560_v41, %v8325_v29  ;;  %v8477_v16 = vadd.f32 %v16563_v33, %v8453_v11  ;;  %v16570_v29 = vld [vmem:[#allocation13_spill] sm:$0xff] }
 0xa2c   :  { %v10267_v53 = vadd.f32 %v10266_v46, %v10245_v23  ;;  %11225 = vrot.lane.b32.xlu2 %v7763_v56, %s13536_s1 }
 0xa2d   :  { %v8371_v23 = vadd.f32 %v16562_v5, %v8349_v45 }
 0xa2e   :  { %11255 = vrot.lane.b32.xlu0 %v10267_v53, %s13537_s27 }
 0xa31   :  { %v10372_v34 = vpop.f32.mrf.mxu3 }
 0xa33   :  { %v10324_v21 = vpop.f32.mrf.mxu1  ;;  %v10348_v42 = vpop.f32.mrf.mxu2 }
 0xa34   :  { %v10325_v9 = vadd.f32 %v10324_v21, %v10298_v47  ;;  %v10396_v6 = vpop.f32.mrf.mxu0  ;;  %11227 = vrot.lane.b32.xlu2 %v7915_v51, %s13536_s1  ;;  %v11306_v47 = vld [vmem:[#allocation2 + $0x18] sm:$0xff]  ;;  %v8501_v21 = vadd.f32 %v16564_v14, %v8477_v16 }
 0xa35   :  { %v11347_v39 = vand.u32 4294901760, %v11306_v47 }
 0xa36   :  { %v10349_v32 = vadd.f32 %v10348_v42, %v10325_v9  ;;  %v11304_v9 = vld [vmem:[#allocation2 + $0x8] sm:$0xff] }
 0xa37   :  { %v11433_v51 = vsub.f32 %v11306_v47, %v11347_v39  ;;  %11567 = vmatpush.msra.mxu3 %v11347_v39  ;;  %11348 = vmatpush.msra.mxu0 %v11347_v39  ;;  %v11351_v12 = vand.u32 4294901760, %v11304_v9 }
 0xa38   :  { %v10373_v27 = vadd.f32 %v10372_v34, %v10349_v32  ;;  %v11305_v34 = vld [vmem:[#allocation2 + $0x10] sm:$0xff] }
 0xa39   :  { %v11349_v38 = vand.u32 4294901760, %v11305_v34  ;;  %v11434_v13 = vand.u32 4294901760, %v11433_v51  ;;  %11503 = vmatpush.msra.mxu2 %v11433_v51  ;;  %v11445_v1 = vsub.f32 %v11304_v9, %v11351_v12 }
 0xa3a   :  { %v10397_v59 = vadd.f32 %v10396_v6, %v10373_v27  ;;  %v10476_v2 = vpop.f32.mrf.mxu3 }
 0xa3b   :  { %v10418_v52 = vpop.f32.mrf.mxu1  ;;  %v11439_v44 = vsub.f32 %v11305_v34, %v11349_v38  ;;  %11569 = vmatpush.msra.mxu3 %v11349_v38  ;;  %11350 = vmatpush.msra.mxu0 %v11349_v38  ;;  %v11435_v27 = vsub.f32 %v11433_v51, %v11434_v13  ;;  %v11446_v50 = vand.u32 4294901760, %v11445_v1 }
 0xa3c   :  { %v10419_v19 = vadd.f32 %v10418_v52, %v10397_v59  ;;  %v10450_v10 = vpop.f32.mrf.mxu2  ;;  %v10500_v0 = vpop.f32.mrf.mxu0  ;;  %11229 = vrot.lane.b32.xlu2 %v8067_v4, %s13536_s1  ;;  %v16565_v59 = vld [vmem:[#allocation121_spill] sm:$0xff] }
 0xa3d   :  { %v10477_v48 = vadd.f32 %v10476_v2, %v10450_v10  ;;  %v11440_v20 = vand.u32 4294901760, %v11439_v44  ;;  %11506 = vmatpush.msra.mxu2 %v11439_v44  ;;  %11571 = vmatpush.msra.mxu3 %v11351_v12  ;;  %v8523_v63 = vadd.f32 %v16565_v59, %v8501_v21  ;;  %v11353_v2 = vand.u32 4294901760, %v11303_v61 }
 0xa3e   :  { %11257 = vrot.lane.b32.xlu0 %v10419_v19, %s13537_s27  ;;  %11352 = vmatpush.msra.mxu0 %v11351_v12  ;;  %v11436_v19 = vand.u32 4294901760, %v11435_v27  ;;  %v11447_v60 = vsub.f32 %v11445_v1, %v11446_v50 }
 0xa3f   :  { %v10501_v57 = vadd.f32 %v10500_v0, %v10477_v48  ;;  %v11441_v10 = vsub.f32 %v11439_v44, %v11440_v20  ;;  %11509 = vmatpush.msra.mxu2 %v11445_v1  ;;  %v11451_v35 = vsub.f32 %v11303_v61, %v11353_v2  ;;  %11573 = vmatpush.msra.mxu3 %v11353_v2  ;;  %v16573_v1 = vld [vmem:[#allocation18_spill] sm:$0xff] }
 0xa40   :  { %11437 = vmatpush.msra.mxu1 %v11436_v19  ;;  %11354 = vmatpush.msra.mxu0 %v11353_v2  ;;  %v11448_v0 = vand.u32 4294901760, %v11447_v60 }
 0xa41   :  { %v11442_v3 = vand.u32 4294901760, %v11441_v10  ;;  %v11452_v28 = vand.u32 4294901760, %v11451_v35  ;;  %11512 = vmatpush.msra.mxu2 %v11451_v35 }
 0xa42   :  { %v10570_v46 = vpop.f32.mrf.mxu3  ;;  %11638 = vmatpush.msrb.mxu0 %v11434_v13 }
 0xa43   :  { %v10524_v22 = vpop.f32.mrf.mxu1  ;;  %11443 = vmatpush.msra.mxu1 %v11442_v3  ;;  %v11453_v48 = vsub.f32 %v11451_v35, %v11452_v28  ;;  %v16575_v3 = vld [vmem:[#allocation17_spill] sm:$0xff] }
 0xa44   :  { %v10525_v58 = vadd.f32 %v10524_v22, %v10501_v57  ;;  %v10548_v40 = vpop.f32.mrf.mxu2  ;;  %11231 = vrot.lane.b32.xlu2 %v8219_v7, %s13536_s1  ;;  %v10602_v56 = vpop.f32.mrf.mxu0  ;;  %11642 = vmatpush.msrb.mxu0 %v11440_v20  ;;  %v16568_v57 = vld [vmem:[#allocation19_spill] sm:$0xff]  ;;  %v16572_v20 = vld [vmem:[#allocation22_spill] sm:$0xff] }
 0xa45   :  { %11449 = vmatpush.msra.mxu1 %v11448_v0  ;;  %v11454_v43 = vand.u32 4294901760, %v11453_v48  ;;  %v2077_v62 = vadd.f32 %v16568_v57, %v2053_v30  ;;  %v16569_v7 = vld [vmem:[#allocation15_spill] sm:$0xff]  ;;  %v2205_v59 = vadd.f32 %v16573_v1, %v16572_v20  ;;  %v11192_v0 = vpop.permute.xlu0 %11191  ;;  %v16577_v30 = vld [vmem:[#allocation20_spill] sm:$0xff]  ;;  %v16578_v57 = vld [vmem:[#allocation21_spill] sm:$0xff] }
 0xa46   :  { %v10549_v36 = vadd.f32 %v10548_v40, %v10525_v58  ;;  %11646 = vmatpush.msrb.mxu0 %v11446_v50  ;;  %v11222_v58 = vpop.permute.xlu2 %11221  ;;  %v11190_v40 = vpop.permute.xlu1 %11189 }
 0xa47   :  { %11455 = vmatpush.msra.mxu1 %v11454_v43  ;;  %v2101_v49 = vadd.f32 %v16569_v7, %v2077_v62  ;;  %v16576_v43 = vld [vmem:[#allocation27_spill] sm:$0xff]  ;;  %v2357_v62 = vadd.f32 %v16578_v57, %v16577_v30 }
 0xa48   :  { %v10571_v25 = vadd.f32 %v10570_v46, %v10549_v36  ;;  %11650 = vmatpush.msrb.mxu0 %v11452_v28  ;;  %v16579_v7 = vld [vmem:[#allocation23_spill] sm:$0xff] }
 0xa49   :  { %11697 = vmatpush.msrb.mxu1 %v11347_v39  ;;  %v2125_v22 = vadd.f32 %v16570_v29, %v2101_v49 }
 0xa4a   :  { %11259 = vrot.lane.b32.xlu0 %v10571_v25, %s13537_s27  ;;  %v10676_v42 = vpop.f32.mrf.mxu3 }
 0xa4b   :  { %v10628_v31 = vpop.f32.mrf.mxu1  ;;  %11699 = vmatpush.msrb.mxu1 %v11349_v38  ;;  %v2147_v37 = vadd.f32 %v16571_v18, %v2125_v22 }
 0xa4c   :  { %v10629_v53 = vadd.f32 %v10628_v31, %v10602_v56  ;;  %v10652_v26 = vpop.f32.mrf.mxu2  ;;  %11233 = vrot.lane.b32.xlu2 %v8371_v23, %s13536_s1  ;;  %v10700_v32 = vpop.f32.mrf.mxu0 }
 0xa4d   :  { %11701 = vmatpush.msrb.mxu1 %v11351_v12  ;;  %v11277_v36 = vsel %vm543_vm1, %v2147_v37, %v11190_v40 }
 0xa4e   :  { %v10653_v54 = vadd.f32 %v10652_v26, %v10629_v53  ;;  %v11286_v45 = vsel %vm11285_vm4, %v11277_v36, %v11222_v58  ;;  %v16580_v58 = vld [vmem:[#allocation29_spill] sm:$0xff] }
 0xa4f   :  { %11703 = vmatpush.msrb.mxu1 %v11353_v2  ;;  %v2381_v40 = vadd.f32 %v16580_v58, %v2357_v62 }
 0xa50   :  { %v10677_v6 = vadd.f32 %v10676_v42, %v10653_v54 }
 0xa52   :  { %v10701_v17 = vadd.f32 %v10700_v32, %v10677_v6 }
 0xa53   :  { %v10722_v4 = vpop.f32.mrf.mxu1 }
 0xa54   :  { %v10723_v52 = vadd.f32 %v10722_v4, %v10701_v17  ;;  %11235 = vrot.lane.b32.xlu2 %v8523_v63, %s13536_s1 }
 0xa56   :  { %11261 = vrot.lane.b32.xlu0 %v10723_v52, %s13537_s27  ;;  %v16574_v52 = vld [vmem:[#allocation16_spill] sm:$0xff] }
 0xa57   :  { %v2229_v19 = vadd.f32 %v16574_v52, %v2205_v59 }
 0xa59   :  { %v2253_v60 = vadd.f32 %v16575_v3, %v2229_v19 }
 0xa5b   :  { %v2277_v15 = vadd.f32 %v16576_v43, %v2253_v60 }
 0xa5d   :  { %v2299_v49 = vadd.f32 %v16579_v7, %v2277_v15 }
 0xa5f   :  { %v11278_v22 = vsel %vm543_vm1, %v2299_v49, %v11192_v0  ;;  %v16595_v49 = vld [vmem:[#allocation38_spill] sm:$0xff] }
 0xa6b   :  { %v10804_v46 = vpop.f32.mrf.mxu0 }
 0xa6d   :  { %v10828_v41 = vpop.f32.mrf.mxu1 }
 0xa6f   :  { %v10780_v55 = vpop.f32.mrf.mxu3 }
 0xa73   :  { %v10906_v39 = vpop.f32.mrf.mxu0 }
 0xa75   :  { %v10932_v51 = vpop.f32.mrf.mxu1 }
 0xa76   :  { %v11254_v56 = vpop.permute.xlu2 %11253  ;;  %v10933_v42 = vadd.f32 %v10932_v51, %v10906_v39  ;;  %v11194_v39 = vpop.permute.xlu1 %11193 }
 0xa77   :  { %v10754_v25 = vpop.f32.mrf.mxu2  ;;  %v11295_v24 = vsel %vm11294_vm5, %v11286_v45, %v11254_v56  ;;  %v10874_v47 = vpop.f32.mrf.mxu3 }
 0xa78   :  { %v10781_v11 = vadd.f32 %v10780_v55, %v10754_v25  ;;  %v11312_v31 = vsel %vm87_vm0, %v11295_v24, 0  ;;  %v16582_v24 = vld [vmem:[#allocation24_spill] sm:$0xff] }
 0xa79   :  { %v15564_v5 = vand.u32 4294901760, %v11312_v31 }
 0xa7a   :  { %v10805_v23 = vadd.f32 %v10804_v46, %v10781_v11 }
 0xa7b   :  { %v11356_v53 = vsub.f32 %v11312_v31, %v15564_v5  ;;  %11457 = vmatmul.f32.vlgmr.msra.gmra.mxu1 %v15564_v5  ;;  %v11004_v9 = vpop.f32.mrf.mxu0 }
 0xa7c   :  { %v10829_v16 = vadd.f32 %v10828_v41, %v10805_v23  ;;  %v16581_v41 = vld [vmem:[#allocation26_spill] sm:$0xff]  ;;  %v16583_v23 = vld [vmem:[#allocation33_spill] sm:$0xff] }
 0xa7d   :  { %v11357_v33 = vand.u32 4294901760, %v11356_v53  ;;  %11515 = vmatmul.f32.vlgmr.msra.gmra.mxu2 %v11356_v53  ;;  %v11026_v12 = vpop.f32.mrf.mxu1  ;;  %v2405_v45 = vadd.f32 %v16581_v41, %v2381_v40 }
 0xa7e   :  { %v11224_v29 = vpop.permute.xlu2 %11223  ;;  %v11196_v59 = vpop.permute.xlu1 %11195 }
 0xa7f   :  { %v10852_v26 = vpop.f32.mrf.mxu2  ;;  %v11358_v34 = vsub.f32 %v11356_v53, %v11357_v33  ;;  %11577 = vmatmul.f32.vlgmr.msra.gmra.mxu3 %v11357_v33  ;;  %v10980_v21 = vpop.f32.mrf.mxu3  ;;  %v11287_v55 = vsel %vm11285_vm4, %v11278_v22, %v11224_v29  ;;  %v2429_v11 = vadd.f32 %v16582_v24, %v2405_v45 }
 0xa80   :  { %v10853_v54 = vadd.f32 %v10852_v26, %v10829_v16  ;;  %v16585_v16 = vld [vmem:[#allocation25_spill] sm:$0xff] }
 0xa81   :  { %v11359_v38 = vand.u32 4294901760, %v11358_v34  ;;  %v2451_v26 = vadd.f32 %v16585_v16, %v2429_v11 }
 0xa82   :  { %v10875_v14 = vadd.f32 %v10874_v47, %v10853_v54  ;;  %v16584_v47 = vld [vmem:[#allocation31_spill] sm:$0xff]  ;;  %v16586_v54 = vld [vmem:[#allocation28_spill] sm:$0xff] }
 0xa83   :  { %11360 = vmatmul.f32.vlgmr.msra.gmra.mxu0 %v11359_v38  ;;  %v11108_v4 = vpop.f32.mrf.mxu0  ;;  %v2509_v53 = vadd.f32 %v16584_v47, %v16583_v23  ;;  %v11279_v38 = vsel %vm543_vm1, %v2451_v26, %v11194_v39  ;;  %v16597_v23 = vld [vmem:[#allocation42_spill] sm:$0xff]  ;;  %v16600_v26 = vld [vmem:[#allocation51_spill] sm:$0xff] }
 0xa84   :  { %11263 = vrot.lane.b32.xlu0 %v10875_v14, %s13537_s27 }
 0xa85   :  { %v11132_v10 = vpop.f32.mrf.mxu1  ;;  %v2533_v51 = vadd.f32 %v16586_v54, %v2509_v53  ;;  %v16598_v53 = vld [vmem:[#allocation40_spill] sm:$0xff] }
 0xa86   :  { %v11226_v34 = vpop.permute.xlu2 %11225  ;;  %v11198_v7 = vpop.permute.xlu1 %11197  ;;  %v16601_v54 = vld [vmem:[#allocation44_spill] sm:$0xff] }
 0xa87   :  { %v10956_v6 = vpop.f32.mrf.mxu2  ;;  %v11084_v17 = vpop.f32.mrf.mxu3  ;;  %v11288_v14 = vsel %vm11285_vm4, %v11279_v38, %v11226_v34 }
 0xa88   :  { %v10957_v13 = vadd.f32 %v10956_v6, %v10933_v42  ;;  %v16587_v42 = vld [vmem:[#allocation30_spill] sm:$0xff] }
 0xa8a   :  { %v10981_v44 = vadd.f32 %v10980_v21, %v10957_v13 }
 0xa8c   :  { %v11005_v32 = vadd.f32 %v11004_v9, %v10981_v44  ;;  %v2557_v9 = vadd.f32 %v16587_v42, %v2533_v51  ;;  %v16602_v51 = vld [vmem:[#allocation45_spill] sm:$0xff] }
 0xa8d   :  { %v2965_v38 = vadd.f32 %v16602_v51, %v16601_v54 }
 0xa8e   :  { %v11027_v61 = vadd.f32 %v11026_v12, %v11005_v32  ;;  %v16588_v12 = vld [vmem:[#allocation37_spill] sm:$0xff]  ;;  %v11228_v19 = vpop.permute.xlu2 %11227 }
 0xa8f   :  { %v11058_v27 = vpop.f32.mrf.mxu2  ;;  %v11178_v48 = vpop.f32.mrf.mxu3  ;;  %v2581_v32 = vadd.f32 %v16588_v12, %v2557_v9  ;;  %v16604_v9 = vld [vmem:[#allocation55_spill] sm:$0xff] }
 0xa90   :  { %v11085_v63 = vadd.f32 %v11084_v17, %v11058_v27  ;;  %11265 = vrot.lane.b32.xlu0 %v11027_v61, %s13537_s27  ;;  %v16589_v61 = vld [vmem:[#allocation32_spill] sm:$0xff]  ;;  %v16590_v17 = vld [vmem:[#allocation34_spill] sm:$0xff] }
 0xa91   :  { %v2661_v27 = vadd.f32 %v16590_v17, %v16589_v61  ;;  %v16605_v17 = vld [vmem:[#allocation50_spill] sm:$0xff] }
 0xa92   :  { %v11109_v2 = vadd.f32 %v11108_v4, %v11085_v63  ;;  %v16591_v63 = vld [vmem:[#allocation35_spill] sm:$0xff] }
 0xa93   :  { %v2603_v4 = vadd.f32 %v16591_v63, %v2581_v32  ;;  %v16606_v63 = vld [vmem:[#allocation48_spill] sm:$0xff] }
 0xa94   :  { %v11133_v50 = vadd.f32 %v11132_v10, %v11109_v2  ;;  %v16592_v2 = vld [vmem:[#allocation43_spill] sm:$0xff] }
 0xa95   :  { %v2685_v52 = vadd.f32 %v16592_v2, %v2661_v27 }
 0xa96   :  { %v11230_v22 = vpop.permute.xlu2 %11229 }
 0xa97   :  { %v11156_v35 = vpop.f32.mrf.mxu2 }
 0xa98   :  { %v11157_v28 = vadd.f32 %v11156_v35, %v11133_v50  ;;  %v11280_v50 = vsel %vm543_vm1, %v2603_v4, %v11196_v59 }
 0xa99   :  { %v11289_v3 = vsel %vm11285_vm4, %v11280_v50, %v11228_v19  ;;  %v16608_v19 = vld [vmem:[#allocation54_spill] sm:$0xff] }
 0xa9a   :  { %v11179_v8 = vadd.f32 %v11178_v48, %v11157_v28  ;;  %v16593_v28 = vld [vmem:[#allocation39_spill] sm:$0xff] }
 0xa9b   :  { %v2709_v0 = vadd.f32 %v16593_v28, %v2685_v52  ;;  %v16607_v52 = vld [vmem:[#allocation57_spill] sm:$0xff] }
 0xa9c   :  { %11267 = vrot.lane.b32.xlu0 %v11179_v8, %s13537_s27  ;;  %v16594_v8 = vld [vmem:[#allocation36_spill] sm:$0xff] }
 0xa9d   :  { %v2733_v30 = vadd.f32 %v16594_v8, %v2709_v0 }
 0xa9f   :  { %v2755_v29 = vadd.f32 %v16595_v49, %v2733_v30 }
 0xaa0   :  { %v11256_v18 = vpop.permute.xlu0 %11255 }
 0xaa1   :  { %v11296_v37 = vsel %vm11294_vm5, %v11287_v55, %v11256_v18  ;;  %v11281_v40 = vsel %vm543_vm1, %v2755_v29, %v11198_v7  ;;  %v16611_v29 = vld [vmem:[#allocation53_spill] sm:$0xff] }
 0xaa2   :  { %v11315_v46 = vsel %vm87_vm0, %v11296_v37, 0  ;;  %v11290_v18 = vsel %vm11285_vm4, %v11281_v40, %v11230_v22  ;;  %v16612_v40 = vld [vmem:[#allocation58_spill] sm:$0xff] }
 0xaa3   :  { %v15584_v36 = vand.u32 4294901760, %v11315_v46 }
 0xaa5   :  { %v11364_v56 = vsub.f32 %v11315_v46, %v15584_v36  ;;  %11461 = vmatmul.f32.gmra.mxu1 %v15584_v36 }
 0xaa7   :  { %11520 = vmatmul.f32.gmra.mxu2 %v11364_v56  ;;  %v11365_v25 = vand.u32 4294901760, %v11364_v56 }
 0xaa9   :  { %11583 = vmatmul.f32.gmra.mxu3 %v11365_v25  ;;  %v11366_v31 = vsub.f32 %v11364_v56, %v11365_v25 }
 0xaab   :  { %v11367_v33 = vand.u32 4294901760, %v11366_v31  ;;  %v16596_v31 = vld [vmem:[#allocation47_spill] sm:$0xff] }
 0xaac   :  { %v2813_v47 = vadd.f32 %v16597_v23, %v16596_v31 }
 0xaad   :  { %11368 = vmatmul.f32.gmra.mxu0 %v11367_v33  ;;  %v16599_v33 = vld [vmem:[#allocation41_spill] sm:$0xff] }
 0xaae   :  { %v2837_v39 = vadd.f32 %v16598_v53, %v2813_v47 }
 0xab0   :  { %v11258_v21 = vpop.permute.xlu0 %11257  ;;  %v2861_v16 = vadd.f32 %v16599_v33, %v2837_v39 }
 0xab1   :  { %v11297_v6 = vsel %vm11294_vm5, %v11288_v14, %v11258_v21  ;;  %v11200_v14 = vpop.permute.xlu1 %11199  ;;  %v16603_v21 = vld [vmem:[#allocation46_spill] sm:$0xff] }
 0xab2   :  { %v11318_v13 = vsel %vm87_vm0, %v11297_v6, 0  ;;  %v2885_v34 = vadd.f32 %v16600_v26, %v2861_v16  ;;  %v2989_v6 = vadd.f32 %v16604_v9, %v2965_v38 }
 0xab3   :  { %v15599_v44 = vand.u32 4294901760, %v11318_v13 }
 0xab4   :  { %v2907_v42 = vadd.f32 %v16603_v21, %v2885_v34  ;;  %v3013_v27 = vadd.f32 %v16605_v17, %v2989_v6 }
 0xab5   :  { %v11372_v20 = vsub.f32 %v11318_v13, %v15599_v44  ;;  %11465 = vmatmul.f32.gmra.mxu1 %v15599_v44  ;;  %v11232_v13 = vpop.permute.xlu2 %11231 }
 0xab6   :  { %v11282_v12 = vsel %vm543_vm1, %v2907_v42, %v11200_v14  ;;  %v3037_v4 = vadd.f32 %v16606_v63, %v3013_v27 }
 0xab7   :  { %11525 = vmatmul.f32.gmra.mxu2 %v11372_v20  ;;  %v11373_v1 = vand.u32 4294901760, %v11372_v20  ;;  %v11291_v32 = vsel %vm11285_vm4, %v11282_v12, %v11232_v13  ;;  %v15674_v12 = vld [vmem:[%s16372_s6] ss:$0 sm:$0xff] }
 0xab9   :  { %11589 = vmatmul.f32.gmra.mxu3 %v11373_v1  ;;  %v11374_v10 = vsub.f32 %v11372_v20, %v11373_v1 }
 0xabb   :  { %v11375_v35 = vand.u32 4294901760, %v11374_v10  ;;  %v3117_v10 = vadd.f32 %v16608_v19, %v16607_v52 }
 0xabc   :  { %v11260_v60 = vpop.permute.xlu0 %11259 }
 0xabd   :  { %v11298_v48 = vsel %vm11294_vm5, %v11289_v3, %v11260_v60  ;;  %11376 = vmatmul.f32.gmra.mxu0 %v11375_v35  ;;  %v11202_v35 = vpop.permute.xlu1 %11201  ;;  %v16609_v3 = vld [vmem:[#allocation49_spill] sm:$0xff]  ;;  %v11234_v28 = vpop.permute.xlu2 %11233 }
 0xabe   :  { %v11321_v43 = vsel %vm87_vm0, %v11298_v48, 0  ;;  %v3059_v60 = vadd.f32 %v16609_v3, %v3037_v4  ;;  %v16610_v48 = vld [vmem:[#allocation52_spill] sm:$0xff] }
 0xabf   :  { %v15613_v15 = vand.u32 4294901760, %v11321_v43 }
 0xac0   :  { %v11283_v8 = vsel %vm543_vm1, %v3059_v60, %v11202_v35 }
 0xac1   :  { %v11380_v57 = vsub.f32 %v11321_v43, %v15613_v15  ;;  %11469 = vmatmul.f32.gmra.mxu1 %v15613_v15  ;;  %v3141_v43 = vadd.f32 %v16610_v48, %v3117_v10  ;;  %v13435_v48 = vld [vmem:[%s16366_s0] sm:$0xff] }
 0xac3   :  { %11530 = vmatmul.f32.gmra.mxu2 %v11380_v57  ;;  %v11381_v62 = vand.u32 4294901760, %v11380_v57  ;;  %v3165_v22 = vadd.f32 %v16611_v29, %v3141_v43 }
 0xac5   :  { %11595 = vmatmul.f32.gmra.mxu3 %v11381_v62  ;;  %v11382_v58 = vsub.f32 %v11380_v57, %v11381_v62  ;;  %v11292_v57 = vsel %vm11285_vm4, %v11283_v8, %v11234_v28 }
 0xac7   :  { %v11383_v55 = vand.u32 4294901760, %v11382_v58 }
 0xac8   :  { %v11262_v37 = vpop.permute.xlu0 %11261 }
 0xac9   :  { %v11299_v46 = vsel %vm11294_vm5, %v11290_v18, %v11262_v37  ;;  %11384 = vmatmul.f32.gmra.mxu0 %v11383_v55  ;;  %v3189_v55 = vadd.f32 %v16612_v40, %v3165_v22 }
 0xaca   :  { %v11324_v41 = vsel %vm87_vm0, %v11299_v46, 0  ;;  %v11204_v46 = vpop.permute.xlu1 %11203 }
 0xacb   :  { %v15623_v45 = vand.u32 4294901760, %v11324_v41 }
 0xacd   :  { %v11388_v56 = vsub.f32 %v11324_v41, %v15623_v45  ;;  %11473 = vmatmul.f32.gmra.mxu1 %v15623_v45  ;;  %v16613_v41 = vld [vmem:[#allocation56_spill] sm:$0xff] }
 0xacf   :  { %11535 = vmatmul.f32.gmra.mxu2 %v11388_v56  ;;  %v11389_v25 = vand.u32 4294901760, %v11388_v56 }
 0xad1   :  { %11601 = vmatmul.f32.gmra.mxu3 %v11389_v25  ;;  %v11390_v24 = vsub.f32 %v11388_v56, %v11389_v25  ;;  %v3211_v56 = vadd.f32 %v16613_v41, %v3189_v55  ;;  %v11236_v25 = vpop.permute.xlu2 %11235 }
 0xad3   :  { %v11391_v11 = vand.u32 4294901760, %v11390_v24 }
 0xad5   :  { %11392 = vmatmul.f32.gmra.mxu0 %v11391_v11  ;;  %v11284_v11 = vsel %vm543_vm1, %v3211_v56, %v11204_v46 }
 0xad6   :  { %v11293_v23 = vsel %vm11285_vm4, %v11284_v11, %v11236_v25 }
 0xaf6   :  { %v11264_v61 = vpop.permute.xlu0 %11263 }
 0xaf7   :  { %v11300_v20 = vsel %vm11294_vm5, %v11291_v32, %v11264_v61 }
 0xaf8   :  { %v11327_v1 = vsel %vm87_vm0, %v11300_v20, 0 }
 0xaf9   :  { %v11395_v59 = vand.u32 4294901760, %v11327_v1 }
 0xafb   :  { %v11396_v2 = vsub.f32 %v11327_v1, %v11395_v59  ;;  %11477 = vmatmul.f32.gmra.mxu1 %v11395_v59 }
 0xafd   :  { %11540 = vmatmul.f32.gmra.mxu2 %v11396_v2  ;;  %v11397_v50 = vand.u32 4294901760, %v11396_v2 }
 0xaff   :  { %11607 = vmatmul.f32.gmra.mxu3 %v11397_v50  ;;  %v11398_v0 = vsub.f32 %v11396_v2, %v11397_v50 }
 0xb01   :  { %v11399_v30 = vand.u32 4294901760, %v11398_v0 }
 0xb02   :  { %v11266_v62 = vpop.permute.xlu0 %11265  ;;  %v11578_v2 = vpop.f32.mrf.mxu3 }
 0xb03   :  { %v11301_v7 = vsel %vm11294_vm5, %v11292_v57, %v11266_v62  ;;  %11400 = vmatmul.f32.gmra.mxu0 %v11399_v30 }
 0xb04   :  { %v11330_v49 = vsel %vm87_vm0, %v11301_v7, 0 }
 0xb05   :  { %v11403_v58 = vand.u32 4294901760, %v11330_v49 }
 0xb07   :  { %v11404_v18 = vsub.f32 %v11330_v49, %v11403_v58  ;;  %11481 = vmatmul.f32.gmra.mxu1 %v11403_v58 }
 0xb09   :  { %11545 = vmatmul.f32.gmra.mxu2 %v11404_v18  ;;  %v11405_v37 = vand.u32 4294901760, %v11404_v18 }
 0xb0b   :  { %11613 = vmatmul.f32.gmra.mxu3 %v11405_v37  ;;  %v11406_v24 = vsub.f32 %v11404_v18, %v11405_v37  ;;  %v13436_v18 = vld [vmem:[%s16366_s0 + $0x8] sm:$0xff] }
 0xb0d   :  { %v11407_v31 = vand.u32 4294901760, %v11406_v24 }
 0xb0e   :  { %v11268_v47 = vpop.permute.xlu0 %11267 }
 0xb0f   :  { %v11302_v53 = vsel %vm11294_vm5, %v11293_v23, %v11268_v47  ;;  %11408 = vmatmul.f32.gmra.mxu0 %v11407_v31 }
 0xb10   :  { %v11333_v39 = vsel %vm87_vm0, %v11302_v53, 0 }
 0xb11   :  { %v11411_v33 = vand.u32 4294901760, %v11333_v39 }
 0xb13   :  { %v11412_v16 = vsub.f32 %v11333_v39, %v11411_v33  ;;  %11485 = vmatmul.f32.gmra.mxu1 %v11411_v33 }
 0xb15   :  { %11550 = vmatmul.f32.gmra.mxu2 %v11412_v16  ;;  %v11413_v26 = vand.u32 4294901760, %v11412_v16 }
 0xb17   :  { %11619 = vmatmul.f32.gmra.mxu3 %v11413_v26  ;;  %v11414_v34 = vsub.f32 %v11412_v16, %v11413_v26 }
 0xb19   :  { %v11415_v54 = vand.u32 4294901760, %v11414_v34 }
 0xb1b   :  { %11416 = vmatmul.f32.gmra.mxu0 %v11415_v54  ;;  %11705 = vmatmul.f32.vlgmr.msrb.gmra.mxu1 %v15564_v5 }
 0xb23   :  { %11652 = vmatmul.f32.vlgmr.msrb.gmra.mxu0 %v15564_v5  ;;  %11709 = vmatmul.f32.gmra.mxu1 %v15584_v36  ;;  %v11458_v5 = vpop.f32.mrf.mxu1 }
 0xb2b   :  { %11656 = vmatmul.f32.gmra.mxu0 %v15584_v36  ;;  %11713 = vmatmul.f32.gmra.mxu1 %v15599_v44  ;;  %v11361_v36 = vpop.f32.mrf.mxu0  ;;  %v11462_v51 = vpop.f32.mrf.mxu1 }
 0xb2c   :  { %v11362_v17 = vadd.f32 %v15674_v12, %v11361_v36  ;;  %v11584_v8 = vpop.f32.mrf.mxu3 }
 0xb2e   :  { %v11459_v27 = vadd.f32 %v11458_v5, %v11362_v17 }
 0xb33   :  { %11660 = vmatmul.f32.gmra.mxu0 %v15599_v44  ;;  %11717 = vmatmul.f32.gmra.mxu1 %v15613_v15  ;;  %v11369_v38 = vpop.f32.mrf.mxu0  ;;  %v11466_v14 = vpop.f32.mrf.mxu1 }
 0xb34   :  { %v11370_v4 = vadd.f32 %v15674_v12, %v11369_v38 }
 0xb36   :  { %v11463_v19 = vadd.f32 %v11462_v51, %v11370_v4 }
 0xb3b   :  { %11664 = vmatmul.f32.gmra.mxu0 %v15613_v15  ;;  %11721 = vmatmul.f32.gmra.mxu1 %v15623_v45  ;;  %v11377_v44 = vpop.f32.mrf.mxu0 }
 0xb3c   :  { %v11378_v28 = vadd.f32 %v15674_v12, %v11377_v44  ;;  %v11590_v46 = vpop.f32.mrf.mxu3 }
 0xb3e   :  { %v11470_v21 = vpop.f32.mrf.mxu1  ;;  %v11467_v57 = vadd.f32 %v11466_v14, %v11378_v28 }
 0xb43   :  { %11668 = vmatmul.f32.gmra.mxu0 %v15623_v45  ;;  %11725 = vmatmul.f32.gmra.mxu1 %v11395_v59 }
 0xb46   :  { %v11385_v42 = vpop.f32.mrf.mxu0 }
 0xb47   :  { %v11386_v40 = vadd.f32 %v15674_v12, %v11385_v42  ;;  %v13438_v42 = vld [vmem:[%s16366_s0 + $0x18] sm:$0xff] }
 0xb48   :  { %v11596_v26 = vpop.f32.mrf.mxu3 }
 0xb49   :  { %v11471_v56 = vadd.f32 %v11470_v21, %v11386_v40 }
 0xb4a   :  { %v11474_v9 = vpop.f32.mrf.mxu1 }
 0xb4b   :  { %11672 = vmatmul.f32.gmra.mxu0 %v11395_v59  ;;  %11729 = vmatmul.f32.gmra.mxu1 %v11403_v58  ;;  %v11516_v59 = vpop.f32.mrf.mxu2 }
 0xb4c   :  { %v11517_v63 = vadd.f32 %v11516_v59, %v11459_v27 }
 0xb4e   :  { %v11579_v52 = vadd.f32 %v11578_v2, %v11517_v63 }
 0xb52   :  { %v11393_v15 = vpop.f32.mrf.mxu0 }
 0xb53   :  { %11676 = vmatmul.f32.gmra.mxu0 %v11403_v58  ;;  %11733 = vmatmul.f32.gmra.mxu1 %v11411_v33  ;;  %v11521_v3 = vpop.f32.mrf.mxu2  ;;  %v11394_v47 = vadd.f32 %v15674_v12, %v11393_v15 }
 0xb54   :  { %v11522_v60 = vadd.f32 %v11521_v3, %v11463_v19  ;;  %v11602_v17 = vpop.f32.mrf.mxu3 }
 0xb55   :  { %v11475_v54 = vadd.f32 %v11474_v9, %v11394_v47 }
 0xb56   :  { %v11585_v30 = vadd.f32 %v11584_v8, %v11522_v60 }
 0xb5b   :  { %11680 = vmatmul.f32.gmra.mxu0 %v11411_v33  ;;  %v11526_v29 = vpop.f32.mrf.mxu2  ;;  %v13437_v33 = vld [vmem:[%s16366_s0 + $0x10] sm:$0xff] }
 0xb5c   :  { %v11527_v58 = vadd.f32 %v11526_v29, %v11467_v57  ;;  %v13440_v57 = vld [vmem:[%s16366_s0 + $0x28] sm:$0xff] }
 0xb5e   :  { %v11591_v41 = vadd.f32 %v11590_v46, %v11527_v58 }
 0xb63   :  { %v11531_v31 = vpop.f32.mrf.mxu2 }
 0xb64   :  { %v11532_v23 = vadd.f32 %v11531_v31, %v11471_v56 }
 0xb66   :  { %v11597_v34 = vadd.f32 %v11596_v26, %v11532_v23 }
 0xb6b   :  { %v11536_v38 = vpop.f32.mrf.mxu2 }
 0xb6c   :  { %v11537_v14 = vadd.f32 %v11536_v38, %v11475_v54 }
 0xb6e   :  { %v11603_v9 = vadd.f32 %v11602_v17, %v11537_v14  ;;  %v13442_v17 = vld [vmem:[%s16366_s0 + $0x38] sm:$0xff] }
 0xb78   :  { %v15667_v6 = vpop.f32.mrf.mxu1 }
 0xb80   :  { %v11401_v13 = vpop.f32.mrf.mxu0  ;;  %v11541_v2 = vpop.f32.mrf.mxu2 }
 0xb81   :  { %v11402_v44 = vadd.f32 %v15674_v12, %v11401_v13 }
 0xb84   :  { %v15669_v45 = vpop.f32.mrf.mxu1 }
 0xb8c   :  { %v15676_v32 = vpop.f32.mrf.mxu0  ;;  %v11546_v8 = vpop.f32.mrf.mxu2 }
 0xb90   :  { %v15678_v61 = vpop.f32.mrf.mxu1 }
 0xb98   :  { %v15681_v20 = vpop.f32.mrf.mxu0  ;;  %v11706_v1 = vpop.f32.mrf.mxu1 }
 0xba0   :  { %v11653_v10 = vpop.f32.mrf.mxu0  ;;  %v11710_v35 = vpop.f32.mrf.mxu1 }
 0xba1   :  { %v11654_v50 = vadd.f32 %v11653_v10, %v11579_v52  ;;  %v11410_v52 = vadd.f32 %v15674_v12, %v15676_v32  ;;  %v13439_v10 = vld [vmem:[%s16366_s0 + $0x20] sm:$0xff] }
 0xba3   :  { %v11707_v0 = vadd.f32 %v11706_v1, %v11654_v50  ;;  %v11479_v1 = vadd.f32 %v15667_v6, %v11402_v44  ;;  %v11483_v3 = vadd.f32 %v15669_v45, %v11410_v52 }
 0xba5   :  { %v15688_v43 = vadd.f32 %v13435_v48, %v11707_v0  ;;  %v11542_v13 = vadd.f32 %v11541_v2, %v11479_v1  ;;  %v11547_v32 = vadd.f32 %v11546_v8, %v11483_v3 }
 0xba7   :  { %v11747_v62 = vsel %vm87_vm0, %v15688_v43, 0.0 }
 0xba8   :  { %v11657_v7 = vpop.f32.mrf.mxu0  ;;  %11748 = vadd.xlane.f32.xlu1 %v11747_v62  ;;  %v11714_v22 = vpop.f32.mrf.mxu1 }
 0xba9   :  { %v11658_v49 = vadd.f32 %v11657_v7, %v11585_v30 }
 0xbab   :  { %v11711_v55 = vadd.f32 %v11710_v35, %v11658_v49  ;;  %v11608_v35 = vpop.f32.mrf.mxu3 }
 0xbac   :  { %v11609_v6 = vadd.f32 %v11608_v35, %v11542_v13 }
 0xbad   :  { %v15696_v37 = vadd.f32 %v13436_v18, %v11711_v55  ;;  %v13441_v55 = vld [vmem:[%s16366_s0 + $0x30] sm:$0xff] }
 0xbaf   :  { %v11750_v25 = vsel %vm87_vm0, %v15696_v37, 0.0 }
 0xbb0   :  { %v11661_v24 = vpop.f32.mrf.mxu0  ;;  %11751 = vadd.xlane.f32.xlu2 %v11750_v25  ;;  %v11718_v39 = vpop.f32.mrf.mxu1 }
 0xbb1   :  { %v11662_v11 = vadd.f32 %v11661_v24, %v11591_v41  ;;  %v13538_v41 = vmov 32.0  }
 0xbb2   :  { %13377 = vrcp.f32 %v13538_v41 }
 0xbb3   :  { %v11715_v53 = vadd.f32 %v11714_v22, %v11662_v11  ;;  %v11614_v7 = vpop.f32.mrf.mxu3  ;;  %v11418_v11 = vadd.f32 %v15674_v12, %v15681_v20 }
 0xbb4   :  { %v11615_v49 = vadd.f32 %v11614_v7, %v11547_v32 }
 0xbb5   :  { %v15704_v16 = vadd.f32 %v13437_v33, %v11715_v53  ;;  %v11487_v23 = vadd.f32 %v15678_v61, %v11418_v11  ;;  %v11551_v53 = vpop.f32.mrf.mxu2 }
 0xbb7   :  { %v11753_v5 = vsel %vm87_vm0, %v15704_v16, 0.0 }
 0xbb8   :  { %v11665_v36 = vpop.f32.mrf.mxu0  ;;  %11754 = vadd.xlane.f32.xlu0 %v11753_v5  ;;  %v11722_v27 = vpop.f32.mrf.mxu1 }
 0xbb9   :  { %v11666_v51 = vadd.f32 %v11665_v36, %v11597_v34  ;;  %v13378_v56 = vpop.eup %13377 }
 0xbba   :  { %v11772_v25 = vmul.f32 32.0, %v13378_v56  ;;  %vm11776_vm1 = vweird.f32 %v13378_v56 }
 0xbbb   :  { %v11719_v21 = vadd.f32 %v11718_v39, %v11666_v51  ;;  %v11552_v39 = vadd.f32 %v11551_v53, %v11487_v23  ;;  %v11620_v26 = vpop.f32.mrf.mxu3 }
 0xbbc   :  { %v11773_v24 = vsub.f32 1.0, %v11772_v25 }
 0xbbd   :  { %v15712_v15 = vadd.f32 %v13438_v42, %v11719_v21  ;;  %v11621_v5 = vadd.f32 %v11620_v26, %v11552_v39 }
 0xbbe   :  { %v11774_v31 = vmul.f32 %v13378_v56, %v11773_v24 }
 0xbbf   :  { %v11756_v59 = vsel %vm87_vm0, %v15712_v15, 0.0 }
 0xbc0   :  { %v11669_v63 = vpop.f32.mrf.mxu0  ;;  %11757 = vadd.xlane.f32.xlu2 %v11756_v59  ;;  %v11726_v28 = vpop.f32.mrf.mxu1  ;;  %v11775_v47 = vadd.f32 %v13378_v56, %v11774_v31 }
 0xbc1   :  { %v11670_v4 = vadd.f32 %v11669_v63, %v11603_v9 }
 0xbc2   :  { %v15744_v33 = vsel %vm11776_vm1, %v13378_v56, %v11775_v47 }
 0xbc3   :  { %v11723_v19 = vadd.f32 %v11722_v27, %v11670_v4 }
 0xbc5   :  { %v15722_v50 = vadd.f32 %v13439_v10, %v11723_v19 }
 0xbc7   :  { %v11759_v60 = vsel %vm87_vm0, %v15722_v50, 0.0 }
 0xbc8   :  { %v11673_v0 = vpop.f32.mrf.mxu0  ;;  %11760 = vadd.xlane.f32.xlu1 %v11759_v60  ;;  %v11730_v58 = vpop.f32.mrf.mxu1 }
 0xbc9   :  { %v11674_v48 = vadd.f32 %v11673_v0, %v11609_v6 }
 0xbcb   :  { %v11727_v30 = vadd.f32 %v11726_v28, %v11674_v48 }
 0xbcd   :  { %v15730_v62 = vadd.f32 %v13440_v57, %v11727_v30 }
 0xbcf   :  { %v11762_v45 = vsel %vm87_vm0, %v15730_v62, 0.0 }
 0xbd0   :  { %v11677_v29 = vpop.f32.mrf.mxu0  ;;  %11763 = vadd.xlane.f32.xlu2 %v11762_v45  ;;  %v11734_v61 = vpop.f32.mrf.mxu1 }
 0xbd1   :  { %v11678_v22 = vadd.f32 %v11677_v29, %v11615_v49  ;;  %v11954_v29 = vld [vmem:[#allocation5 + $0x10] sm:$0xff] }
 0xbd3   :  { %v11731_v40 = vadd.f32 %v11730_v58, %v11678_v22  ;;  %v11998_v58 = vand.u32 4294901760, %v11954_v29 }
 0xbd5   :  { %v15737_v18 = vadd.f32 %v13441_v55, %v11731_v40  ;;  %v11953_v40 = vld [vmem:[#allocation5 + $0x8] sm:$0xff] }
 0xbd6   :  { %v12000_v41 = vand.u32 4294901760, %v11953_v40 }
 0xbd7   :  { %v11765_v46 = vsel %vm87_vm0, %v15737_v18, 0.0 }
 0xbd8   :  { %11766 = vadd.xlane.f32.xlu1 %v11765_v46  ;;  %v11681_v34 = vpop.f32.mrf.mxu0  ;;  %v12088_v46 = vsub.f32 %v11954_v29, %v11998_v58  ;;  %v12094_v24 = vsub.f32 %v11953_v40, %v12000_v41 }
 0xbd9   :  { %v11682_v51 = vadd.f32 %v11681_v34, %v11621_v5 }
 0xbda   :  { %v12089_v25 = vand.u32 4294901760, %v12088_v46  ;;  %v12095_v47 = vand.u32 4294901760, %v12094_v24 }
 0xbdb   :  { %v11735_v20 = vadd.f32 %v11734_v61, %v11682_v51 }
 0xbdc   :  { %v12090_v23 = vsub.f32 %v12088_v46, %v12089_v25  ;;  %v12096_v26 = vsub.f32 %v12094_v24, %v12095_v47 }
 0xbde   :  { %v12091_v39 = vand.u32 4294901760, %v12090_v23 }
 0xc1b   :  { %v11749_v54 = vpop.xlane.xlu1 %11748 }
 0xc1c   :  { %v11778_v36 = vmul.f32 %v15744_v33, %v11749_v54  ;;  %v12097_v54 = vand.u32 4294901760, %v12096_v26 }
 0xc1e   :  { %v15748_v38 = vsub.f32 %v15688_v43, %v11778_v36  ;;  %v15760_v43 = vadd.f32 %v13442_v17, %v11735_v20 }
 0xc20   :  { %v11794_v12 = vmul.f32 %v15748_v38, %v15748_v38  ;;  %v11768_v1 = vsel %vm87_vm0, %v15760_v43, 0.0 }
 0xc22   :  { %v11802_v14 = vsel %vm87_vm0, %v11794_v12, 0.0 }
 0xc23   :  { %v11752_v44 = vpop.xlane.xlu2 %11751  ;;  %11803 = vadd.xlane.f32.xlu0 %v11802_v14 }
 0xc24   :  { %v11779_v21 = vmul.f32 %v15744_v33, %v11752_v44 }
 0xc26   :  { %v15755_v42 = vsub.f32 %v15696_v37, %v11779_v21 }
 0xc28   :  { %v11795_v27 = vmul.f32 %v15755_v42, %v15755_v42 }
 0xc2a   :  { %v11805_v9 = vsel %vm87_vm0, %v11795_v27, 0.0 }
 0xc2b   :  { %v11755_v59 = vpop.xlane.xlu0 %11754  ;;  %11806 = vadd.xlane.f32.xlu2 %v11805_v9  ;;  %11769 = vadd.xlane.f32.xlu0 %v11768_v1 }
 0xc2c   :  { %v11780_v37 = vmul.f32 %v15744_v33, %v11755_v59 }
 0xc2e   :  { %v15769_v63 = vsub.f32 %v15704_v16, %v11780_v37 }
 0xc30   :  { %v11796_v4 = vmul.f32 %v15769_v63, %v15769_v63 }
 0xc32   :  { %v11808_v2 = vsel %vm87_vm0, %v11796_v4, 0.0 }
 0xc33   :  { %v11758_v13 = vpop.xlane.xlu2 %11757  ;;  %11809 = vadd.xlane.f32.xlu1 %v11808_v2 }
 0xc34   :  { %v11781_v52 = vmul.f32 %v15744_v33, %v11758_v13 }
 0xc36   :  { %v15776_v19 = vsub.f32 %v15712_v15, %v11781_v52 }
 0xc38   :  { %v11797_v10 = vmul.f32 %v15776_v19, %v15776_v19 }
 0xc3a   :  { %v11811_v35 = vsel %vm87_vm0, %v11797_v10, 0.0 }
 0xc3b   :  { %11812 = vadd.xlane.f32.xlu2 %v11811_v35  ;;  %v11761_v16 = vpop.xlane.xlu1 %11760 }
 0xc3c   :  { %v11782_v6 = vmul.f32 %v15744_v33, %v11761_v16 }
 0xc3e   :  { %v15783_v3 = vsub.f32 %v15722_v50, %v11782_v6 }
 0xc40   :  { %v11798_v60 = vmul.f32 %v15783_v3, %v15783_v3 }
 0xc42   :  { %v11814_v28 = vsel %vm87_vm0, %v11798_v60, 0.0  ;;  %v15815_v60 = vld [vmem:[%s16373_s7] ss:$0 sm:$0xff] }
 0xc43   :  { %v11764_v0 = vpop.xlane.xlu2 %11763  ;;  %11815 = vadd.xlane.f32.xlu0 %v11814_v28 }
 0xc44   :  { %v11783_v15 = vmul.f32 %v15744_v33, %v11764_v0 }
 0xc46   :  { %v15790_v48 = vsub.f32 %v15730_v62, %v11783_v15  ;;  %v11955_v62 = vld [vmem:[#allocation5 + $0x18] sm:$0xff]  ;;  %v15820_v15 = vld [vmem:[%s16374_s8] ss:$0 sm:$0xff] }
 0xc47   :  { %v11996_v45 = vand.u32 4294901760, %v11955_v62 }
 0xc48   :  { %v11799_v8 = vmul.f32 %v15790_v48, %v15790_v48 }
 0xc49   :  { %v12082_v22 = vsub.f32 %v11955_v62, %v11996_v45  ;;  %12216 = vmatpush.msra.mxu1 %v11996_v45  ;;  %11997 = vmatpush.msrb.mxu2 %v11996_v45 }
 0xc4a   :  { %v11817_v32 = vsel %vm87_vm0, %v11799_v8, 0.0 }
 0xc4b   :  { %11818 = vadd.xlane.f32.xlu1 %v11817_v32  ;;  %v11767_v50 = vpop.xlane.xlu1 %11766  ;;  %v12083_v55 = vand.u32 4294901760, %v12082_v22  ;;  %12152 = vmatpush.msra.mxu0 %v12082_v22 }
 0xc4c   :  { %v11784_v30 = vmul.f32 %v15744_v33, %v11767_v50  ;;  %12218 = vmatpush.msra.mxu1 %v11998_v58  ;;  %11999 = vmatpush.msrb.mxu2 %v11998_v58 }
 0xc4d   :  { %v12084_v56 = vsub.f32 %v12082_v22, %v12083_v55  ;;  %12155 = vmatpush.msra.mxu0 %v12088_v46 }
 0xc4e   :  { %v15797_v57 = vsub.f32 %v15737_v18, %v11784_v30  ;;  %v11952_v18 = vld [vmem:[#allocation5] sm:$0xff]  ;;  %12220 = vmatpush.msra.mxu1 %v12000_v41  ;;  %12001 = vmatpush.msrb.mxu2 %v12000_v41 }
 0xc4f   :  { %v12002_v11 = vand.u32 4294901760, %v11952_v18  ;;  %v12085_v31 = vand.u32 4294901760, %v12084_v56  ;;  %12158 = vmatpush.msra.mxu0 %v12094_v24 }
 0xc50   :  { %v11800_v7 = vmul.f32 %v15797_v57, %v15797_v57 }
 0xc51   :  { %v12100_v53 = vsub.f32 %v11952_v18, %v12002_v11  ;;  %12222 = vmatpush.msra.mxu1 %v12002_v11  ;;  %12003 = vmatpush.msrb.mxu2 %v12002_v11 }
 0xc52   :  { %v11820_v49 = vsel %vm87_vm0, %v11800_v7, 0.0  ;;  %12086 = vmatpush.msrb.mxu3 %v12085_v31 }
 0xc53   :  { %11821 = vadd.xlane.f32.xlu2 %v11820_v49  ;;  %v12101_v34 = vand.u32 4294901760, %v12100_v53  ;;  %12161 = vmatpush.msra.mxu0 %v12100_v53 }
 0xc54   :  { %12287 = vmatpush.msra.mxu2 %v12083_v55  ;;  %12092 = vmatpush.msrb.mxu3 %v12091_v39 }
 0xc55   :  { %v12102_v5 = vsub.f32 %v12100_v53, %v12101_v34 }
 0xc56   :  { %12291 = vmatpush.msra.mxu2 %v12089_v25  ;;  %12098 = vmatpush.msrb.mxu3 %v12097_v54 }
 0xc57   :  { %v12103_v36 = vand.u32 4294901760, %v12102_v5 }
 0xc58   :  { %12295 = vmatpush.msra.mxu2 %v12095_v47 }
 0xc59   :  { %12104 = vmatpush.msrb.mxu3 %v12103_v36 }
 0xc5a   :  { %12299 = vmatpush.msra.mxu2 %v12101_v34 }
 0xc5b   :  { %12346 = vmatpush.msra.mxu3 %v11996_v45 }
 0xc5d   :  { %12348 = vmatpush.msra.mxu3 %v11998_v58 }
 0xc5f   :  { %12350 = vmatpush.msra.mxu3 %v12000_v41 }
 0xc61   :  { %12352 = vmatpush.msra.mxu3 %v12002_v11 }
 0xc96   :  { %v11804_v51 = vpop.xlane.xlu0 %11803 }
 0xc97   :  { %v11826_v12 = vmul.f32 %v11804_v51, %v15744_v33 }
 0xc99   :  { %v11834_v61 = vadd.f32 1e-05, %v11826_v12 }
 0xc9b   :  { %13379 = vrsqrt.f32 %v11834_v61  ;;  %vm11848_vm7 = vweird.f32 %v11834_v61 }
 0xc9e   :  { %v11807_v20 = vpop.xlane.xlu2 %11806  ;;  %v11770_v14 = vpop.xlane.xlu0 %11769 }
 0xc9f   :  { %v11827_v44 = vmul.f32 %v11807_v20, %v15744_v33  ;;  %v11785_v21 = vmul.f32 %v15744_v33, %v11770_v14 }
 0xca1   :  { %v13380_v17 = vpop.eup %13379  ;;  %v11835_v27 = vadd.f32 1e-05, %v11827_v44  ;;  %v15806_v9 = vsub.f32 %v15760_v43, %v11785_v21 }
 0xca2   :  { %v11843_v1 = vmul.f32 %v13380_v17, %v11834_v61  ;;  %vm11849_vm6 = vweird.f32 %v13380_v17 }
 0xca3   :  { %13381 = vrsqrt.f32 %v11835_v27  ;;  %v11801_v59 = vmul.f32 %v15806_v9, %v15806_v9  ;;  %vm11850_vm8 = vmor %vm11848_vm7, %vm11849_vm6  ;;  %vm11858_vm10 = vweird.f32 %v11835_v27 }
 0xca4   :  { %v11844_v37 = vmul.f32 %v13380_v17, %v11843_v1 }
 0xca5   :  { %v11823_v4 = vsel %vm87_vm0, %v11801_v59, 0.0 }
 0xca6   :  { %v11845_v2 = vmul.f32 0.5, %v11844_v37  ;;  %v11810_v13 = vpop.xlane.xlu1 %11809  ;;  %11824 = vadd.xlane.f32.xlu0 %v11823_v4 }
 0xca7   :  { %v11828_v52 = vmul.f32 %v11810_v13, %v15744_v33 }
 0xca8   :  { %v11846_v10 = vsub.f32 1.5, %v11845_v2 }
 0xca9   :  { %v13382_v35 = vpop.eup %13381  ;;  %v11836_v16 = vadd.f32 1e-05, %v11828_v52 }
 0xcaa   :  { %v11847_v6 = vmul.f32 %v13380_v17, %v11846_v10  ;;  %v11853_v43 = vmul.f32 %v13382_v35, %v11835_v27  ;;  %vm11859_vm9 = vweird.f32 %v13382_v35 }
 0xcab   :  { %13383 = vrsqrt.f32 %v11836_v16  ;;  %vm11860_vm11 = vmor %vm11858_vm10, %vm11859_vm9  ;;  %vm11868_vm13 = vweird.f32 %v11836_v16 }
 0xcac   :  { %v11851_v28 = vsel %vm11850_vm8, %v13380_v17, %v11847_v6  ;;  %v11854_v0 = vmul.f32 %v13382_v35, %v11853_v43 }
 0xcad   :  { %v11922_v8 = vmul.f32 %v11851_v28, %v15748_v38 }
 0xcae   :  { %v11855_v32 = vmul.f32 0.5, %v11854_v0  ;;  %v11813_v50 = vpop.xlane.xlu2 %11812 }
 0xcaf   :  { %v11933_v30 = vmul.f32 %v15815_v60, %v11922_v8  ;;  %v11829_v7 = vmul.f32 %v11813_v50, %v15744_v33 }
 0xcb0   :  { %v11856_v49 = vsub.f32 1.5, %v11855_v32 }
 0xcb1   :  { %v13384_v62 = vpop.eup %13383  ;;  %v15826_v45 = vadd.f32 %v15820_v15, %v11933_v30  ;;  %v11837_v29 = vadd.f32 1e-05, %v11829_v7 }
 0xcb2   :  { %v11857_v22 = vmul.f32 %v13382_v35, %v11856_v49  ;;  %v11863_v58 = vmul.f32 %v13384_v62, %v11836_v16  ;;  %vm11869_vm12 = vweird.f32 %v13384_v62 }
 0xcb3   :  { %13385 = vrsqrt.f32 %v11837_v29  ;;  %v11961_v38 = vsel %vm87_vm0, %v15826_v45, 0  ;;  %vm11870_vm14 = vmor %vm11868_vm13, %vm11869_vm12  ;;  %vm11878_vm2 = vweird.f32 %v11837_v29 }
 0xcb4   :  { %v11861_v40 = vsel %vm11860_vm11, %v13382_v35, %v11857_v22  ;;  %v11864_v55 = vmul.f32 %v13384_v62, %v11863_v58  ;;  %v15830_v46 = vand.u32 4294901760, %v11961_v38 }
 0xcb5   :  { %v11923_v41 = vmul.f32 %v11861_v40, %v15755_v42 }
 0xcb6   :  { %v11865_v18 = vmul.f32 0.5, %v11864_v55  ;;  %12106 = vmatmul.f32.vlgmr.msrb.gmra.mxu3 %v15830_v46  ;;  %v11816_v56 = vpop.xlane.xlu0 %11815  ;;  %v12005_v25 = vsub.f32 %v11961_v38, %v15830_v46 }
 0xcb7   :  { %v11934_v24 = vmul.f32 %v15815_v60, %v11923_v41  ;;  %v11830_v11 = vmul.f32 %v11816_v56, %v15744_v33 }
 0xcb8   :  { %v11866_v31 = vsub.f32 1.5, %v11865_v18  ;;  %12164 = vmatmul.f32.vlgmr.msra.gmra.mxu0 %v12005_v25  ;;  %v12006_v23 = vand.u32 4294901760, %v12005_v25 }
 0xcb9   :  { %v13386_v47 = vpop.eup %13385  ;;  %v11838_v53 = vadd.f32 1e-05, %v11830_v11  ;;  %v15838_v39 = vadd.f32 %v15820_v15, %v11934_v24 }
 0xcba   :  { %v11867_v42 = vmul.f32 %v13384_v62, %v11866_v31  ;;  %v11873_v26 = vmul.f32 %v13386_v47, %v11837_v29  ;;  %12226 = vmatmul.f32.vlgmr.msra.gmra.mxu1 %v12006_v23  ;;  %v12007_v34 = vsub.f32 %v12005_v25, %v12006_v23  ;;  %vm11879_vm15 = vweird.f32 %v13386_v47 }
 0xcbb   :  { %13387 = vrsqrt.f32 %v11838_v53  ;;  %v11964_v54 = vsel %vm87_vm0, %v15838_v39, 0  ;;  %vm11880_vm3 = vmor %vm11878_vm2, %vm11879_vm15  ;;  %vm11888_vm5 = vweird.f32 %v11838_v53  ;;  %vm12406_vm15 = vcmask 523264  }
 0xcbc   :  { %v11871_v5 = vsel %vm11870_vm14, %v13384_v62, %v11867_v42  ;;  %v11874_v36 = vmul.f32 %v13386_v47, %v11873_v26  ;;  %v12008_v51 = vand.u32 4294901760, %v12007_v34  ;;  %v15842_v12 = vand.u32 4294901760, %v11964_v54 }
 0xcbd   :  { %v11924_v61 = vmul.f32 %v11871_v5, %v15769_v63 }
 0xcbe   :  { %v11875_v20 = vmul.f32 0.5, %v11874_v36  ;;  %12009 = vmatmul.f32.vlgmr.msrb.gmra.mxu2 %v12008_v51  ;;  %12110 = vmatmul.f32.gmra.mxu3 %v15842_v12  ;;  %v11819_v14 = vpop.xlane.xlu1 %11818  ;;  %v12013_v44 = vsub.f32 %v11964_v54, %v15842_v12 }
 0xcbf   :  { %v11935_v21 = vmul.f32 %v15815_v60, %v11924_v61  ;;  %v11831_v17 = vmul.f32 %v11819_v14, %v15744_v33 }
 0xcc0   :  { %v11876_v27 = vsub.f32 1.5, %v11875_v20  ;;  %12169 = vmatmul.f32.gmra.mxu0 %v12013_v44  ;;  %v12014_v1 = vand.u32 4294901760, %v12013_v44 }
 0xcc1   :  { %v13388_v59 = vpop.eup %13387  ;;  %v11839_v37 = vadd.f32 1e-05, %v11831_v17  ;;  %v15850_v4 = vadd.f32 %v15820_v15, %v11935_v21 }
 0xcc2   :  { %v11877_v63 = vmul.f32 %v13386_v47, %v11876_v27  ;;  %v11883_v2 = vmul.f32 %v13388_v59, %v11838_v53  ;;  %12232 = vmatmul.f32.gmra.mxu1 %v12014_v1  ;;  %v12015_v13 = vsub.f32 %v12013_v44, %v12014_v1  ;;  %vm11889_vm4 = vweird.f32 %v13388_v59 }
 0xcc3   :  { %13389 = vrsqrt.f32 %v11839_v37  ;;  %v11967_v52 = vsel %vm87_vm0, %v15850_v4, 0  ;;  %vm11890_vm1 = vmor %vm11888_vm5, %vm11889_vm4  ;;  %vm11898_vm7 = vweird.f32 %v11839_v37 }
 0xcc4   :  { %v11881_v10 = vsel %vm11880_vm3, %v13386_v47, %v11877_v63  ;;  %v11884_v35 = vmul.f32 %v13388_v59, %v11883_v2  ;;  %v12016_v16 = vand.u32 4294901760, %v12015_v13  ;;  %v15854_v6 = vand.u32 4294901760, %v11967_v52 }
 0xcc5   :  { %v11925_v43 = vmul.f32 %v11881_v10, %v15776_v19 }
 0xcc6   :  { %v11885_v28 = vmul.f32 0.5, %v11884_v35  ;;  %12017 = vmatmul.f32.gmra.mxu2 %v12016_v16  ;;  %v11822_v0 = vpop.xlane.xlu2 %11821  ;;  %12114 = vmatmul.f32.gmra.mxu3 %v15854_v6  ;;  %v12021_v8 = vsub.f32 %v11967_v52, %v15854_v6 }
 0xcc7   :  { %v11936_v32 = vmul.f32 %v15815_v60, %v11925_v43  ;;  %v11832_v50 = vmul.f32 %v11822_v0, %v15744_v33 }
 0xcc8   :  { %v11886_v30 = vsub.f32 1.5, %v11885_v28  ;;  %12174 = vmatmul.f32.gmra.mxu0 %v12021_v8  ;;  %v12022_v7 = vand.u32 4294901760, %v12021_v8 }
 0xcc9   :  { %v13390_v49 = vpop.eup %13389  ;;  %v11840_v62 = vadd.f32 1e-05, %v11832_v50  ;;  %v15862_v29 = vadd.f32 %v15820_v15, %v11936_v32 }
 0xcca   :  { %v11887_v19 = vmul.f32 %v13388_v59, %v11886_v30  ;;  %v11893_v22 = vmul.f32 %v13390_v49, %v11839_v37  ;;  %12238 = vmatmul.f32.gmra.mxu1 %v12022_v7  ;;  %v12023_v58 = vsub.f32 %v12021_v8, %v12022_v7  ;;  %vm11899_vm6 = vweird.f32 %v13390_v49 }
 0xccb   :  { %13391 = vrsqrt.f32 %v11840_v62  ;;  %v11970_v38 = vsel %vm87_vm0, %v15862_v29, 0  ;;  %vm11900_vm8 = vmor %vm11898_vm7, %vm11899_vm6  ;;  %vm11908_vm10 = vweird.f32 %v11840_v62 }
 0xccc   :  { %v11891_v40 = vsel %vm11890_vm1, %v13388_v59, %v11887_v19  ;;  %v11894_v55 = vmul.f32 %v13390_v49, %v11893_v22  ;;  %v12024_v41 = vand.u32 4294901760, %v12023_v58  ;;  %v15866_v18 = vand.u32 4294901760, %v11970_v38 }
 0xccd   :  { %v11926_v56 = vmul.f32 %v11891_v40, %v15783_v3 }
 0xcce   :  { %v11895_v25 = vmul.f32 0.5, %v11894_v55  ;;  %12025 = vmatmul.f32.gmra.mxu2 %v12024_v41  ;;  %12118 = vmatmul.f32.gmra.mxu3 %v15866_v18  ;;  %v12029_v24 = vsub.f32 %v11970_v38, %v15866_v18 }
 0xccf   :  { %v11937_v11 = vmul.f32 %v15815_v60, %v11926_v56 }
 0xcd0   :  { %v11896_v31 = vsub.f32 1.5, %v11895_v25  ;;  %12179 = vmatmul.f32.gmra.mxu0 %v12029_v24  ;;  %v12030_v23 = vand.u32 4294901760, %v12029_v24 }
 0xcd1   :  { %v13392_v47 = vpop.eup %13391  ;;  %v15873_v53 = vadd.f32 %v15820_v15, %v11937_v11 }
 0xcd2   :  { %v11897_v42 = vmul.f32 %v13390_v49, %v11896_v31  ;;  %v11903_v26 = vmul.f32 %v13392_v47, %v11840_v62  ;;  %12244 = vmatmul.f32.gmra.mxu1 %v12030_v23  ;;  %v12031_v3 = vsub.f32 %v12029_v24, %v12030_v23  ;;  %vm11909_vm9 = vweird.f32 %v13392_v47 }
 0xcd3   :  { %v11973_v34 = vsel %vm87_vm0, %v15873_v53, 0  ;;  %vm11910_vm11 = vmor %vm11908_vm10, %vm11909_vm9 }
 0xcd4   :  { %v11901_v54 = vsel %vm11900_vm8, %v13390_v49, %v11897_v42  ;;  %v11904_v5 = vmul.f32 %v13392_v47, %v11903_v26  ;;  %v12032_v36 = vand.u32 4294901760, %v12031_v3  ;;  %v15877_v51 = vand.u32 4294901760, %v11973_v34 }
 0xcd5   :  { %v11927_v61 = vmul.f32 %v11901_v54, %v15790_v48 }
 0xcd6   :  { %v11905_v20 = vmul.f32 0.5, %v11904_v5  ;;  %12033 = vmatmul.f32.gmra.mxu2 %v12032_v36  ;;  %12122 = vmatmul.f32.gmra.mxu3 %v15877_v51  ;;  %v12037_v14 = vsub.f32 %v11973_v34, %v15877_v51  ;;  %v12401_v34 = vld [vmem:[%s16377_s11 + $0x38] sm:$0xff]  ;;  %v12400_v36 = vld [vmem:[%s16377_s11 + $0x30] sm:$0xff] }
 0xcd7   :  { %v11938_v44 = vmul.f32 %v15815_v60, %v11927_v61  ;;  %v15932_v54 = vand.u32 4294901760, %v12401_v34  ;;  %v15942_v61 = vand.u32 4294901760, %v12400_v36 }
 0xcd8   :  { %v11906_v21 = vsub.f32 1.5, %v11905_v20  ;;  %12184 = vmatmul.f32.gmra.mxu0 %v12037_v14  ;;  %v12038_v17 = vand.u32 4294901760, %v12037_v14  ;;  %v12399_v20 = vld [vmem:[%s16377_s11 + $0x28] sm:$0xff] }
 0xcd9   :  { %v15884_v27 = vadd.f32 %v15820_v15, %v11938_v44  ;;  %12691 = vmatpush.msrb.mxu3 %v15932_v54  ;;  %12440 = vmatpush.msrb.mxu0 %v15932_v54  ;;  %v15951_v44 = vsub.f32 %v12400_v36, %v15942_v61 }
 0xcda   :  { %v11907_v1 = vmul.f32 %v13392_v47, %v11906_v21  ;;  %12250 = vmatmul.f32.gmra.mxu1 %v12038_v17  ;;  %v12039_v59 = vsub.f32 %v12037_v14, %v12038_v17  ;;  %v15954_v21 = vand.u32 4294901760, %v12399_v20  ;;  %v12398_v17 = vld [vmem:[%s16377_s11 + $0x20] sm:$0xff] }
 0xcdb   :  { %v11976_v48 = vsel %vm87_vm0, %v15884_v27, 0  ;;  %12693 = vmatpush.msrb.mxu3 %v15942_v61  ;;  %12442 = vmatpush.msrb.mxu0 %v15942_v61 }
 0xcdc   :  { %v11911_v37 = vsel %vm11910_vm11, %v13392_v47, %v11907_v1  ;;  %v12040_v63 = vand.u32 4294901760, %v12039_v59  ;;  %v12044_v2 = vand.u32 4294901760, %v11976_v48  ;;  %v12536_v59 = vand.u32 4294901760, %v15951_v44 }
 0xcdd   :  { %v11928_v13 = vmul.f32 %v11911_v37, %v15797_v57  ;;  %v15969_v37 = vand.u32 4294901760, %v12398_v17  ;;  %12695 = vmatpush.msrb.mxu3 %v15954_v21  ;;  %12444 = vmatpush.msrb.mxu0 %v15954_v21 }
 0xcde   :  { %12041 = vmatmul.f32.gmra.mxu2 %v12040_v63  ;;  %12126 = vmatmul.f32.gmra.mxu3 %v12044_v2  ;;  %v12045_v52 = vsub.f32 %v11976_v48, %v12044_v2  ;;  %v15966_v48 = vsub.f32 %v12399_v20, %v15954_v21  ;;  %v12397_v63 = vld [vmem:[%s16377_s11 + $0x18] sm:$0xff] }
 0xcdf   :  { %v11939_v10 = vmul.f32 %v15815_v60, %v11928_v13  ;;  %v12537_v13 = vsub.f32 %v15951_v44, %v12536_v59  ;;  %12697 = vmatpush.msrb.mxu3 %v15969_v37  ;;  %12446 = vmatpush.msrb.mxu0 %v15969_v37 }
 0xce0   :  { %12189 = vmatmul.f32.gmra.mxu0 %v12045_v52  ;;  %v12046_v35 = vand.u32 4294901760, %v12045_v52 }
 0xce1   :  { %v15891_v16 = vadd.f32 %v15820_v15, %v11939_v10  ;;  %v15981_v10 = vsub.f32 %v12398_v17, %v15969_v37 }
 0xce2   :  { %12256 = vmatmul.f32.gmra.mxu1 %v12046_v35  ;;  %v12047_v43 = vsub.f32 %v12045_v52, %v12046_v35  ;;  %v12542_v52 = vand.u32 4294901760, %v15966_v48 }
 0xce3   :  { %v11979_v28 = vsel %vm87_vm0, %v15891_v16, 0 }
 0xce4   :  { %v12048_v0 = vand.u32 4294901760, %v12047_v43  ;;  %v12052_v8 = vand.u32 4294901760, %v11979_v28  ;;  %v15987_v43 = vand.u32 4294901760, %v12397_v63 }
 0xce6   :  { %12049 = vmatmul.f32.gmra.mxu2 %v12048_v0  ;;  %12130 = vmatmul.f32.gmra.mxu3 %v12052_v8  ;;  %v12053_v57 = vsub.f32 %v11979_v28, %v12052_v8  ;;  %v12396_v28 = vld [vmem:[%s16377_s11 + $0x10] sm:$0xff]  ;;  %v12538_v0 = vand.u32 4294901760, %v12537_v13 }
 0xce7   :  { %12699 = vmatpush.msrb.mxu3 %v15987_v43  ;;  %12448 = vmatpush.msrb.mxu0 %v15987_v43 }
 0xce8   :  { %12194 = vmatmul.f32.gmra.mxu0 %v12053_v57  ;;  %v12054_v32 = vand.u32 4294901760, %v12053_v57 }
 0xcea   :  { %12262 = vmatmul.f32.gmra.mxu1 %v12054_v32  ;;  %v12055_v50 = vsub.f32 %v12053_v57, %v12054_v32  ;;  %v12548_v57 = vand.u32 4294901760, %v15981_v10  ;;  %v15996_v32 = vand.u32 4294901760, %v12396_v28 }
 0xcec   :  { %v12056_v30 = vand.u32 4294901760, %v12055_v50  ;;  %12701 = vmatpush.msrb.mxu3 %v15996_v32  ;;  %12450 = vmatpush.msrb.mxu0 %v15996_v32 }
 0xcee   :  { %12057 = vmatmul.f32.gmra.mxu2 %v12056_v30  ;;  %v12553_v30 = vsub.f32 %v12397_v63, %v15987_v43 }
 0xd19   :  { %v11825_v7 = vpop.xlane.xlu0 %11824 }
 0xd1a   :  { %v11833_v49 = vmul.f32 %v11825_v7, %v15744_v33  ;;  %v12395_v7 = vld [vmem:[%s16377_s11 + $0x8] sm:$0xff] }
 0xd1c   :  { %v11841_v62 = vadd.f32 1e-05, %v11833_v49 }
 0xd1e   :  { %13393 = vrsqrt.f32 %v11841_v62  ;;  %vm11918_vm13 = vweird.f32 %v11841_v62 }
 0xd24   :  { %v13394_v19 = vpop.eup %13393 }
 0xd25   :  { %v11913_v22 = vmul.f32 %v13394_v19, %v11841_v62  ;;  %vm11919_vm12 = vweird.f32 %v13394_v19  ;;  %v12549_v62 = vsub.f32 %v15981_v10, %v12548_v57 }
 0xd26   :  { %vm11920_vm14 = vmor %vm11918_vm13, %vm11919_vm12 }
 0xd27   :  { %v11914_v58 = vmul.f32 %v13394_v19, %v11913_v22  ;;  %v12451_v22 = vand.u32 4294901760, %v12395_v7 }
 0xd29   :  { %v11915_v38 = vmul.f32 0.5, %v11914_v58  ;;  %v12554_v58 = vand.u32 4294901760, %v12553_v30  ;;  %12703 = vmatpush.msrb.mxu3 %v12451_v22  ;;  %12452 = vmatpush.msrb.mxu0 %v12451_v22 }
 0xd2b   :  { %v11916_v40 = vsub.f32 1.5, %v11915_v38  ;;  %v12394_v38 = vld [vmem:[%s16377_s11] sm:$0xff] }
 0xd2d   :  { %v11917_v55 = vmul.f32 %v13394_v19, %v11916_v40  ;;  %v12550_v40 = vand.u32 4294901760, %v12549_v62 }
 0xd2f   :  { %v11921_v41 = vsel %vm11920_vm14, %v13394_v19, %v11917_v55  ;;  %v12559_v19 = vsub.f32 %v12396_v28, %v15996_v32 }
 0xd30   :  { %v11929_v56 = vmul.f32 %v11921_v41, %v15806_v9  ;;  %v12565_v41 = vsub.f32 %v12395_v7, %v12451_v22 }
 0xd31   :  { %v12560_v55 = vand.u32 4294901760, %v12559_v19 }
 0xd32   :  { %v11940_v25 = vmul.f32 %v15815_v60, %v11929_v56  ;;  %v12453_v56 = vand.u32 4294901760, %v12394_v38 }
 0xd34   :  { %v15899_v24 = vadd.f32 %v15820_v15, %v11940_v25  ;;  %v12555_v25 = vsub.f32 %v12553_v30, %v12554_v58  ;;  %12705 = vmatpush.msrb.mxu3 %v12453_v56  ;;  %12454 = vmatpush.msrb.mxu0 %v12453_v56 }
 0xd35   :  { %v12165_v63 = vpop.f32.mrf.mxu0 }
 0xd36   :  { %v11982_v11 = vsel %vm87_vm0, %v15899_v24, 0 }
 0xd37   :  { %v12060_v31 = vand.u32 4294901760, %v11982_v11 }
 0xd39   :  { %12134 = vmatmul.f32.gmra.mxu3 %v12060_v31  ;;  %v12061_v23 = vsub.f32 %v11982_v11, %v12060_v31  ;;  %v15913_v9 = vpop.f32.mrf.mxu3  ;;  %v12561_v11 = vsub.f32 %v12559_v19, %v12560_v55 }
 0xd3b   :  { %12199 = vmatmul.f32.gmra.mxu0 %v12061_v23  ;;  %v12062_v47 = vand.u32 4294901760, %v12061_v23 }
 0xd3d   :  { %12268 = vmatmul.f32.gmra.mxu1 %v12062_v47  ;;  %v12063_v42 = vsub.f32 %v12061_v23, %v12062_v47  ;;  %v12571_v23 = vsub.f32 %v12394_v38, %v12453_v56  ;;  %v12556_v47 = vand.u32 4294901760, %v12555_v25 }
 0xd3f   :  { %v12064_v26 = vand.u32 4294901760, %v12063_v42  ;;  %v12562_v42 = vand.u32 4294901760, %v12561_v11 }
 0xd41   :  { %12065 = vmatmul.f32.gmra.mxu2 %v12064_v26  ;;  %12354 = vmatmul.f32.vlgmr.msra.gmra.mxu3 %v15830_v46  ;;  %v15915_v60 = vpop.f32.mrf.mxu2  ;;  %v15917_v15 = vpop.f32.mrf.mxu3 }
 0xd49   :  { %12301 = vmatmul.f32.vlgmr.msra.gmra.mxu2 %v15830_v46  ;;  %12358 = vmatmul.f32.gmra.mxu3 %v15842_v12  ;;  %v15919_v46 = vpop.f32.mrf.mxu2 }
 0xd51   :  { %12305 = vmatmul.f32.gmra.mxu2 %v15842_v12  ;;  %12362 = vmatmul.f32.gmra.mxu3 %v15854_v6  ;;  %v15921_v12 = vpop.f32.mrf.mxu3 }
 0xd59   :  { %12309 = vmatmul.f32.gmra.mxu2 %v15854_v6  ;;  %12366 = vmatmul.f32.gmra.mxu3 %v15866_v18  ;;  %v15923_v6 = vpop.f32.mrf.mxu2 }
 0xd61   :  { %12313 = vmatmul.f32.gmra.mxu2 %v15866_v18  ;;  %12370 = vmatmul.f32.gmra.mxu3 %v15877_v51  ;;  %v15925_v18 = vpop.f32.mrf.mxu3  ;;  %v15927_v3 = vpop.f32.mrf.mxu2 }
 0xd69   :  { %12317 = vmatmul.f32.gmra.mxu2 %v15877_v51  ;;  %12374 = vmatmul.f32.gmra.mxu3 %v12044_v2  ;;  %v15934_v5 = vpop.f32.mrf.mxu3  ;;  %v15940_v51 = vsub.f32 %v12401_v34, %v15932_v54  ;;  %v15985_v35 = vpop.f32.mrf.mxu2  ;;  %v12572_v34 = vand.u32 4294901760, %v12571_v23 }
 0xd6b   :  { %v12530_v14 = vand.u32 4294901760, %v15940_v51  ;;  %12619 = vmatpush.msrb.mxu2 %v15940_v51  ;;  %v12573_v17 = vsub.f32 %v12571_v23, %v12572_v34 }
 0xd6d   :  { %v12531_v1 = vsub.f32 %v15940_v51, %v12530_v14  ;;  %12622 = vmatpush.msrb.mxu2 %v15951_v44  ;;  %12766 = vmatpush.msra.mxu0 %v12530_v14  ;;  %v12227_v44 = vpop.f32.mrf.mxu1 }
 0xd6f   :  { %12625 = vmatpush.msrb.mxu2 %v15966_v48  ;;  %12770 = vmatpush.msra.mxu0 %v12536_v59  ;;  %v12170_v59 = vpop.f32.mrf.mxu0 }
 0xd71   :  { %12321 = vmatmul.f32.gmra.mxu2 %v12044_v2  ;;  %12378 = vmatmul.f32.gmra.mxu3 %v12052_v8  ;;  %v12532_v2 = vand.u32 4294901760, %v12531_v1  ;;  %v15998_v50 = vpop.f32.mrf.mxu3  ;;  %v16013_v36 = vpop.f32.mrf.mxu2 }
 0xd72   :  { %12628 = vmatpush.msrb.mxu2 %v15981_v10  ;;  %12774 = vmatpush.msra.mxu0 %v12542_v52 }
 0xd73   :  { %12533 = vmatpush.msrb.mxu1 %v12532_v2  ;;  %v16025_v2 = vld [vmem:[%s16376_s10] ss:$0 sm:$0xff] }
 0xd74   :  { %12631 = vmatpush.msrb.mxu2 %v12553_v30  ;;  %12778 = vmatpush.msra.mxu0 %v12548_v57 }
 0xd75   :  { %12539 = vmatpush.msrb.mxu1 %v12538_v0 }
 0xd76   :  { %12634 = vmatpush.msrb.mxu2 %v12559_v19  ;;  %12782 = vmatpush.msra.mxu0 %v12554_v58 }
 0xd77   :  { %v12175_v57 = vpop.f32.mrf.mxu0 }
 0xd78   :  { %12637 = vmatpush.msrb.mxu2 %v12565_v41  ;;  %12786 = vmatpush.msra.mxu0 %v12560_v55 }
 0xd79   :  { %12325 = vmatmul.f32.gmra.mxu2 %v12052_v8  ;;  %12382 = vmatmul.f32.gmra.mxu3 %v12060_v31  ;;  %v12543_v8 = vsub.f32 %v15966_v48, %v12542_v52  ;;  %v16017_v1 = vpop.f32.mrf.mxu3  ;;  %v12574_v48 = vand.u32 4294901760, %v12573_v17  ;;  %v16028_v51 = vpop.f32.mrf.mxu2 }
 0xd7a   :  { %12640 = vmatpush.msrb.mxu2 %v12571_v23 }
 0xd7b   :  { %v12544_v49 = vand.u32 4294901760, %v12543_v8 }
 0xd7d   :  { %12545 = vmatpush.msrb.mxu1 %v12544_v49 }
 0xd7f   :  { %12551 = vmatpush.msrb.mxu1 %v12550_v40 }
 0xd81   :  { %12329 = vmatmul.f32.gmra.mxu2 %v12060_v31  ;;  %v12566_v31 = vand.u32 4294901760, %v12565_v41  ;;  %12557 = vmatpush.msrb.mxu1 %v12556_v47 }
 0xd83   :  { %v12567_v26 = vsub.f32 %v12565_v41, %v12566_v31  ;;  %12563 = vmatpush.msrb.mxu1 %v12562_v42  ;;  %12790 = vmatpush.msra.mxu0 %v12566_v31 }
 0xd85   :  { %v12568_v20 = vand.u32 4294901760, %v12567_v26  ;;  %12794 = vmatpush.msra.mxu0 %v12572_v34 }
 0xd87   :  { %12569 = vmatpush.msrb.mxu1 %v12568_v20 }
 0xd89   :  { %12575 = vmatpush.msrb.mxu1 %v12574_v48 }
 0xd8b   :  { %12837 = vmatpush.msra.mxu1 %v15932_v54  ;;  %v12011_v54 = vadd.f32 %v16025_v2, %v15915_v60  ;;  %v12233_v60 = vpop.f32.mrf.mxu1 }
 0xd8d   :  { %12839 = vmatpush.msra.mxu1 %v15942_v61  ;;  %v12108_v61 = vadd.f32 %v15913_v9, %v12011_v54  ;;  %v12027_v9 = vadd.f32 %v16025_v2, %v15923_v6  ;;  %v12035_v6 = vadd.f32 %v16025_v2, %v15927_v3 }
 0xd8f   :  { %12841 = vmatpush.msra.mxu1 %v15954_v21  ;;  %v12019_v21 = vadd.f32 %v16025_v2, %v15919_v46  ;;  %v12166_v10 = vadd.f32 %v12165_v63, %v12108_v61  ;;  %v12116_v46 = vadd.f32 %v15921_v12, %v12027_v9  ;;  %v12120_v31 = vadd.f32 %v15925_v18, %v12035_v6 }
 0xd90   :  { %v12043_v63 = vadd.f32 %v16025_v2, %v15985_v35 }
 0xd91   :  { %12843 = vmatpush.msra.mxu1 %v15969_v37  ;;  %v12112_v37 = vadd.f32 %v15917_v15, %v12019_v21  ;;  %v12228_v28 = vadd.f32 %v12227_v44, %v12166_v10  ;;  %v12176_v41 = vadd.f32 %v12175_v57, %v12116_v46  ;;  %v12051_v57 = vadd.f32 %v16025_v2, %v16013_v36 }
 0xd92   :  { %v12124_v21 = vadd.f32 %v15934_v5, %v12043_v63 }
 0xd93   :  { %12845 = vmatpush.msra.mxu1 %v15987_v43  ;;  %v12171_v30 = vadd.f32 %v12170_v59, %v12112_v37  ;;  %v12239_v49 = vpop.f32.mrf.mxu1  ;;  %v12128_v46 = vadd.f32 %v15998_v50, %v12051_v57 }
 0xd94   :  { %v12240_v47 = vadd.f32 %v12239_v49, %v12176_v41 }
 0xd95   :  { %12847 = vmatpush.msra.mxu1 %v15996_v32  ;;  %v12234_v19 = vadd.f32 %v12233_v60, %v12171_v30 }
 0xd97   :  { %12849 = vmatpush.msra.mxu1 %v12451_v22 }
 0xd99   :  { %12851 = vmatpush.msra.mxu1 %v12453_v56  ;;  %v12180_v56 = vpop.f32.mrf.mxu0 }
 0xd9a   :  { %v12181_v18 = vadd.f32 %v12180_v56, %v12120_v31 }
 0xd9b   :  { %v12245_v42 = vpop.f32.mrf.mxu1 }
 0xd9c   :  { %v12246_v60 = vadd.f32 %v12245_v42, %v12181_v18 }
 0xda1   :  { %v12185_v61 = vpop.f32.mrf.mxu0 }
 0xdbc   :  { %v16030_v14 = vpop.f32.mrf.mxu3 }
 0xdc4   :  { %v16039_v13 = vpop.f32.mrf.mxu2  ;;  %v12355_v52 = vpop.f32.mrf.mxu3 }
 0xdc5   :  { %v12067_v63 = vadd.f32 %v16025_v2, %v16039_v13 }
 0xdcc   :  { %v12302_v43 = vpop.f32.mrf.mxu2  ;;  %v12359_v0 = vpop.f32.mrf.mxu3 }
 0xdcd   :  { %v12303_v8 = vadd.f32 %v12302_v43, %v12228_v28 }
 0xdcf   :  { %v12356_v32 = vadd.f32 %v12355_v52, %v12303_v8  ;;  %v12251_v8 = vpop.f32.mrf.mxu1 }
 0xdd1   :  { %v12386_v7 = vmax.f32 %v12356_v32, 0.0  ;;  %v12186_v32 = vadd.f32 %v12185_v61, %v12124_v21 }
 0xdd3   :  { %v12408_v62 = vsel %vm12406_vm15, %v12386_v7, 0 }
 0xdd4   :  { %v16048_v22 = vand.u32 4294901760, %v12408_v62  ;;  %v12306_v15 = vpop.f32.mrf.mxu2  ;;  %v12363_v58 = vpop.f32.mrf.mxu3 }
 0xdd5   :  { %v12307_v38 = vadd.f32 %v12306_v15, %v12234_v19  ;;  %v12252_v19 = vadd.f32 %v12251_v8, %v12186_v32  ;;  %v12190_v15 = vpop.f32.mrf.mxu0 }
 0xdd6   :  { %v12456_v40 = vsub.f32 %v12408_v62, %v16048_v22  ;;  %12577 = vmatmul.f32.vlgmr.msrb.gmra.mxu1 %v16048_v22  ;;  %v12191_v56 = vadd.f32 %v12190_v15, %v12128_v46 }
 0xdd7   :  { %v12360_v55 = vadd.f32 %v12359_v0, %v12307_v38  ;;  %v12257_v50 = vpop.f32.mrf.mxu1 }
 0xdd8   :  { %v12457_v25 = vand.u32 4294901760, %v12456_v40  ;;  %12643 = vmatmul.f32.vlgmr.msrb.gmra.mxu2 %v12456_v40  ;;  %v12258_v42 = vadd.f32 %v12257_v50, %v12191_v56 }
 0xdd9   :  { %v12387_v12 = vmax.f32 %v12360_v55, 0.0  ;;  %v12059_v55 = vadd.f32 %v16025_v2, %v16028_v51 }
 0xdda   :  { %v12458_v11 = vsub.f32 %v12456_v40, %v12457_v25  ;;  %12709 = vmatmul.f32.vlgmr.msrb.gmra.mxu3 %v12457_v25 }
 0xddb   :  { %v12411_v23 = vsel %vm12406_vm15, %v12387_v12, 0 }
 0xddc   :  { %v12459_v26 = vand.u32 4294901760, %v12458_v11  ;;  %v16056_v34 = vand.u32 4294901760, %v12411_v23  ;;  %v12310_v20 = vpop.f32.mrf.mxu2  ;;  %v12367_v3 = vpop.f32.mrf.mxu3 }
 0xddd   :  { %v12311_v17 = vadd.f32 %v12310_v20, %v12240_v47  ;;  %v12195_v51 = vpop.f32.mrf.mxu0 }
 0xdde   :  { %12460 = vmatmul.f32.vlgmr.msrb.gmra.mxu0 %v12459_v26  ;;  %12581 = vmatmul.f32.gmra.mxu1 %v16056_v34  ;;  %v12464_v48 = vsub.f32 %v12411_v23, %v16056_v34  ;;  %v12132_v23 = vadd.f32 %v16017_v1, %v12059_v55 }
 0xddf   :  { %v12364_v44 = vadd.f32 %v12363_v58, %v12311_v17 }
 0xde0   :  { %12648 = vmatmul.f32.gmra.mxu2 %v12464_v48  ;;  %v12465_v54 = vand.u32 4294901760, %v12464_v48  ;;  %v12196_v18 = vadd.f32 %v12195_v51, %v12132_v23 }
 0xde1   :  { %v12388_v59 = vmax.f32 %v12364_v44, 0.0 }
 0xde2   :  { %12715 = vmatmul.f32.gmra.mxu3 %v12465_v54  ;;  %v12466_v52 = vsub.f32 %v12464_v48, %v12465_v54 }
 0xde3   :  { %v12414_v10 = vsel %vm12406_vm15, %v12388_v59, 0  ;;  %v12263_v59 = vpop.f32.mrf.mxu1 }
 0xde4   :  { %v16064_v37 = vand.u32 4294901760, %v12414_v10  ;;  %v12314_v28 = vpop.f32.mrf.mxu2  ;;  %v12467_v43 = vand.u32 4294901760, %v12466_v52  ;;  %v12371_v5 = vpop.f32.mrf.mxu3  ;;  %v12136_v52 = vadd.f32 %v16030_v14, %v12067_v63 }
 0xde5   :  { %v12315_v0 = vadd.f32 %v12314_v28, %v12246_v60 }
 0xde6   :  { %12468 = vmatmul.f32.gmra.mxu0 %v12467_v43  ;;  %12585 = vmatmul.f32.gmra.mxu1 %v16064_v37  ;;  %v12472_v35 = vsub.f32 %v12414_v10, %v16064_v37  ;;  %v12264_v10 = vadd.f32 %v12263_v59, %v12196_v18 }
 0xde7   :  { %v12368_v9 = vadd.f32 %v12367_v3, %v12315_v0 }
 0xde8   :  { %12653 = vmatmul.f32.gmra.mxu2 %v12472_v35  ;;  %v12473_v30 = vand.u32 4294901760, %v12472_v35 }
 0xde9   :  { %v12389_v7 = vmax.f32 %v12368_v9, 0.0 }
 0xdea   :  { %12721 = vmatmul.f32.gmra.mxu3 %v12473_v30  ;;  %v12474_v49 = vsub.f32 %v12472_v35, %v12473_v30  ;;  %v12200_v35 = vpop.f32.mrf.mxu0 }
 0xdeb   :  { %v12417_v62 = vsel %vm12406_vm15, %v12389_v7, 0  ;;  %v12201_v57 = vadd.f32 %v12200_v35, %v12136_v52 }
 0xdec   :  { %v16072_v58 = vand.u32 4294901760, %v12417_v62  ;;  %v12318_v38 = vpop.f32.mrf.mxu2  ;;  %v12475_v40 = vand.u32 4294901760, %v12474_v49  ;;  %v12375_v11 = vpop.f32.mrf.mxu3 }
 0xded   :  { %v12319_v6 = vadd.f32 %v12318_v38, %v12252_v19 }
 0xdee   :  { %12476 = vmatmul.f32.gmra.mxu0 %v12475_v40  ;;  %12589 = vmatmul.f32.gmra.mxu1 %v16072_v58  ;;  %v12480_v36 = vsub.f32 %v12417_v62, %v16072_v58 }
 0xdef   :  { %v12372_v41 = vadd.f32 %v12371_v5, %v12319_v6  ;;  %v12269_v5 = vpop.f32.mrf.mxu1 }
 0xdf0   :  { %12658 = vmatmul.f32.gmra.mxu2 %v12480_v36  ;;  %v12481_v25 = vand.u32 4294901760, %v12480_v36  ;;  %v12270_v7 = vadd.f32 %v12269_v5, %v12201_v57 }
 0xdf1   :  { %v12390_v12 = vmax.f32 %v12372_v41, 0.0 }
 0xdf2   :  { %12727 = vmatmul.f32.gmra.mxu3 %v12481_v25  ;;  %v12482_v31 = vsub.f32 %v12480_v36, %v12481_v25 }
 0xdf3   :  { %v12420_v47 = vsel %vm12406_vm15, %v12390_v12, 0 }
 0xdf4   :  { %v16080_v26 = vand.u32 4294901760, %v12420_v47  ;;  %v12322_v20 = vpop.f32.mrf.mxu2  ;;  %v12483_v17 = vand.u32 4294901760, %v12482_v31  ;;  %v12379_v28 = vpop.f32.mrf.mxu3 }
 0xdf5   :  { %v12323_v3 = vadd.f32 %v12322_v20, %v12258_v42 }
 0xdf6   :  { %12484 = vmatmul.f32.gmra.mxu0 %v12483_v17  ;;  %12593 = vmatmul.f32.gmra.mxu1 %v16080_v26  ;;  %v12488_v48 = vsub.f32 %v12420_v47, %v16080_v26 }
 0xdf7   :  { %v12376_v44 = vadd.f32 %v12375_v11, %v12323_v3 }
 0xdf8   :  { %12663 = vmatmul.f32.gmra.mxu2 %v12488_v48  ;;  %v12489_v1 = vand.u32 4294901760, %v12488_v48 }
 0xdf9   :  { %v12391_v54 = vmax.f32 %v12376_v44, 0.0  ;;  %v16107_v44 = vld [vmem:[%s16378_s12] ss:$0 sm:$0xff] }
 0xdfa   :  { %12733 = vmatmul.f32.gmra.mxu3 %v12489_v1  ;;  %v12490_v61 = vsub.f32 %v12488_v48, %v12489_v1 }
 0xdfb   :  { %v12423_v21 = vsel %vm12406_vm15, %v12391_v54, 0 }
 0xdfc   :  { %v12495_v60 = vand.u32 4294901760, %v12423_v21  ;;  %v12326_v43 = vpop.f32.mrf.mxu2  ;;  %v12491_v0 = vand.u32 4294901760, %v12490_v61  ;;  %v12383_v15 = vpop.f32.mrf.mxu3 }
 0xdfd   :  { %v12327_v8 = vadd.f32 %v12326_v43, %v12264_v10 }
 0xdfe   :  { %12492 = vmatmul.f32.gmra.mxu0 %v12491_v0  ;;  %12597 = vmatmul.f32.gmra.mxu1 %v12495_v60  ;;  %v12496_v2 = vsub.f32 %v12423_v21, %v12495_v60 }
 0xdff   :  { %v12380_v13 = vadd.f32 %v12379_v28, %v12327_v8 }
 0xe00   :  { %12668 = vmatmul.f32.gmra.mxu2 %v12496_v2  ;;  %v12497_v9 = vand.u32 4294901760, %v12496_v2 }
 0xe01   :  { %v12392_v32 = vmax.f32 %v12380_v13, 0.0 }
 0xe02   :  { %12739 = vmatmul.f32.gmra.mxu3 %v12497_v9  ;;  %v12498_v14 = vsub.f32 %v12496_v2, %v12497_v9 }
 0xe03   :  { %v12426_v30 = vsel %vm12406_vm15, %v12392_v32, 0 }
 0xe04   :  { %v12503_v49 = vand.u32 4294901760, %v12426_v30  ;;  %v12330_v46 = vpop.f32.mrf.mxu2  ;;  %v12499_v62 = vand.u32 4294901760, %v12498_v14 }
 0xe05   :  { %v12331_v19 = vadd.f32 %v12330_v46, %v12270_v7 }
 0xe06   :  { %12500 = vmatmul.f32.gmra.mxu0 %v12499_v62  ;;  %12601 = vmatmul.f32.gmra.mxu1 %v12503_v49  ;;  %v12504_v38 = vsub.f32 %v12426_v30, %v12503_v49 }
 0xe07   :  { %v12384_v40 = vadd.f32 %v12383_v15, %v12331_v19 }
 0xe08   :  { %12673 = vmatmul.f32.gmra.mxu2 %v12504_v38  ;;  %v12505_v6 = vand.u32 4294901760, %v12504_v38 }
 0xe09   :  { %v12393_v36 = vmax.f32 %v12384_v40, 0.0 }
 0xe0a   :  { %12745 = vmatmul.f32.gmra.mxu3 %v12505_v6  ;;  %v12506_v55 = vsub.f32 %v12504_v38, %v12505_v6 }
 0xe0b   :  { %v12429_v41 = vsel %vm12406_vm15, %v12393_v36, 0 }
 0xe0c   :  { %v12511_v56 = vand.u32 4294901760, %v12429_v41  ;;  %v12507_v50 = vand.u32 4294901760, %v12506_v55 }
 0xe0e   :  { %12508 = vmatmul.f32.gmra.mxu0 %v12507_v50  ;;  %12605 = vmatmul.f32.gmra.mxu1 %v12511_v56  ;;  %v12512_v25 = vsub.f32 %v12429_v41, %v12511_v56 }
 0xe10   :  { %12678 = vmatmul.f32.gmra.mxu2 %v12512_v25  ;;  %v12513_v12 = vand.u32 4294901760, %v12512_v25 }
 0xe12   :  { %12751 = vmatmul.f32.gmra.mxu3 %v12513_v12  ;;  %v12514_v11 = vsub.f32 %v12512_v25, %v12513_v12 }
 0xe14   :  { %v12515_v31 = vand.u32 4294901760, %v12514_v11 }
 0xe16   :  { %12516 = vmatmul.f32.gmra.mxu0 %v12515_v31  ;;  %12853 = vmatmul.f32.vlgmr.msra.gmra.mxu1 %v16048_v22 }
 0xe1e   :  { %12796 = vmatmul.f32.vlgmr.msra.gmra.mxu0 %v16048_v22  ;;  %12857 = vmatmul.f32.gmra.mxu1 %v16056_v34 }
 0xe26   :  { %12800 = vmatmul.f32.gmra.mxu0 %v16056_v34  ;;  %12861 = vmatmul.f32.gmra.mxu1 %v16064_v37 }
 0xe2e   :  { %12804 = vmatmul.f32.gmra.mxu0 %v16064_v37  ;;  %12865 = vmatmul.f32.gmra.mxu1 %v16072_v58 }
 0xe36   :  { %12808 = vmatmul.f32.gmra.mxu0 %v16072_v58  ;;  %12869 = vmatmul.f32.gmra.mxu1 %v16080_v26 }
 0xe3e   :  { %12812 = vmatmul.f32.gmra.mxu0 %v16080_v26  ;;  %12873 = vmatmul.f32.gmra.mxu1 %v12495_v60 }
 0xe46   :  { %12816 = vmatmul.f32.gmra.mxu0 %v12495_v60  ;;  %12877 = vmatmul.f32.gmra.mxu1 %v12503_v49 }
 0xe4e   :  { %12820 = vmatmul.f32.gmra.mxu0 %v12503_v49  ;;  %12881 = vmatmul.f32.gmra.mxu1 %v12511_v56 }
 0xe53   :  { %v12578_v22 = vpop.f32.mrf.mxu1 }
 0xe56   :  { %12824 = vmatmul.f32.gmra.mxu0 %v12511_v56 }
 0xe5b   :  { %v12461_v34 = vpop.f32.mrf.mxu0  ;;  %v12582_v23 = vpop.f32.mrf.mxu1 }
 0xe5c   :  { %v12644_v63 = vpop.f32.mrf.mxu2  ;;  %v12462_v59 = vadd.f32 %v16107_v44, %v12461_v34 }
 0xe5d   :  { %v12710_v18 = vpop.f32.mrf.mxu3 }
 0xe5e   :  { %v12579_v52 = vadd.f32 %v12578_v22, %v12462_v59 }
 0xe60   :  { %v12645_v28 = vadd.f32 %v12644_v63, %v12579_v52 }
 0xe62   :  { %v12711_v0 = vadd.f32 %v12710_v18, %v12645_v28 }
 0xe63   :  { %v12469_v47 = vpop.f32.mrf.mxu0  ;;  %v12586_v42 = vpop.f32.mrf.mxu1 }
 0xe64   :  { %v12649_v61 = vpop.f32.mrf.mxu2  ;;  %v12470_v43 = vadd.f32 %v16107_v44, %v12469_v47 }
 0xe65   :  { %v12716_v60 = vpop.f32.mrf.mxu3 }
 0xe66   :  { %v12583_v8 = vadd.f32 %v12582_v23, %v12470_v43 }
 0xe68   :  { %v12650_v9 = vadd.f32 %v12649_v61, %v12583_v8 }
 0xe6a   :  { %v12717_v7 = vadd.f32 %v12716_v60, %v12650_v9 }
 0xe6b   :  { %v12477_v37 = vpop.f32.mrf.mxu0  ;;  %v12590_v20 = vpop.f32.mrf.mxu1 }
 0xe6c   :  { %v12654_v35 = vpop.f32.mrf.mxu2  ;;  %v12478_v32 = vadd.f32 %v16107_v44, %v12477_v37 }
 0xe6d   :  { %v12722_v14 = vpop.f32.mrf.mxu3 }
 0xe6e   :  { %v12587_v49 = vadd.f32 %v12586_v42, %v12478_v32 }
 0xe70   :  { %v12655_v40 = vadd.f32 %v12654_v35, %v12587_v49 }
 0xe73   :  { %v12485_v17 = vpop.f32.mrf.mxu0  ;;  %v12594_v3 = vpop.f32.mrf.mxu1 }
 0xe74   :  { %v12659_v38 = vpop.f32.mrf.mxu2  ;;  %v12486_v6 = vadd.f32 %v16107_v44, %v12485_v17 }
 0xe75   :  { %v12728_v41 = vpop.f32.mrf.mxu3 }
 0xe76   :  { %v12591_v56 = vadd.f32 %v12590_v20, %v12486_v6 }
 0xe78   :  { %v12660_v31 = vadd.f32 %v12659_v38, %v12591_v56 }
 0xe7b   :  { %v12493_v58 = vpop.f32.mrf.mxu0  ;;  %v16100_v51 = vpop.f32.mrf.mxu1 }
 0xe7c   :  { %v12494_v22 = vadd.f32 %v16107_v44, %v12493_v58  ;;  %v12664_v23 = vpop.f32.mrf.mxu2 }
 0xe7d   :  { %v12734_v20 = vpop.f32.mrf.mxu3 }
 0xe7e   :  { %v12595_v42 = vadd.f32 %v12594_v3, %v12494_v22 }
 0xe80   :  { %v12665_v18 = vadd.f32 %v12664_v23, %v12595_v42 }
 0xe83   :  { %v12501_v48 = vpop.f32.mrf.mxu0  ;;  %v16102_v26 = vpop.f32.mrf.mxu1 }
 0xe84   :  { %v12502_v59 = vadd.f32 %v16107_v44, %v12501_v48 }
 0xe85   :  { %v12740_v8 = vpop.f32.mrf.mxu3 }
 0xe86   :  { %v12599_v60 = vadd.f32 %v16100_v51, %v12502_v59 }
 0xe8b   :  { %v16109_v1 = vpop.f32.mrf.mxu0  ;;  %v16111_v54 = vpop.f32.mrf.mxu1 }
 0xe93   :  { %v16114_v21 = vpop.f32.mrf.mxu0  ;;  %v12854_v10 = vpop.f32.mrf.mxu1 }
 0xe94   :  { %v12518_v49 = vadd.f32 %v16107_v44, %v16114_v21 }
 0xe9b   :  { %v12797_v2 = vpop.f32.mrf.mxu0  ;;  %v12858_v13 = vpop.f32.mrf.mxu1 }
 0xe9c   :  { %v12798_v57 = vadd.f32 %v12797_v2, %v12711_v0  ;;  %v13539_v0 = vmov 0  }
 0xe9d   :  { %13222 = vset.pattern.permute.xlu2 %v13539_v0  ;;  %13224 = vset.pattern.permute.xlu1 %v13539_v0 }
 0xe9e   :  { %v12855_v5 = vadd.f32 %v12854_v10, %v12798_v57  ;;  %v12669_v10 = vpop.f32.mrf.mxu2  ;;  %13223 = vset.pattern.permute.xlu0 %v13539_v0 }
 0xe9f   :  { %v12670_v48 = vadd.f32 %v12669_v10, %v12599_v60 }
 0xea0   :  { %v16119_v30 = vadd.f32 %v12855_v5, %v15826_v45  ;;  %v12723_v45 = vadd.f32 %v12722_v14, %v12655_v40 }
 0xea2   :  { %v12895_v46 = vsel %vm87_vm0, %v16119_v30, 0.0 }
 0xea3   :  { %v12801_v62 = vpop.f32.mrf.mxu0  ;;  %v12862_v19 = vpop.f32.mrf.mxu1  ;;  %12896 = vadd.xlane.f32.xlu1 %v12895_v46 }
 0xea4   :  { %v12802_v15 = vadd.f32 %v12801_v62, %v12717_v7  ;;  %v12746_v46 = vpop.f32.mrf.mxu3 }
 0xea6   :  { %v12859_v36 = vadd.f32 %v12858_v13, %v12802_v15  ;;  %v12741_v13 = vadd.f32 %v12740_v8, %v12670_v48  ;;  %v12674_v32 = vpop.f32.mrf.mxu2 }
 0xea8   :  { %v16125_v55 = vadd.f32 %v12859_v36, %v15838_v39  ;;  %v12729_v39 = vadd.f32 %v12728_v41, %v12660_v31  ;;  %v13239_v31 = vld [vmem:[%s16368_s2] ss:$0 sm:$0xff] }
 0xeaa   :  { %v12898_v50 = vsel %vm87_vm0, %v16125_v55, 0.0 }
 0xeab   :  { %v12805_v25 = vpop.f32.mrf.mxu0  ;;  %12899 = vadd.xlane.f32.xlu2 %v12898_v50  ;;  %v12866_v11 = vpop.f32.mrf.mxu1 }
 0xeac   :  { %v12806_v12 = vadd.f32 %v12805_v25, %v12723_v45  ;;  %v12752_v56 = vpop.f32.mrf.mxu3 }
 0xeae   :  { %v12863_v34 = vadd.f32 %v12862_v19, %v12806_v12  ;;  %v12607_v19 = vadd.f32 %v16111_v54, %v12518_v49  ;;  %v12679_v6 = vpop.f32.mrf.mxu2  ;;  %v13244_v49 = vld [vmem:[%s16368_s2 + $0x5] ss:$0 sm:$0xff] }
 0xeb0   :  { %v16131_v47 = vadd.f32 %v12863_v34, %v15850_v4  ;;  %v12735_v4 = vadd.f32 %v12734_v20, %v12665_v18  ;;  %v12680_v36 = vadd.f32 %v12679_v6, %v12607_v19 }
 0xeb2   :  { %v12901_v37 = vsel %vm87_vm0, %v16131_v47, 0.0 }
 0xeb3   :  { %v12809_v17 = vpop.f32.mrf.mxu0  ;;  %12902 = vadd.xlane.f32.xlu0 %v12901_v37  ;;  %v12870_v52 = vpop.f32.mrf.mxu1 }
 0xeb4   :  { %v12810_v63 = vadd.f32 %v12809_v17, %v12729_v39 }
 0xeb6   :  { %v12867_v61 = vadd.f32 %v12866_v11, %v12810_v63 }
 0xeb8   :  { %v16137_v58 = vadd.f32 %v12867_v61, %v15862_v29  ;;  %v12510_v29 = vadd.f32 %v16107_v44, %v16109_v1  ;;  %v12753_v44 = vadd.f32 %v12752_v56, %v12680_v36 }
 0xeba   :  { %v12904_v3 = vsel %vm87_vm0, %v16137_v58, 0.0  ;;  %v12603_v57 = vadd.f32 %v16102_v26, %v12510_v29 }
 0xebb   :  { %v12813_v28 = vpop.f32.mrf.mxu0  ;;  %12905 = vadd.xlane.f32.xlu1 %v12904_v3  ;;  %v12874_v51 = vpop.f32.mrf.mxu1 }
 0xebc   :  { %v12814_v43 = vadd.f32 %v12813_v28, %v12735_v4  ;;  %v12675_v7 = vadd.f32 %v12674_v32, %v12603_v57  ;;  %v13240_v32 = vld [vmem:[%s16368_s2 + $0x2] ss:$0 sm:$0xff] }
 0xebe   :  { %v12871_v35 = vadd.f32 %v12870_v52, %v12814_v43  ;;  %v12747_v62 = vadd.f32 %v12746_v46, %v12675_v7  ;;  %v13242_v7 = vld [vmem:[%s16368_s2 + $0x1] ss:$0 sm:$0xff] }
 0xec0   :  { %v16145_v2 = vadd.f32 %v12871_v35, %v15873_v53 }
 0xec2   :  { %v12907_v9 = vsel %vm87_vm0, %v16145_v2, 0.0 }
 0xec3   :  { %v12817_v5 = vpop.f32.mrf.mxu0  ;;  %12908 = vadd.xlane.f32.xlu2 %v12907_v9  ;;  %v12878_v15 = vpop.f32.mrf.mxu1 }
 0xec4   :  { %v12818_v14 = vadd.f32 %v12817_v5, %v12741_v13  ;;  %v13243_v5 = vld [vmem:[%s16368_s2 + $0x3] ss:$0 sm:$0xff] }
 0xec6   :  { %v12875_v1 = vadd.f32 %v12874_v51, %v12818_v14  ;;  %v13241_v14 = vld [vmem:[%s16368_s2 + $0x4] ss:$0 sm:$0xff] }
 0xec8   :  { %v12890_v53 = vadd.f32 %v12875_v1, %v15884_v27  ;;  %v13245_v1 = vld [vmem:[%s16368_s2 + $0x7] ss:$0 sm:$0xff] }
 0xeca   :  { %v12910_v26 = vsel %vm87_vm0, %v12890_v53, 0.0 }
 0xecb   :  { %v12821_v38 = vpop.f32.mrf.mxu0  ;;  %12911 = vadd.xlane.f32.xlu0 %v12910_v26  ;;  %v12882_v25 = vpop.f32.mrf.mxu1 }
 0xecc   :  { %v12822_v40 = vadd.f32 %v12821_v38, %v12747_v62 }
 0xece   :  { %v12879_v41 = vadd.f32 %v12878_v15, %v12822_v40  ;;  %v13248_v15 = vld [vmem:[%s16368_s2 + $0x6] ss:$0 sm:$0xff] }
 0xed0   :  { %v12891_v45 = vadd.f32 %v12879_v41, %v15891_v16 }
 0xed2   :  { %v12913_v21 = vsel %vm87_vm0, %v12891_v45, 0.0 }
 0xed3   :  { %v12825_v50 = vpop.f32.mrf.mxu0  ;;  %12914 = vadd.xlane.f32.xlu1 %v12913_v21 }
 0xed4   :  { %v12826_v27 = vadd.f32 %v12825_v50, %v12753_v44 }
 0xed6   :  { %v12883_v54 = vadd.f32 %v12882_v25, %v12826_v27 }
 0xed8   :  { %v12892_v12 = vadd.f32 %v12883_v54, %v15899_v24 }
 0xeda   :  { %v12916_v11 = vsel %vm87_vm0, %v12892_v12, 0.0 }
 0xedb   :  { %12917 = vadd.xlane.f32.xlu2 %v12916_v11 }
 0xef3   :  { %13119 = vperm.xlu2 %13222, %v13239_v31  }
 0xf16   :  { %v12897_v16 = vpop.xlane.xlu1 %12896 }
 0xf17   :  { %v12919_v22 = vmul.f32 %v12897_v16, %v15744_v33 }
 0xf19   :  { %v16164_v34 = vsub.f32 %v16119_v30, %v12919_v22 }
 0xf1b   :  { %v12935_v23 = vmul.f32 %v16164_v34, %v16164_v34 }
 0xf1d   :  { %v12943_v39 = vsel %vm87_vm0, %v12935_v23, 0.0 }
 0xf1e   :  { %v12900_v24 = vpop.xlane.xlu2 %12899  ;;  %12944 = vadd.xlane.f32.xlu0 %v12943_v39 }
 0xf1f   :  { %v12920_v42 = vmul.f32 %v12900_v24, %v15744_v33 }
 0xf21   :  { %v16171_v37 = vsub.f32 %v16125_v55, %v12920_v42 }
 0xf23   :  { %v12936_v20 = vmul.f32 %v16171_v37, %v16171_v37 }
 0xf25   :  { %v12946_v17 = vsel %vm87_vm0, %v12936_v20, 0.0 }
 0xf26   :  { %v12903_v63 = vpop.xlane.xlu0 %12902  ;;  %12947 = vadd.xlane.f32.xlu1 %v12946_v17 }
 0xf27   :  { %v12921_v30 = vmul.f32 %v12903_v63, %v15744_v33 }
 0xf29   :  { %v16178_v18 = vsub.f32 %v16131_v47, %v12921_v30 }
 0xf2b   :  { %v12937_v59 = vmul.f32 %v16178_v18, %v16178_v18 }
 0xf2d   :  { %v12949_v61 = vsel %vm87_vm0, %v12937_v59, 0.0 }
 0xf2e   :  { %v12906_v52 = vpop.xlane.xlu1 %12905  ;;  %12950 = vadd.xlane.f32.xlu2 %v12949_v61 }
 0xf2f   :  { %v12922_v55 = vmul.f32 %v12906_v52, %v15744_v33 }
 0xf31   :  { %v16185_v10 = vsub.f32 %v16137_v58, %v12922_v55 }
 0xf33   :  { %v12938_v4 = vmul.f32 %v16185_v10, %v16185_v10 }
 0xf35   :  { %v12952_v60 = vsel %vm87_vm0, %v12938_v4, 0.0 }
 0xf36   :  { %v12909_v3 = vpop.xlane.xlu2 %12908  ;;  %12953 = vadd.xlane.f32.xlu0 %v12952_v60 }
 0xf37   :  { %v12923_v47 = vmul.f32 %v12909_v3, %v15744_v33 }
 0xf39   :  { %v16192_v28 = vsub.f32 %v16145_v2, %v12923_v47 }
 0xf3b   :  { %v12939_v43 = vmul.f32 %v16192_v28, %v16192_v28 }
 0xf3d   :  { %v12955_v0 = vsel %vm87_vm0, %v12939_v43, 0.0 }
 0xf3e   :  { %v12912_v8 = vpop.xlane.xlu0 %12911  ;;  %12956 = vadd.xlane.f32.xlu1 %v12955_v0 }
 0xf3f   :  { %v12924_v58 = vmul.f32 %v12912_v8, %v15744_v33 }
 0xf41   :  { %v16198_v48 = vsub.f32 %v12890_v53, %v12924_v58 }
 0xf43   :  { %v12940_v29 = vmul.f32 %v16198_v48, %v16198_v48 }
 0xf45   :  { %v12958_v35 = vsel %vm87_vm0, %v12940_v29, 0.0 }
 0xf46   :  { %v12915_v51 = vpop.xlane.xlu1 %12914  ;;  %12959 = vadd.xlane.f32.xlu2 %v12958_v35 }
 0xf47   :  { %v12925_v2 = vmul.f32 %v12915_v51, %v15744_v33 }
 0xf49   :  { %v16204_v13 = vsub.f32 %v12891_v45, %v12925_v2 }
 0xf4b   :  { %v12941_v57 = vmul.f32 %v16204_v13, %v16204_v13 }
 0xf4d   :  { %v12961_v9 = vsel %vm87_vm0, %v12941_v57, 0.0 }
 0xf4e   :  { %12962 = vadd.xlane.f32.xlu0 %v12961_v9  ;;  %v12918_v46 = vpop.xlane.xlu2 %12917 }
 0xf4f   :  { %v12926_v53 = vmul.f32 %v12918_v46, %v15744_v33 }
 0xf51   :  { %v16228_v62 = vsub.f32 %v12892_v12, %v12926_v53 }
 0xf53   :  { %v12942_v19 = vmul.f32 %v16228_v62, %v16228_v62 }
 0xf55   :  { %v12964_v26 = vsel %vm87_vm0, %v12942_v19, 0.0 }
 0xf56   :  { %v16236_v38 = vpop.permute.xlu2 %13119 }
 0xf57   :  { %13127 = vperm.xlu1 %13224, %v13240_v32  }
 0xf5e   :  { %13131 = vperm.xlu2 %13222, %v13243_v5  }
 0xf5f   :  { %13135 = vperm.xlu1 %13224, %v13241_v14  }
 0xf62   :  { %13123 = vperm.xlu0 %13223, %v13242_v7  }
 0xf66   :  { %13139 = vperm.xlu2 %13222, %v13244_v49  }
 0xf6e   :  { %13147 = vperm.xlu2 %13222, %v13245_v1  }
 0xf89   :  { %12965 = vadd.xlane.f32.xlu1 %v12964_v26 }
 0xf91   :  { %v12945_v40 = vpop.xlane.xlu0 %12944 }
 0xf92   :  { %v12967_v36 = vmul.f32 %v12945_v40, %v15744_v33 }
 0xf94   :  { %v12975_v45 = vadd.f32 1e-05, %v12967_v36 }
 0xf96   :  { %13395 = vrsqrt.f32 %v12975_v45  ;;  %vm12989_vm4 = vweird.f32 %v12975_v45 }
 0xf99   :  { %v12948_v6 = vpop.xlane.xlu1 %12947 }
 0xf9a   :  { %v12968_v41 = vmul.f32 %v12948_v6, %v15744_v33 }
 0xf9c   :  { %v12976_v44 = vadd.f32 1e-05, %v12968_v41  ;;  %v13396_v11 = vpop.eup %13395 }
 0xf9d   :  { %v12984_v23 = vmul.f32 %v13396_v11, %v12975_v45  ;;  %vm12990_vm2 = vweird.f32 %v13396_v11  ;;  %v13540_v45 = vmov 0.0  }
 0xf9e   :  { %13397 = vrsqrt.f32 %v12976_v44  ;;  %vm16282_vm5 = vmor %vm12989_vm4, %vm12990_vm2  ;;  %vm12999_vm1 = vweird.f32 %v12976_v44  ;;  %88 = vst.msk [vmem:[#allocation7] sm:$0xff] %vm87_vm0, %v13540_v45 }
 0xf9f   :  { %v12985_v63 = vmul.f32 %v13396_v11, %v12984_v23 }
 0xfa1   :  { %v12951_v56 = vpop.xlane.xlu2 %12950  ;;  %v12986_v4 = vmul.f32 0.5, %v12985_v63 }
 0xfa2   :  { %13143 = vperm.xlu1 %13224, %v13248_v15   ;;  %v12969_v50 = vmul.f32 %v12951_v56, %v15744_v33 }
 0xfa3   :  { %v12987_v58 = vsub.f32 1.5, %v12986_v4 }
 0xfa4   :  { %v16242_v25 = vadd.f32 1e-05, %v12969_v50  ;;  %v13398_v16 = vpop.eup %13397 }
 0xfa5   :  { %v12994_v24 = vmul.f32 %v13398_v16, %v12976_v44  ;;  %v12988_v9 = vmul.f32 %v13396_v11, %v12987_v58  ;;  %vm13000_vm3 = vweird.f32 %v13398_v16  ;;  %v16301_v44 = vld [vmem:[%s16379_s13] ss:$0 sm:$0xff] }
 0xfa6   :  { %13399 = vrsqrt.f32 %v16242_v25  ;;  %vm13001_vm6 = vmor %vm12999_vm1, %vm13000_vm3  ;;  %vm13009_vm8 = vweird.f32 %v16242_v25 }
 0xfa7   :  { %v12995_v61 = vmul.f32 %v13398_v16, %v12994_v24  ;;  %v12992_v53 = vsel %vm16282_vm5, %v13396_v11, %v12988_v9 }
 0xfa8   :  { %v13063_v56 = vmul.f32 %v12992_v53, %v16164_v34 }
 0xfa9   :  { %v12954_v21 = vpop.xlane.xlu0 %12953  ;;  %v12996_v3 = vmul.f32 0.5, %v12995_v61 }
 0xfaa   :  { %v12970_v27 = vmul.f32 %v12954_v21, %v15744_v33 }
 0xfab   :  { %v12997_v29 = vsub.f32 1.5, %v12996_v3 }
 0xfac   :  { %v16244_v12 = vadd.f32 1e-05, %v12970_v27  ;;  %v16252_v17 = vpop.eup %13399 }
 0xfad   :  { %v13004_v55 = vmul.f32 %v16252_v17, %v16242_v25  ;;  %v12998_v32 = vmul.f32 %v13398_v16, %v12997_v29  ;;  %vm13010_vm7 = vweird.f32 %v16252_v17  ;;  %v16314_v25 = vld [vmem:[%s16380_s14] ss:$0 sm:$0xff]  ;;  %s13541_s14 = smov [#allocation7]  }
 0xfae   :  { %13401 = vrsqrt.f32 %v16244_v12  ;;  %vm13011_vm10 = vmor %vm13009_vm8, %vm13010_vm7  ;;  %vm13019_vm11 = vweird.f32 %v16244_v12  ;;  %s13180_s9 = sshll.u32 %s13541_s14, 4  ;;  %s13181_s9 = int_to_ptr.vmem [resolvable:$true] %s13180_s9 }
 0xfaf   :  { %v13005_v43 = vmul.f32 %v16252_v17, %v13004_v55  ;;  %v13002_v6 = vsel %vm13001_vm6, %v13398_v16, %v12998_v32 }
 0xfb0   :  { %v13064_v21 = vmul.f32 %v13002_v6, %v16171_v37 }
 0xfb1   :  { %v12957_v54 = vpop.xlane.xlu1 %12956  ;;  %v13006_v2 = vmul.f32 0.5, %v13005_v43 }
 0xfb2   :  { %v12971_v22 = vmul.f32 %v12957_v54, %v15744_v33  ;;  %v13075_v37 = vmul.f32 %v16301_v44, %v13064_v21 }
 0xfb3   :  { %v13007_v1 = vsub.f32 1.5, %v13006_v2 }
 0xfb4   :  { %v16250_v20 = vadd.f32 1e-05, %v12971_v22  ;;  %v16257_v52 = vpop.eup %13401  ;;  %v13086_v61 = vadd.f32 %v16314_v25, %v13075_v37 }
 0xfb5   :  { %v13014_v47 = vmul.f32 %v16257_v52, %v16244_v12  ;;  %v13008_v36 = vmul.f32 %v16252_v17, %v13007_v1  ;;  %vm13020_vm9 = vweird.f32 %v16257_v52 }
 0xfb6   :  { %13403 = vrsqrt.f32 %v16250_v20  ;;  %vm13021_vm12 = vmor %vm13019_vm11, %vm13020_vm9  ;;  %vm13029_vm14 = vweird.f32 %v16250_v20 }
 0xfb7   :  { %v13015_v35 = vmul.f32 %v16257_v52, %v13014_v47  ;;  %v13012_v11 = vsel %vm13011_vm10, %v16252_v17, %v13008_v36 }
 0xfb8   :  { %v13065_v12 = vmul.f32 %v13012_v11, %v16178_v18 }
 0xfb9   :  { %v12960_v31 = vpop.xlane.xlu2 %12959  ;;  %v13016_v5 = vmul.f32 0.5, %v13015_v35 }
 0xfba   :  { %v12972_v39 = vmul.f32 %v12960_v31, %v15744_v33  ;;  %v13074_v31 = vmul.f32 %v16301_v44, %v13063_v56 }
 0xfbb   :  { %v13017_v19 = vsub.f32 1.5, %v13016_v5 }
 0xfbc   :  { %v16254_v30 = vadd.f32 1e-05, %v12972_v39  ;;  %v16270_v8 = vpop.eup %13403  ;;  %v13085_v63 = vadd.f32 %v16314_v25, %v13074_v31 }
 0xfbd   :  { %v13024_v57 = vmul.f32 %v16270_v8, %v16250_v20  ;;  %v13018_v50 = vmul.f32 %v16257_v52, %v13017_v19  ;;  %vm13030_vm13 = vweird.f32 %v16270_v8 }
 0xfbe   :  { %13405 = vrsqrt.f32 %v16254_v30  ;;  %vm13031_vm2 = vmor %vm13029_vm14, %vm13030_vm13  ;;  %vm13039_vm3 = vweird.f32 %v16254_v30 }
 0xfbf   :  { %v13025_v46 = vmul.f32 %v16270_v8, %v13024_v57  ;;  %v13022_v23 = vsel %vm13021_vm12, %v16257_v52, %v13018_v50 }
 0xfc1   :  { %v12963_v42 = vpop.xlane.xlu0 %12962  ;;  %v13026_v41 = vmul.f32 0.5, %v13025_v46  ;;  %v13132_v43 = vpop.permute.xlu2 %13131 }
 0xfc2   :  { %v12973_v59 = vmul.f32 %v12963_v42, %v15744_v33 }
 0xfc3   :  { %v13027_v34 = vsub.f32 1.5, %v13026_v41 }
 0xfc4   :  { %v16263_v60 = vadd.f32 1e-05, %v12973_v59  ;;  %v16274_v51 = vpop.eup %13405  ;;  %v13066_v59 = vmul.f32 %v13022_v23, %v16185_v10  ;;  %v13150_v10 = vmul.f32 %v16236_v38, %v13085_v63 }
 0xfc5   :  { %v13034_v14 = vmul.f32 %v16274_v51, %v16254_v30  ;;  %v13028_v42 = vmul.f32 %v16270_v8, %v13027_v34  ;;  %vm13040_vm15 = vweird.f32 %v16274_v51 }
 0xfc6   :  { %13407 = vrsqrt.f32 %v16263_v60  ;;  %vm13041_vm4 = vmor %vm13039_vm3, %vm13040_vm15  ;;  %v13077_v47 = vmul.f32 %v16301_v44, %v13066_v59  ;;  %vm13049_vm1 = vweird.f32 %v16263_v60  ;;  %v13158_v38 = vsel %vm87_vm0, %v13150_v10, 0.0 }
 0xfc7   :  { %v13035_v26 = vmul.f32 %v16274_v51, %v13034_v14  ;;  %v13032_v3 = vsel %vm13031_vm2, %v16270_v8, %v13028_v42 }
 0xfc8   :  { %v13067_v35 = vmul.f32 %v13032_v3, %v16192_v28  ;;  %v13088_v2 = vadd.f32 %v16314_v25, %v13077_v47 }
 0xfc9   :  { %v16268_v0 = vpop.permute.xlu1 %13127  ;;  %v13036_v27 = vmul.f32 0.5, %v13035_v26  ;;  %v13140_v26 = vpop.permute.xlu2 %13139 }
 0xfca   :  { %v13078_v28 = vmul.f32 %v16301_v44, %v13067_v35  ;;  %v13153_v49 = vmul.f32 %v13132_v43, %v13088_v2 }
 0xfcb   :  { %v13037_v16 = vsub.f32 1.5, %v13036_v27 }
 0xfcc   :  { %v16280_v7 = vpop.eup %13407 }
 0xfcd   :  { %v13044_v15 = vmul.f32 %v16280_v7, %v16263_v60  ;;  %v13038_v52 = vmul.f32 %v16274_v51, %v13037_v16  ;;  %vm13050_vm5 = vweird.f32 %v16280_v7 }
 0xfce   :  { %vm13051_vm6 = vmor %vm13049_vm1, %vm13050_vm5 }
 0xfcf   :  { %v13045_v54 = vmul.f32 %v16280_v7, %v13044_v15  ;;  %v13042_v58 = vsel %vm13041_vm4, %v16274_v51, %v13038_v52  ;;  %v13163_v15 = vsel %vm87_vm0, %v13153_v49, 0.0 }
 0xfd0   :  { %v13068_v9 = vmul.f32 %v13042_v58, %v16198_v48 }
 0xfd1   :  { %v16292_v40 = vpop.permute.xlu1 %13135  ;;  %v13046_v22 = vmul.f32 0.5, %v13045_v54  ;;  %v13148_v23 = vpop.permute.xlu2 %13147 }
 0xfd2   :  { %v13079_v1 = vmul.f32 %v16301_v44, %v13068_v9 }
 0xfd3   :  { %v13047_v18 = vsub.f32 1.5, %v13046_v22 }
 0xfd4   :  { %v13124_v17 = vpop.permute.xlu0 %13123  ;;  %v13090_v6 = vadd.f32 %v16314_v25, %v13079_v1 }
 0xfd5   :  { %v13151_v4 = vmul.f32 %v13124_v17, %v13086_v61  ;;  %v13048_v20 = vmul.f32 %v16280_v7, %v13047_v18 }
 0xfd6   :  { %v13155_v21 = vmul.f32 %v13140_v26, %v13090_v6 }
 0xfd7   :  { %v13159_v30 = vsel %vm87_vm0, %v13151_v4, 0.0  ;;  %v13052_v5 = vsel %vm13051_vm6, %v16280_v7, %v13048_v20 }
 0xfd8   :  { %v13160_v32 = vadd.f32 %v13159_v30, %v13158_v38  ;;  %v13069_v46 = vmul.f32 %v13052_v5, %v16204_v13  ;;  %v13167_v31 = vsel %vm87_vm0, %v13155_v21, 0.0 }
 0xfda   :  { %v13080_v36 = vmul.f32 %v16301_v44, %v13069_v46 }
 0xfdc   :  { %v13091_v27 = vadd.f32 %v16314_v25, %v13080_v36 }
 0xffc   :  { %v12966_v39 = vpop.xlane.xlu1 %12965 }
 0xffd   :  { %v12974_v24 = vmul.f32 %v12966_v39, %v15744_v33  ;;  %v13076_v33 = vmul.f32 %v16301_v44, %v13065_v12 }
 0xfff   :  { %v12982_v55 = vadd.f32 1e-05, %v12974_v24  ;;  %v13087_v29 = vadd.f32 %v16314_v25, %v13076_v33  ;;  %v13093_v24 = vld [vmem:[#allocation7] sm:$0xff] }
0x1001   :  { %13409 = vrsqrt.f32 %v12982_v55  ;;  %v13152_v57 = vmul.f32 %v16268_v0, %v13087_v29  ;;  %v13089_v0 = vadd.f32 %v16314_v25, %v13078_v28  ;;  %vm13059_vm8 = vweird.f32 %v12982_v55 }
0x1003   :  { %v13161_v60 = vsel %vm87_vm0, %v13152_v57, 0.0  ;;  %v13154_v7 = vmul.f32 %v16292_v40, %v13089_v0 }
0x1004   :  { %v13162_v53 = vadd.f32 %v13161_v60, %v13160_v32 }
0x1005   :  { %v13165_v56 = vsel %vm87_vm0, %v13154_v7, 0.0 }
0x1006   :  { %v13164_v41 = vadd.f32 %v13163_v15, %v13162_v53 }
0x1007   :  { %v13410_v8 = vpop.eup %13409 }
0x1008   :  { %v13054_v51 = vmul.f32 %v13410_v8, %v12982_v55  ;;  %vm13060_vm7 = vweird.f32 %v13410_v8  ;;  %v13166_v54 = vadd.f32 %v13165_v56, %v13164_v41 }
0x1009   :  { %vm13061_vm9 = vmor %vm13059_vm8, %vm13060_vm7 }
0x100a   :  { %v13055_v14 = vmul.f32 %v13410_v8, %v13054_v51  ;;  %v13168_v22 = vadd.f32 %v13167_v31, %v13166_v54 }
0x100c   :  { %v13056_v19 = vmul.f32 0.5, %v13055_v14 }
0x100e   :  { %v13057_v48 = vsub.f32 1.5, %v13056_v19 }
0x1010   :  { %v13058_v45 = vmul.f32 %v13410_v8, %v13057_v48 }
0x1012   :  { %v13062_v13 = vsel %vm13061_vm9, %v13410_v8, %v13058_v45 }
0x1013   :  { %v13070_v50 = vmul.f32 %v13062_v13, %v16228_v62 }
0x1014   :  { %v13144_v34 = vpop.permute.xlu1 %13143 }
0x1015   :  { %v13081_v40 = vmul.f32 %v16301_v44, %v13070_v50  ;;  %v13156_v11 = vmul.f32 %v13144_v34, %v13091_v27 }
0x1017   :  { %v13092_v37 = vadd.f32 %v16314_v25, %v13081_v40  ;;  %v13169_v16 = vsel %vm87_vm0, %v13156_v11, 0.0 }
0x1018   :  { %v13170_v12 = vadd.f32 %v13169_v16, %v13168_v22 }
0x1019   :  { %v13157_v39 = vmul.f32 %v13148_v23, %v13092_v37 }
0x101b   :  { %v13171_v62 = vsel %vm87_vm0, %v13157_v39, 0.0 }
0x101c   :  { %v13172_v44 = vadd.f32 %v13171_v62, %v13170_v12 }
0x101e   :  { %v13173_v42 = vadd.f32 %v13172_v44, %v13093_v24 }
0x1020   :  { %13174 = vst.msk [vmem:[#allocation7] sm:$0xff] %vm87_vm0, %v13173_v42 }
0x1021   :  { %13185 = dma.vmem_to_hbm [thread:$0]  %s13181_s9, 128, %s13183_s18, [#allocation4]  }
0x1022   :  { %13519 = dma.done.wait [#allocation4], 128  }
0x1023   :  { %13520 = vsyncadd [#allocation4], 4294967168 }
0x1024   :  { %13190 = vsyncpa [#allocation3], 1 }
0x1025   :  { %13191 = vsyncpa [#allocation6], 1 }
0x1026   :  { %13192 = vsyncpa [#allocation4], 1 }

</bundles_post_ra>
